<compile_context>
chip_gen: v5e
topology: v5e:2x2
jax: 0.10.0
libtpu: 0.0.40
codegen_flags: <defaults>
</compile_context>

<pallas_src>
import functools

import jax
import jax.numpy as jnp
from jax.experimental import pallas as pl
from jax.experimental.pallas import tpu as pltpu


def _round_up(x, m):
    return (x + m - 1) // m * m


# ----------------------------------------------------------------------------
# Fused tiled matmul:  out = maybe_relu((X @ W) * scale + shift)
#   X/W hit the MXU in bf16; accumulation and epilogue are f32.
# ----------------------------------------------------------------------------
def _mm_single_k_kernel(x_ref, w_ref, s_ref, b_ref, o_ref, *, apply_relu):
    # Single K block: no k-loop, no accumulator scratch.
    acc = jnp.dot(x_ref[...], w_ref[...], preferred_element_type=jnp.float32)
    y = acc * s_ref[...] + b_ref[...]
    if apply_relu:
        y = jnp.maximum(y, 0.0)
    o_ref[...] = y.astype(o_ref.dtype)


def _mm_multi_k_kernel(x_ref, w_ref, s_ref, b_ref, o_ref, acc_ref, *, apply_relu):
    @pl.when(pl.program_id(2) == 0)
    def _():
        acc_ref[...] = jnp.zeros_like(acc_ref)

    acc_ref[...] += jnp.dot(x_ref[...], w_ref[...],
                            preferred_element_type=jnp.float32)

    @pl.when(pl.program_id(2) == pl.num_programs(2) - 1)
    def _():
        y = acc_ref[...] * s_ref[...] + b_ref[...]
        if apply_relu:
            y = jnp.maximum(y, 0.0)
        o_ref[...] = y.astype(o_ref.dtype)


def fused_matmul(x, w_p, s_p, b_p, *, n_out, apply_relu, out_dtype):
    """x:(M,K) @ w_p:(Kp,Np) [pre-padded bf16], per-column scale/shift (f32),
    optional ReLU.  Returns (M, n_out) in out_dtype."""
    M, K = x.shape
    Kp, Np = w_p.shape
    assert K <= Kp

    Mp = _round_up(M, 16)                 # bf16 sublane-packing friendly
    tm = Mp if Mp <= 128 else 128
    Mp = _round_up(Mp, tm)

    # Big K tiles; small-K (conv) layers get a single full-K block.
    if Kp <= 1536:
        tk = Kp
    elif Kp % 1024 == 0:
        tk = 1024
    elif Kp % 512 == 0:
        tk = 512
    else:
        tk = 128

    # Big N tiles (but >= 2 N blocks for the 4096-wide layers -> megacore).
    if Np % 512 == 0:
        tn = 512
    elif Np % 256 == 0:
        tn = 256
    else:
        tn = 128

    xp = jnp.zeros((Mp, Kp), jnp.bfloat16).at[:M, :K].set(x.astype(jnp.bfloat16))

    nk = Kp // tk
    out_bytes = jnp.dtype(out_dtype).itemsize
    cost = pl.CostEstimate(
        flops=2 * Mp * Kp * Np,
        transcendentals=0,
        bytes_accessed=Mp * Kp * 2 + Kp * Np * 2 + Mp * Np * out_bytes,
    )

    if nk == 1:
        grid = (Mp // tm, Np // tn)
        out = pl.pallas_call(
            functools.partial(_mm_single_k_kernel, apply_relu=apply_relu),
            out_shape=jax.ShapeDtypeStruct((Mp, Np), out_dtype),
            grid_spec=pltpu.PrefetchScalarGridSpec(
                num_scalar_prefetch=0,
                grid=grid,
                in_specs=[
                    pl.BlockSpec((tm, Kp), lambda i, j: (i, 0)),
                    pl.BlockSpec((Kp, tn), lambda i, j: (0, j)),
                    pl.BlockSpec((1, tn), lambda i, j: (0, j)),
                    pl.BlockSpec((1, tn), lambda i, j: (0, j)),
                ],
                out_specs=pl.BlockSpec((tm, tn), lambda i, j: (i, j)),
            ),
            compiler_params=pltpu.CompilerParams(
                dimension_semantics=("parallel", "parallel")),
            cost_estimate=cost,
        )(xp, w_p, s_p, b_p)
    else:
        grid = (Mp // tm, Np // tn, nk)
        out = pl.pallas_call(
            functools.partial(_mm_multi_k_kernel, apply_relu=apply_relu),
            out_shape=jax.ShapeDtypeStruct((Mp, Np), out_dtype),
            grid_spec=pltpu.PrefetchScalarGridSpec(
                num_scalar_prefetch=0,
                grid=grid,
                in_specs=[
                    pl.BlockSpec((tm, tk), lambda i, j, k: (i, k)),
                    pl.BlockSpec((tk, tn), lambda i, j, k: (k, j)),
                    pl.BlockSpec((1, tn), lambda i, j, k: (0, j)),
                    pl.BlockSpec((1, tn), lambda i, j, k: (0, j)),
                ],
                out_specs=pl.BlockSpec((tm, tn), lambda i, j, k: (i, j)),
                scratch_shapes=[pltpu.VMEM((tm, tn), jnp.float32)],
            ),
            compiler_params=pltpu.CompilerParams(
                dimension_semantics=("parallel", "parallel", "arbitrary")),
            cost_estimate=cost,
        )(xp, w_p, s_p, b_p)
    return out[:M, :n_out]


# ----------------------------------------------------------------------------
# MaxPool2d(kernel=2, stride=2): lane-dense elementwise 4-way max kernel.
# ----------------------------------------------------------------------------
def _max4_kernel(a_ref, b_ref, c_ref, d_ref, o_ref):
    o_ref[...] = jnp.maximum(jnp.maximum(a_ref[...], b_ref[...]),
                             jnp.maximum(c_ref[...], d_ref[...]))


def maxpool2x2(x):  # x: NHWC
    N, H, W, C = x.shape
    Ho, Wo = H // 2, W // 2
    # Lane-dense slabs: last dim (W//2)*C >= 128 for every pool layer here,
    # so the kernel does full-lane stores instead of masked partial stores.
    a = x[:, 0::2, 0::2, :].reshape(N * Ho, Wo * C)
    b = x[:, 0::2, 1::2, :].reshape(N * Ho, Wo * C)
    c = x[:, 1::2, 0::2, :].reshape(N * Ho, Wo * C)
    d = x[:, 1::2, 1::2, :].reshape(N * Ho, Wo * C)
    # TODO(synk): fuse the four strided reads into the kernel (grid over input
    # row pairs of the NHWC tensor) to halve pooling HBM traffic at big batch.
    out = pl.pallas_call(
        _max4_kernel,
        out_shape=jax.ShapeDtypeStruct(a.shape, x.dtype),
    )(a, b, c, d)
    return out.reshape(N, Ho, Wo, C)


# ----------------------------------------------------------------------------
# Conv2d(3x3, pad=1) + BatchNorm2d (eval, folded) + ReLU
# ----------------------------------------------------------------------------
def conv3x3_bn_relu(x, w_p, s_p, b_p, cout):
    # x: NHWC; w_p: pre-reshaped/padded (Kp, Np) bf16; s_p/b_p: (1, Np) f32.
    N, H, W, Cin = x.shape
    xpad = jnp.pad(x, ((0, 0), (1, 1), (1, 1), (0, 0)))
    cols = [xpad[:, dy:dy + H, dx:dx + W, :] for dy in range(3) for dx in range(3)]
    patches = jnp.concatenate(cols, axis=-1).reshape(N * H * W, 9 * Cin)
    # TODO(synk): fold the 9 taps into the matmul K reduction (halo'd tiles)
    # to avoid the 9x im2col HBM blow-up at larger spatial/batch sizes.
    y = fused_matmul(patches, w_p, s_p, b_p, n_out=cout,
                     apply_relu=True, out_dtype=jnp.bfloat16)
    return y.reshape(N, H, W, cout)


# ----------------------------------------------------------------------------
# Parameter init (matches the module's __init__ rules, deterministic) and
# one-time weight preparation (transpose / BN fold / pad / bf16 cast).
# ----------------------------------------------------------------------------
def init_params(key, cfg, in_ch=3, num_class=10):
    params = {"convs": [], "linears": []}
    c = in_ch
    for v in cfg:
        if v == 'M':
            continue
        key, k1 = jax.random.split(key)
        fan_out = v * 3 * 3
        std = (2.0 / fan_out) ** 0.5                     # kaiming_normal_, fan_out
        w = jax.random.normal(k1, (v, c, 3, 3), jnp.float32) * std
        b = jnp.zeros((v,), jnp.float32)                 # conv bias = 0
        gamma = jnp.ones((v,), jnp.float32)              # BN weight = 1
        beta = jnp.zeros((v,), jnp.float32)              # BN bias = 0
        mean = jnp.zeros((v,), jnp.float32)              # running_mean default
        var = jnp.ones((v,), jnp.float32)                # running_var default
        params["convs"].append((w, b, gamma, beta, mean, var))
        c = v
    for (din, dout) in [(512, 4096), (4096, 4096), (4096, num_class)]:
        key, k1 = jax.random.split(key)
        w = jax.random.normal(k1, (dout, din), jnp.float32) * 0.01  # normal(0, 0.01)
        b = jnp.zeros((dout,), jnp.float32)
        params["linears"].append((w, b))
    return params


def _pad_weight(w2):  # (K, N) f32 -> (Kp, Np) bf16, zero padded
    K, N = w2.shape
    Kp, Np = _round_up(K, 128), _round_up(N, 128)
    return jnp.zeros((Kp, Np), jnp.bfloat16).at[:K, :N].set(w2.astype(jnp.bfloat16))


def _pad_row(v):  # (N,) -> (1, Np) f32, zero padded
    N = v.shape[0]
    Np = _round_up(N, 128)
    return jnp.zeros((1, Np), jnp.float32).at[:, :N].set(v.astype(jnp.float32))


def prepare_params(raw, eps=1e-5):
    """One-time: transpose+reshape conv weights, fold eval BatchNorm, transpose
    Linear weights, zero-pad everything to tile multiples, cast to bf16."""
    prepared = {"convs": [], "linears": []}
    for (w, b, gamma, beta, mean, var) in raw["convs"]:
        cin, cout = w.shape[1], w.shape[0]
        w2 = jnp.transpose(w, (2, 3, 1, 0)).reshape(9 * cin, cout)  # (ky,kx,Cin,Cout)
        scale = gamma / jnp.sqrt(var + eps)
        shift = beta + (b - mean) * scale
        prepared["convs"].append((_pad_weight(w2), _pad_row(scale), _pad_row(shift)))
    for (w, b) in raw["linears"]:
        dout = w.shape[0]
        prepared["linears"].append((_pad_weight(w.T),
                                    _pad_row(jnp.ones((dout,), jnp.float32)),
                                    _pad_row(b)))
    return prepared


# ----------------------------------------------------------------------------
# VGG forward (cifar10 head: 512 -> 4096 -> 4096 -> 10)
# ----------------------------------------------------------------------------
def vgg_forward(prepared, x_nchw, cfg, num_class=10):
    x = jnp.transpose(x_nchw, (0, 2, 3, 1))  # NCHW -> NHWC (channels on lanes)
    ci = 0
    for v in cfg:
        if v == 'M':
            x = maxpool2x2(x)
        else:
            w_p, s_p, b_p = prepared["convs"][ci]
            x = conv3x3_bn_relu(x, w_p, s_p, b_p, v)
            ci += 1
    # torch.flatten(output, 1): final spatial is 1x1, so NHWC flatten == NCHW flatten.
    feats = x.reshape(x.shape[0], -1)

    (w1, s1, b1), (w2, s2, b2), (w3, s3, b3) = prepared["linears"]
    h = fused_matmul(feats, w1, s1, b1, n_out=4096, apply_relu=True,
                     out_dtype=jnp.bfloat16)
    # Dropout(0.5): identity in eval mode.
    # TODO(synk): training-mode dropout (random masking) not implemented.
    h = fused_matmul(h, w2, s2, b2, n_out=4096, apply_relu=True,
                     out_dtype=jnp.bfloat16)
    h = fused_matmul(h, w3, s3, b3, n_out=num_class, apply_relu=False,
                     out_dtype=jnp.float32)
    return h


if __name__ == "__main__":
    # Small VGG-style feature cfg ending in 512 channels at 1x1 spatial
    # (so the cifar10 classifier Linear(512, 4096) shape matches exactly).
    cfg = [16, 'M', 32, 'M', 64, 'M', 128, 'M', 512, 'M']
    key = jax.random.PRNGKey(0)
    key, kx = jax.random.split(key)
    x = jax.random.normal(kx, (2, 3, 32, 32), jnp.float32)  # NCHW, like PyTorch

    raw = init_params(key, cfg, in_ch=3, num_class=10)
    params = prepare_params(raw)   # one-time weight prep (outside the forward)

    fwd = jax.jit(functools.partial(vgg_forward, cfg=cfg, num_class=10))
    out = fwd(params, x)
    out = jax.block_until_ready(out)
    assert out.shape == (2, 10) and out.dtype == jnp.float32
    print("KERNEL_OK")
</pallas_src>

<mosaic_0001>
module attributes {stable_mosaic.version = 11 : i64} {
  func.func @_mm_single_k_kernel(%arg0: i32, %arg1: i32, %arg2: memref<128x128xbf16, #tpu.memory_space<vmem>>, %arg3: memref<128x128xbf16, #tpu.memory_space<vmem>>, %arg4: memref<1x128xf32, #tpu.memory_space<vmem>>, %arg5: memref<1x128xf32, #tpu.memory_space<vmem>>, %arg6: memref<128x128xbf16, #tpu.memory_space<vmem>>) attributes {dimension_semantics = [#tpu.dimension_semantics<parallel>, #tpu.dimension_semantics<parallel>], iteration_bounds = array<i64: 16, 1>, scalar_prefetch = 0 : i64, scratch_operands = 0 : i64, tpu.core_type = #tpu.core_type<tc>, window_params = [{transform_indices = @transform_0, window_bounds = array<i64: 128, 128>}, {transform_indices = @transform_1, window_bounds = array<i64: 128, 128>}, {transform_indices = @transform_2, window_bounds = array<i64: 1, 128>}, {transform_indices = @transform_3, window_bounds = array<i64: 1, 128>}, {transform_indices = @transform_4, window_bounds = array<i64: 128, 128>}]} {
    %c0 = arith.constant 0 : index
    %c0_0 = arith.constant 0 : index
    %0 = vector.load %arg2[%c0, %c0_0] : memref<128x128xbf16, #tpu.memory_space<vmem>>, vector<128x128xbf16>
    %c0_1 = arith.constant 0 : index
    %c0_2 = arith.constant 0 : index
    %1 = vector.load %arg3[%c0_1, %c0_2] : memref<128x128xbf16, #tpu.memory_space<vmem>>, vector<128x128xbf16>
    %cst = arith.constant dense<0.000000e+00> : vector<128x128xf32>
    %2 = tpu.matmul %0, %1, %cst {dimension_numbers = #tpu.dot_dimension_numbers<[1], [0], [0], [1], [0, 0, 1, 1], [], []>} : vector<128x128xbf16>, vector<128x128xbf16>, vector<128x128xf32> -> vector<128x128xf32>
    %c0_3 = arith.constant 0 : index
    %c0_4 = arith.constant 0 : index
    %3 = vector.load %arg4[%c0_3, %c0_4] : memref<1x128xf32, #tpu.memory_space<vmem>>, vector<1x128xf32>
    %4 = vector.broadcast %3 : vector<1x128xf32> to vector<128x128xf32>
    %5 = arith.mulf %2, %4 : vector<128x128xf32>
    %c0_5 = arith.constant 0 : index
    %c0_6 = arith.constant 0 : index
    %6 = vector.load %arg5[%c0_5, %c0_6] : memref<1x128xf32, #tpu.memory_space<vmem>>, vector<1x128xf32>
    %7 = vector.broadcast %6 : vector<1x128xf32> to vector<128x128xf32>
    %8 = arith.addf %5, %7 : vector<128x128xf32>
    %cst_7 = arith.constant 0.000000e+00 : f32
    %9 = vector.broadcast %cst_7 : f32 to vector<128x128xf32>
    %10 = arith.maximumf %8, %9 : vector<128x128xf32>
    %11 = arith.truncf %10 : vector<128x128xf32> to vector<128x128xbf16>
    %c0_8 = arith.constant 0 : index
    %c0_9 = arith.constant 0 : index
    %12 = vector.load %arg6[%c0_8, %c0_9] : memref<128x128xbf16, #tpu.memory_space<vmem>>, vector<128x128xbf16>
    tpu.vector_store %arg6[%c0_8, %c0_9], %11 {strides = array<i32>} : memref<128x128xbf16, #tpu.memory_space<vmem>>, vector<128x128xbf16>,
    return
  }
  func.func @transform_0(%arg0: i32, %arg1: i32) -> (i32, i32) {
    %c0_i32 = arith.constant 0 : i32
    %c0_i32_0 = arith.constant 0 : i32
    return %arg0, %c0_i32 : i32, i32
  }
  func.func @transform_1(%arg0: i32, %arg1: i32) -> (i32, i32) {
    %c0_i32 = arith.constant 0 : i32
    %c0_i32_0 = arith.constant 0 : i32
    return %c0_i32, %arg1 : i32, i32
  }
  func.func @transform_2(%arg0: i32, %arg1: i32) -> (i32, i32) {
    %c0_i32 = arith.constant 0 : i32
    %c0_i32_0 = arith.constant 0 : i32
    return %c0_i32, %arg1 : i32, i32
  }
  func.func @transform_3(%arg0: i32, %arg1: i32) -> (i32, i32) {
    %c0_i32 = arith.constant 0 : i32
    %c0_i32_0 = arith.constant 0 : i32
    return %c0_i32, %arg1 : i32, i32
  }
  func.func @transform_4(%arg0: i32, %arg1: i32) -> (i32, i32) {
    %c0_i32 = arith.constant 0 : i32
    return %arg0, %arg1 : i32, i32
  }
}

module attributes {stable_mosaic.version = 11 : i64} {
  func.func @_max4_kernel(%arg0: memref<32x256xbf16, #tpu.memory_space<vmem>>, %arg1: memref<32x256xbf16, #tpu.memory_space<vmem>>, %arg2: memref<32x256xbf16, #tpu.memory_space<vmem>>, %arg3: memref<32x256xbf16, #tpu.memory_space<vmem>>, %arg4: memref<32x256xbf16, #tpu.memory_space<vmem>>) attributes {dimension_semantics = [], scalar_prefetch = 0 : i64, scratch_operands = 0 : i64, tpu.core_type = #tpu.core_type<tc>} {
    %c0 = arith.constant 0 : index
    %c0_0 = arith.constant 0 : index
    %0 = vector.load %arg0[%c0, %c0_0] : memref<32x256xbf16, #tpu.memory_space<vmem>>, vector<32x256xbf16>
    %c0_1 = arith.constant 0 : index
    %c0_2 = arith.constant 0 : index
    %1 = vector.load %arg1[%c0_1, %c0_2] : memref<32x256xbf16, #tpu.memory_space<vmem>>, vector<32x256xbf16>
    %2 = arith.maximumf %0, %1 : vector<32x256xbf16>
    %c0_3 = arith.constant 0 : index
    %c0_4 = arith.constant 0 : index
    %3 = vector.load %arg2[%c0_3, %c0_4] : memref<32x256xbf16, #tpu.memory_space<vmem>>, vector<32x256xbf16>
    %c0_5 = arith.constant 0 : index
    %c0_6 = arith.constant 0 : index
    %4 = vector.load %arg3[%c0_5, %c0_6] : memref<32x256xbf16, #tpu.memory_space<vmem>>, vector<32x256xbf16>
    %5 = arith.maximumf %3, %4 : vector<32x256xbf16>
    %6 = arith.maximumf %2, %5 : vector<32x256xbf16>
    %c0_7 = arith.constant 0 : index
    %c0_8 = arith.constant 0 : index
    %7 = vector.load %arg4[%c0_7, %c0_8] : memref<32x256xbf16, #tpu.memory_space<vmem>>, vector<32x256xbf16>
    tpu.vector_store %arg4[%c0_7, %c0_8], %6 {strides = array<i32>} : memref<32x256xbf16, #tpu.memory_space<vmem>>, vector<32x256xbf16>,
    return
  }
}

module attributes {stable_mosaic.version = 11 : i64} {
  func.func @_mm_single_k_kernel(%arg0: i32, %arg1: i32, %arg2: memref<128x256xbf16, #tpu.memory_space<vmem>>, %arg3: memref<256x128xbf16, #tpu.memory_space<vmem>>, %arg4: memref<1x128xf32, #tpu.memory_space<vmem>>, %arg5: memref<1x128xf32, #tpu.memory_space<vmem>>, %arg6: memref<128x128xbf16, #tpu.memory_space<vmem>>) attributes {dimension_semantics = [#tpu.dimension_semantics<parallel>, #tpu.dimension_semantics<parallel>], iteration_bounds = array<i64: 4, 1>, scalar_prefetch = 0 : i64, scratch_operands = 0 : i64, tpu.core_type = #tpu.core_type<tc>, window_params = [{transform_indices = @transform_0, window_bounds = array<i64: 128, 256>}, {transform_indices = @transform_1, window_bounds = array<i64: 256, 128>}, {transform_indices = @transform_2, window_bounds = array<i64: 1, 128>}, {transform_indices = @transform_3, window_bounds = array<i64: 1, 128>}, {transform_indices = @transform_4, window_bounds = array<i64: 128, 128>}]} {
    %c0 = arith.constant 0 : index
    %c0_0 = arith.constant 0 : index
    %0 = vector.load %arg2[%c0, %c0_0] : memref<128x256xbf16, #tpu.memory_space<vmem>>, vector<128x256xbf16>
    %c0_1 = arith.constant 0 : index
    %c0_2 = arith.constant 0 : index
    %1 = vector.load %arg3[%c0_1, %c0_2] : memref<256x128xbf16, #tpu.memory_space<vmem>>, vector<256x128xbf16>
    %cst = arith.constant dense<0.000000e+00> : vector<128x128xf32>
    %2 = tpu.matmul %0, %1, %cst {dimension_numbers = #tpu.dot_dimension_numbers<[1], [0], [0], [1], [0, 0, 1, 1], [], []>} : vector<128x256xbf16>, vector<256x128xbf16>, vector<128x128xf32> -> vector<128x128xf32>
    %c0_3 = arith.constant 0 : index
    %c0_4 = arith.constant 0 : index
    %3 = vector.load %arg4[%c0_3, %c0_4] : memref<1x128xf32, #tpu.memory_space<vmem>>, vector<1x128xf32>
    %4 = vector.broadcast %3 : vector<1x128xf32> to vector<128x128xf32>
    %5 = arith.mulf %2, %4 : vector<128x128xf32>
    %c0_5 = arith.constant 0 : index
    %c0_6 = arith.constant 0 : index
    %6 = vector.load %arg5[%c0_5, %c0_6] : memref<1x128xf32, #tpu.memory_space<vmem>>, vector<1x128xf32>
    %7 = vector.broadcast %6 : vector<1x128xf32> to vector<128x128xf32>
    %8 = arith.addf %5, %7 : vector<128x128xf32>
    %cst_7 = arith.constant 0.000000e+00 : f32
    %9 = vector.broadcast %cst_7 : f32 to vector<128x128xf32>
    %10 = arith.maximumf %8, %9 : vector<128x128xf32>
    %11 = arith.truncf %10 : vector<128x128xf32> to vector<128x128xbf16>
    %c0_8 = arith.constant 0 : index
    %c0_9 = arith.constant 0 : index
    %12 = vector.load %arg6[%c0_8, %c0_9] : memref<128x128xbf16, #tpu.memory_space<vmem>>, vector<128x128xbf16>
    tpu.vector_store %arg6[%c0_8, %c0_9], %11 {strides = array<i32>} : memref<128x128xbf16, #tpu.memory_space<vmem>>, vector<128x128xbf16>,
    return
  }
  func.func @transform_0(%arg0: i32, %arg1: i32) -> (i32, i32) {
    %c0_i32 = arith.constant 0 : i32
    %c0_i32_0 = arith.constant 0 : i32
    return %arg0, %c0_i32 : i32, i32
  }
  func.func @transform_1(%arg0: i32, %arg1: i32) -> (i32, i32) {
    %c0_i32 = arith.constant 0 : i32
    %c0_i32_0 = arith.constant 0 : i32
    return %c0_i32, %arg1 : i32, i32
  }
  func.func @transform_2(%arg0: i32, %arg1: i32) -> (i32, i32) {
    %c0_i32 = arith.constant 0 : i32
    %c0_i32_0 = arith.constant 0 : i32
    return %c0_i32, %arg1 : i32, i32
  }
  func.func @transform_3(%arg0: i32, %arg1: i32) -> (i32, i32) {
    %c0_i32 = arith.constant 0 : i32
    %c0_i32_0 = arith.constant 0 : i32
    return %c0_i32, %arg1 : i32, i32
  }
  func.func @transform_4(%arg0: i32, %arg1: i32) -> (i32, i32) {
    %c0_i32 = arith.constant 0 : i32
    return %arg0, %arg1 : i32, i32
  }
}

module attributes {stable_mosaic.version = 11 : i64} {
  func.func @_max4_kernel(%arg0: memref<16x256xbf16, #tpu.memory_space<vmem>>, %arg1: memref<16x256xbf16, #tpu.memory_space<vmem>>, %arg2: memref<16x256xbf16, #tpu.memory_space<vmem>>, %arg3: memref<16x256xbf16, #tpu.memory_space<vmem>>, %arg4: memref<16x256xbf16, #tpu.memory_space<vmem>>) attributes {dimension_semantics = [], scalar_prefetch = 0 : i64, scratch_operands = 0 : i64, tpu.core_type = #tpu.core_type<tc>} {
    %c0 = arith.constant 0 : index
    %c0_0 = arith.constant 0 : index
    %0 = vector.load %arg0[%c0, %c0_0] : memref<16x256xbf16, #tpu.memory_space<vmem>>, vector<16x256xbf16>
    %c0_1 = arith.constant 0 : index
    %c0_2 = arith.constant 0 : index
    %1 = vector.load %arg1[%c0_1, %c0_2] : memref<16x256xbf16, #tpu.memory_space<vmem>>, vector<16x256xbf16>
    %2 = arith.maximumf %0, %1 : vector<16x256xbf16>
    %c0_3 = arith.constant 0 : index
    %c0_4 = arith.constant 0 : index
    %3 = vector.load %arg2[%c0_3, %c0_4] : memref<16x256xbf16, #tpu.memory_space<vmem>>, vector<16x256xbf16>
    %c0_5 = arith.constant 0 : index
    %c0_6 = arith.constant 0 : index
    %4 = vector.load %arg3[%c0_5, %c0_6] : memref<16x256xbf16, #tpu.memory_space<vmem>>, vector<16x256xbf16>
    %5 = arith.maximumf %3, %4 : vector<16x256xbf16>
    %6 = arith.maximumf %2, %5 : vector<16x256xbf16>
    %c0_7 = arith.constant 0 : index
    %c0_8 = arith.constant 0 : index
    %7 = vector.load %arg4[%c0_7, %c0_8] : memref<16x256xbf16, #tpu.memory_space<vmem>>, vector<16x256xbf16>
    tpu.vector_store %arg4[%c0_7, %c0_8], %6 {strides = array<i32>} : memref<16x256xbf16, #tpu.memory_space<vmem>>, vector<16x256xbf16>,
    return
  }
}

module attributes {stable_mosaic.version = 11 : i64} {
  func.func @_mm_single_k_kernel(%arg0: i32, %arg1: i32, %arg2: memref<128x384xbf16, #tpu.memory_space<vmem>>, %arg3: memref<384x128xbf16, #tpu.memory_space<vmem>>, %arg4: memref<1x128xf32, #tpu.memory_space<vmem>>, %arg5: memref<1x128xf32, #tpu.memory_space<vmem>>, %arg6: memref<128x128xbf16, #tpu.memory_space<vmem>>) attributes {dimension_semantics = [#tpu.dimension_semantics<parallel>, #tpu.dimension_semantics<parallel>], iteration_bounds = array<i64: 1, 1>, scalar_prefetch = 0 : i64, scratch_operands = 0 : i64, tpu.core_type = #tpu.core_type<tc>, window_params = [{transform_indices = @transform_0, window_bounds = array<i64: 128, 384>}, {transform_indices = @transform_1, window_bounds = array<i64: 384, 128>}, {transform_indices = @transform_2, window_bounds = array<i64: 1, 128>}, {transform_indices = @transform_3, window_bounds = array<i64: 1, 128>}, {transform_indices = @transform_4, window_bounds = array<i64: 128, 128>}]} {
    %c0 = arith.constant 0 : index
    %c0_0 = arith.constant 0 : index
    %0 = vector.load %arg2[%c0, %c0_0] : memref<128x384xbf16, #tpu.memory_space<vmem>>, vector<128x384xbf16>
    %c0_1 = arith.constant 0 : index
    %c0_2 = arith.constant 0 : index
    %1 = vector.load %arg3[%c0_1, %c0_2] : memref<384x128xbf16, #tpu.memory_space<vmem>>, vector<384x128xbf16>
    %cst = arith.constant dense<0.000000e+00> : vector<128x128xf32>
    %2 = tpu.matmul %0, %1, %cst {dimension_numbers = #tpu.dot_dimension_numbers<[1], [0], [0], [1], [0, 0, 1, 1], [], []>} : vector<128x384xbf16>, vector<384x128xbf16>, vector<128x128xf32> -> vector<128x128xf32>
    %c0_3 = arith.constant 0 : index
    %c0_4 = arith.constant 0 : index
    %3 = vector.load %arg4[%c0_3, %c0_4] : memref<1x128xf32, #tpu.memory_space<vmem>>, vector<1x128xf32>
    %4 = vector.broadcast %3 : vector<1x128xf32> to vector<128x128xf32>
    %5 = arith.mulf %2, %4 : vector<128x128xf32>
    %c0_5 = arith.constant 0 : index
    %c0_6 = arith.constant 0 : index
    %6 = vector.load %arg5[%c0_5, %c0_6] : memref<1x128xf32, #tpu.memory_space<vmem>>, vector<1x128xf32>
    %7 = vector.broadcast %6 : vector<1x128xf32> to vector<128x128xf32>
    %8 = arith.addf %5, %7 : vector<128x128xf32>
    %cst_7 = arith.constant 0.000000e+00 : f32
    %9 = vector.broadcast %cst_7 : f32 to vector<128x128xf32>
    %10 = arith.maximumf %8, %9 : vector<128x128xf32>
    %11 = arith.truncf %10 : vector<128x128xf32> to vector<128x128xbf16>
    %c0_8 = arith.constant 0 : index
    %c0_9 = arith.constant 0 : index
    %12 = vector.load %arg6[%c0_8, %c0_9] : memref<128x128xbf16, #tpu.memory_space<vmem>>, vector<128x128xbf16>
    tpu.vector_store %arg6[%c0_8, %c0_9], %11 {strides = array<i32>} : memref<128x128xbf16, #tpu.memory_space<vmem>>, vector<128x128xbf16>,
    return
  }
  func.func @transform_0(%arg0: i32, %arg1: i32) -> (i32, i32) {
    %c0_i32 = arith.constant 0 : i32
    %c0_i32_0 = arith.constant 0 : i32
    return %arg0, %c0_i32 : i32, i32
  }
  func.func @transform_1(%arg0: i32, %arg1: i32) -> (i32, i32) {
    %c0_i32 = arith.constant 0 : i32
    %c0_i32_0 = arith.constant 0 : i32
    return %c0_i32, %arg1 : i32, i32
  }
  func.func @transform_2(%arg0: i32, %arg1: i32) -> (i32, i32) {
    %c0_i32 = arith.constant 0 : i32
    %c0_i32_0 = arith.constant 0 : i32
    return %c0_i32, %arg1 : i32, i32
  }
  func.func @transform_3(%arg0: i32, %arg1: i32) -> (i32, i32) {
    %c0_i32 = arith.constant 0 : i32
    %c0_i32_0 = arith.constant 0 : i32
    return %c0_i32, %arg1 : i32, i32
  }
  func.func @transform_4(%arg0: i32, %arg1: i32) -> (i32, i32) {
    %c0_i32 = arith.constant 0 : i32
    return %arg0, %arg1 : i32, i32
  }
}

module attributes {stable_mosaic.version = 11 : i64} {
  func.func @_max4_kernel(%arg0: memref<8x256xbf16, #tpu.memory_space<vmem>>, %arg1: memref<8x256xbf16, #tpu.memory_space<vmem>>, %arg2: memref<8x256xbf16, #tpu.memory_space<vmem>>, %arg3: memref<8x256xbf16, #tpu.memory_space<vmem>>, %arg4: memref<8x256xbf16, #tpu.memory_space<vmem>>) attributes {dimension_semantics = [], scalar_prefetch = 0 : i64, scratch_operands = 0 : i64, tpu.core_type = #tpu.core_type<tc>} {
    %c0 = arith.constant 0 : index
    %c0_0 = arith.constant 0 : index
    %0 = vector.load %arg0[%c0, %c0_0] : memref<8x256xbf16, #tpu.memory_space<vmem>>, vector<8x256xbf16>
    %c0_1 = arith.constant 0 : index
    %c0_2 = arith.constant 0 : index
    %1 = vector.load %arg1[%c0_1, %c0_2] : memref<8x256xbf16, #tpu.memory_space<vmem>>, vector<8x256xbf16>
    %2 = arith.maximumf %0, %1 : vector<8x256xbf16>
    %c0_3 = arith.constant 0 : index
    %c0_4 = arith.constant 0 : index
    %3 = vector.load %arg2[%c0_3, %c0_4] : memref<8x256xbf16, #tpu.memory_space<vmem>>, vector<8x256xbf16>
    %c0_5 = arith.constant 0 : index
    %c0_6 = arith.constant 0 : index
    %4 = vector.load %arg3[%c0_5, %c0_6] : memref<8x256xbf16, #tpu.memory_space<vmem>>, vector<8x256xbf16>
    %5 = arith.maximumf %3, %4 : vector<8x256xbf16>
    %6 = arith.maximumf %2, %5 : vector<8x256xbf16>
    %c0_7 = arith.constant 0 : index
    %c0_8 = arith.constant 0 : index
    %7 = vector.load %arg4[%c0_7, %c0_8] : memref<8x256xbf16, #tpu.memory_space<vmem>>, vector<8x256xbf16>
    tpu.vector_store %arg4[%c0_7, %c0_8], %6 {strides = array<i32>} : memref<8x256xbf16, #tpu.memory_space<vmem>>, vector<8x256xbf16>,
    return
  }
}

module attributes {stable_mosaic.version = 11 : i64} {
  func.func @_mm_single_k_kernel(%arg0: i32, %arg1: i32, %arg2: memref<32x640xbf16, #tpu.memory_space<vmem>>, %arg3: memref<640x128xbf16, #tpu.memory_space<vmem>>, %arg4: memref<1x128xf32, #tpu.memory_space<vmem>>, %arg5: memref<1x128xf32, #tpu.memory_space<vmem>>, %arg6: memref<32x128xbf16, #tpu.memory_space<vmem>>) attributes {dimension_semantics = [#tpu.dimension_semantics<parallel>, #tpu.dimension_semantics<parallel>], iteration_bounds = array<i64: 1, 1>, scalar_prefetch = 0 : i64, scratch_operands = 0 : i64, tpu.core_type = #tpu.core_type<tc>, window_params = [{transform_indices = @transform_0, window_bounds = array<i64: 32, 640>}, {transform_indices = @transform_1, window_bounds = array<i64: 640, 128>}, {transform_indices = @transform_2, window_bounds = array<i64: 1, 128>}, {transform_indices = @transform_3, window_bounds = array<i64: 1, 128>}, {transform_indices = @transform_4, window_bounds = array<i64: 32, 128>}]} {
    %c0 = arith.constant 0 : index
    %c0_0 = arith.constant 0 : index
    %0 = vector.load %arg2[%c0, %c0_0] : memref<32x640xbf16, #tpu.memory_space<vmem>>, vector<32x640xbf16>
    %c0_1 = arith.constant 0 : index
    %c0_2 = arith.constant 0 : index
    %1 = vector.load %arg3[%c0_1, %c0_2] : memref<640x128xbf16, #tpu.memory_space<vmem>>, vector<640x128xbf16>
    %cst = arith.constant dense<0.000000e+00> : vector<32x128xf32>
    %2 = tpu.matmul %0, %1, %cst {dimension_numbers = #tpu.dot_dimension_numbers<[1], [0], [0], [1], [0, 0, 1, 1], [], []>} : vector<32x640xbf16>, vector<640x128xbf16>, vector<32x128xf32> -> vector<32x128xf32>
    %c0_3 = arith.constant 0 : index
    %c0_4 = arith.constant 0 : index
    %3 = vector.load %arg4[%c0_3, %c0_4] : memref<1x128xf32, #tpu.memory_space<vmem>>, vector<1x128xf32>
    %4 = vector.broadcast %3 : vector<1x128xf32> to vector<32x128xf32>
    %5 = arith.mulf %2, %4 : vector<32x128xf32>
    %c0_5 = arith.constant 0 : index
    %c0_6 = arith.constant 0 : index
    %6 = vector.load %arg5[%c0_5, %c0_6] : memref<1x128xf32, #tpu.memory_space<vmem>>, vector<1x128xf32>
    %7 = vector.broadcast %6 : vector<1x128xf32> to vector<32x128xf32>
    %8 = arith.addf %5, %7 : vector<32x128xf32>
    %cst_7 = arith.constant 0.000000e+00 : f32
    %9 = vector.broadcast %cst_7 : f32 to vector<32x128xf32>
    %10 = arith.maximumf %8, %9 : vector<32x128xf32>
    %11 = arith.truncf %10 : vector<32x128xf32> to vector<32x128xbf16>
    %c0_8 = arith.constant 0 : index
    %c0_9 = arith.constant 0 : index
    %12 = vector.load %arg6[%c0_8, %c0_9] : memref<32x128xbf16, #tpu.memory_space<vmem>>, vector<32x128xbf16>
    tpu.vector_store %arg6[%c0_8, %c0_9], %11 {strides = array<i32>} : memref<32x128xbf16, #tpu.memory_space<vmem>>, vector<32x128xbf16>,
    return
  }
  func.func @transform_0(%arg0: i32, %arg1: i32) -> (i32, i32) {
    %c0_i32 = arith.constant 0 : i32
    %c0_i32_0 = arith.constant 0 : i32
    return %arg0, %c0_i32 : i32, i32
  }
  func.func @transform_1(%arg0: i32, %arg1: i32) -> (i32, i32) {
    %c0_i32 = arith.constant 0 : i32
    %c0_i32_0 = arith.constant 0 : i32
    return %c0_i32, %arg1 : i32, i32
  }
  func.func @transform_2(%arg0: i32, %arg1: i32) -> (i32, i32) {
    %c0_i32 = arith.constant 0 : i32
    %c0_i32_0 = arith.constant 0 : i32
    return %c0_i32, %arg1 : i32, i32
  }
  func.func @transform_3(%arg0: i32, %arg1: i32) -> (i32, i32) {
    %c0_i32 = arith.constant 0 : i32
    %c0_i32_0 = arith.constant 0 : i32
    return %c0_i32, %arg1 : i32, i32
  }
  func.func @transform_4(%arg0: i32, %arg1: i32) -> (i32, i32) {
    %c0_i32 = arith.constant 0 : i32
    return %arg0, %arg1 : i32, i32
  }
}

module attributes {stable_mosaic.version = 11 : i64} {
  func.func @_max4_kernel(%arg0: memref<4x256xbf16, #tpu.memory_space<vmem>>, %arg1: memref<4x256xbf16, #tpu.memory_space<vmem>>, %arg2: memref<4x256xbf16, #tpu.memory_space<vmem>>, %arg3: memref<4x256xbf16, #tpu.memory_space<vmem>>, %arg4: memref<4x256xbf16, #tpu.memory_space<vmem>>) attributes {dimension_semantics = [], scalar_prefetch = 0 : i64, scratch_operands = 0 : i64, tpu.core_type = #tpu.core_type<tc>} {
    %c0 = arith.constant 0 : index
    %c0_0 = arith.constant 0 : index
    %0 = vector.load %arg0[%c0, %c0_0] : memref<4x256xbf16, #tpu.memory_space<vmem>>, vector<4x256xbf16>
    %c0_1 = arith.constant 0 : index
    %c0_2 = arith.constant 0 : index
    %1 = vector.load %arg1[%c0_1, %c0_2] : memref<4x256xbf16, #tpu.memory_space<vmem>>, vector<4x256xbf16>
    %2 = arith.maximumf %0, %1 : vector<4x256xbf16>
    %c0_3 = arith.constant 0 : index
    %c0_4 = arith.constant 0 : index
    %3 = vector.load %arg2[%c0_3, %c0_4] : memref<4x256xbf16, #tpu.memory_space<vmem>>, vector<4x256xbf16>
    %c0_5 = arith.constant 0 : index
    %c0_6 = arith.constant 0 : index
    %4 = vector.load %arg3[%c0_5, %c0_6] : memref<4x256xbf16, #tpu.memory_space<vmem>>, vector<4x256xbf16>
    %5 = arith.maximumf %3, %4 : vector<4x256xbf16>
    %6 = arith.maximumf %2, %5 : vector<4x256xbf16>
    %c0_7 = arith.constant 0 : index
    %c0_8 = arith.constant 0 : index
    %7 = vector.load %arg4[%c0_7, %c0_8] : memref<4x256xbf16, #tpu.memory_space<vmem>>, vector<4x256xbf16>
    tpu.vector_store %arg4[%c0_7, %c0_8], %6 {strides = array<i32>} : memref<4x256xbf16, #tpu.memory_space<vmem>>, vector<4x256xbf16>,
    return
  }
}

module attributes {stable_mosaic.version = 11 : i64} {
  func.func @_max4_kernel(%arg0: memref<2x512xbf16, #tpu.memory_space<vmem>>, %arg1: memref<2x512xbf16, #tpu.memory_space<vmem>>, %arg2: memref<2x512xbf16, #tpu.memory_space<vmem>>, %arg3: memref<2x512xbf16, #tpu.memory_space<vmem>>, %arg4: memref<2x512xbf16, #tpu.memory_space<vmem>>) attributes {dimension_semantics = [], scalar_prefetch = 0 : i64, scratch_operands = 0 : i64, tpu.core_type = #tpu.core_type<tc>} {
    %c0 = arith.constant 0 : index
    %c0_0 = arith.constant 0 : index
    %0 = vector.load %arg0[%c0, %c0_0] : memref<2x512xbf16, #tpu.memory_space<vmem>>, vector<2x512xbf16>
    %c0_1 = arith.constant 0 : index
    %c0_2 = arith.constant 0 : index
    %1 = vector.load %arg1[%c0_1, %c0_2] : memref<2x512xbf16, #tpu.memory_space<vmem>>, vector<2x512xbf16>
    %2 = arith.maximumf %0, %1 : vector<2x512xbf16>
    %c0_3 = arith.constant 0 : index
    %c0_4 = arith.constant 0 : index
    %3 = vector.load %arg2[%c0_3, %c0_4] : memref<2x512xbf16, #tpu.memory_space<vmem>>, vector<2x512xbf16>
    %c0_5 = arith.constant 0 : index
    %c0_6 = arith.constant 0 : index
    %4 = vector.load %arg3[%c0_5, %c0_6] : memref<2x512xbf16, #tpu.memory_space<vmem>>, vector<2x512xbf16>
    %5 = arith.maximumf %3, %4 : vector<2x512xbf16>
    %6 = arith.maximumf %2, %5 : vector<2x512xbf16>
    %c0_7 = arith.constant 0 : index
    %c0_8 = arith.constant 0 : index
    %7 = vector.load %arg4[%c0_7, %c0_8] : memref<2x512xbf16, #tpu.memory_space<vmem>>, vector<2x512xbf16>
    tpu.vector_store %arg4[%c0_7, %c0_8], %6 {strides = array<i32>} : memref<2x512xbf16, #tpu.memory_space<vmem>>, vector<2x512xbf16>,
    return
  }
}

module attributes {stable_mosaic.version = 11 : i64} {
  func.func @_mm_single_k_kernel(%arg0: i32, %arg1: i32, %arg2: memref<16x1152xbf16, #tpu.memory_space<vmem>>, %arg3: memref<1152x512xbf16, #tpu.memory_space<vmem>>, %arg4: memref<1x512xf32, #tpu.memory_space<vmem>>, %arg5: memref<1x512xf32, #tpu.memory_space<vmem>>, %arg6: memref<16x512xbf16, #tpu.memory_space<vmem>>) attributes {dimension_semantics = [#tpu.dimension_semantics<parallel>, #tpu.dimension_semantics<parallel>], iteration_bounds = array<i64: 1, 1>, scalar_prefetch = 0 : i64, scratch_operands = 0 : i64, tpu.core_type = #tpu.core_type<tc>, window_params = [{transform_indices = @transform_0, window_bounds = array<i64: 16, 1152>}, {transform_indices = @transform_1, window_bounds = array<i64: 1152, 512>}, {transform_indices = @transform_2, window_bounds = array<i64: 1, 512>}, {transform_indices = @transform_3, window_bounds = array<i64: 1, 512>}, {transform_indices = @transform_4, window_bounds = array<i64: 16, 512>}]} {
    %c0 = arith.constant 0 : index
    %c0_0 = arith.constant 0 : index
    %0 = vector.load %arg2[%c0, %c0_0] : memref<16x1152xbf16, #tpu.memory_space<vmem>>, vector<16x1152xbf16>
    %c0_1 = arith.constant 0 : index
    %c0_2 = arith.constant 0 : index
    %1 = vector.load %arg3[%c0_1, %c0_2] : memref<1152x512xbf16, #tpu.memory_space<vmem>>, vector<1152x512xbf16>
    %cst = arith.constant dense<0.000000e+00> : vector<16x512xf32>
    %2 = tpu.matmul %0, %1, %cst {dimension_numbers = #tpu.dot_dimension_numbers<[1], [0], [0], [1], [0, 0, 1, 1], [], []>} : vector<16x1152xbf16>, vector<1152x512xbf16>, vector<16x512xf32> -> vector<16x512xf32>
    %c0_3 = arith.constant 0 : index
    %c0_4 = arith.constant 0 : index
    %3 = vector.load %arg4[%c0_3, %c0_4] : memref<1x512xf32, #tpu.memory_space<vmem>>, vector<1x512xf32>
    %4 = vector.broadcast %3 : vector<1x512xf32> to vector<16x512xf32>
    %5 = arith.mulf %2, %4 : vector<16x512xf32>
    %c0_5 = arith.constant 0 : index
    %c0_6 = arith.constant 0 : index
    %6 = vector.load %arg5[%c0_5, %c0_6] : memref<1x512xf32, #tpu.memory_space<vmem>>, vector<1x512xf32>
    %7 = vector.broadcast %6 : vector<1x512xf32> to vector<16x512xf32>
    %8 = arith.addf %5, %7 : vector<16x512xf32>
    %cst_7 = arith.constant 0.000000e+00 : f32
    %9 = vector.broadcast %cst_7 : f32 to vector<16x512xf32>
    %10 = arith.maximumf %8, %9 : vector<16x512xf32>
    %11 = arith.truncf %10 : vector<16x512xf32> to vector<16x512xbf16>
    %c0_8 = arith.constant 0 : index
    %c0_9 = arith.constant 0 : index
    %12 = vector.load %arg6[%c0_8, %c0_9] : memref<16x512xbf16, #tpu.memory_space<vmem>>, vector<16x512xbf16>
    tpu.vector_store %arg6[%c0_8, %c0_9], %11 {strides = array<i32>} : memref<16x512xbf16, #tpu.memory_space<vmem>>, vector<16x512xbf16>,
    return
  }
  func.func @transform_0(%arg0: i32, %arg1: i32) -> (i32, i32) {
    %c0_i32 = arith.constant 0 : i32
    %c0_i32_0 = arith.constant 0 : i32
    return %arg0, %c0_i32 : i32, i32
  }
  func.func @transform_1(%arg0: i32, %arg1: i32) -> (i32, i32) {
    %c0_i32 = arith.constant 0 : i32
    %c0_i32_0 = arith.constant 0 : i32
    return %c0_i32, %arg1 : i32, i32
  }
  func.func @transform_2(%arg0: i32, %arg1: i32) -> (i32, i32) {
    %c0_i32 = arith.constant 0 : i32
    %c0_i32_0 = arith.constant 0 : i32
    return %c0_i32, %arg1 : i32, i32
  }
  func.func @transform_3(%arg0: i32, %arg1: i32) -> (i32, i32) {
    %c0_i32 = arith.constant 0 : i32
    %c0_i32_0 = arith.constant 0 : i32
    return %c0_i32, %arg1 : i32, i32
  }
  func.func @transform_4(%arg0: i32, %arg1: i32) -> (i32, i32) {
    %c0_i32 = arith.constant 0 : i32
    return %arg0, %arg1 : i32, i32
  }
}

module attributes {stable_mosaic.version = 11 : i64} {
  func.func @_mm_multi_k_kernel(%arg0: i32, %arg1: i32, %arg2: i32, %arg3: memref<16x1024xbf16, #tpu.memory_space<vmem>>, %arg4: memref<1024x512xbf16, #tpu.memory_space<vmem>>, %arg5: memref<1x512xf32, #tpu.memory_space<vmem>>, %arg6: memref<1x512xf32, #tpu.memory_space<vmem>>, %arg7: memref<16x512xbf16, #tpu.memory_space<vmem>>, %arg8: memref<16x512xf32, #tpu.memory_space<vmem>>) attributes {dimension_semantics = [#tpu.dimension_semantics<parallel>, #tpu.dimension_semantics<parallel>, #tpu.dimension_semantics<arbitrary>], iteration_bounds = array<i64: 1, 8, 4>, scalar_prefetch = 0 : i64, scratch_operands = 1 : i64, tpu.core_type = #tpu.core_type<tc>, window_params = [{transform_indices = @transform_0, window_bounds = array<i64: 16, 1024>}, {transform_indices = @transform_1, window_bounds = array<i64: 1024, 512>}, {transform_indices = @transform_2, window_bounds = array<i64: 1, 512>}, {transform_indices = @transform_3, window_bounds = array<i64: 1, 512>}, {transform_indices = @transform_4, window_bounds = array<i64: 16, 512>}]} {
    %c0_i32 = arith.constant 0 : i32
    %0 = arith.cmpi eq, %arg2, %c0_i32 : i32
    %1 = arith.extui %0 : i1 to i32
    %c0_i32_0 = arith.constant 0 : i32
    %2 = arith.cmpi ne, %1, %c0_i32_0 : i32
    scf.if %2 {
      %cst_9 = arith.constant 0.000000e+00 : f32
      %12 = vector.broadcast %cst_9 : f32 to vector<16x512xf32>
      %c0_10 = arith.constant 0 : index
      %c0_11 = arith.constant 0 : index
      %13 = vector.load %arg8[%c0_10, %c0_11] : memref<16x512xf32, #tpu.memory_space<vmem>>, vector<16x512xf32>
      tpu.vector_store %arg8[%c0_10, %c0_11], %12 {strides = array<i32>} : memref<16x512xf32, #tpu.memory_space<vmem>>, vector<16x512xf32>,
    } else {
    }
    %c0 = arith.constant 0 : index
    %c0_1 = arith.constant 0 : index
    %3 = vector.load %arg8[%c0, %c0_1] : memref<16x512xf32, #tpu.memory_space<vmem>>, vector<16x512xf32>
    %c0_2 = arith.constant 0 : index
    %c0_3 = arith.constant 0 : index
    %4 = vector.load %arg3[%c0_2, %c0_3] : memref<16x1024xbf16, #tpu.memory_space<vmem>>, vector<16x1024xbf16>
    %c0_4 = arith.constant 0 : index
    %c0_5 = arith.constant 0 : index
    %5 = vector.load %arg4[%c0_4, %c0_5] : memref<1024x512xbf16, #tpu.memory_space<vmem>>, vector<1024x512xbf16>
    %cst = arith.constant dense<0.000000e+00> : vector<16x512xf32>
    %6 = tpu.matmul %4, %5, %cst {dimension_numbers = #tpu.dot_dimension_numbers<[1], [0], [0], [1], [0, 0, 1, 1], [], []>} : vector<16x1024xbf16>, vector<1024x512xbf16>, vector<16x512xf32> -> vector<16x512xf32>
    %7 = arith.addf %3, %6 : vector<16x512xf32>
    %c0_6 = arith.constant 0 : index
    %c0_7 = arith.constant 0 : index
    %8 = vector.load %arg8[%c0_6, %c0_7] : memref<16x512xf32, #tpu.memory_space<vmem>>, vector<16x512xf32>
    tpu.vector_store %arg8[%c0_6, %c0_7], %7 {strides = array<i32>} : memref<16x512xf32, #tpu.memory_space<vmem>>, vector<16x512xf32>,
    %c3_i32 = arith.constant 3 : i32
    %9 = arith.cmpi eq, %arg2, %c3_i32 : i32
    %10 = arith.extui %9 : i1 to i32
    %c0_i32_8 = arith.constant 0 : i32
    %11 = arith.cmpi ne, %10, %c0_i32_8 : i32
    scf.if %11 {
      %c0_9 = arith.constant 0 : index
      %c0_10 = arith.constant 0 : index
      %12 = vector.load %arg8[%c0_9, %c0_10] : memref<16x512xf32, #tpu.memory_space<vmem>>, vector<16x512xf32>
      %c0_11 = arith.constant 0 : index
      %c0_12 = arith.constant 0 : index
      %13 = vector.load %arg5[%c0_11, %c0_12] : memref<1x512xf32, #tpu.memory_space<vmem>>, vector<1x512xf32>
      %14 = vector.broadcast %13 : vector<1x512xf32> to vector<16x512xf32>
      %15 = arith.mulf %12, %14 : vector<16x512xf32>
      %c0_13 = arith.constant 0 : index
      %c0_14 = arith.constant 0 : index
      %16 = vector.load %arg6[%c0_13, %c0_14] : memref<1x512xf32, #tpu.memory_space<vmem>>, vector<1x512xf32>
      %17 = vector.broadcast %16 : vector<1x512xf32> to vector<16x512xf32>
      %18 = arith.addf %15, %17 : vector<16x512xf32>
      %cst_15 = arith.constant 0.000000e+00 : f32
      %19 = vector.broadcast %cst_15 : f32 to vector<16x512xf32>
      %20 = arith.maximumf %18, %19 : vector<16x512xf32>
      %21 = arith.truncf %20 : vector<16x512xf32> to vector<16x512xbf16>
      %c0_16 = arith.constant 0 : index
      %c0_17 = arith.constant 0 : index
      %22 = vector.load %arg7[%c0_16, %c0_17] : memref<16x512xbf16, #tpu.memory_space<vmem>>, vector<16x512xbf16>
      tpu.vector_store %arg7[%c0_16, %c0_17], %21 {strides = array<i32>} : memref<16x512xbf16, #tpu.memory_space<vmem>>, vector<16x512xbf16>,
    } else {
    }
    return
  }
  func.func @transform_0(%arg0: i32, %arg1: i32, %arg2: i32) -> (i32, i32) {
    %c0_i32 = arith.constant 0 : i32
    return %arg0, %arg2 : i32, i32
  }
  func.func @transform_1(%arg0: i32, %arg1: i32, %arg2: i32) -> (i32, i32) {
    %c0_i32 = arith.constant 0 : i32
    return %arg2, %arg1 : i32, i32
  }
  func.func @transform_2(%arg0: i32, %arg1: i32, %arg2: i32) -> (i32, i32) {
    %c0_i32 = arith.constant 0 : i32
    %c0_i32_0 = arith.constant 0 : i32
    return %c0_i32, %arg1 : i32, i32
  }
  func.func @transform_3(%arg0: i32, %arg1: i32, %arg2: i32) -> (i32, i32) {
    %c0_i32 = arith.constant 0 : i32
    %c0_i32_0 = arith.constant 0 : i32
    return %c0_i32, %arg1 : i32, i32
  }
  func.func @transform_4(%arg0: i32, %arg1: i32, %arg2: i32) -> (i32, i32) {
    %c0_i32 = arith.constant 0 : i32
    return %arg0, %arg1 : i32, i32
  }
}

module attributes {stable_mosaic.version = 11 : i64} {
  func.func @_mm_single_k_kernel(%arg0: i32, %arg1: i32, %arg2: memref<16x512xbf16, #tpu.memory_space<vmem>>, %arg3: memref<512x512xbf16, #tpu.memory_space<vmem>>, %arg4: memref<1x512xf32, #tpu.memory_space<vmem>>, %arg5: memref<1x512xf32, #tpu.memory_space<vmem>>, %arg6: memref<16x512xbf16, #tpu.memory_space<vmem>>) attributes {dimension_semantics = [#tpu.dimension_semantics<parallel>, #tpu.dimension_semantics<parallel>], iteration_bounds = array<i64: 1, 8>, scalar_prefetch = 0 : i64, scratch_operands = 0 : i64, tpu.core_type = #tpu.core_type<tc>, window_params = [{transform_indices = @transform_0, window_bounds = array<i64: 16, 512>}, {transform_indices = @transform_1, window_bounds = array<i64: 512, 512>}, {transform_indices = @transform_2, window_bounds = array<i64: 1, 512>}, {transform_indices = @transform_3, window_bounds = array<i64: 1, 512>}, {transform_indices = @transform_4, window_bounds = array<i64: 16, 512>}]} {
    %c0 = arith.constant 0 : index
    %c0_0 = arith.constant 0 : index
    %0 = vector.load %arg2[%c0, %c0_0] : memref<16x512xbf16, #tpu.memory_space<vmem>>, vector<16x512xbf16>
    %c0_1 = arith.constant 0 : index
    %c0_2 = arith.constant 0 : index
    %1 = vector.load %arg3[%c0_1, %c0_2] : memref<512x512xbf16, #tpu.memory_space<vmem>>, vector<512x512xbf16>
    %cst = arith.constant dense<0.000000e+00> : vector<16x512xf32>
    %2 = tpu.matmul %0, %1, %cst {dimension_numbers = #tpu.dot_dimension_numbers<[1], [0], [0], [1], [0, 0, 1, 1], [], []>} : vector<16x512xbf16>, vector<512x512xbf16>, vector<16x512xf32> -> vector<16x512xf32>
    %c0_3 = arith.constant 0 : index
    %c0_4 = arith.constant 0 : index
    %3 = vector.load %arg4[%c0_3, %c0_4] : memref<1x512xf32, #tpu.memory_space<vmem>>, vector<1x512xf32>
    %4 = vector.broadcast %3 : vector<1x512xf32> to vector<16x512xf32>
    %5 = arith.mulf %2, %4 : vector<16x512xf32>
    %c0_5 = arith.constant 0 : index
    %c0_6 = arith.constant 0 : index
    %6 = vector.load %arg5[%c0_5, %c0_6] : memref<1x512xf32, #tpu.memory_space<vmem>>, vector<1x512xf32>
    %7 = vector.broadcast %6 : vector<1x512xf32> to vector<16x512xf32>
    %8 = arith.addf %5, %7 : vector<16x512xf32>
    %cst_7 = arith.constant 0.000000e+00 : f32
    %9 = vector.broadcast %cst_7 : f32 to vector<16x512xf32>
    %10 = arith.maximumf %8, %9 : vector<16x512xf32>
    %11 = arith.truncf %10 : vector<16x512xf32> to vector<16x512xbf16>
    %c0_8 = arith.constant 0 : index
    %c0_9 = arith.constant 0 : index
    %12 = vector.load %arg6[%c0_8, %c0_9] : memref<16x512xbf16, #tpu.memory_space<vmem>>, vector<16x512xbf16>
    tpu.vector_store %arg6[%c0_8, %c0_9], %11 {strides = array<i32>} : memref<16x512xbf16, #tpu.memory_space<vmem>>, vector<16x512xbf16>,
    return
  }
  func.func @transform_0(%arg0: i32, %arg1: i32) -> (i32, i32) {
    %c0_i32 = arith.constant 0 : i32
    %c0_i32_0 = arith.constant 0 : i32
    return %arg0, %c0_i32 : i32, i32
  }
  func.func @transform_1(%arg0: i32, %arg1: i32) -> (i32, i32) {
    %c0_i32 = arith.constant 0 : i32
    %c0_i32_0 = arith.constant 0 : i32
    return %c0_i32, %arg1 : i32, i32
  }
  func.func @transform_2(%arg0: i32, %arg1: i32) -> (i32, i32) {
    %c0_i32 = arith.constant 0 : i32
    %c0_i32_0 = arith.constant 0 : i32
    return %c0_i32, %arg1 : i32, i32
  }
  func.func @transform_3(%arg0: i32, %arg1: i32) -> (i32, i32) {
    %c0_i32 = arith.constant 0 : i32
    %c0_i32_0 = arith.constant 0 : i32
    return %c0_i32, %arg1 : i32, i32
  }
  func.func @transform_4(%arg0: i32, %arg1: i32) -> (i32, i32) {
    %c0_i32 = arith.constant 0 : i32
    return %arg0, %arg1 : i32, i32
  }
}

module attributes {stable_mosaic.version = 11 : i64} {
  func.func @_mm_multi_k_kernel(%arg0: i32, %arg1: i32, %arg2: i32, %arg3: memref<16x1024xbf16, #tpu.memory_space<vmem>>, %arg4: memref<1024x128xbf16, #tpu.memory_space<vmem>>, %arg5: memref<1x128xf32, #tpu.memory_space<vmem>>, %arg6: memref<1x128xf32, #tpu.memory_space<vmem>>, %arg7: memref<16x128xf32, #tpu.memory_space<vmem>>, %arg8: memref<16x128xf32, #tpu.memory_space<vmem>>) attributes {dimension_semantics = [#tpu.dimension_semantics<parallel>, #tpu.dimension_semantics<parallel>, #tpu.dimension_semantics<arbitrary>], iteration_bounds = array<i64: 1, 1, 4>, scalar_prefetch = 0 : i64, scratch_operands = 1 : i64, tpu.core_type = #tpu.core_type<tc>, window_params = [{transform_indices = @transform_0, window_bounds = array<i64: 16, 1024>}, {transform_indices = @transform_1, window_bounds = array<i64: 1024, 128>}, {transform_indices = @transform_2, window_bounds = array<i64: 1, 128>}, {transform_indices = @transform_3, window_bounds = array<i64: 1, 128>}, {transform_indices = @transform_4, window_bounds = array<i64: 16, 128>}]} {
    %c0_i32 = arith.constant 0 : i32
    %0 = arith.cmpi eq, %arg2, %c0_i32 : i32
    %1 = arith.extui %0 : i1 to i32
    %c0_i32_0 = arith.constant 0 : i32
    %2 = arith.cmpi ne, %1, %c0_i32_0 : i32
    scf.if %2 {
      %cst_9 = arith.constant 0.000000e+00 : f32
      %12 = vector.broadcast %cst_9 : f32 to vector<16x128xf32>
      %c0_10 = arith.constant 0 : index
      %c0_11 = arith.constant 0 : index
      %13 = vector.load %arg8[%c0_10, %c0_11] : memref<16x128xf32, #tpu.memory_space<vmem>>, vector<16x128xf32>
      tpu.vector_store %arg8[%c0_10, %c0_11], %12 {strides = array<i32>} : memref<16x128xf32, #tpu.memory_space<vmem>>, vector<16x128xf32>,
    } else {
    }
    %c0 = arith.constant 0 : index
    %c0_1 = arith.constant 0 : index
    %3 = vector.load %arg8[%c0, %c0_1] : memref<16x128xf32, #tpu.memory_space<vmem>>, vector<16x128xf32>
    %c0_2 = arith.constant 0 : index
    %c0_3 = arith.constant 0 : index
    %4 = vector.load %arg3[%c0_2, %c0_3] : memref<16x1024xbf16, #tpu.memory_space<vmem>>, vector<16x1024xbf16>
    %c0_4 = arith.constant 0 : index
    %c0_5 = arith.constant 0 : index
    %5 = vector.load %arg4[%c0_4, %c0_5] : memref<1024x128xbf16, #tpu.memory_space<vmem>>, vector<1024x128xbf16>
    %cst = arith.constant dense<0.000000e+00> : vector<16x128xf32>
    %6 = tpu.matmul %4, %5, %cst {dimension_numbers = #tpu.dot_dimension_numbers<[1], [0], [0], [1], [0, 0, 1, 1], [], []>} : vector<16x1024xbf16>, vector<1024x128xbf16>, vector<16x128xf32> -> vector<16x128xf32>
    %7 = arith.addf %3, %6 : vector<16x128xf32>
    %c0_6 = arith.constant 0 : index
    %c0_7 = arith.constant 0 : index
    %8 = vector.load %arg8[%c0_6, %c0_7] : memref<16x128xf32, #tpu.memory_space<vmem>>, vector<16x128xf32>
    tpu.vector_store %arg8[%c0_6, %c0_7], %7 {strides = array<i32>} : memref<16x128xf32, #tpu.memory_space<vmem>>, vector<16x128xf32>,
    %c3_i32 = arith.constant 3 : i32
    %9 = arith.cmpi eq, %arg2, %c3_i32 : i32
    %10 = arith.extui %9 : i1 to i32
    %c0_i32_8 = arith.constant 0 : i32
    %11 = arith.cmpi ne, %10, %c0_i32_8 : i32
    scf.if %11 {
      %c0_9 = arith.constant 0 : index
      %c0_10 = arith.constant 0 : index
      %12 = vector.load %arg8[%c0_9, %c0_10] : memref<16x128xf32, #tpu.memory_space<vmem>>, vector<16x128xf32>
      %c0_11 = arith.constant 0 : index
      %c0_12 = arith.constant 0 : index
      %13 = vector.load %arg5[%c0_11, %c0_12] : memref<1x128xf32, #tpu.memory_space<vmem>>, vector<1x128xf32>
      %14 = vector.broadcast %13 : vector<1x128xf32> to vector<16x128xf32>
      %15 = arith.mulf %12, %14 : vector<16x128xf32>
      %c0_13 = arith.constant 0 : index
      %c0_14 = arith.constant 0 : index
      %16 = vector.load %arg6[%c0_13, %c0_14] : memref<1x128xf32, #tpu.memory_space<vmem>>, vector<1x128xf32>
      %17 = vector.broadcast %16 : vector<1x128xf32> to vector<16x128xf32>
      %18 = arith.addf %15, %17 : vector<16x128xf32>
      %c0_15 = arith.constant 0 : index
      %c0_16 = arith.constant 0 : index
      %19 = vector.load %arg7[%c0_15, %c0_16] : memref<16x128xf32, #tpu.memory_space<vmem>>, vector<16x128xf32>
      tpu.vector_store %arg7[%c0_15, %c0_16], %18 {strides = array<i32>} : memref<16x128xf32, #tpu.memory_space<vmem>>, vector<16x128xf32>,
    } else {
    }
    return
  }
  func.func @transform_0(%arg0: i32, %arg1: i32, %arg2: i32) -> (i32, i32) {
    %c0_i32 = arith.constant 0 : i32
    return %arg0, %arg2 : i32, i32
  }
  func.func @transform_1(%arg0: i32, %arg1: i32, %arg2: i32) -> (i32, i32) {
    %c0_i32 = arith.constant 0 : i32
    return %arg2, %arg1 : i32, i32
  }
  func.func @transform_2(%arg0: i32, %arg1: i32, %arg2: i32) -> (i32, i32) {
    %c0_i32 = arith.constant 0 : i32
    %c0_i32_0 = arith.constant 0 : i32
    return %c0_i32, %arg1 : i32, i32
  }
  func.func @transform_3(%arg0: i32, %arg1: i32, %arg2: i32) -> (i32, i32) {
    %c0_i32 = arith.constant 0 : i32
    %c0_i32_0 = arith.constant 0 : i32
    return %c0_i32, %arg1 : i32, i32
  }
  func.func @transform_4(%arg0: i32, %arg1: i32, %arg2: i32) -> (i32, i32) {
    %c0_i32 = arith.constant 0 : i32
    return %arg0, %arg1 : i32, i32
  }
}

</mosaic_0001>

<bundles_post_ra>
// kernel: vgg_forward.13
= control target key start
LH: loop header
LB: loop body
LE: loop exit
PB: predicated region body
PF: predicated region fallthrough
CT: control target
= control target key end

     0   :  { %9 = vsyncpa [#allocation3], 0  ;;  %s1171_s0 = inlined_call_operand.vmem [shape: bf16[2048,128], index: 0, kind: input, shape index: {}]   ;;  %s1172_s1 = inlined_call_operand.hbm [shape: bf16[128,128], index: 1, kind: input, shape index: {}]   ;;  %s1173_s2 = inlined_call_operand.hbm [shape: f32[1,128], index: 2, kind: input, shape index: {}]   ;;  %s1174_s3 = inlined_call_operand.hbm [shape: f32[1,128], index: 3, kind: input, shape index: {}]   ;;  %s1175_s4 = inlined_call_operand.vmem [shape: bf16[2048,128], index: 4, kind: output, shape index: {}]  }
   0x1   :  { %10 = vsyncpa [#allocation5], 0  ;;  %s1040_s15 = smov 0   ;;  %s1042_s16 = smov 0  }
   0x2   :  { %s1044_s17 = smov 0  }
   0x3 LB: > { %s194_s20 = sshll.u32 %s1173_s2, 4  ;;  %s661_s21 = sadd.s32 4294967295, %s1008_s17   ;;  %s1008_s17 = sphi %s1044_s17, %s16_s17   ;;  %s1004_s16 = sphi %s1042_s16, %s1180_s16   ;;  %s1000_s15 = sphi %s1040_s15, %s1179_s15   ;;  %s195_s20 = int_to_ptr.hbm [resolvable:$true] %s194_s20 }
   0x4   : > { %p663_p0 = scmp.ge.s32.totalorder %s1008_s17, 1  ;;  %p165_p1 = scmp.lt.s32.totalorder %s1008_s17, 17 }
   0x5   : > { %p1061_p2 = scmp.eq.s32.totalorder %s661_s21, 0  ;;  %s1010_s24 = smov [#allocation4]  }
   0x6   : > { %p1065_p3 = pnand %p663_p0, %p165_p1  ;;  %s196_s25 = sshll.u32 %s1010_s24, 4  ;;  %s197_s25 = int_to_ptr.vmem [resolvable:$true] %s196_s25 }
   0x7   : > { %s28_s27 = sadd.s32 1, %s1004_s16  ;;  %s178_s30 = sshll.u32 %s1172_s1, 4  ;;  %s179_s30 = int_to_ptr.hbm [resolvable:$true] %s178_s30 }
   0x8   : > { %p841_p4 = pneg %p1065_p3  ;;  %p30_p6 = scmp.ge.s32.totalorder %s28_s27, 16 }
   0x9   : > { %s1011_s5 = smov [#allocation2]   ;;  %s207_s9 = sshll.u32 %s1174_s3, 4  ;;  %s208_s9 = int_to_ptr.hbm [resolvable:$true] %s207_s9 }
   0xa   : > { %p1073_p5 = pnand %p1061_p2, %p841_p4  ;;  %s1182_s27 = smov (%p30_p6, %s28_s27), 0 }
   0xb   : > { %s180_s6 = sshll.u32 %s1011_s5, 4  ;;  %s1012_s10 = smov 64   ;;  %s181_s6 = int_to_ptr.vmem [resolvable:$true] %s180_s6 }
   0xc   : > { %847 = dma.hbm_to_vmem [thread:$0]  (!%p1073_p5), %s195_s20, 16, %s197_s25, [#allocation5]  }
   0xd   : > { %s1013_s11 = smov 4   ;;  %s1014_s12 = smov [#allocation6]  }
   0xe   : > { %844 = dma.hbm_to_vmem [thread:$0]  (!%p1073_p5), %s179_s30, 1024, %s181_s6, [#allocation3], %s1012_s10, %s1012_s10, %s1013_s11  }
   0xf   : > { %s209_s13 = sshll.u32 %s1014_s12, 4  ;;  %231 = sbr.rel (%p1065_p3) target bundleno = 222 (0xde), region = 36  ;;  %s210_s13 = int_to_ptr.vmem [resolvable:$true] %s209_s13 }
  0x10   : > { %850 = dma.hbm_to_vmem [thread:$0]  (!%p1073_p5), %s208_s9, 16, %s210_s13, [#allocation5]  }
  0x14   : > { %991 = dma.done.wait (%p1061_p2), [#allocation3], 1024  }
  0x15   : > { %993 = vsyncadd (%p1061_p2), [#allocation3], 4294966272 }
  0x16   : > { %995 = dma.done.wait (%p1061_p2), [#allocation5], 32  }
  0x17   : > { %997 = vsyncadd (%p1061_p2), [#allocation5], 4294967264  ;;  %v757_v0 = vld [vmem:[#allocation2 + $0x38] sm:$0xff]  ;;  %v756_v1 = vld [vmem:[#allocation2 + $0x30] sm:$0xff]  ;;  %s672_s14 = sshll.u32 %s1000_s15, 4 }
  0x18   : > { %414 = vmatpush.bf16.msra.mxu0 %v757_v0  ;;  %805 = vmatpush.bf16.msra.mxu1 %v757_v0  ;;  %v755_v2 = vld [vmem:[#allocation2 + $0x28] sm:$0xff]  ;;  %v754_v3 = vld [vmem:[#allocation2 + $0x20] sm:$0xff]  ;;  %v753_v4 = vld [vmem:[#allocation2 + $0x18] sm:$0xff]  ;;  %p272_p7 = scmp.lt.s32.totalorder %s672_s14, 255 }
  0x19   : > { %806 = vmatpush.bf16.msra.mxu2 %v757_v0  ;;  %807 = vmatpush.bf16.msra.mxu3 %v757_v0  ;;  %v752_v5 = vld [vmem:[#allocation2 + $0x10] sm:$0xff]  ;;  %v751_v6 = vld [vmem:[#allocation2 + $0x8] sm:$0xff]  ;;  %v750_v7 = vld [vmem:[#allocation2] sm:$0xff] }
  0x1a   : > { %s1184_s14 = smov (!%p272_p7, %s672_s14), 255  ;;  %v1111_v18 = vld [vmem:[#allocation4] ss:$0 sm:$0xff]  ;;  %v1114_v20 = vld [vmem:[#allocation6] ss:$0 sm:$0xff] }
  0x1b   : > { %s673_s15 = sshll.u32 %s1184_s14, 2 }
  0x1c   : > { %415 = vmatpush.bf16.msra.mxu0 %v756_v1  ;;  %808 = vmatpush.bf16.msra.mxu1 %v756_v1  ;;  %s275_s20 = scalar_lea.vmem %s1171_s0, %s673_s15  ;;  %s1130_s23 = scalar_lea.vmem %s1175_s4, %s673_s15 }
  0x1d   : > { %809 = vmatpush.bf16.msra.mxu2 %v756_v1  ;;  %810 = vmatpush.bf16.msra.mxu3 %v756_v1  ;;  %v742_v8 = vld [vmem:[%s275_s20] sm:$0xff]  ;;  %v744_v9 = vld [vmem:[%s275_s20 + $0x10] sm:$0xff]  ;;  %v743_v12 = vld [vmem:[%s275_s20 + $0x8] sm:$0xff] }
  0x1e   : > { %v746_v10 = vld [vmem:[%s275_s20 + $0x20] sm:$0xff]  ;;  %v748_v11 = vld [vmem:[%s275_s20 + $0x30] sm:$0xff]  ;;  %v745_v13 = vld [vmem:[%s275_s20 + $0x18] sm:$0xff] }
  0x1f   : > { %v747_v14 = vld [vmem:[%s275_s20 + $0x28] sm:$0xff]  ;;  %v749_v15 = vld [vmem:[%s275_s20 + $0x38] sm:$0xff] }
  0x20   : > { %416 = vmatpush.bf16.msra.mxu0 %v755_v2  ;;  %811 = vmatpush.bf16.msra.mxu1 %v755_v2 }
  0x21   : > { %812 = vmatpush.bf16.msra.mxu2 %v755_v2  ;;  %813 = vmatpush.bf16.msra.mxu3 %v755_v2 }
  0x24   : > { %417 = vmatpush.bf16.msra.mxu0 %v754_v3  ;;  %814 = vmatpush.bf16.msra.mxu1 %v754_v3 }
  0x25   : > { %815 = vmatpush.bf16.msra.mxu2 %v754_v3  ;;  %816 = vmatpush.bf16.msra.mxu3 %v754_v3 }
  0x28   : > { %418 = vmatpush.bf16.msra.mxu0 %v753_v4  ;;  %817 = vmatpush.bf16.msra.mxu1 %v753_v4 }
  0x29   : > { %818 = vmatpush.bf16.msra.mxu2 %v753_v4  ;;  %819 = vmatpush.bf16.msra.mxu3 %v753_v4 }
  0x2c   : > { %419 = vmatpush.bf16.msra.mxu0 %v752_v5  ;;  %820 = vmatpush.bf16.msra.mxu1 %v752_v5 }
  0x2d   : > { %821 = vmatpush.bf16.msra.mxu2 %v752_v5  ;;  %822 = vmatpush.bf16.msra.mxu3 %v752_v5 }
  0x30   : > { %420 = vmatpush.bf16.msra.mxu0 %v751_v6  ;;  %823 = vmatpush.bf16.msra.mxu1 %v751_v6 }
  0x31   : > { %824 = vmatpush.bf16.msra.mxu2 %v751_v6  ;;  %825 = vmatpush.bf16.msra.mxu3 %v751_v6 }
  0x34   : > { %421 = vmatpush.bf16.msra.mxu0 %v750_v7  ;;  %826 = vmatpush.bf16.msra.mxu1 %v750_v7 }
  0x35   : > { %827 = vmatpush.bf16.msra.mxu2 %v750_v7  ;;  %828 = vmatpush.bf16.msra.mxu3 %v750_v7 }
  0x37   : > { %422 = vmatmul.bf16.vlgmr.msra.gmra.mxu0 %v742_v8  ;;  %432 = vmatmul.bf16.vlgmr.msra.gmra.mxu1 %v744_v9 }
  0x38   : > { %442 = vmatmul.bf16.vlgmr.msra.gmra.mxu2 %v746_v10  ;;  %452 = vmatmul.bf16.vlgmr.msra.gmra.mxu3 %v748_v11 }
  0x47   : > { %427 = vmatmul.bf16.gmra.mxu0 %v743_v12  ;;  %437 = vmatmul.bf16.gmra.mxu1 %v745_v13 }
  0x48   : > { %447 = vmatmul.bf16.gmra.mxu2 %v747_v14  ;;  %457 = vmatmul.bf16.gmra.mxu3 %v749_v15 }
  0xb4   : > { %v423_v16 = vpop.f32.mrf.mxu0  ;;  %v433_v17 = vpop.f32.mrf.mxu1 }
  0xb5   : > { %v467_v19 = vmul.f32 %v1111_v18, %v423_v16  ;;  %v471_v21 = vmul.f32 %v1111_v18, %v433_v17 }
  0xb7   : > { %v487_v26 = vadd.f32 %v1114_v20, %v467_v19  ;;  %v491_v27 = vadd.f32 %v1114_v20, %v471_v21 }
  0xb9   : > { %v503_v34 = vmax.f32 %v487_v26, 0.0  ;;  %v507_v35 = vmax.f32 %v491_v27, 0.0 }
  0xbb   : > { %v443_v22 = vpop.f32.mrf.mxu2  ;;  %v453_v23 = vpop.f32.mrf.mxu3 }
  0xbc   : > { %v425_v24 = vpop.f32.mrf.mxu0  ;;  %v435_v25 = vpop.f32.mrf.mxu1  ;;  %v475_v32 = vmul.f32 %v1111_v18, %v443_v22  ;;  %v479_v33 = vmul.f32 %v1111_v18, %v453_v23 }
  0xbd   : > { %v468_v28 = vmul.f32 %v1111_v18, %v425_v24  ;;  %v472_v29 = vmul.f32 %v1111_v18, %v435_v25 }
  0xbe   : > { %v495_v42 = vadd.f32 %v1114_v20, %v475_v32  ;;  %v499_v43 = vadd.f32 %v1114_v20, %v479_v33 }
  0xbf   : > { %v488_v30 = vadd.f32 %v1114_v20, %v468_v28  ;;  %v492_v31 = vadd.f32 %v1114_v20, %v472_v29 }
  0xc0   : > { %v511_v50 = vmax.f32 %v495_v42, 0.0  ;;  %v515_v51 = vmax.f32 %v499_v43, 0.0 }
  0xc1   : > { %v504_v36 = vmax.f32 %v488_v30, 0.0  ;;  %v508_v37 = vmax.f32 %v492_v31, 0.0 }
  0xc3   : > { %v761_v38 = vpack.c.bf16 %v504_v36, %v503_v34  ;;  %v771_v39 = vpack.c.bf16 %v508_v37, %v507_v35  ;;  %v445_v40 = vpop.f32.mrf.mxu2  ;;  %v455_v41 = vpop.f32.mrf.mxu3 }
  0xc4   : > { %v476_v44 = vmul.f32 %v1111_v18, %v445_v40  ;;  %v480_v45 = vmul.f32 %v1111_v18, %v455_v41  ;;  %v428_v46 = vpop.f32.mrf.mxu0  ;;  %v438_v47 = vpop.f32.mrf.mxu1 }
  0xc5   : > { %762 = vst [vmem:[%s1130_s23] sm:$0xff] %v761_v38   ;;  %v469_v54 = vmul.f32 %v1111_v18, %v428_v46  ;;  %v473_v55 = vmul.f32 %v1111_v18, %v438_v47 }
  0xc6   : > { %799 = vst [vmem:[%s1130_s23 + $0x10] sm:$0xff] %v771_v39   ;;  %v496_v48 = vadd.f32 %v1114_v20, %v476_v44  ;;  %v500_v49 = vadd.f32 %v1114_v20, %v480_v45 }
  0xc7   : > { %v489_v62 = vadd.f32 %v1114_v20, %v469_v54  ;;  %v493_v63 = vadd.f32 %v1114_v20, %v473_v55 }
  0xc8   : > { %v512_v52 = vmax.f32 %v496_v48, 0.0  ;;  %v516_v53 = vmax.f32 %v500_v49, 0.0 }
  0xc9   : > { %v505_v6 = vmax.f32 %v489_v62, 0.0  ;;  %v509_v7 = vmax.f32 %v493_v63, 0.0 }
  0xca   : > { %v781_v56 = vpack.c.bf16 %v512_v52, %v511_v50  ;;  %v791_v57 = vpack.c.bf16 %v516_v53, %v515_v51 }
  0xcb   : > { %v448_v58 = vpop.f32.mrf.mxu2  ;;  %v458_v59 = vpop.f32.mrf.mxu3 }
  0xcc   : > { %801 = vst [vmem:[%s1130_s23 + $0x20] sm:$0xff] %v781_v56   ;;  %v430_v60 = vpop.f32.mrf.mxu0  ;;  %v440_v61 = vpop.f32.mrf.mxu1  ;;  %v477_v4 = vmul.f32 %v1111_v18, %v448_v58  ;;  %v481_v5 = vmul.f32 %v1111_v18, %v458_v59 }
  0xcd   : > { %803 = vst [vmem:[%s1130_s23 + $0x30] sm:$0xff] %v791_v57   ;;  %v470_v0 = vmul.f32 %v1111_v18, %v430_v60  ;;  %v474_v1 = vmul.f32 %v1111_v18, %v440_v61 }
  0xce   : > { %v497_v14 = vadd.f32 %v1114_v20, %v477_v4  ;;  %v501_v15 = vadd.f32 %v1114_v20, %v481_v5 }
  0xcf   : > { %v490_v2 = vadd.f32 %v1114_v20, %v470_v0  ;;  %v494_v3 = vadd.f32 %v1114_v20, %v474_v1 }
  0xd0   : > { %v513_v22 = vmax.f32 %v497_v14, 0.0  ;;  %v517_v23 = vmax.f32 %v501_v15, 0.0 }
  0xd1   : > { %v506_v8 = vmax.f32 %v490_v2, 0.0  ;;  %v510_v9 = vmax.f32 %v494_v3, 0.0 }
  0xd3   : > { %v766_v10 = vpack.c.bf16 %v506_v8, %v505_v6  ;;  %v776_v11 = vpack.c.bf16 %v510_v9, %v509_v7  ;;  %v450_v12 = vpop.f32.mrf.mxu2  ;;  %v460_v13 = vpop.f32.mrf.mxu3 }
  0xd4   : > { %v478_v16 = vmul.f32 %v1111_v18, %v450_v12  ;;  %v482_v17 = vmul.f32 %v1111_v18, %v460_v13 }
  0xd5   : > { %798 = vst [vmem:[%s1130_s23 + $0x8] sm:$0xff] %v766_v10  }
  0xd6   : > { %800 = vst [vmem:[%s1130_s23 + $0x18] sm:$0xff] %v776_v11   ;;  %v498_v19 = vadd.f32 %v1114_v20, %v478_v16  ;;  %v502_v21 = vadd.f32 %v1114_v20, %v482_v17 }
  0xd8   : > { %v514_v24 = vmax.f32 %v498_v19, 0.0  ;;  %v518_v25 = vmax.f32 %v502_v21, 0.0 }
  0xda   : > { %v786_v26 = vpack.c.bf16 %v514_v24, %v513_v22  ;;  %v796_v27 = vpack.c.bf16 %v518_v25, %v517_v23 }
  0xdc   : > { %802 = vst [vmem:[%s1130_s23 + $0x28] sm:$0xff] %v786_v26  }
  0xdd   : > { %804 = vst [vmem:[%s1130_s23 + $0x38] sm:$0xff] %v796_v27  }
  0xde PF: > { %s16_s17 = sadd.s32 1, %s1008_s17   ;;  %s1179_s15 = smov %s1004_s16 }
  0xdf   : > { %p13_p8 = scmp.ge.s32.totalorder %s16_s17, 18   ;;  %s1180_s16 = smov %s1182_s27 }
  0xe1   :  { %15 = sbr.rel (!%p13_p8) target bundleno = 3 (0x3), region = 82 }
  0xe6   :  { %579 = vsyncpa [#allocation3], 1 }
  0xe7   :  { %581 = vsyncpa [#allocation3 + $0x1], 1 }
  0xe8   :  { %582 = vsyncpa [#allocation5], 1 }

// kernel: vgg_forward.14
= control target key start
LH: loop header
LB: loop body
LE: loop exit
PB: predicated region body
PF: predicated region fallthrough
CT: control target
= control target key end

     0   :  { %s210_s0 = inlined_call_operand.vmem [shape: bf16[32,256], index: 0, kind: input, shape index: {}]   ;;  %s211_s1 = inlined_call_operand.vmem [shape: bf16[32,256], index: 1, kind: input, shape index: {}]   ;;  %s212_s2 = inlined_call_operand.vmem [shape: bf16[32,256], index: 2, kind: input, shape index: {}]   ;;  %s213_s3 = inlined_call_operand.vmem [shape: bf16[32,256], index: 3, kind: input, shape index: {}]   ;;  %s214_s4 = inlined_call_operand.vmem [shape: bf16[32,256], index: 4, kind: output, shape index: {}]  }
   0x1   :  { %v17_v0 = vld [vmem:[%s210_s0] sm:$0xff]  ;;  %v18_v8 = vld [vmem:[%s210_s0 + $0x8] sm:$0xff]  ;;  %v19_v24 = vld [vmem:[%s210_s0 + $0x10] sm:$0xff] }
   0x2   :  { %v21_v1 = vld [vmem:[%s211_s1] sm:$0xff]  ;;  %v25_v3 = vunpack.c.l.bf16 %v17_v0  ;;  %v26_v4 = vunpack.c.h.bf16 %v17_v0  ;;  %v22_v9 = vld [vmem:[%s211_s1 + $0x8] sm:$0xff]  ;;  %v27_v18 = vunpack.c.l.bf16 %v18_v8  ;;  %v28_v19 = vunpack.c.h.bf16 %v18_v8  ;;  %v23_v29 = vld [vmem:[%s211_s1 + $0x10] sm:$0xff] }
   0x3   :  { %v53_v2 = vld [vmem:[%s212_s2] sm:$0xff]  ;;  %v33_v5 = vunpack.c.l.bf16 %v21_v1  ;;  %v34_v6 = vunpack.c.h.bf16 %v21_v1  ;;  %v54_v14 = vld [vmem:[%s212_s2 + $0x8] sm:$0xff]  ;;  %v35_v22 = vunpack.c.l.bf16 %v22_v9  ;;  %v36_v23 = vunpack.c.h.bf16 %v22_v9  ;;  %v55_v30 = vld [vmem:[%s212_s2 + $0x10] sm:$0xff] }
   0x4   :  { %v57_v7 = vld [vmem:[%s213_s3] sm:$0xff]  ;;  %v61_v10 = vunpack.c.l.bf16 %v53_v2  ;;  %v62_v11 = vunpack.c.h.bf16 %v53_v2  ;;  %v58_v15 = vld [vmem:[%s213_s3 + $0x8] sm:$0xff]  ;;  %v63_v25 = vunpack.c.l.bf16 %v54_v14  ;;  %v64_v26 = vunpack.c.h.bf16 %v54_v14  ;;  %v59_v35 = vld [vmem:[%s213_s3 + $0x10] sm:$0xff] }
   0x5   :  { %v69_v12 = vunpack.c.l.bf16 %v57_v7  ;;  %v70_v13 = vunpack.c.h.bf16 %v57_v7  ;;  %v41_v16 = vmax.f32 %v25_v3, %v33_v5  ;;  %v42_v17 = vmax.f32 %v26_v4, %v34_v6  ;;  %v20_v40 = vld [vmem:[%s210_s0 + $0x18] sm:$0xff] }
   0x6   :  { %v71_v27 = vunpack.c.l.bf16 %v58_v15  ;;  %v72_v28 = vunpack.c.h.bf16 %v58_v15  ;;  %v43_v33 = vmax.f32 %v27_v18, %v35_v22  ;;  %v44_v34 = vmax.f32 %v28_v19, %v36_v23  ;;  %v24_v45 = vld [vmem:[%s211_s1 + $0x18] sm:$0xff] }
   0x7   :  { %v77_v20 = vmax.f32 %v61_v10, %v69_v12  ;;  %v78_v21 = vmax.f32 %v62_v11, %v70_v13  ;;  %v29_v38 = vunpack.c.l.bf16 %v19_v24  ;;  %v30_v39 = vunpack.c.h.bf16 %v19_v24  ;;  %v56_v50 = vld [vmem:[%s212_s2 + $0x18] sm:$0xff] }
   0x8   :  { %v79_v36 = vmax.f32 %v63_v25, %v71_v27  ;;  %v80_v37 = vmax.f32 %v64_v26, %v72_v28  ;;  %v37_v42 = vunpack.c.l.bf16 %v23_v29  ;;  %v38_v43 = vunpack.c.h.bf16 %v23_v29  ;;  %v60_v55 = vld [vmem:[%s213_s3 + $0x18] sm:$0xff] }
   0x9   :  { %v105_v31 = vmax.f32 %v41_v16, %v77_v20  ;;  %v106_v32 = vmax.f32 %v42_v17, %v78_v21  ;;  %v65_v44 = vunpack.c.l.bf16 %v55_v30  ;;  %v66_v48 = vunpack.c.h.bf16 %v55_v30 }
   0xa   :  { %v107_v46 = vmax.f32 %v43_v33, %v79_v36  ;;  %v108_v47 = vmax.f32 %v44_v34, %v80_v37  ;;  %v73_v49 = vunpack.c.l.bf16 %v59_v35  ;;  %v45_v51 = vmax.f32 %v29_v38, %v37_v42 }
   0xb   :  { %v113_v41 = vpack.c.bf16 %v106_v32, %v105_v31  ;;  %v46_v52 = vmax.f32 %v30_v39, %v38_v43  ;;  %v74_v53 = vunpack.c.h.bf16 %v59_v35  ;;  %v31_v54 = vunpack.c.l.bf16 %v20_v40 }
   0xc   :  { %v114_v56 = vpack.c.bf16 %v108_v47, %v107_v46  ;;  %v81_v57 = vmax.f32 %v65_v44, %v73_v49  ;;  %v32_v58 = vunpack.c.h.bf16 %v20_v40  ;;  %v39_v59 = vunpack.c.l.bf16 %v24_v45 }
   0xd   :  { %117 = vst [vmem:[%s214_s4] sm:$0xff] %v113_v41  ;;  %v82_v60 = vmax.f32 %v66_v48, %v74_v53  ;;  %v40_v61 = vunpack.c.h.bf16 %v24_v45  ;;  %v67_v62 = vunpack.c.l.bf16 %v56_v50  ;;  %v68_v63 = vunpack.c.h.bf16 %v56_v50 }
   0xe   :  { %118 = vst [vmem:[%s214_s4 + $0x8] sm:$0xff] %v114_v56  ;;  %v109_v0 = vmax.f32 %v45_v51, %v81_v57  ;;  %v47_v1 = vmax.f32 %v31_v54, %v39_v59  ;;  %v75_v2 = vunpack.c.l.bf16 %v60_v55  ;;  %v76_v3 = vunpack.c.h.bf16 %v60_v55 }
   0xf   :  { %v110_v4 = vmax.f32 %v46_v52, %v82_v60  ;;  %v48_v5 = vmax.f32 %v32_v58, %v40_v61 }
  0x10   :  { %v83_v6 = vmax.f32 %v67_v62, %v75_v2  ;;  %v84_v7 = vmax.f32 %v68_v63, %v76_v3 }
  0x11   :  { %v115_v8 = vpack.c.bf16 %v110_v4, %v109_v0 }
  0x12   :  { %v111_v9 = vmax.f32 %v47_v1, %v83_v6  ;;  %v112_v10 = vmax.f32 %v48_v5, %v84_v7 }
  0x13   :  { %119 = vst [vmem:[%s214_s4 + $0x10] sm:$0xff] %v115_v8 }
  0x14   :  { %v116_v11 = vpack.c.bf16 %v112_v10, %v111_v9 }
  0x16   :  { %120 = vst [vmem:[%s214_s4 + $0x18] sm:$0xff] %v116_v11 }

// kernel: vgg_forward.15
= control target key start
LH: loop header
LB: loop body
LE: loop exit
PB: predicated region body
PF: predicated region fallthrough
CT: control target
= control target key end

     0   :  { %s1107_s15 = smov 0   ;;  %s1109_s16 = smov 0   ;;  %s1281_s0 = inlined_call_operand.vmem [shape: bf16[512,256], index: 0, kind: input, shape index: {}]   ;;  %s1282_s1 = inlined_call_operand.vmem [shape: bf16[256,128], index: 1, kind: input, shape index: {}]   ;;  %s1283_s2 = inlined_call_operand.vmem [shape: f32[1,128], index: 2, kind: input, shape index: {}]   ;;  %s1284_s3 = inlined_call_operand.vmem [shape: f32[1,128], index: 3, kind: input, shape index: {}]   ;;  %s1285_s4 = inlined_call_operand.vmem [shape: bf16[512,128], index: 4, kind: output, shape index: {}]  }
   0x1   :  { %s1111_s17 = smov 0  }
   0x2 LB: > { %s26_s18 = sadd.s32 1, %s1076_s16  ;;  %p800_p0 = scmp.ge.s32.totalorder %s1080_s17, 1  ;;  %s1080_s17 = sphi %s1111_s17, %s14_s17   ;;  %s1076_s16 = sphi %s1109_s16, %s1287_s16   ;;  %s1072_s15 = sphi %s1107_s15, %s1286_s15  }
   0x3   : > { %p28_p1 = scmp.ge.s32.totalorder %s26_s18, 4  ;;  %p203_p2 = scmp.lt.s32.totalorder %s1080_s17, 5 }
   0x5   : > { %s1289_s18 = smov (%p28_p1, %s26_s18), 0  ;;  %p204_p3 = pnand %p800_p0, %p203_p2 }
   0x6   : > { %s801_s5 = sshll.u32 (!%p204_p3), %s1072_s15, 4 }
   0x7   : > { %207 = sbr.rel (%p204_p3) target bundleno = 244 (0xf4), region = 36  ;;  %p244_p4 = scmp.lt.s32.totalorder (!%p204_p3), %s801_s5, 63 }
   0xc   : > { %v960_v0 = vld [vmem:[%s1282_s1 + $0x38] sm:$0xff]  ;;  %v959_v2 = vld [vmem:[%s1282_s1 + $0x30] sm:$0xff]  ;;  %v958_v4 = vld [vmem:[%s1282_s1 + $0x28] sm:$0xff]  ;;  %s1291_s5 = smov (!%p244_p4, %s801_s5), 63 }
   0xd   : > { %v968_v1 = vld [vmem:[%s1282_s1 + $0x78] sm:$0xff]  ;;  %493 = vmatpush.bf16.msra.mxu0 %v960_v0  ;;  %1016 = vmatpush.bf16.msra.mxu2 %v960_v0  ;;  %v967_v3 = vld [vmem:[%s1282_s1 + $0x70] sm:$0xff]  ;;  %v966_v5 = vld [vmem:[%s1282_s1 + $0x68] sm:$0xff]  ;;  %s936_s21 = sshll.u32 %s1291_s5, 3  ;;  %s805_s12 = sshll.u32 %s1291_s5, 2 }
   0xe   : > { %542 = vmatpush.bf16.msra.mxu1 %v968_v1  ;;  %1024 = vmatpush.bf16.msra.mxu3 %v968_v1  ;;  %v957_v6 = vld [vmem:[%s1282_s1 + $0x20] sm:$0xff]  ;;  %v956_v8 = vld [vmem:[%s1282_s1 + $0x18] sm:$0xff]  ;;  %v955_v10 = vld [vmem:[%s1282_s1 + $0x10] sm:$0xff]  ;;  %s1173_s26 = scalar_lea.vmem %s1281_s0, %s936_s21  ;;  %s1235_s15 = scalar_lea.vmem %s1285_s4, %s805_s12 }
   0xf   : > { %v965_v7 = vld [vmem:[%s1282_s1 + $0x60] sm:$0xff]  ;;  %v964_v9 = vld [vmem:[%s1282_s1 + $0x58] sm:$0xff]  ;;  %v963_v11 = vld [vmem:[%s1282_s1 + $0x50] sm:$0xff] }
  0x10   : > { %v954_v12 = vld [vmem:[%s1282_s1 + $0x8] sm:$0xff]  ;;  %v953_v14 = vld [vmem:[%s1282_s1] sm:$0xff]  ;;  %v816_v28 = vld [vmem:[%s1173_s26 + $0x10] sm:$0xf] }
  0x11   : > { %494 = vmatpush.bf16.msra.mxu0 %v959_v2  ;;  %1017 = vmatpush.bf16.msra.mxu2 %v959_v2  ;;  %v962_v13 = vld [vmem:[%s1282_s1 + $0x48] sm:$0xff]  ;;  %v961_v15 = vld [vmem:[%s1282_s1 + $0x40] sm:$0xff]  ;;  %v940_v29 = vld [vmem:[%s1173_s26 + $0x14] sm:$0xf0] }
  0x12   : > { %543 = vmatpush.bf16.msra.mxu1 %v967_v3  ;;  %1025 = vmatpush.bf16.msra.mxu3 %v967_v3  ;;  %v808_v16 = vld [vmem:[%s1173_s26] sm:$0xf]  ;;  %v938_v17 = vld [vmem:[%s1173_s26 + $0x4] sm:$0xf0]  ;;  %v937_v20 = vld [vmem:[%s1173_s26 + $0x4] sm:$0xf]  ;;  %v817_v36 = vor.u32 %v940_v29, %v816_v28 }
  0x13   : > { %v840_v18 = vld [vmem:[%s1173_s26 + $0x40] sm:$0xf]  ;;  %v946_v19 = vld [vmem:[%s1173_s26 + $0x44] sm:$0xf0]  ;;  %v810_v21 = vld [vmem:[%s1173_s26 + $0x8] sm:$0xf0]  ;;  %v809_v24 = vor.u32 %v938_v17, %v808_v16 }
  0x14   : > { %v945_v22 = vld [vmem:[%s1173_s26 + $0x44] sm:$0xf]  ;;  %v842_v23 = vld [vmem:[%s1173_s26 + $0x48] sm:$0xf0]  ;;  %v841_v25 = vor.u32 %v946_v19, %v840_v18  ;;  %v813_v26 = vor.u32 %v937_v20, %v810_v21  ;;  %v848_v30 = vld [vmem:[%s1173_s26 + $0x50] sm:$0xf] }
  0x15   : > { %495 = vmatpush.bf16.msra.mxu0 %v958_v4  ;;  %1018 = vmatpush.bf16.msra.mxu2 %v958_v4  ;;  %v845_v27 = vor.u32 %v945_v22, %v842_v23  ;;  %v948_v31 = vld [vmem:[%s1173_s26 + $0x54] sm:$0xf0]  ;;  %v939_v32 = vld [vmem:[%s1173_s26 + $0x14] sm:$0xf]  ;;  %v818_v33 = vld [vmem:[%s1173_s26 + $0x18] sm:$0xf0] }
  0x16   : > { %544 = vmatpush.bf16.msra.mxu1 %v966_v5  ;;  %1026 = vmatpush.bf16.msra.mxu3 %v966_v5  ;;  %v947_v34 = vld [vmem:[%s1173_s26 + $0x54] sm:$0xf]  ;;  %v850_v35 = vld [vmem:[%s1173_s26 + $0x58] sm:$0xf0]  ;;  %v849_v37 = vor.u32 %v948_v31, %v848_v30  ;;  %v821_v38 = vor.u32 %v939_v32, %v818_v33  ;;  %v824_v40 = vld [vmem:[%s1173_s26 + $0x20] sm:$0xf] }
  0x17   : > { %v853_v39 = vor.u32 %v947_v34, %v850_v35  ;;  %v942_v41 = vld [vmem:[%s1173_s26 + $0x24] sm:$0xf0]  ;;  %v856_v42 = vld [vmem:[%s1173_s26 + $0x60] sm:$0xf]  ;;  %v941_v44 = vld [vmem:[%s1173_s26 + $0x24] sm:$0xf] }
  0x18   : > { %v950_v43 = vld [vmem:[%s1173_s26 + $0x64] sm:$0xf0]  ;;  %v826_v45 = vld [vmem:[%s1173_s26 + $0x28] sm:$0xf0]  ;;  %v949_v46 = vld [vmem:[%s1173_s26 + $0x64] sm:$0xf]  ;;  %v825_v48 = vor.u32 %v942_v41, %v824_v40 }
  0x19   : > { %496 = vmatpush.bf16.msra.mxu0 %v957_v6  ;;  %1019 = vmatpush.bf16.msra.mxu2 %v957_v6  ;;  %v858_v47 = vld [vmem:[%s1173_s26 + $0x68] sm:$0xf0]  ;;  %v857_v49 = vor.u32 %v950_v43, %v856_v42  ;;  %v829_v50 = vor.u32 %v941_v44, %v826_v45  ;;  %v832_v52 = vld [vmem:[%s1173_s26 + $0x30] sm:$0xf]  ;;  %v944_v53 = vld [vmem:[%s1173_s26 + $0x34] sm:$0xf0] }
  0x1a   : > { %545 = vmatpush.bf16.msra.mxu1 %v965_v7  ;;  %1027 = vmatpush.bf16.msra.mxu3 %v965_v7  ;;  %v861_v51 = vor.u32 %v949_v46, %v858_v47  ;;  %v864_v54 = vld [vmem:[%s1173_s26 + $0x70] sm:$0xf]  ;;  %v952_v55 = vld [vmem:[%s1173_s26 + $0x74] sm:$0xf0]  ;;  %v943_v56 = vld [vmem:[%s1173_s26 + $0x34] sm:$0xf]  ;;  %v833_v60 = vor.u32 %v944_v53, %v832_v52 }
  0x1b   : > { %v834_v57 = vld [vmem:[%s1173_s26 + $0x38] sm:$0xf0]  ;;  %v951_v58 = vld [vmem:[%s1173_s26 + $0x74] sm:$0xf]  ;;  %v865_v61 = vor.u32 %v952_v55, %v864_v54  ;;  %v1219_v3 = vld [vmem:[%s1283_s2] ss:$0 sm:$0xff] }
  0x1c   : > { %v866_v59 = vld [vmem:[%s1173_s26 + $0x78] sm:$0xf0]  ;;  %v837_v62 = vor.u32 %v943_v56, %v834_v57  ;;  %v1225_v7 = vld [vmem:[%s1284_s3] ss:$0 sm:$0xff] }
  0x1d   : > { %497 = vmatpush.bf16.msra.mxu0 %v956_v8  ;;  %1020 = vmatpush.bf16.msra.mxu2 %v956_v8  ;;  %v869_v63 = vor.u32 %v951_v58, %v866_v59 }
  0x1e   : > { %546 = vmatpush.bf16.msra.mxu1 %v964_v9  ;;  %1028 = vmatpush.bf16.msra.mxu3 %v964_v9 }
  0x21   : > { %498 = vmatpush.bf16.msra.mxu0 %v955_v10  ;;  %1021 = vmatpush.bf16.msra.mxu2 %v955_v10 }
  0x22   : > { %547 = vmatpush.bf16.msra.mxu1 %v963_v11  ;;  %1029 = vmatpush.bf16.msra.mxu3 %v963_v11 }
  0x25   : > { %499 = vmatpush.bf16.msra.mxu0 %v954_v12  ;;  %1022 = vmatpush.bf16.msra.mxu2 %v954_v12 }
  0x26   : > { %548 = vmatpush.bf16.msra.mxu1 %v962_v13  ;;  %1030 = vmatpush.bf16.msra.mxu3 %v962_v13 }
  0x29   : > { %500 = vmatpush.bf16.msra.mxu0 %v953_v14  ;;  %1023 = vmatpush.bf16.msra.mxu2 %v953_v14 }
  0x2a   : > { %549 = vmatpush.bf16.msra.mxu1 %v961_v15  ;;  %1031 = vmatpush.bf16.msra.mxu3 %v961_v15 }
  0x2c   : > { %501 = vmatmul.bf16.vlgmr.msra.gmra.mxu0 %v809_v24  ;;  %521 = vmatmul.bf16.vlgmr.msra.gmra.mxu2 %v841_v25 }
  0x2d   : > { %550 = vmatmul.bf16.vlgmr.msra.gmra.mxu1 %v813_v26  ;;  %570 = vmatmul.bf16.vlgmr.msra.gmra.mxu3 %v845_v27 }
  0x3c   : > { %506 = vmatmul.bf16.gmra.mxu0 %v817_v36  ;;  %526 = vmatmul.bf16.gmra.mxu2 %v849_v37 }
  0x3d   : > { %555 = vmatmul.bf16.gmra.mxu1 %v821_v38  ;;  %575 = vmatmul.bf16.gmra.mxu3 %v853_v39 }
  0x4c   : > { %511 = vmatmul.bf16.gmra.mxu0 %v825_v48  ;;  %531 = vmatmul.bf16.gmra.mxu2 %v857_v49 }
  0x4d   : > { %560 = vmatmul.bf16.gmra.mxu1 %v829_v50  ;;  %580 = vmatmul.bf16.gmra.mxu3 %v861_v51 }
  0x5c   : > { %516 = vmatmul.bf16.gmra.mxu0 %v833_v60  ;;  %536 = vmatmul.bf16.gmra.mxu2 %v865_v61 }
  0x5d   : > { %565 = vmatmul.bf16.gmra.mxu1 %v837_v62  ;;  %585 = vmatmul.bf16.gmra.mxu3 %v869_v63 }
  0xa9   : > { %v502_v0 = vpop.f32.mrf.mxu0 }
  0xaa   : > { %v551_v1 = vpop.f32.mrf.mxu1 }
  0xab   : > { %v552_v2 = vadd.f32 %v551_v1, %v502_v0 }
  0xad   : > { %v595_v6 = vmul.f32 %v1219_v3, %v552_v2 }
  0xaf   : > { %v522_v4 = vpop.f32.mrf.mxu2  ;;  %v615_v12 = vadd.f32 %v1225_v7, %v595_v6 }
  0xb0   : > { %v571_v5 = vpop.f32.mrf.mxu3 }
  0xb1   : > { %v504_v8 = vpop.f32.mrf.mxu0  ;;  %v572_v10 = vadd.f32 %v571_v5, %v522_v4  ;;  %v631_v18 = vmax.f32 %v615_v12, 0.0 }
  0xb2   : > { %v553_v9 = vpop.f32.mrf.mxu1 }
  0xb3   : > { %v554_v11 = vadd.f32 %v553_v9, %v504_v8  ;;  %v603_v14 = vmul.f32 %v1219_v3, %v572_v10 }
  0xb5   : > { %v596_v13 = vmul.f32 %v1219_v3, %v554_v11  ;;  %v623_v23 = vadd.f32 %v1225_v7, %v603_v14 }
  0xb7   : > { %v616_v15 = vadd.f32 %v1225_v7, %v596_v13  ;;  %v524_v16 = vpop.f32.mrf.mxu2  ;;  %v639_v28 = vmax.f32 %v623_v23, 0.0 }
  0xb8   : > { %v573_v17 = vpop.f32.mrf.mxu3 }
  0xb9   : > { %v632_v19 = vmax.f32 %v616_v15, 0.0  ;;  %v574_v20 = vadd.f32 %v573_v17, %v524_v16  ;;  %v507_v21 = vpop.f32.mrf.mxu0 }
  0xba   : > { %v556_v22 = vpop.f32.mrf.mxu1 }
  0xbb   : > { %v972_v24 = vpack.c.bf16 %v632_v19, %v631_v18  ;;  %v604_v25 = vmul.f32 %v1219_v3, %v574_v20  ;;  %v557_v27 = vadd.f32 %v556_v22, %v507_v21 }
  0xbd   : > { %973 = vst [vmem:[%s1235_s15] sm:$0xff] %v972_v24   ;;  %v624_v26 = vadd.f32 %v1225_v7, %v604_v25  ;;  %v597_v33 = vmul.f32 %v1219_v3, %v557_v27 }
  0xbf   : > { %v640_v29 = vmax.f32 %v624_v26, 0.0  ;;  %v527_v30 = vpop.f32.mrf.mxu2  ;;  %v617_v38 = vadd.f32 %v1225_v7, %v597_v33 }
  0xc0   : > { %v576_v31 = vpop.f32.mrf.mxu3 }
  0xc1   : > { %v992_v32 = vpack.c.bf16 %v640_v29, %v639_v28  ;;  %v509_v34 = vpop.f32.mrf.mxu0  ;;  %v577_v36 = vadd.f32 %v576_v31, %v527_v30  ;;  %v633_v44 = vmax.f32 %v617_v38, 0.0 }
  0xc2   : > { %v558_v35 = vpop.f32.mrf.mxu1 }
  0xc3   : > { %1012 = vst [vmem:[%s1235_s15 + $0x20] sm:$0xff] %v992_v32   ;;  %v559_v37 = vadd.f32 %v558_v35, %v509_v34  ;;  %v605_v40 = vmul.f32 %v1219_v3, %v577_v36 }
  0xc5   : > { %v598_v39 = vmul.f32 %v1219_v3, %v559_v37  ;;  %v625_v49 = vadd.f32 %v1225_v7, %v605_v40 }
  0xc7   : > { %v618_v41 = vadd.f32 %v1225_v7, %v598_v39  ;;  %v529_v42 = vpop.f32.mrf.mxu2  ;;  %v641_v54 = vmax.f32 %v625_v49, 0.0 }
  0xc8   : > { %v578_v43 = vpop.f32.mrf.mxu3 }
  0xc9   : > { %v634_v45 = vmax.f32 %v618_v41, 0.0  ;;  %v579_v46 = vadd.f32 %v578_v43, %v529_v42  ;;  %v512_v47 = vpop.f32.mrf.mxu0 }
  0xca   : > { %v561_v48 = vpop.f32.mrf.mxu1 }
  0xcb   : > { %v977_v50 = vpack.c.bf16 %v634_v45, %v633_v44  ;;  %v606_v51 = vmul.f32 %v1219_v3, %v579_v46  ;;  %v562_v53 = vadd.f32 %v561_v48, %v512_v47 }
  0xcd   : > { %1009 = vst [vmem:[%s1235_s15 + $0x8] sm:$0xff] %v977_v50   ;;  %v626_v52 = vadd.f32 %v1225_v7, %v606_v51  ;;  %v599_v59 = vmul.f32 %v1219_v3, %v562_v53 }
  0xcf   : > { %v642_v55 = vmax.f32 %v626_v52, 0.0  ;;  %v532_v56 = vpop.f32.mrf.mxu2  ;;  %v619_v0 = vadd.f32 %v1225_v7, %v599_v59 }
  0xd0   : > { %v581_v57 = vpop.f32.mrf.mxu3 }
  0xd1   : > { %v997_v58 = vpack.c.bf16 %v642_v55, %v641_v54  ;;  %v514_v60 = vpop.f32.mrf.mxu0  ;;  %v582_v62 = vadd.f32 %v581_v57, %v532_v56  ;;  %v635_v8 = vmax.f32 %v619_v0, 0.0 }
  0xd2   : > { %v563_v61 = vpop.f32.mrf.mxu1 }
  0xd3   : > { %1013 = vst [vmem:[%s1235_s15 + $0x28] sm:$0xff] %v997_v58   ;;  %v564_v63 = vadd.f32 %v563_v61, %v514_v60  ;;  %v607_v2 = vmul.f32 %v1219_v3, %v582_v62 }
  0xd5   : > { %v600_v1 = vmul.f32 %v1219_v3, %v564_v63  ;;  %v627_v13 = vadd.f32 %v1225_v7, %v607_v2 }
  0xd7   : > { %v620_v4 = vadd.f32 %v1225_v7, %v600_v1  ;;  %v534_v5 = vpop.f32.mrf.mxu2  ;;  %v643_v18 = vmax.f32 %v627_v13, 0.0 }
  0xd8   : > { %v583_v6 = vpop.f32.mrf.mxu3 }
  0xd9   : > { %v636_v9 = vmax.f32 %v620_v4, 0.0  ;;  %v584_v10 = vadd.f32 %v583_v6, %v534_v5  ;;  %v517_v11 = vpop.f32.mrf.mxu0 }
  0xda   : > { %v566_v12 = vpop.f32.mrf.mxu1 }
  0xdb   : > { %v982_v14 = vpack.c.bf16 %v636_v9, %v635_v8  ;;  %v608_v15 = vmul.f32 %v1219_v3, %v584_v10  ;;  %v567_v17 = vadd.f32 %v566_v12, %v517_v11 }
  0xdd   : > { %1010 = vst [vmem:[%s1235_s15 + $0x10] sm:$0xff] %v982_v14   ;;  %v628_v16 = vadd.f32 %v1225_v7, %v608_v15  ;;  %v601_v23 = vmul.f32 %v1219_v3, %v567_v17 }
  0xdf   : > { %v644_v19 = vmax.f32 %v628_v16, 0.0  ;;  %v537_v20 = vpop.f32.mrf.mxu2  ;;  %v621_v28 = vadd.f32 %v1225_v7, %v601_v23 }
  0xe0   : > { %v586_v21 = vpop.f32.mrf.mxu3 }
  0xe1   : > { %v1002_v22 = vpack.c.bf16 %v644_v19, %v643_v18  ;;  %v519_v24 = vpop.f32.mrf.mxu0  ;;  %v587_v26 = vadd.f32 %v586_v21, %v537_v20  ;;  %v637_v34 = vmax.f32 %v621_v28, 0.0 }
  0xe2   : > { %v568_v25 = vpop.f32.mrf.mxu1 }
  0xe3   : > { %1014 = vst [vmem:[%s1235_s15 + $0x30] sm:$0xff] %v1002_v22   ;;  %v569_v27 = vadd.f32 %v568_v25, %v519_v24  ;;  %v609_v30 = vmul.f32 %v1219_v3, %v587_v26 }
  0xe5   : > { %v602_v29 = vmul.f32 %v1219_v3, %v569_v27  ;;  %v629_v37 = vadd.f32 %v1225_v7, %v609_v30 }
  0xe7   : > { %v622_v31 = vadd.f32 %v1225_v7, %v602_v29  ;;  %v539_v32 = vpop.f32.mrf.mxu2  ;;  %v645_v41 = vmax.f32 %v629_v37, 0.0 }
  0xe8   : > { %v588_v33 = vpop.f32.mrf.mxu3 }
  0xe9   : > { %v638_v35 = vmax.f32 %v622_v31, 0.0  ;;  %v589_v36 = vadd.f32 %v588_v33, %v539_v32 }
  0xeb   : > { %v987_v38 = vpack.c.bf16 %v638_v35, %v637_v34  ;;  %v610_v39 = vmul.f32 %v1219_v3, %v589_v36 }
  0xed   : > { %1011 = vst [vmem:[%s1235_s15 + $0x18] sm:$0xff] %v987_v38   ;;  %v630_v40 = vadd.f32 %v1225_v7, %v610_v39 }
  0xef   : > { %v646_v42 = vmax.f32 %v630_v40, 0.0 }
  0xf1   : > { %v1007_v43 = vpack.c.bf16 %v646_v42, %v645_v41 }
  0xf3   : > { %1015 = vst [vmem:[%s1235_s15 + $0x38] sm:$0xff] %v1007_v43  }
  0xf4 PF: > { %s14_s17 = sadd.s32 1, %s1080_s17   ;;  %s1286_s15 = smov %s1076_s16 }
  0xf5   : > { %p11_p5 = scmp.ge.s32.totalorder %s14_s17, 6   ;;  %s1287_s16 = smov %s1289_s18 }
  0xf7   :  { %13 = sbr.rel (!%p11_p5) target bundleno = 2 (0x2), region = 75 }

// kernel: vgg_forward.16
= control target key start
LH: loop header
LB: loop body
LE: loop exit
PB: predicated region body
PF: predicated region fallthrough
CT: control target
= control target key end

     0   :  { %s128_s0 = inlined_call_operand.vmem [shape: bf16[16,256], index: 0, kind: input, shape index: {}]   ;;  %s129_s1 = inlined_call_operand.vmem [shape: bf16[16,256], index: 1, kind: input, shape index: {}]   ;;  %s130_s2 = inlined_call_operand.vmem [shape: bf16[16,256], index: 2, kind: input, shape index: {}]   ;;  %s131_s3 = inlined_call_operand.vmem [shape: bf16[16,256], index: 3, kind: input, shape index: {}]   ;;  %s132_s4 = inlined_call_operand.vmem [shape: bf16[16,256], index: 4, kind: output, shape index: {}]  }
   0x1   :  { %v17_v0 = vld [vmem:[%s128_s0] sm:$0xff]  ;;  %v18_v8 = vld [vmem:[%s128_s0 + $0x8] sm:$0xff] }
   0x2   :  { %v19_v1 = vld [vmem:[%s129_s1] sm:$0xff]  ;;  %v21_v3 = vunpack.c.l.bf16 %v17_v0  ;;  %v22_v4 = vunpack.c.h.bf16 %v17_v0  ;;  %v20_v9 = vld [vmem:[%s129_s1 + $0x8] sm:$0xff]  ;;  %v23_v18 = vunpack.c.l.bf16 %v18_v8  ;;  %v24_v19 = vunpack.c.h.bf16 %v18_v8 }
   0x3   :  { %v35_v2 = vld [vmem:[%s130_s2] sm:$0xff]  ;;  %v25_v5 = vunpack.c.l.bf16 %v19_v1  ;;  %v26_v6 = vunpack.c.h.bf16 %v19_v1  ;;  %v36_v14 = vld [vmem:[%s130_s2 + $0x8] sm:$0xff]  ;;  %v27_v22 = vunpack.c.l.bf16 %v20_v9  ;;  %v28_v23 = vunpack.c.h.bf16 %v20_v9 }
   0x4   :  { %v37_v7 = vld [vmem:[%s131_s3] sm:$0xff]  ;;  %v39_v10 = vunpack.c.l.bf16 %v35_v2  ;;  %v40_v11 = vunpack.c.h.bf16 %v35_v2  ;;  %v38_v15 = vld [vmem:[%s131_s3 + $0x8] sm:$0xff]  ;;  %v41_v24 = vunpack.c.l.bf16 %v36_v14  ;;  %v42_v25 = vunpack.c.h.bf16 %v36_v14 }
   0x5   :  { %v43_v12 = vunpack.c.l.bf16 %v37_v7  ;;  %v44_v13 = vunpack.c.h.bf16 %v37_v7  ;;  %v29_v16 = vmax.f32 %v21_v3, %v25_v5  ;;  %v30_v17 = vmax.f32 %v22_v4, %v26_v6 }
   0x6   :  { %v45_v26 = vunpack.c.l.bf16 %v38_v15  ;;  %v46_v27 = vunpack.c.h.bf16 %v38_v15  ;;  %v31_v30 = vmax.f32 %v23_v18, %v27_v22  ;;  %v32_v31 = vmax.f32 %v24_v19, %v28_v23 }
   0x7   :  { %v47_v20 = vmax.f32 %v39_v10, %v43_v12  ;;  %v48_v21 = vmax.f32 %v40_v11, %v44_v13 }
   0x8   :  { %v49_v32 = vmax.f32 %v41_v24, %v45_v26  ;;  %v50_v33 = vmax.f32 %v42_v25, %v46_v27 }
   0x9   :  { %v61_v28 = vmax.f32 %v29_v16, %v47_v20  ;;  %v62_v29 = vmax.f32 %v30_v17, %v48_v21 }
   0xa   :  { %v63_v35 = vmax.f32 %v31_v30, %v49_v32  ;;  %v64_v36 = vmax.f32 %v32_v31, %v50_v33 }
   0xb   :  { %v65_v34 = vpack.c.bf16 %v62_v29, %v61_v28 }
   0xc   :  { %v66_v37 = vpack.c.bf16 %v64_v36, %v63_v35 }
   0xd   :  { %67 = vst [vmem:[%s132_s4] sm:$0xff] %v65_v34 }
   0xe   :  { %68 = vst [vmem:[%s132_s4 + $0x8] sm:$0xff] %v66_v37 }

// kernel: vgg_forward.18
= control target key start
LH: loop header
LB: loop body
LE: loop exit
PB: predicated region body
PF: predicated region fallthrough
CT: control target
= control target key end

     0   :  { %s87_s0 = inlined_call_operand.vmem [shape: bf16[8,256], index: 0, kind: input, shape index: {}]   ;;  %s88_s1 = inlined_call_operand.vmem [shape: bf16[8,256], index: 1, kind: input, shape index: {}]   ;;  %s89_s2 = inlined_call_operand.vmem [shape: bf16[8,256], index: 2, kind: input, shape index: {}]   ;;  %s90_s3 = inlined_call_operand.vmem [shape: bf16[8,256], index: 3, kind: input, shape index: {}]   ;;  %s91_s4 = inlined_call_operand.vmem [shape: bf16[8,256], index: 4, kind: output, shape index: {}]  }
   0x1   :  { %v17_v0 = vld [vmem:[%s87_s0] sm:$0xff] }
   0x2   :  { %v18_v1 = vld [vmem:[%s88_s1] sm:$0xff]  ;;  %v19_v3 = vunpack.c.l.bf16 %v17_v0  ;;  %v20_v4 = vunpack.c.h.bf16 %v17_v0 }
   0x3   :  { %v26_v2 = vld [vmem:[%s89_s2] sm:$0xff]  ;;  %v21_v5 = vunpack.c.l.bf16 %v18_v1  ;;  %v22_v6 = vunpack.c.h.bf16 %v18_v1 }
   0x4   :  { %v27_v7 = vld [vmem:[%s90_s3] sm:$0xff]  ;;  %v28_v8 = vunpack.c.l.bf16 %v26_v2  ;;  %v29_v9 = vunpack.c.h.bf16 %v26_v2 }
   0x5   :  { %v30_v10 = vunpack.c.l.bf16 %v27_v7  ;;  %v31_v11 = vunpack.c.h.bf16 %v27_v7  ;;  %v23_v12 = vmax.f32 %v19_v3, %v21_v5  ;;  %v24_v13 = vmax.f32 %v20_v4, %v22_v6 }
   0x7   :  { %v32_v14 = vmax.f32 %v28_v8, %v30_v10  ;;  %v33_v15 = vmax.f32 %v29_v9, %v31_v11 }
   0x9   :  { %v39_v16 = vmax.f32 %v23_v12, %v32_v14  ;;  %v40_v17 = vmax.f32 %v24_v13, %v33_v15 }
   0xb   :  { %v41_v18 = vpack.c.bf16 %v40_v17, %v39_v16 }
   0xd   :  { %42 = vst [vmem:[%s91_s4] sm:$0xff] %v41_v18 }

// kernel: vgg_forward.17
= control target key start
LH: loop header
LB: loop body
LE: loop exit
PB: predicated region body
PF: predicated region fallthrough
CT: control target
= control target key end

     0   :  { %s1284_s1 = inlined_call_operand.vmem [shape: bf16[384,128], index: 1, kind: input, shape index: {}]   ;;  %s1285_s0 = inlined_call_operand.vmem [shape: bf16[128,384], index: 0, kind: input, shape index: {}]   ;;  %s1286_s2 = inlined_call_operand.vmem [shape: f32[1,128], index: 2, kind: input, shape index: {}]   ;;  %s1287_s3 = inlined_call_operand.vmem [shape: f32[1,128], index: 3, kind: input, shape index: {}]   ;;  %s1288_s4 = inlined_call_operand.vmem [shape: bf16[128,128], index: 4, kind: output, shape index: {}]  }
   0x1   :  { %v831_v0 = vld [vmem:[%s1284_s1 + $0x38] sm:$0xff]  ;;  %v830_v3 = vld [vmem:[%s1284_s1 + $0x30] sm:$0xff]  ;;  %v829_v6 = vld [vmem:[%s1284_s1 + $0x28] sm:$0xff] }
   0x2   :  { %v952_v1 = vld [vmem:[%s1284_s1 + $0x78] sm:$0xff]  ;;  %369 = vmatpush.bf16.msra.mxu0 %v831_v0  ;;  %895 = vmatpush.bf16.msra.mxu3 %v831_v0  ;;  %v967_v4 = vld [vmem:[%s1284_s1 + $0x70] sm:$0xff]  ;;  %v837_v7 = vld [vmem:[%s1284_s1 + $0x68] sm:$0xff] }
   0x3   :  { %v957_v2 = vld [vmem:[%s1284_s1 + $0xb8] sm:$0xff]  ;;  %418 = vmatpush.bf16.msra.mxu1 %v952_v1  ;;  %v972_v5 = vld [vmem:[%s1284_s1 + $0xb0] sm:$0xff]  ;;  %v985_v8 = vld [vmem:[%s1284_s1 + $0xa8] sm:$0xff] }
   0x4   :  { %467 = vmatpush.bf16.msra.mxu2 %v957_v2  ;;  %v828_v9 = vld [vmem:[%s1284_s1 + $0x20] sm:$0xff]  ;;  %v827_v12 = vld [vmem:[%s1284_s1 + $0x18] sm:$0xff]  ;;  %v826_v15 = vld [vmem:[%s1284_s1 + $0x10] sm:$0xff] }
   0x5   :  { %v994_v10 = vld [vmem:[%s1284_s1 + $0x60] sm:$0xff]  ;;  %v835_v13 = vld [vmem:[%s1284_s1 + $0x58] sm:$0xff]  ;;  %v834_v16 = vld [vmem:[%s1284_s1 + $0x50] sm:$0xff] }
   0x6   :  { %370 = vmatpush.bf16.msra.mxu0 %v830_v3  ;;  %896 = vmatpush.bf16.msra.mxu3 %v830_v3  ;;  %v999_v11 = vld [vmem:[%s1284_s1 + $0xa0] sm:$0xff]  ;;  %v1012_v14 = vld [vmem:[%s1284_s1 + $0x98] sm:$0xff]  ;;  %v1024_v17 = vld [vmem:[%s1284_s1 + $0x90] sm:$0xff] }
   0x7   :  { %419 = vmatpush.bf16.msra.mxu1 %v967_v4  ;;  %v825_v18 = vld [vmem:[%s1284_s1 + $0x8] sm:$0xff]  ;;  %v824_v21 = vld [vmem:[%s1284_s1] sm:$0xff]  ;;  %v682_v26 = vld [vmem:[%s1285_s0 + $0x90] sm:$0xf] }
   0x8   :  { %468 = vmatpush.bf16.msra.mxu2 %v972_v5  ;;  %v833_v19 = vld [vmem:[%s1284_s1 + $0x48] sm:$0xff]  ;;  %v832_v22 = vld [vmem:[%s1284_s1 + $0x40] sm:$0xff]  ;;  %v819_v27 = vld [vmem:[%s1285_s0 + $0x98] sm:$0xf0] }
   0x9   :  { %v1036_v20 = vld [vmem:[%s1284_s1 + $0x88] sm:$0xff]  ;;  %v1047_v23 = vld [vmem:[%s1284_s1 + $0x80] sm:$0xff]  ;;  %v612_v29 = vld [vmem:[%s1285_s0 + $0xc] sm:$0xf0]  ;;  %v683_v33 = vor.u32 %v819_v27, %v682_v26 }
   0xa   :  { %371 = vmatpush.bf16.msra.mxu0 %v829_v6  ;;  %897 = vmatpush.bf16.msra.mxu3 %v829_v6  ;;  %v610_v24 = vld [vmem:[%s1285_s0] sm:$0xf]  ;;  %v801_v25 = vld [vmem:[%s1285_s0 + $0x8] sm:$0xf0]  ;;  %v800_v28 = vld [vmem:[%s1285_s0 + $0x4] sm:$0xf] }
   0xb   :  { %420 = vmatpush.bf16.msra.mxu1 %v837_v7  ;;  %v618_v30 = vld [vmem:[%s1285_s0 + $0x8] sm:$0xf]  ;;  %v802_v31 = vld [vmem:[%s1285_s0 + $0x10] sm:$0xf0]  ;;  %v611_v32 = vor.u32 %v801_v25, %v610_v24  ;;  %v615_v34 = vor.u32 %v800_v28, %v612_v29  ;;  %v622_v36 = vld [vmem:[%s1285_s0 + $0x18] sm:$0xf] }
   0xc   :  { %469 = vmatpush.bf16.msra.mxu2 %v985_v8  ;;  %v619_v35 = vor.u32 %v802_v31, %v618_v30  ;;  %v804_v37 = vld [vmem:[%s1285_s0 + $0x20] sm:$0xf0]  ;;  %v694_v38 = vld [vmem:[%s1285_s0 + $0xa8] sm:$0xf]  ;;  %v822_v39 = vld [vmem:[%s1285_s0 + $0xb0] sm:$0xf0] }
   0xd   :  { %v803_v40 = vld [vmem:[%s1285_s0 + $0x1c] sm:$0xf]  ;;  %v624_v41 = vld [vmem:[%s1285_s0 + $0x24] sm:$0xf0]  ;;  %v630_v42 = vld [vmem:[%s1285_s0 + $0x20] sm:$0xf]  ;;  %v623_v44 = vor.u32 %v804_v37, %v622_v36  ;;  %v695_v45 = vor.u32 %v822_v39, %v694_v38 }
   0xe   :  { %372 = vmatpush.bf16.msra.mxu0 %v828_v9  ;;  %898 = vmatpush.bf16.msra.mxu3 %v828_v9  ;;  %v805_v43 = vld [vmem:[%s1285_s0 + $0x28] sm:$0xf0]  ;;  %v627_v46 = vor.u32 %v803_v40, %v624_v41  ;;  %v634_v48 = vld [vmem:[%s1285_s0 + $0x30] sm:$0xf]  ;;  %v807_v49 = vld [vmem:[%s1285_s0 + $0x38] sm:$0xf0] }
   0xf   :  { %421 = vmatpush.bf16.msra.mxu1 %v994_v10  ;;  %v631_v47 = vor.u32 %v805_v43, %v630_v42  ;;  %v806_v50 = vld [vmem:[%s1285_s0 + $0x34] sm:$0xf]  ;;  %v684_v52 = vld [vmem:[%s1285_s0 + $0x9c] sm:$0xf0]  ;;  %v642_v54 = vld [vmem:[%s1285_s0 + $0x38] sm:$0xf]  ;;  %v635_v56 = vor.u32 %v807_v49, %v634_v48 }
  0x10   :  { %470 = vmatpush.bf16.msra.mxu2 %v999_v11  ;;  %v818_v51 = vld [vmem:[%s1285_s0 + $0x94] sm:$0xf]  ;;  %v636_v53 = vld [vmem:[%s1285_s0 + $0x3c] sm:$0xf0]  ;;  %v808_v55 = vld [vmem:[%s1285_s0 + $0x40] sm:$0xf0] }
  0x11   :  { %v687_v57 = vor.u32 %v818_v51, %v684_v52  ;;  %v639_v58 = vor.u32 %v806_v50, %v636_v53  ;;  %v643_v59 = vor.u32 %v808_v55, %v642_v54  ;;  %v646_v60 = vld [vmem:[%s1285_s0 + $0x48] sm:$0xf]  ;;  %v810_v61 = vld [vmem:[%s1285_s0 + $0x50] sm:$0xf0]  ;;  %v809_v62 = vld [vmem:[%s1285_s0 + $0x4c] sm:$0xf] }
  0x12   :  { %373 = vmatpush.bf16.msra.mxu0 %v827_v12  ;;  %899 = vmatpush.bf16.msra.mxu3 %v827_v12  ;;  %v821_v63 = vld [vmem:[%s1285_s0 + $0xac] sm:$0xf]  ;;  %v696_v0 = vld [vmem:[%s1285_s0 + $0xb4] sm:$0xf0]  ;;  %v811_v3 = vld [vmem:[%s1285_s0 + $0x58] sm:$0xf0] }
  0x13   :  { %422 = vmatpush.bf16.msra.mxu1 %v835_v13  ;;  %v813_v9 = vld [vmem:[%s1285_s0 + $0x68] sm:$0xf0]  ;;  %v820_v12 = vld [vmem:[%s1285_s0 + $0xa0] sm:$0xf0]  ;;  %v823_v24 = vld [vmem:[%s1285_s0 + $0xb8] sm:$0xf0] }
  0x14   :  { %471 = vmatpush.bf16.msra.mxu2 %v1012_v14  ;;  %v672_v25 = vld [vmem:[%s1285_s0 + $0x84] sm:$0xf0]  ;;  %v678_v26 = vld [vmem:[%s1285_s0 + $0x80] sm:$0xf]  ;;  %v817_v27 = vld [vmem:[%s1285_s0 + $0x88] sm:$0xf0] }
  0x15   :  { %v679_v31 = vor.u32 %v817_v27, %v678_v26  ;;  %v1211_v40 = vld [vmem:[%s1286_s2] ss:$0 sm:$0xff] }
  0x16   :  { %374 = vmatpush.bf16.msra.mxu0 %v826_v15  ;;  %900 = vmatpush.bf16.msra.mxu3 %v826_v15  ;;  %v814_v15 = vld [vmem:[%s1285_s0 + $0x70] sm:$0xf0]  ;;  %v1217_v42 = vld [vmem:[%s1287_s3] ss:$0 sm:$0xff] }
  0x17   :  { %423 = vmatpush.bf16.msra.mxu1 %v834_v16 }
  0x18   :  { %472 = vmatpush.bf16.msra.mxu2 %v1024_v17 }
  0x1a   :  { %375 = vmatpush.bf16.msra.mxu0 %v825_v18  ;;  %901 = vmatpush.bf16.msra.mxu3 %v825_v18 }
  0x1b   :  { %424 = vmatpush.bf16.msra.mxu1 %v833_v19 }
  0x1c   :  { %473 = vmatpush.bf16.msra.mxu2 %v1036_v20 }
  0x1e   :  { %376 = vmatpush.bf16.msra.mxu0 %v824_v21  ;;  %902 = vmatpush.bf16.msra.mxu3 %v824_v21  ;;  %v816_v21 = vld [vmem:[%s1285_s0 + $0x80] sm:$0xf0] }
  0x1f   :  { %425 = vmatpush.bf16.msra.mxu1 %v832_v22 }
  0x20   :  { %474 = vmatpush.bf16.msra.mxu2 %v1047_v23 }
  0x21   :  { %377 = vmatmul.bf16.vlgmr.msra.gmra.mxu0 %v611_v32  ;;  %407 = vmatmul.bf16.vlgmr.msra.gmra.mxu3 %v683_v33 }
  0x22   :  { %903 = vmatpush.bf16.msrb.mxu3 %v952_v1  ;;  %426 = vmatmul.bf16.vlgmr.msra.gmra.mxu1 %v615_v34  ;;  %v648_v1 = vld [vmem:[%s1285_s0 + $0x54] sm:$0xf0] }
  0x23   :  { %475 = vmatmul.bf16.vlgmr.msra.gmra.mxu2 %v619_v35  ;;  %v651_v6 = vor.u32 %v809_v62, %v648_v1 }
  0x26   :  { %904 = vmatpush.bf16.msrb.mxu3 %v967_v4  ;;  %v647_v4 = vor.u32 %v810_v61, %v646_v60 }
  0x2a   :  { %905 = vmatpush.bf16.msrb.mxu3 %v837_v7 }
  0x2e   :  { %906 = vmatpush.bf16.msrb.mxu3 %v994_v10  ;;  %v812_v10 = vld [vmem:[%s1285_s0 + $0x64] sm:$0xf] }
  0x31   :  { %382 = vmatmul.bf16.gmra.mxu0 %v623_v44  ;;  %412 = vmatmul.bf16.gmra.mxu3 %v695_v45 }
  0x32   :  { %907 = vmatpush.bf16.msrb.mxu3 %v835_v13  ;;  %431 = vmatmul.bf16.gmra.mxu1 %v627_v46  ;;  %v660_v13 = vld [vmem:[%s1285_s0 + $0x6c] sm:$0xf0] }
  0x33   :  { %480 = vmatmul.bf16.gmra.mxu2 %v631_v47  ;;  %v663_v18 = vor.u32 %v812_v10, %v660_v13 }
  0x36   :  { %908 = vmatpush.bf16.msrb.mxu3 %v834_v16 }
  0x3a   :  { %909 = vmatpush.bf16.msrb.mxu3 %v833_v19 }
  0x3e   :  { %910 = vmatpush.bf16.msrb.mxu3 %v832_v22  ;;  %v815_v22 = vld [vmem:[%s1285_s0 + $0x7c] sm:$0xf] }
  0x3f   :  { %v675_v30 = vor.u32 %v815_v22, %v672_v25 }
  0x41   :  { %387 = vmatmul.bf16.gmra.mxu0 %v635_v56  ;;  %456 = vmatmul.bf16.vlgmr.msrb.gmra.mxu3 %v687_v57 }
  0x42   :  { %911 = vmatpush.bf16.msra.mxu3 %v957_v2  ;;  %436 = vmatmul.bf16.gmra.mxu1 %v639_v58  ;;  %v654_v2 = vld [vmem:[%s1285_s0 + $0x50] sm:$0xf] }
  0x43   :  { %485 = vmatmul.bf16.gmra.mxu2 %v643_v59  ;;  %v655_v7 = vor.u32 %v811_v3, %v654_v2 }
  0x46   :  { %912 = vmatpush.bf16.msra.mxu3 %v972_v5  ;;  %v699_v5 = vor.u32 %v821_v63, %v696_v0 }
  0x4a   :  { %913 = vmatpush.bf16.msra.mxu3 %v985_v8  ;;  %v658_v8 = vld [vmem:[%s1285_s0 + $0x60] sm:$0xf] }
  0x4b   :  { %v659_v16 = vor.u32 %v813_v9, %v658_v8 }
  0x4e   :  { %914 = vmatpush.bf16.msra.mxu3 %v999_v11  ;;  %v690_v11 = vld [vmem:[%s1285_s0 + $0x98] sm:$0xf] }
  0x51   :  { %392 = vmatmul.bf16.gmra.mxu0 %v647_v4  ;;  %461 = vmatmul.bf16.gmra.mxu3 %v699_v5 }
  0x52   :  { %915 = vmatpush.bf16.msra.mxu3 %v1012_v14  ;;  %441 = vmatmul.bf16.gmra.mxu1 %v651_v6  ;;  %v666_v14 = vld [vmem:[%s1285_s0 + $0x68] sm:$0xf] }
  0x53   :  { %490 = vmatmul.bf16.gmra.mxu2 %v655_v7  ;;  %v667_v19 = vor.u32 %v814_v15, %v666_v14 }
  0x56   :  { %916 = vmatpush.bf16.msra.mxu3 %v1024_v17  ;;  %v691_v17 = vor.u32 %v820_v12, %v690_v11 }
  0x5a   :  { %917 = vmatpush.bf16.msra.mxu3 %v1036_v20  ;;  %v670_v20 = vld [vmem:[%s1285_s0 + $0x78] sm:$0xf] }
  0x5b   :  { %v671_v28 = vor.u32 %v816_v21, %v670_v20 }
  0x5e   :  { %918 = vmatpush.bf16.msra.mxu3 %v1047_v23  ;;  %v702_v23 = vld [vmem:[%s1285_s0 + $0xb0] sm:$0xf] }
  0x5f   :  { %v703_v29 = vor.u32 %v823_v24, %v702_v23 }
  0x61   :  { %397 = vmatmul.bf16.gmra.mxu0 %v659_v16  ;;  %505 = vmatmul.bf16.vlgmr.msra.gmra.mxu3 %v691_v17 }
  0x62   :  { %446 = vmatmul.bf16.gmra.mxu1 %v663_v18 }
  0x63   :  { %495 = vmatmul.bf16.gmra.mxu2 %v667_v19 }
  0x71   :  { %402 = vmatmul.bf16.gmra.mxu0 %v671_v28  ;;  %510 = vmatmul.bf16.gmra.mxu3 %v703_v29 }
  0x72   :  { %451 = vmatmul.bf16.gmra.mxu1 %v675_v30 }
  0x73   :  { %500 = vmatmul.bf16.gmra.mxu2 %v679_v31 }
  0x9e   :  { %v378_v32 = vpop.f32.mrf.mxu0 }
  0x9f   :  { %v427_v33 = vpop.f32.mrf.mxu1 }
  0xa0   :  { %v428_v34 = vadd.f32 %v427_v33, %v378_v32 }
  0xa4   :  { %v1206_v35 = vpop.f32.mrf.mxu3 }
  0xa6   :  { %v476_v36 = vpop.f32.mrf.mxu2  ;;  %v380_v37 = vpop.f32.mrf.mxu0 }
  0xa7   :  { %v429_v38 = vpop.f32.mrf.mxu1  ;;  %v477_v39 = vadd.f32 %v476_v36, %v428_v34 }
  0xa8   :  { %v430_v43 = vadd.f32 %v429_v38, %v380_v37 }
  0xa9   :  { %v520_v41 = vmul.f32 %v1211_v40, %v477_v39 }
  0xab   :  { %v540_v49 = vadd.f32 %v1217_v42, %v520_v41 }
  0xac   :  { %v1219_v44 = vpop.f32.mrf.mxu3 }
  0xad   :  { %v556_v52 = vmax.f32 %v540_v49, 0.0 }
  0xae   :  { %v478_v45 = vpop.f32.mrf.mxu2  ;;  %v383_v47 = vpop.f32.mrf.mxu0 }
  0xaf   :  { %v479_v46 = vadd.f32 %v478_v45, %v430_v43  ;;  %v432_v48 = vpop.f32.mrf.mxu1 }
  0xb0   :  { %v433_v54 = vadd.f32 %v432_v48, %v383_v47 }
  0xb1   :  { %v521_v50 = vmul.f32 %v1211_v40, %v479_v46 }
  0xb3   :  { %v541_v51 = vadd.f32 %v1217_v42, %v521_v50 }
  0xb4   :  { %v1224_v55 = vpop.f32.mrf.mxu3 }
  0xb5   :  { %v557_v53 = vmax.f32 %v541_v51, 0.0 }
  0xb6   :  { %v481_v56 = vpop.f32.mrf.mxu2  ;;  %v385_v58 = vpop.f32.mrf.mxu0 }
  0xb7   :  { %v851_v57 = vpack.c.bf16 %v557_v53, %v556_v52  ;;  %v434_v59 = vpop.f32.mrf.mxu1  ;;  %v482_v60 = vadd.f32 %v481_v56, %v433_v54 }
  0xb8   :  { %v435_v62 = vadd.f32 %v434_v59, %v385_v58 }
  0xb9   :  { %852 = vst [vmem:[%s1288_s4] sm:$0xff] %v851_v57   ;;  %v522_v61 = vmul.f32 %v1211_v40, %v482_v60 }
  0xbb   :  { %v542_v4 = vadd.f32 %v1217_v42, %v522_v61 }
  0xbc   :  { %v1230_v63 = vpop.f32.mrf.mxu3 }
  0xbd   :  { %v558_v7 = vmax.f32 %v542_v4, 0.0 }
  0xbe   :  { %v483_v0 = vpop.f32.mrf.mxu2  ;;  %v388_v2 = vpop.f32.mrf.mxu0 }
  0xbf   :  { %v484_v1 = vadd.f32 %v483_v0, %v435_v62  ;;  %v437_v3 = vpop.f32.mrf.mxu1 }
  0xc0   :  { %v438_v9 = vadd.f32 %v437_v3, %v388_v2 }
  0xc1   :  { %v523_v5 = vmul.f32 %v1211_v40, %v484_v1 }
  0xc3   :  { %v543_v6 = vadd.f32 %v1217_v42, %v523_v5 }
  0xc4   :  { %v457_v10 = vpop.f32.mrf.mxu3 }
  0xc5   :  { %v559_v8 = vmax.f32 %v543_v6, 0.0  ;;  %v458_v53 = vadd.f32 %v457_v10, %v1206_v35 }
  0xc6   :  { %v486_v11 = vpop.f32.mrf.mxu2  ;;  %v390_v13 = vpop.f32.mrf.mxu0 }
  0xc7   :  { %v856_v12 = vpack.c.bf16 %v559_v8, %v558_v7  ;;  %v439_v14 = vpop.f32.mrf.mxu1  ;;  %v487_v15 = vadd.f32 %v486_v11, %v438_v9 }
  0xc8   :  { %v440_v17 = vadd.f32 %v439_v14, %v390_v13 }
  0xc9   :  { %888 = vst [vmem:[%s1288_s4 + $0x8] sm:$0xff] %v856_v12   ;;  %v524_v16 = vmul.f32 %v1211_v40, %v487_v15 }
  0xcb   :  { %v544_v23 = vadd.f32 %v1217_v42, %v524_v16 }
  0xcc   :  { %v459_v18 = vpop.f32.mrf.mxu3 }
  0xcd   :  { %v560_v26 = vmax.f32 %v544_v23, 0.0  ;;  %v460_v61 = vadd.f32 %v459_v18, %v1219_v44 }
  0xce   :  { %v488_v19 = vpop.f32.mrf.mxu2  ;;  %v393_v21 = vpop.f32.mrf.mxu0 }
  0xcf   :  { %v489_v20 = vadd.f32 %v488_v19, %v440_v17  ;;  %v442_v22 = vpop.f32.mrf.mxu1 }
  0xd0   :  { %v443_v28 = vadd.f32 %v442_v22, %v393_v21 }
  0xd1   :  { %v525_v24 = vmul.f32 %v1211_v40, %v489_v20 }
  0xd3   :  { %v545_v25 = vadd.f32 %v1217_v42, %v525_v24 }
  0xd4   :  { %v462_v29 = vpop.f32.mrf.mxu3 }
  0xd5   :  { %v561_v27 = vmax.f32 %v545_v25, 0.0  ;;  %v463_v18 = vadd.f32 %v462_v29, %v1224_v55 }
  0xd6   :  { %v491_v30 = vpop.f32.mrf.mxu2  ;;  %v395_v32 = vpop.f32.mrf.mxu0 }
  0xd7   :  { %v861_v31 = vpack.c.bf16 %v561_v27, %v560_v26  ;;  %v444_v33 = vpop.f32.mrf.mxu1  ;;  %v492_v34 = vadd.f32 %v491_v30, %v443_v28 }
  0xd8   :  { %v445_v37 = vadd.f32 %v444_v33, %v395_v32 }
  0xd9   :  { %889 = vst [vmem:[%s1288_s4 + $0x10] sm:$0xff] %v861_v31   ;;  %v526_v36 = vmul.f32 %v1211_v40, %v492_v34 }
  0xdb   :  { %v546_v46 = vadd.f32 %v1217_v42, %v526_v36 }
  0xdc   :  { %v464_v38 = vpop.f32.mrf.mxu3 }
  0xdd   :  { %v562_v49 = vmax.f32 %v546_v46, 0.0  ;;  %v465_v26 = vadd.f32 %v464_v38, %v1230_v63 }
  0xde   :  { %v493_v39 = vpop.f32.mrf.mxu2  ;;  %v398_v43 = vpop.f32.mrf.mxu0 }
  0xdf   :  { %v494_v41 = vadd.f32 %v493_v39, %v445_v37  ;;  %v447_v45 = vpop.f32.mrf.mxu1 }
  0xe0   :  { %v448_v51 = vadd.f32 %v447_v45, %v398_v43 }
  0xe1   :  { %v527_v47 = vmul.f32 %v1211_v40, %v494_v41 }
  0xe3   :  { %v547_v48 = vadd.f32 %v1217_v42, %v527_v47 }
  0xe4   :  { %v506_v52 = vpop.f32.mrf.mxu3 }
  0xe5   :  { %v563_v50 = vmax.f32 %v547_v48, 0.0  ;;  %v507_v58 = vadd.f32 %v506_v52, %v458_v53 }
  0xe6   :  { %v496_v54 = vpop.f32.mrf.mxu2  ;;  %v400_v57 = vpop.f32.mrf.mxu0 }
  0xe7   :  { %v866_v56 = vpack.c.bf16 %v563_v50, %v562_v49  ;;  %v449_v59 = vpop.f32.mrf.mxu1  ;;  %v497_v60 = vadd.f32 %v496_v54, %v448_v51  ;;  %v532_v62 = vmul.f32 %v1211_v40, %v507_v58 }
  0xe8   :  { %v450_v1 = vadd.f32 %v449_v59, %v400_v57 }
  0xe9   :  { %890 = vst [vmem:[%s1288_s4 + $0x18] sm:$0xff] %v866_v56   ;;  %v528_v0 = vmul.f32 %v1211_v40, %v497_v60  ;;  %v552_v5 = vadd.f32 %v1217_v42, %v532_v62 }
  0xeb   :  { %v548_v9 = vadd.f32 %v1217_v42, %v528_v0  ;;  %v568_v12 = vmax.f32 %v552_v5, 0.0 }
  0xec   :  { %v508_v2 = vpop.f32.mrf.mxu3 }
  0xed   :  { %v509_v35 = vadd.f32 %v508_v2, %v460_v61  ;;  %v564_v14 = vmax.f32 %v548_v9, 0.0 }
  0xee   :  { %v498_v3 = vpop.f32.mrf.mxu2  ;;  %v403_v7 = vpop.f32.mrf.mxu0 }
  0xef   :  { %v499_v4 = vadd.f32 %v498_v3, %v450_v1  ;;  %v533_v6 = vmul.f32 %v1211_v40, %v509_v35  ;;  %v452_v8 = vpop.f32.mrf.mxu1 }
  0xf0   :  { %v453_v16 = vadd.f32 %v452_v8, %v403_v7 }
  0xf1   :  { %v529_v10 = vmul.f32 %v1211_v40, %v499_v4  ;;  %v553_v44 = vadd.f32 %v1217_v42, %v533_v6 }
  0xf3   :  { %v549_v11 = vadd.f32 %v1217_v42, %v529_v10  ;;  %v569_v13 = vmax.f32 %v553_v44, 0.0 }
  0xf4   :  { %v511_v17 = vpop.f32.mrf.mxu3 }
  0xf5   :  { %v565_v15 = vmax.f32 %v549_v11, 0.0  ;;  %v881_v19 = vpack.c.bf16 %v569_v13, %v568_v12  ;;  %v512_v22 = vadd.f32 %v511_v17, %v463_v18 }
  0xf6   :  { %v501_v20 = vpop.f32.mrf.mxu2  ;;  %v405_v24 = vpop.f32.mrf.mxu0 }
  0xf7   :  { %v871_v21 = vpack.c.bf16 %v565_v15, %v564_v14  ;;  %893 = vst [vmem:[%s1288_s4 + $0x30] sm:$0xff] %v881_v19   ;;  %v502_v23 = vadd.f32 %v501_v20, %v453_v16  ;;  %v454_v25 = vpop.f32.mrf.mxu1  ;;  %v534_v27 = vmul.f32 %v1211_v40, %v512_v22 }
  0xf8   :  { %v455_v28 = vadd.f32 %v454_v25, %v405_v24 }
  0xf9   :  { %891 = vst [vmem:[%s1288_s4 + $0x20] sm:$0xff] %v871_v21   ;;  %v530_v55 = vmul.f32 %v1211_v40, %v502_v23  ;;  %v554_v33 = vadd.f32 %v1217_v42, %v534_v27 }
  0xfb   :  { %v550_v36 = vadd.f32 %v1217_v42, %v530_v55  ;;  %v570_v38 = vmax.f32 %v554_v33, 0.0 }
  0xfc   :  { %v513_v29 = vpop.f32.mrf.mxu3 }
  0xfd   :  { %v514_v31 = vadd.f32 %v513_v29, %v465_v26  ;;  %v566_v43 = vmax.f32 %v550_v36, 0.0 }
  0xfe   :  { %v503_v30 = vpop.f32.mrf.mxu2 }
  0xff   :  { %v504_v32 = vadd.f32 %v503_v30, %v455_v28  ;;  %v535_v34 = vmul.f32 %v1211_v40, %v514_v31 }
 0x101   :  { %v531_v37 = vmul.f32 %v1211_v40, %v504_v32  ;;  %v555_v39 = vadd.f32 %v1217_v42, %v535_v34 }
 0x103   :  { %v551_v63 = vadd.f32 %v1217_v42, %v531_v37  ;;  %v571_v41 = vmax.f32 %v555_v39, 0.0 }
 0x105   :  { %v567_v45 = vmax.f32 %v551_v63, 0.0  ;;  %v886_v46 = vpack.c.bf16 %v571_v41, %v570_v38 }
 0x107   :  { %v876_v47 = vpack.c.bf16 %v567_v45, %v566_v43  ;;  %894 = vst [vmem:[%s1288_s4 + $0x38] sm:$0xff] %v886_v46  }
 0x109   :  { %892 = vst [vmem:[%s1288_s4 + $0x28] sm:$0xff] %v876_v47  }

// kernel: vgg_forward.20
= control target key start
LH: loop header
LB: loop body
LE: loop exit
PB: predicated region body
PF: predicated region fallthrough
CT: control target
= control target key end

     0   :  { %vm50_vm0 = vcmask 1041408   ;;  %s100_s0 = inlined_call_operand.vmem [shape: bf16[4,256], index: 0, kind: input, shape index: {}]   ;;  %s101_s1 = inlined_call_operand.vmem [shape: bf16[4,256], index: 1, kind: input, shape index: {}]   ;;  %s102_s2 = inlined_call_operand.vmem [shape: bf16[4,256], index: 2, kind: input, shape index: {}]   ;;  %s103_s3 = inlined_call_operand.vmem [shape: bf16[4,256], index: 3, kind: input, shape index: {}]   ;;  %s104_s4 = inlined_call_operand.vmem [shape: bf16[4,256], index: 4, kind: output, shape index: {}]  }
   0x1   :  { %v17_v0 = vld [vmem:[%s100_s0] sm:$0xf] }
   0x2   :  { %v18_v1 = vld [vmem:[%s101_s1] sm:$0xf]  ;;  %v19_v2 = vunpack.c.l.bf16 %v17_v0 }
   0x3   :  { %v20_v3 = vunpack.c.l.bf16 %v18_v1  ;;  %v29_v4 = vld [vmem:[%s102_s2] sm:$0xf] }
   0x4   :  { %v30_v5 = vld [vmem:[%s103_s3] sm:$0xf]  ;;  %v31_v7 = vunpack.c.l.bf16 %v29_v4 }
   0x5   :  { %v21_v6 = vmax.f32 %v19_v2, %v20_v3  ;;  %v32_v8 = vunpack.c.l.bf16 %v30_v5 }
   0x7   :  { %23 = vst [vmem:[#allocation1] ss:$2 sm:$0xff] %v21_v6  ;;  %v33_v9 = vmax.f32 %v31_v7, %v32_v8 }
   0xe   :  { %v24_v10 = vld.sshfl [vmem:[#allocation1] sm:$0xff pattern:$0x75316420]  ;;  %v25_v11 = vld.sshfl [vmem:[#allocation1 + $0x8] sm:$0xff pattern:$0x75316420] }
   0xf   :  { %35 = vst [vmem:[#allocation1] ss:$2 sm:$0xff] %v33_v9 }
  0x16   :  { %v36_v12 = vld.sshfl [vmem:[#allocation1] sm:$0xff pattern:$0x75316420]  ;;  %v37_v13 = vld.sshfl [vmem:[#allocation1 + $0x8] sm:$0xff pattern:$0x75316420] }
  0x17   :  { %v45_v14 = vmax.f32 %v24_v10, %v36_v12  ;;  %v46_v15 = vmax.f32 %v25_v11, %v37_v13 }
  0x19   :  { %v47_v16 = vpack.c.bf16 %v46_v15, %v45_v14 }
  0x1b   :  { %v49_v17 = vrot.slane %v47_v16, 2 }
  0x1d   :  { %v53_v18 = vsel %vm50_vm0, %v47_v16, %v49_v17 }
  0x1e   :  { %55 = vst [vmem:[%s104_s4] sm:$0xf] %v53_v18 }

// kernel: vgg_forward.19
= control target key start
LH: loop header
LB: loop body
LE: loop exit
PB: predicated region body
PF: predicated region fallthrough
CT: control target
= control target key end

     0   :  { %s1016_s1 = inlined_call_operand.vmem [shape: bf16[640,128], index: 1, kind: input, shape index: {}]   ;;  %s1017_s0 = inlined_call_operand.vmem [shape: bf16[32,640], index: 0, kind: input, shape index: {}]   ;;  %s1018_s2 = inlined_call_operand.vmem [shape: f32[1,128], index: 2, kind: input, shape index: {}]   ;;  %s1019_s3 = inlined_call_operand.vmem [shape: f32[1,128], index: 3, kind: input, shape index: {}]   ;;  %s1020_s4 = inlined_call_operand.vmem [shape: bf16[32,128], index: 4, kind: output, shape index: {}]  }
   0x1   :  { %v745_v0 = vld [vmem:[%s1016_s1 + $0x38] sm:$0xff]  ;;  %v744_v4 = vld [vmem:[%s1016_s1 + $0x30] sm:$0xff]  ;;  %v743_v8 = vld [vmem:[%s1016_s1 + $0x28] sm:$0xff] }
   0x2   :  { %v753_v1 = vld [vmem:[%s1016_s1 + $0x78] sm:$0xff]  ;;  %401 = vmatpush.bf16.msra.mxu0 %v745_v0  ;;  %v752_v5 = vld [vmem:[%s1016_s1 + $0x70] sm:$0xff]  ;;  %v751_v9 = vld [vmem:[%s1016_s1 + $0x68] sm:$0xff] }
   0x3   :  { %v761_v2 = vld [vmem:[%s1016_s1 + $0xb8] sm:$0xff]  ;;  %420 = vmatpush.bf16.msra.mxu1 %v753_v1  ;;  %v760_v6 = vld [vmem:[%s1016_s1 + $0xb0] sm:$0xff]  ;;  %v759_v10 = vld [vmem:[%s1016_s1 + $0xa8] sm:$0xff] }
   0x4   :  { %v769_v3 = vld [vmem:[%s1016_s1 + $0xf8] sm:$0xff]  ;;  %439 = vmatpush.bf16.msra.mxu2 %v761_v2  ;;  %v768_v7 = vld [vmem:[%s1016_s1 + $0xf0] sm:$0xff]  ;;  %v767_v11 = vld [vmem:[%s1016_s1 + $0xe8] sm:$0xff] }
   0x5   :  { %458 = vmatpush.bf16.msra.mxu3 %v769_v3  ;;  %v742_v12 = vld [vmem:[%s1016_s1 + $0x20] sm:$0xff]  ;;  %v741_v16 = vld [vmem:[%s1016_s1 + $0x18] sm:$0xff]  ;;  %v740_v20 = vld [vmem:[%s1016_s1 + $0x10] sm:$0xff] }
   0x6   :  { %402 = vmatpush.bf16.msra.mxu0 %v744_v4  ;;  %v750_v13 = vld [vmem:[%s1016_s1 + $0x60] sm:$0xff]  ;;  %v749_v17 = vld [vmem:[%s1016_s1 + $0x58] sm:$0xff]  ;;  %v748_v21 = vld [vmem:[%s1016_s1 + $0x50] sm:$0xff] }
   0x7   :  { %421 = vmatpush.bf16.msra.mxu1 %v752_v5  ;;  %v758_v14 = vld [vmem:[%s1016_s1 + $0xa0] sm:$0xff]  ;;  %v757_v18 = vld [vmem:[%s1016_s1 + $0x98] sm:$0xff]  ;;  %v756_v22 = vld [vmem:[%s1016_s1 + $0x90] sm:$0xff] }
   0x8   :  { %440 = vmatpush.bf16.msra.mxu2 %v760_v6  ;;  %v766_v15 = vld [vmem:[%s1016_s1 + $0xe0] sm:$0xff]  ;;  %v765_v19 = vld [vmem:[%s1016_s1 + $0xd8] sm:$0xff]  ;;  %v764_v23 = vld [vmem:[%s1016_s1 + $0xd0] sm:$0xff] }
   0x9   :  { %459 = vmatpush.bf16.msra.mxu3 %v768_v7  ;;  %v739_v24 = vld [vmem:[%s1016_s1 + $0x8] sm:$0xff]  ;;  %v738_v28 = vld [vmem:[%s1016_s1] sm:$0xff]  ;;  %v730_v33 = vld [vmem:[%s1017_s0 + $0x10] sm:$0xf0] }
   0xa   :  { %403 = vmatpush.bf16.msra.mxu0 %v743_v8  ;;  %v747_v25 = vld [vmem:[%s1016_s1 + $0x48] sm:$0xff]  ;;  %v746_v29 = vld [vmem:[%s1016_s1 + $0x40] sm:$0xff]  ;;  %v532_v35 = vld [vmem:[%s1017_s0 + $0x14] sm:$0xf0] }
   0xb   :  { %422 = vmatpush.bf16.msra.mxu1 %v751_v9  ;;  %v755_v26 = vld [vmem:[%s1016_s1 + $0x88] sm:$0xff]  ;;  %v754_v30 = vld [vmem:[%s1016_s1 + $0x80] sm:$0xff]  ;;  %v731_v37 = vld [vmem:[%s1017_s0 + $0x18] sm:$0xf0] }
   0xc   :  { %441 = vmatpush.bf16.msra.mxu2 %v759_v10  ;;  %v763_v27 = vld [vmem:[%s1016_s1 + $0xc8] sm:$0xff]  ;;  %v762_v31 = vld [vmem:[%s1016_s1 + $0xc0] sm:$0xff]  ;;  %v777_v40 = vld [vmem:[%s1016_s1 + $0x138] sm:$0xff] }
   0xd   :  { %460 = vmatpush.bf16.msra.mxu3 %v767_v11  ;;  %v530_v32 = vld [vmem:[%s1017_s0] sm:$0xf]  ;;  %v728_v34 = vld [vmem:[%s1017_s0 + $0x4] sm:$0xf]  ;;  %v538_v36 = vld [vmem:[%s1017_s0 + $0x8] sm:$0xf] }
   0xe   :  { %404 = vmatpush.bf16.msra.mxu0 %v742_v12  ;;  %v729_v38 = vld [vmem:[%s1017_s0 + $0xc] sm:$0xf]  ;;  %v540_v39 = vld [vmem:[%s1017_s0 + $0x1c] sm:$0xf0]  ;;  %v531_v41 = vor.u32 %v730_v33, %v530_v32  ;;  %v535_v42 = vor.u32 %v728_v34, %v532_v35  ;;  %v539_v43 = vor.u32 %v731_v37, %v538_v36  ;;  %v776_v45 = vld [vmem:[%s1016_s1 + $0x130] sm:$0xff] }
   0xf   :  { %423 = vmatpush.bf16.msra.mxu1 %v750_v13  ;;  %v543_v44 = vor.u32 %v729_v38, %v540_v39  ;;  %v775_v46 = vld [vmem:[%s1016_s1 + $0x128] sm:$0xff]  ;;  %v774_v47 = vld [vmem:[%s1016_s1 + $0x120] sm:$0xff]  ;;  %v735_v49 = vld [vmem:[%s1017_s0 + $0x38] sm:$0xf0] }
  0x10   :  { %442 = vmatpush.bf16.msra.mxu2 %v758_v14  ;;  %v550_v48 = vld [vmem:[%s1017_s0 + $0x28] sm:$0xf]  ;;  %v733_v50 = vld [vmem:[%s1017_s0 + $0x2c] sm:$0xf]  ;;  %v552_v51 = vld [vmem:[%s1017_s0 + $0x3c] sm:$0xf0] }
  0x11   :  { %461 = vmatpush.bf16.msra.mxu3 %v766_v15  ;;  %v558_v52 = vld [vmem:[%s1017_s0 + $0x30] sm:$0xf]  ;;  %v736_v53 = vld [vmem:[%s1017_s0 + $0x40] sm:$0xf0]  ;;  %v734_v54 = vld [vmem:[%s1017_s0 + $0x34] sm:$0xf]  ;;  %v551_v57 = vor.u32 %v735_v49, %v550_v48  ;;  %v555_v58 = vor.u32 %v733_v50, %v552_v51 }
  0x12   :  { %405 = vmatpush.bf16.msra.mxu0 %v741_v16  ;;  %v560_v55 = vld [vmem:[%s1017_s0 + $0x44] sm:$0xf0]  ;;  %v773_v56 = vld [vmem:[%s1016_s1 + $0x118] sm:$0xff]  ;;  %v559_v59 = vor.u32 %v736_v53, %v558_v52  ;;  %v772_v61 = vld [vmem:[%s1016_s1 + $0x110] sm:$0xff] }
  0x13   :  { %424 = vmatpush.bf16.msra.mxu1 %v749_v17  ;;  %v563_v60 = vor.u32 %v734_v54, %v560_v55  ;;  %v771_v62 = vld [vmem:[%s1016_s1 + $0x108] sm:$0xff]  ;;  %v770_v63 = vld [vmem:[%s1016_s1 + $0x100] sm:$0xff]  ;;  %v546_v0 = vld [vmem:[%s1017_s0 + $0x10] sm:$0xf] }
  0x14   :  { %443 = vmatpush.bf16.msra.mxu2 %v757_v18  ;;  %v732_v1 = vld [vmem:[%s1017_s0 + $0x20] sm:$0xf0]  ;;  %v566_v2 = vld [vmem:[%s1017_s0 + $0x38] sm:$0xf]  ;;  %v737_v3 = vld [vmem:[%s1017_s0 + $0x48] sm:$0xf0] }
  0x15   :  { %462 = vmatpush.bf16.msra.mxu3 %v765_v19  ;;  %v547_v4 = vor.u32 %v732_v1, %v546_v0  ;;  %v567_v5 = vor.u32 %v737_v3, %v566_v2  ;;  %v797_v34 = vld [vmem:[%s1018_s2] ss:$0 sm:$0xff] }
  0x16   :  { %406 = vmatpush.bf16.msra.mxu0 %v740_v20 }
  0x17   :  { %425 = vmatpush.bf16.msra.mxu1 %v748_v21 }
  0x18   :  { %444 = vmatpush.bf16.msra.mxu2 %v756_v22 }
  0x19   :  { %463 = vmatpush.bf16.msra.mxu3 %v764_v23 }
  0x1a   :  { %407 = vmatpush.bf16.msra.mxu0 %v739_v24 }
  0x1b   :  { %426 = vmatpush.bf16.msra.mxu1 %v747_v25 }
  0x1c   :  { %445 = vmatpush.bf16.msra.mxu2 %v755_v26 }
  0x1d   :  { %464 = vmatpush.bf16.msra.mxu3 %v763_v27 }
  0x1e   :  { %408 = vmatpush.bf16.msra.mxu0 %v738_v28 }
  0x1f   :  { %427 = vmatpush.bf16.msra.mxu1 %v746_v29 }
  0x20   :  { %446 = vmatpush.bf16.msra.mxu2 %v754_v30 }
  0x21   :  { %465 = vmatpush.bf16.msra.mxu3 %v762_v31  ;;  %409 = vmatmul.bf16.vlgmr.msra.gmra.mxu0 %v531_v41 }
  0x22   :  { %477 = vmatpush.bf16.msrb.mxu0 %v777_v40  ;;  %428 = vmatmul.bf16.vlgmr.msra.gmra.mxu1 %v535_v42 }
  0x23   :  { %789 = vmatpush.bf16.msrb.mxu1 %v777_v40  ;;  %447 = vmatmul.bf16.vlgmr.msra.gmra.mxu2 %v539_v43  ;;  %v798_v40 = vld [vmem:[%s1019_s3] ss:$0 sm:$0xff] }
  0x24   :  { %466 = vmatmul.bf16.vlgmr.msra.gmra.mxu3 %v543_v44 }
  0x26   :  { %478 = vmatpush.bf16.msrb.mxu0 %v776_v45 }
  0x27   :  { %790 = vmatpush.bf16.msrb.mxu1 %v776_v45 }
  0x2a   :  { %479 = vmatpush.bf16.msrb.mxu0 %v775_v46 }
  0x2b   :  { %791 = vmatpush.bf16.msrb.mxu1 %v775_v46 }
  0x2e   :  { %480 = vmatpush.bf16.msrb.mxu0 %v774_v47 }
  0x2f   :  { %792 = vmatpush.bf16.msrb.mxu1 %v774_v47 }
  0x31   :  { %414 = vmatmul.bf16.gmra.mxu0 %v551_v57 }
  0x32   :  { %481 = vmatpush.bf16.msrb.mxu0 %v773_v56  ;;  %433 = vmatmul.bf16.gmra.mxu1 %v555_v58 }
  0x33   :  { %793 = vmatpush.bf16.msrb.mxu1 %v773_v56  ;;  %452 = vmatmul.bf16.gmra.mxu2 %v559_v59 }
  0x34   :  { %471 = vmatmul.bf16.gmra.mxu3 %v563_v60 }
  0x36   :  { %482 = vmatpush.bf16.msrb.mxu0 %v772_v61 }
  0x37   :  { %794 = vmatpush.bf16.msrb.mxu1 %v772_v61 }
  0x3a   :  { %483 = vmatpush.bf16.msrb.mxu0 %v771_v62 }
  0x3b   :  { %795 = vmatpush.bf16.msrb.mxu1 %v771_v62 }
  0x3e   :  { %484 = vmatpush.bf16.msrb.mxu0 %v770_v63 }
  0x3f   :  { %796 = vmatpush.bf16.msrb.mxu1 %v770_v63 }
  0x41   :  { %485 = vmatmul.bf16.vlgmr.msrb.gmra.mxu0 %v547_v4 }
  0x42   :  { %490 = vmatmul.bf16.vlgmr.msrb.gmra.mxu1 %v567_v5 }
  0x9e   :  { %v410_v6 = vpop.f32.mrf.mxu0 }
  0x9f   :  { %v429_v7 = vpop.f32.mrf.mxu1 }
  0xa0   :  { %v430_v19 = vadd.f32 %v429_v7, %v410_v6 }
  0xa6   :  { %v448_v8 = vpop.f32.mrf.mxu2  ;;  %v412_v10 = vpop.f32.mrf.mxu0 }
  0xa7   :  { %v467_v9 = vpop.f32.mrf.mxu3  ;;  %v431_v11 = vpop.f32.mrf.mxu1  ;;  %v449_v22 = vadd.f32 %v448_v8, %v430_v19 }
  0xa8   :  { %v432_v28 = vadd.f32 %v431_v11, %v412_v10 }
  0xa9   :  { %v468_v27 = vadd.f32 %v467_v9, %v449_v22 }
  0xae   :  { %v450_v12 = vpop.f32.mrf.mxu2  ;;  %v415_v13 = vpop.f32.mrf.mxu0 }
  0xaf   :  { %v434_v14 = vpop.f32.mrf.mxu1  ;;  %v469_v15 = vpop.f32.mrf.mxu3  ;;  %v451_v31 = vadd.f32 %v450_v12, %v432_v28 }
  0xb0   :  { %v435_v20 = vadd.f32 %v434_v14, %v415_v13 }
  0xb1   :  { %v470_v37 = vadd.f32 %v469_v15, %v451_v31 }
  0xb6   :  { %v453_v16 = vpop.f32.mrf.mxu2  ;;  %v417_v17 = vpop.f32.mrf.mxu0 }
  0xb7   :  { %v436_v18 = vpop.f32.mrf.mxu1  ;;  %v472_v21 = vpop.f32.mrf.mxu3  ;;  %v454_v23 = vadd.f32 %v453_v16, %v435_v20 }
  0xb8   :  { %v437_v30 = vadd.f32 %v436_v18, %v417_v17 }
  0xb9   :  { %v473_v29 = vadd.f32 %v472_v21, %v454_v23 }
  0xbe   :  { %v455_v24 = vpop.f32.mrf.mxu2  ;;  %v486_v25 = vpop.f32.mrf.mxu0 }
  0xbf   :  { %v491_v26 = vpop.f32.mrf.mxu1  ;;  %v456_v32 = vadd.f32 %v455_v24, %v437_v30  ;;  %v487_v33 = vadd.f32 %v486_v25, %v468_v27  ;;  %v474_v36 = vpop.f32.mrf.mxu3 }
  0xc0   :  { %v492_v35 = vadd.f32 %v491_v26, %v473_v29 }
  0xc1   :  { %v475_v38 = vadd.f32 %v474_v36, %v456_v32  ;;  %v500_v39 = vmul.f32 %v797_v34, %v487_v33 }
  0xc2   :  { %v502_v41 = vmul.f32 %v797_v34, %v492_v35 }
  0xc3   :  { %v508_v46 = vadd.f32 %v798_v40, %v500_v39 }
  0xc4   :  { %v510_v47 = vadd.f32 %v798_v40, %v502_v41 }
  0xc5   :  { %v512_v52 = vmax.f32 %v508_v46, 0.0 }
  0xc6   :  { %v488_v42 = vpop.f32.mrf.mxu0  ;;  %v514_v53 = vmax.f32 %v510_v47, 0.0 }
  0xc7   :  { %v493_v43 = vpop.f32.mrf.mxu1  ;;  %v489_v44 = vadd.f32 %v488_v42, %v470_v37 }
  0xc8   :  { %v494_v45 = vadd.f32 %v493_v43, %v475_v38 }
  0xc9   :  { %v501_v48 = vmul.f32 %v797_v34, %v489_v44 }
  0xca   :  { %v503_v49 = vmul.f32 %v797_v34, %v494_v45 }
  0xcb   :  { %v509_v50 = vadd.f32 %v798_v40, %v501_v48 }
  0xcc   :  { %v511_v51 = vadd.f32 %v798_v40, %v503_v49 }
  0xcd   :  { %v513_v54 = vmax.f32 %v509_v50, 0.0 }
  0xce   :  { %v515_v55 = vmax.f32 %v511_v51, 0.0 }
  0xcf   :  { %v781_v56 = vpack.c.bf16 %v513_v54, %v512_v52 }
  0xd0   :  { %v786_v57 = vpack.c.bf16 %v515_v55, %v514_v53 }
  0xd1   :  { %782 = vst [vmem:[%s1020_s4] sm:$0xff] %v781_v56  }
  0xd2   :  { %788 = vst [vmem:[%s1020_s4 + $0x8] sm:$0xff] %v786_v57  }

// kernel: vgg_forward.22
= control target key start
LH: loop header
LB: loop body
LE: loop exit
PB: predicated region body
PF: predicated region fallthrough
CT: control target
= control target key end

     0   :  { %vm74_vm0 = vcmask 1042434   ;;  %vm70_vm1 = vcmask 1040384   ;;  %vm78_vm2 = vcmask 1041408   ;;  %s126_s0 = inlined_call_operand.vmem [shape: bf16[2,512], index: 0, kind: input, shape index: {}]   ;;  %s127_s1 = inlined_call_operand.vmem [shape: bf16[2,512], index: 1, kind: input, shape index: {}]   ;;  %s128_s2 = inlined_call_operand.vmem [shape: bf16[2,512], index: 2, kind: input, shape index: {}]   ;;  %s129_s3 = inlined_call_operand.vmem [shape: bf16[2,512], index: 3, kind: input, shape index: {}]   ;;  %s130_s4 = inlined_call_operand.vmem [shape: bf16[2,512], index: 4, kind: output, shape index: {}]  }
   0x1   :  { %v17_v0 = vld [vmem:[%s126_s0] sm:$0xf] }
   0x2   :  { %v18_v1 = vld [vmem:[%s127_s1] sm:$0xf]  ;;  %v19_v2 = vunpack.c.l.bf16 %v17_v0 }
   0x3   :  { %v20_v3 = vunpack.c.l.bf16 %v18_v1  ;;  %v34_v5 = vld [vmem:[%s128_s2] sm:$0xf] }
   0x4   :  { %v35_v6 = vld [vmem:[%s129_s3] sm:$0xf]  ;;  %v36_v7 = vunpack.c.l.bf16 %v34_v5 }
   0x5   :  { %v21_v4 = vmax.f32 %v19_v2, %v20_v3  ;;  %v37_v8 = vunpack.c.l.bf16 %v35_v6 }
   0x7   :  { %23 = vst [vmem:[#allocation1] ss:$4 sm:$0xff] %v21_v4  ;;  %v38_v9 = vmax.f32 %v36_v7, %v37_v8 }
   0xe   :  { %v24_v10 = vld.sshfl [vmem:[#allocation1] sm:$0xff pattern:$0x73625140]  ;;  %v25_v11 = vld.sshfl [vmem:[#allocation1 + $0x8] sm:$0xff pattern:$0x73625140] }
   0xf   :  { %v26_v12 = vld.sshfl [vmem:[#allocation1 + $0x10] sm:$0xff pattern:$0x73625140]  ;;  %v27_v13 = vld.sshfl [vmem:[#allocation1 + $0x18] sm:$0xff pattern:$0x73625140] }
  0x10   :  { %40 = vst [vmem:[#allocation1] ss:$4 sm:$0xff] %v38_v9 }
  0x17   :  { %v43_v14 = vld.sshfl [vmem:[#allocation1 + $0x10] sm:$0xff pattern:$0x73625140]  ;;  %v44_v15 = vld.sshfl [vmem:[#allocation1 + $0x18] sm:$0xff pattern:$0x73625140] }
  0x18   :  { %v61_v16 = vmax.f32 %v26_v12, %v43_v14  ;;  %v62_v17 = vmax.f32 %v27_v13, %v44_v15  ;;  %v41_v18 = vld.sshfl [vmem:[#allocation1] sm:$0xff pattern:$0x73625140]  ;;  %v42_v19 = vld.sshfl [vmem:[#allocation1 + $0x8] sm:$0xff pattern:$0x73625140] }
  0x19   :  { %v59_v20 = vmax.f32 %v24_v10, %v41_v18  ;;  %v60_v21 = vmax.f32 %v25_v11, %v42_v19 }
  0x1a   :  { %v64_v22 = vpack.c.bf16 %v62_v17, %v61_v16 }
  0x1b   :  { %v63_v23 = vpack.c.bf16 %v60_v21, %v59_v20 }
  0x1c   :  { %v68_v24 = vrot.slane %v64_v22, 6  ;;  %v69_v25 = vrot.slane %v64_v22, 1 }
  0x1d   :  { %v67_v26 = vrot.slane %v63_v23, 3 }
  0x1e   :  { %v77_v27 = vsel %vm74_vm0, %v68_v24, %v69_v25 }
  0x1f   :  { %v73_v28 = vsel %vm70_vm1, %v63_v23, %v67_v26 }
  0x20   :  { %v79_v29 = vsel %vm78_vm2, %v73_v28, %v77_v27 }
  0x21   :  { %81 = vst [vmem:[%s130_s4] sm:$0xf] %v79_v29 }

// kernel: vgg_forward.23
= control target key start
LH: loop header
LB: loop body
LE: loop exit
PB: predicated region body
PF: predicated region fallthrough
CT: control target
= control target key end

     0   :  { %s2536_s15 = smov 0   ;;  %s2538_s16 = smov 0   ;;  %s3207_s0 = inlined_call_operand.vmem [shape: bf16[16,512], index: 0, kind: input, shape index: {}]   ;;  %s3208_s1 = inlined_call_operand.vmem [shape: bf16[512,4096], index: 1, kind: input, shape index: {}]   ;;  %s3209_s2 = inlined_call_operand.vmem [shape: f32[1,4096], index: 2, kind: input, shape index: {}]   ;;  %s3210_s3 = inlined_call_operand.vmem [shape: f32[1,4096], index: 3, kind: input, shape index: {}]   ;;  %s3211_s4 = inlined_call_operand.vmem [shape: bf16[16,4096], index: 4, kind: output, shape index: {}]  }
   0x1   :  { %s2540_s17 = smov 0   ;;  %s2542_s18 = smov 0  }
   0x2   :  { %s2544_s19 = smov 0  }
   0x3 LB: > { %s23_s20 = sadd.s32 1, %s2505_s18  ;;  %s1751_s21 = sadd.s32 4294967295, %s2509_s19   ;;  %s2509_s19 = sphi %s2544_s19, %s14_s19   ;;  %s2505_s18 = sphi %s2542_s18, %s3216_s18   ;;  %s2501_s17 = sphi %s2540_s17, %s3215_s17   ;;  %s2497_s16 = sphi %s2538_s16, %s3214_s16   ;;  %s2493_s15 = sphi %s2536_s15, %s3213_s15  }
   0x4   : > { %p24_p0 = scmp.ge.s32.totalorder %s23_s20, 8  ;;  %p66_p1 = scmp.ne.s32.totalorder %s2497_s16, %s2493_s15 }
   0x5   : > { %p67_p2 = scmp.eq.s32.totalorder %s2509_s19, 0  ;;  %p150_p4 = scmp.eq.s32.totalorder %s1751_s21, 7 }
   0x6   : > { %s3218_s20 = smov (%p24_p0, %s23_s20), 0  ;;  %s59_s23 = sadd.s32 1, %s2497_s16 }
   0x7   : > { %p68_p3 = por %p67_p2, %p66_p1  ;;  %s56_s22 = ssub.s32 %s2505_s18, %s3218_s20 }
   0x8   : > { %p57_p5 = scmp.eq.s32.totalorder %s56_s22, 0  ;;  %p2571_p6 = por %p150_p4, %p66_p1 }
   0x9   : > { %p1755_p7 = scmp.ge.s32.totalorder %s2509_s19, 8 }
   0xa   : > { %s2576_s25 = scalar_select %p57_p5, %s2497_s16, %s59_s23  }
   0xb   : > { %182 = sbr.rel (%p1755_p7) target bundleno = 148 (0x94), region = 20 }
  0x10   : > { %185 = sbr.rel (!%p68_p3) target bundleno = 148 (0x94), region = 24  ;;  %s187_s26 = sand.u32 (%p68_p3), 1, %s2497_s16  }
  0x11   : > { %s2297_s27 = sshll.u32 (%p68_p3), %s2505_s18, 4  ;;  %s1756_s28 = sshll.u32 (%p68_p3), %s187_s26, 10 }
  0x12   : > { %s2584_s5 = scalar_lea.vmem (%p68_p3), %s3208_s1, %s2297_s27  ;;  %s2589_s6 = scalar_lea.vmem (%p68_p3), [#allocation2], %s1756_s28 }
  0x13   : > { %v205_v0 = vld [vmem:[%s2584_s5] sm:$0xff] (%p68_p3)  ;;  %v207_v1 = vld [vmem:[%s2584_s5 + $0x8] sm:$0xff] (%p68_p3) }
  0x14   : > { %v209_v2 = vld [vmem:[%s2584_s5 + $0x80] sm:$0xff] (%p68_p3)  ;;  %206 = vst [vmem:[%s2589_s6] sm:$0xff] (%p68_p3), %v205_v0  ;;  %v211_v3 = vld [vmem:[%s2584_s5 + $0x88] sm:$0xff] (%p68_p3) }
  0x15   : > { %208 = vst [vmem:[%s2589_s6 + $0x8] sm:$0xff] %v207_v1  ;;  %v213_v4 = vld [vmem:[%s2584_s5 + $0x100] sm:$0xff]  ;;  %v215_v5 = vld [vmem:[%s2584_s5 + $0x108] sm:$0xff] }
  0x16   : > { %210 = vst [vmem:[%s2589_s6 + $0x10] sm:$0xff] %v209_v2  ;;  %v217_v6 = vld [vmem:[%s2584_s5 + $0x180] sm:$0xff]  ;;  %v219_v7 = vld [vmem:[%s2584_s5 + $0x188] sm:$0xff] }
  0x17   : > { %212 = vst [vmem:[%s2589_s6 + $0x18] sm:$0xff] %v211_v3  ;;  %v221_v8 = vld [vmem:[%s2584_s5 + $0x200] sm:$0xff]  ;;  %v223_v9 = vld [vmem:[%s2584_s5 + $0x208] sm:$0xff] }
  0x18   : > { %214 = vst [vmem:[%s2589_s6 + $0x20] sm:$0xff] %v213_v4  ;;  %v225_v10 = vld [vmem:[%s2584_s5 + $0x280] sm:$0xff]  ;;  %v227_v11 = vld [vmem:[%s2584_s5 + $0x288] sm:$0xff] }
  0x19   : > { %216 = vst [vmem:[%s2589_s6 + $0x28] sm:$0xff] %v215_v5  ;;  %v229_v12 = vld [vmem:[%s2584_s5 + $0x300] sm:$0xff]  ;;  %v231_v13 = vld [vmem:[%s2584_s5 + $0x308] sm:$0xff] }
  0x1a   : > { %218 = vst [vmem:[%s2589_s6 + $0x30] sm:$0xff] %v217_v6  ;;  %v233_v14 = vld [vmem:[%s2584_s5 + $0x380] sm:$0xff]  ;;  %v235_v15 = vld [vmem:[%s2584_s5 + $0x388] sm:$0xff] }
  0x1b   : > { %220 = vst [vmem:[%s2589_s6 + $0x38] sm:$0xff] %v219_v7  ;;  %v237_v16 = vld [vmem:[%s2584_s5 + $0x400] sm:$0xff]  ;;  %v239_v17 = vld [vmem:[%s2584_s5 + $0x408] sm:$0xff] }
  0x1c   : > { %222 = vst [vmem:[%s2589_s6 + $0x40] sm:$0xff] %v221_v8  ;;  %v241_v18 = vld [vmem:[%s2584_s5 + $0x480] sm:$0xff]  ;;  %v243_v19 = vld [vmem:[%s2584_s5 + $0x488] sm:$0xff] }
  0x1d   : > { %224 = vst [vmem:[%s2589_s6 + $0x48] sm:$0xff] %v223_v9  ;;  %v245_v20 = vld [vmem:[%s2584_s5 + $0x500] sm:$0xff]  ;;  %v247_v21 = vld [vmem:[%s2584_s5 + $0x508] sm:$0xff] }
  0x1e   : > { %226 = vst [vmem:[%s2589_s6 + $0x50] sm:$0xff] %v225_v10  ;;  %v249_v22 = vld [vmem:[%s2584_s5 + $0x580] sm:$0xff]  ;;  %v251_v23 = vld [vmem:[%s2584_s5 + $0x588] sm:$0xff] }
  0x1f   : > { %228 = vst [vmem:[%s2589_s6 + $0x58] sm:$0xff] %v227_v11  ;;  %v253_v24 = vld [vmem:[%s2584_s5 + $0x600] sm:$0xff]  ;;  %v255_v25 = vld [vmem:[%s2584_s5 + $0x608] sm:$0xff] }
  0x20   : > { %230 = vst [vmem:[%s2589_s6 + $0x60] sm:$0xff] %v229_v12  ;;  %v257_v26 = vld [vmem:[%s2584_s5 + $0x680] sm:$0xff]  ;;  %v259_v27 = vld [vmem:[%s2584_s5 + $0x688] sm:$0xff] }
  0x21   : > { %232 = vst [vmem:[%s2589_s6 + $0x68] sm:$0xff] %v231_v13  ;;  %v261_v28 = vld [vmem:[%s2584_s5 + $0x700] sm:$0xff]  ;;  %v263_v29 = vld [vmem:[%s2584_s5 + $0x708] sm:$0xff] }
  0x22   : > { %234 = vst [vmem:[%s2589_s6 + $0x70] sm:$0xff] %v233_v14  ;;  %v265_v30 = vld [vmem:[%s2584_s5 + $0x780] sm:$0xff]  ;;  %v267_v31 = vld [vmem:[%s2584_s5 + $0x788] sm:$0xff] }
  0x23   : > { %236 = vst [vmem:[%s2589_s6 + $0x78] sm:$0xff] %v235_v15  ;;  %v269_v32 = vld [vmem:[%s2584_s5 + $0x800] sm:$0xff]  ;;  %v271_v33 = vld [vmem:[%s2584_s5 + $0x808] sm:$0xff] }
  0x24   : > { %238 = vst [vmem:[%s2589_s6 + $0x80] sm:$0xff] %v237_v16  ;;  %v273_v34 = vld [vmem:[%s2584_s5 + $0x880] sm:$0xff]  ;;  %v275_v35 = vld [vmem:[%s2584_s5 + $0x888] sm:$0xff] }
  0x25   : > { %240 = vst [vmem:[%s2589_s6 + $0x88] sm:$0xff] %v239_v17  ;;  %v277_v36 = vld [vmem:[%s2584_s5 + $0x900] sm:$0xff]  ;;  %v279_v37 = vld [vmem:[%s2584_s5 + $0x908] sm:$0xff] }
  0x26   : > { %242 = vst [vmem:[%s2589_s6 + $0x90] sm:$0xff] %v241_v18  ;;  %v281_v38 = vld [vmem:[%s2584_s5 + $0x980] sm:$0xff]  ;;  %v283_v39 = vld [vmem:[%s2584_s5 + $0x988] sm:$0xff] }
  0x27   : > { %244 = vst [vmem:[%s2589_s6 + $0x98] sm:$0xff] %v243_v19  ;;  %v285_v40 = vld [vmem:[%s2584_s5 + $0xa00] sm:$0xff]  ;;  %v287_v41 = vld [vmem:[%s2584_s5 + $0xa08] sm:$0xff] }
  0x28   : > { %246 = vst [vmem:[%s2589_s6 + $0xa0] sm:$0xff] %v245_v20  ;;  %v289_v42 = vld [vmem:[%s2584_s5 + $0xa80] sm:$0xff]  ;;  %v291_v43 = vld [vmem:[%s2584_s5 + $0xa88] sm:$0xff] }
  0x29   : > { %248 = vst [vmem:[%s2589_s6 + $0xa8] sm:$0xff] %v247_v21  ;;  %v293_v44 = vld [vmem:[%s2584_s5 + $0xb00] sm:$0xff]  ;;  %v295_v45 = vld [vmem:[%s2584_s5 + $0xb08] sm:$0xff] }
  0x2a   : > { %250 = vst [vmem:[%s2589_s6 + $0xb0] sm:$0xff] %v249_v22  ;;  %v297_v46 = vld [vmem:[%s2584_s5 + $0xb80] sm:$0xff]  ;;  %v299_v47 = vld [vmem:[%s2584_s5 + $0xb88] sm:$0xff] }
  0x2b   : > { %252 = vst [vmem:[%s2589_s6 + $0xb8] sm:$0xff] %v251_v23  ;;  %v301_v48 = vld [vmem:[%s2584_s5 + $0xc00] sm:$0xff]  ;;  %v303_v49 = vld [vmem:[%s2584_s5 + $0xc08] sm:$0xff] }
  0x2c   : > { %254 = vst [vmem:[%s2589_s6 + $0xc0] sm:$0xff] %v253_v24  ;;  %v305_v50 = vld [vmem:[%s2584_s5 + $0xc80] sm:$0xff]  ;;  %v307_v51 = vld [vmem:[%s2584_s5 + $0xc88] sm:$0xff] }
  0x2d   : > { %256 = vst [vmem:[%s2589_s6 + $0xc8] sm:$0xff] %v255_v25  ;;  %v309_v52 = vld [vmem:[%s2584_s5 + $0xd00] sm:$0xff]  ;;  %v311_v53 = vld [vmem:[%s2584_s5 + $0xd08] sm:$0xff] }
  0x2e   : > { %258 = vst [vmem:[%s2589_s6 + $0xd0] sm:$0xff] %v257_v26  ;;  %v313_v54 = vld [vmem:[%s2584_s5 + $0xd80] sm:$0xff]  ;;  %v315_v55 = vld [vmem:[%s2584_s5 + $0xd88] sm:$0xff] }
  0x2f   : > { %260 = vst [vmem:[%s2589_s6 + $0xd8] sm:$0xff] %v259_v27  ;;  %v317_v56 = vld [vmem:[%s2584_s5 + $0xe00] sm:$0xff]  ;;  %v319_v57 = vld [vmem:[%s2584_s5 + $0xe08] sm:$0xff] }
  0x30   : > { %262 = vst [vmem:[%s2589_s6 + $0xe0] sm:$0xff] %v261_v28  ;;  %v321_v58 = vld [vmem:[%s2584_s5 + $0xe80] sm:$0xff]  ;;  %v323_v59 = vld [vmem:[%s2584_s5 + $0xe88] sm:$0xff] }
  0x31   : > { %264 = vst [vmem:[%s2589_s6 + $0xe8] sm:$0xff] %v263_v29  ;;  %v325_v60 = vld [vmem:[%s2584_s5 + $0xf00] sm:$0xff]  ;;  %v327_v61 = vld [vmem:[%s2584_s5 + $0xf08] sm:$0xff] }
  0x32   : > { %266 = vst [vmem:[%s2589_s6 + $0xf0] sm:$0xff] %v265_v30  ;;  %v329_v62 = vld [vmem:[%s2584_s5 + $0xf80] sm:$0xff]  ;;  %v331_v63 = vld [vmem:[%s2584_s5 + $0xf88] sm:$0xff] }
  0x33   : > { %268 = vst [vmem:[%s2589_s6 + $0xf8] sm:$0xff] %v267_v31  ;;  %v333_v0 = vld [vmem:[%s2584_s5 + $0x1000] sm:$0xff]  ;;  %v335_v1 = vld [vmem:[%s2584_s5 + $0x1008] sm:$0xff] }
  0x34   : > { %270 = vst [vmem:[%s2589_s6 + $0x100] sm:$0xff] %v269_v32  ;;  %v337_v2 = vld [vmem:[%s2584_s5 + $0x1080] sm:$0xff]  ;;  %v339_v3 = vld [vmem:[%s2584_s5 + $0x1088] sm:$0xff] }
  0x35   : > { %272 = vst [vmem:[%s2589_s6 + $0x108] sm:$0xff] %v271_v33  ;;  %v341_v4 = vld [vmem:[%s2584_s5 + $0x1100] sm:$0xff]  ;;  %v343_v5 = vld [vmem:[%s2584_s5 + $0x1108] sm:$0xff] }
  0x36   : > { %274 = vst [vmem:[%s2589_s6 + $0x110] sm:$0xff] %v273_v34  ;;  %v345_v6 = vld [vmem:[%s2584_s5 + $0x1180] sm:$0xff]  ;;  %v347_v7 = vld [vmem:[%s2584_s5 + $0x1188] sm:$0xff] }
  0x37   : > { %276 = vst [vmem:[%s2589_s6 + $0x118] sm:$0xff] %v275_v35  ;;  %v349_v8 = vld [vmem:[%s2584_s5 + $0x1200] sm:$0xff]  ;;  %v351_v9 = vld [vmem:[%s2584_s5 + $0x1208] sm:$0xff] }
  0x38   : > { %278 = vst [vmem:[%s2589_s6 + $0x120] sm:$0xff] %v277_v36  ;;  %v353_v10 = vld [vmem:[%s2584_s5 + $0x1280] sm:$0xff]  ;;  %v355_v11 = vld [vmem:[%s2584_s5 + $0x1288] sm:$0xff] }
  0x39   : > { %280 = vst [vmem:[%s2589_s6 + $0x128] sm:$0xff] %v279_v37  ;;  %v357_v12 = vld [vmem:[%s2584_s5 + $0x1300] sm:$0xff]  ;;  %v359_v13 = vld [vmem:[%s2584_s5 + $0x1308] sm:$0xff] }
  0x3a   : > { %282 = vst [vmem:[%s2589_s6 + $0x130] sm:$0xff] %v281_v38  ;;  %v361_v14 = vld [vmem:[%s2584_s5 + $0x1380] sm:$0xff]  ;;  %v363_v15 = vld [vmem:[%s2584_s5 + $0x1388] sm:$0xff] }
  0x3b   : > { %284 = vst [vmem:[%s2589_s6 + $0x138] sm:$0xff] %v283_v39  ;;  %v365_v16 = vld [vmem:[%s2584_s5 + $0x1400] sm:$0xff]  ;;  %v367_v17 = vld [vmem:[%s2584_s5 + $0x1408] sm:$0xff] }
  0x3c   : > { %286 = vst [vmem:[%s2589_s6 + $0x140] sm:$0xff] %v285_v40  ;;  %v369_v18 = vld [vmem:[%s2584_s5 + $0x1480] sm:$0xff]  ;;  %v371_v19 = vld [vmem:[%s2584_s5 + $0x1488] sm:$0xff] }
  0x3d   : > { %288 = vst [vmem:[%s2589_s6 + $0x148] sm:$0xff] %v287_v41  ;;  %v373_v20 = vld [vmem:[%s2584_s5 + $0x1500] sm:$0xff]  ;;  %v375_v21 = vld [vmem:[%s2584_s5 + $0x1508] sm:$0xff] }
  0x3e   : > { %290 = vst [vmem:[%s2589_s6 + $0x150] sm:$0xff] %v289_v42  ;;  %v377_v22 = vld [vmem:[%s2584_s5 + $0x1580] sm:$0xff]  ;;  %v379_v23 = vld [vmem:[%s2584_s5 + $0x1588] sm:$0xff] }
  0x3f   : > { %292 = vst [vmem:[%s2589_s6 + $0x158] sm:$0xff] %v291_v43  ;;  %v381_v24 = vld [vmem:[%s2584_s5 + $0x1600] sm:$0xff]  ;;  %v383_v25 = vld [vmem:[%s2584_s5 + $0x1608] sm:$0xff] }
  0x40   : > { %294 = vst [vmem:[%s2589_s6 + $0x160] sm:$0xff] %v293_v44  ;;  %v385_v26 = vld [vmem:[%s2584_s5 + $0x1680] sm:$0xff]  ;;  %v387_v27 = vld [vmem:[%s2584_s5 + $0x1688] sm:$0xff] }
  0x41   : > { %296 = vst [vmem:[%s2589_s6 + $0x168] sm:$0xff] %v295_v45  ;;  %v389_v28 = vld [vmem:[%s2584_s5 + $0x1700] sm:$0xff]  ;;  %v391_v29 = vld [vmem:[%s2584_s5 + $0x1708] sm:$0xff] }
  0x42   : > { %298 = vst [vmem:[%s2589_s6 + $0x170] sm:$0xff] %v297_v46  ;;  %v393_v30 = vld [vmem:[%s2584_s5 + $0x1780] sm:$0xff]  ;;  %v395_v31 = vld [vmem:[%s2584_s5 + $0x1788] sm:$0xff] }
  0x43   : > { %300 = vst [vmem:[%s2589_s6 + $0x178] sm:$0xff] %v299_v47  ;;  %v397_v32 = vld [vmem:[%s2584_s5 + $0x1800] sm:$0xff]  ;;  %v399_v33 = vld [vmem:[%s2584_s5 + $0x1808] sm:$0xff] }
  0x44   : > { %302 = vst [vmem:[%s2589_s6 + $0x180] sm:$0xff] %v301_v48  ;;  %v401_v34 = vld [vmem:[%s2584_s5 + $0x1880] sm:$0xff]  ;;  %v403_v35 = vld [vmem:[%s2584_s5 + $0x1888] sm:$0xff] }
  0x45   : > { %304 = vst [vmem:[%s2589_s6 + $0x188] sm:$0xff] %v303_v49  ;;  %v405_v36 = vld [vmem:[%s2584_s5 + $0x1900] sm:$0xff]  ;;  %v407_v37 = vld [vmem:[%s2584_s5 + $0x1908] sm:$0xff] }
  0x46   : > { %306 = vst [vmem:[%s2589_s6 + $0x190] sm:$0xff] %v305_v50  ;;  %v409_v38 = vld [vmem:[%s2584_s5 + $0x1980] sm:$0xff]  ;;  %v411_v39 = vld [vmem:[%s2584_s5 + $0x1988] sm:$0xff] }
  0x47   : > { %308 = vst [vmem:[%s2589_s6 + $0x198] sm:$0xff] %v307_v51  ;;  %v413_v40 = vld [vmem:[%s2584_s5 + $0x1a00] sm:$0xff]  ;;  %v415_v41 = vld [vmem:[%s2584_s5 + $0x1a08] sm:$0xff] }
  0x48   : > { %310 = vst [vmem:[%s2589_s6 + $0x1a0] sm:$0xff] %v309_v52  ;;  %v417_v42 = vld [vmem:[%s2584_s5 + $0x1a80] sm:$0xff]  ;;  %v419_v43 = vld [vmem:[%s2584_s5 + $0x1a88] sm:$0xff] }
  0x49   : > { %312 = vst [vmem:[%s2589_s6 + $0x1a8] sm:$0xff] %v311_v53  ;;  %v421_v44 = vld [vmem:[%s2584_s5 + $0x1b00] sm:$0xff]  ;;  %v423_v45 = vld [vmem:[%s2584_s5 + $0x1b08] sm:$0xff] }
  0x4a   : > { %314 = vst [vmem:[%s2589_s6 + $0x1b0] sm:$0xff] %v313_v54  ;;  %v425_v46 = vld [vmem:[%s2584_s5 + $0x1b80] sm:$0xff]  ;;  %v427_v47 = vld [vmem:[%s2584_s5 + $0x1b88] sm:$0xff] }
  0x4b   : > { %316 = vst [vmem:[%s2589_s6 + $0x1b8] sm:$0xff] %v315_v55  ;;  %v429_v48 = vld [vmem:[%s2584_s5 + $0x1c00] sm:$0xff]  ;;  %v431_v49 = vld [vmem:[%s2584_s5 + $0x1c08] sm:$0xff] }
  0x4c   : > { %318 = vst [vmem:[%s2589_s6 + $0x1c0] sm:$0xff] %v317_v56  ;;  %v433_v50 = vld [vmem:[%s2584_s5 + $0x1c80] sm:$0xff]  ;;  %v435_v51 = vld [vmem:[%s2584_s5 + $0x1c88] sm:$0xff] }
  0x4d   : > { %320 = vst [vmem:[%s2589_s6 + $0x1c8] sm:$0xff] %v319_v57  ;;  %v437_v52 = vld [vmem:[%s2584_s5 + $0x1d00] sm:$0xff]  ;;  %v439_v53 = vld [vmem:[%s2584_s5 + $0x1d08] sm:$0xff] }
  0x4e   : > { %322 = vst [vmem:[%s2589_s6 + $0x1d0] sm:$0xff] %v321_v58  ;;  %v441_v54 = vld [vmem:[%s2584_s5 + $0x1d80] sm:$0xff]  ;;  %v443_v55 = vld [vmem:[%s2584_s5 + $0x1d88] sm:$0xff] }
  0x4f   : > { %324 = vst [vmem:[%s2589_s6 + $0x1d8] sm:$0xff] %v323_v59  ;;  %v445_v56 = vld [vmem:[%s2584_s5 + $0x1e00] sm:$0xff]  ;;  %v447_v57 = vld [vmem:[%s2584_s5 + $0x1e08] sm:$0xff] }
  0x50   : > { %326 = vst [vmem:[%s2589_s6 + $0x1e0] sm:$0xff] %v325_v60  ;;  %v449_v58 = vld [vmem:[%s2584_s5 + $0x1e80] sm:$0xff]  ;;  %v451_v59 = vld [vmem:[%s2584_s5 + $0x1e88] sm:$0xff] }
  0x51   : > { %328 = vst [vmem:[%s2589_s6 + $0x1e8] sm:$0xff] %v327_v61  ;;  %v453_v60 = vld [vmem:[%s2584_s5 + $0x1f00] sm:$0xff]  ;;  %v455_v61 = vld [vmem:[%s2584_s5 + $0x1f08] sm:$0xff] }
  0x52   : > { %330 = vst [vmem:[%s2589_s6 + $0x1f0] sm:$0xff] %v329_v62  ;;  %v457_v62 = vld [vmem:[%s2584_s5 + $0x1f80] sm:$0xff] }
  0x53   : > { %332 = vst [vmem:[%s2589_s6 + $0x1f8] sm:$0xff] %v331_v63  ;;  %v459_v63 = vld [vmem:[%s2584_s5 + $0x1f88] sm:$0xff] }
  0x54   : > { %334 = vst [vmem:[%s2589_s6 + $0x200] sm:$0xff] %v333_v0 }
  0x55   : > { %336 = vst [vmem:[%s2589_s6 + $0x208] sm:$0xff] %v335_v1 }
  0x56   : > { %338 = vst [vmem:[%s2589_s6 + $0x210] sm:$0xff] %v337_v2 }
  0x57   : > { %340 = vst [vmem:[%s2589_s6 + $0x218] sm:$0xff] %v339_v3 }
  0x58   : > { %342 = vst [vmem:[%s2589_s6 + $0x220] sm:$0xff] %v341_v4 }
  0x59   : > { %344 = vst [vmem:[%s2589_s6 + $0x228] sm:$0xff] %v343_v5 }
  0x5a   : > { %346 = vst [vmem:[%s2589_s6 + $0x230] sm:$0xff] %v345_v6 }
  0x5b   : > { %348 = vst [vmem:[%s2589_s6 + $0x238] sm:$0xff] %v347_v7 }
  0x5c   : > { %350 = vst [vmem:[%s2589_s6 + $0x240] sm:$0xff] %v349_v8 }
  0x5d   : > { %352 = vst [vmem:[%s2589_s6 + $0x248] sm:$0xff] %v351_v9 }
  0x5e   : > { %354 = vst [vmem:[%s2589_s6 + $0x250] sm:$0xff] %v353_v10 }
  0x5f   : > { %356 = vst [vmem:[%s2589_s6 + $0x258] sm:$0xff] %v355_v11 }
  0x60   : > { %358 = vst [vmem:[%s2589_s6 + $0x260] sm:$0xff] %v357_v12 }
  0x61   : > { %360 = vst [vmem:[%s2589_s6 + $0x268] sm:$0xff] %v359_v13 }
  0x62   : > { %362 = vst [vmem:[%s2589_s6 + $0x270] sm:$0xff] %v361_v14 }
  0x63   : > { %364 = vst [vmem:[%s2589_s6 + $0x278] sm:$0xff] %v363_v15 }
  0x64   : > { %366 = vst [vmem:[%s2589_s6 + $0x280] sm:$0xff] %v365_v16 }
  0x65   : > { %368 = vst [vmem:[%s2589_s6 + $0x288] sm:$0xff] %v367_v17 }
  0x66   : > { %370 = vst [vmem:[%s2589_s6 + $0x290] sm:$0xff] %v369_v18 }
  0x67   : > { %372 = vst [vmem:[%s2589_s6 + $0x298] sm:$0xff] %v371_v19 }
  0x68   : > { %374 = vst [vmem:[%s2589_s6 + $0x2a0] sm:$0xff] %v373_v20 }
  0x69   : > { %376 = vst [vmem:[%s2589_s6 + $0x2a8] sm:$0xff] %v375_v21 }
  0x6a   : > { %378 = vst [vmem:[%s2589_s6 + $0x2b0] sm:$0xff] %v377_v22 }
  0x6b   : > { %380 = vst [vmem:[%s2589_s6 + $0x2b8] sm:$0xff] %v379_v23 }
  0x6c   : > { %382 = vst [vmem:[%s2589_s6 + $0x2c0] sm:$0xff] %v381_v24 }
  0x6d   : > { %384 = vst [vmem:[%s2589_s6 + $0x2c8] sm:$0xff] %v383_v25 }
  0x6e   : > { %386 = vst [vmem:[%s2589_s6 + $0x2d0] sm:$0xff] %v385_v26 }
  0x6f   : > { %388 = vst [vmem:[%s2589_s6 + $0x2d8] sm:$0xff] %v387_v27 }
  0x70   : > { %390 = vst [vmem:[%s2589_s6 + $0x2e0] sm:$0xff] %v389_v28 }
  0x71   : > { %392 = vst [vmem:[%s2589_s6 + $0x2e8] sm:$0xff] %v391_v29 }
  0x72   : > { %394 = vst [vmem:[%s2589_s6 + $0x2f0] sm:$0xff] %v393_v30 }
  0x73   : > { %396 = vst [vmem:[%s2589_s6 + $0x2f8] sm:$0xff] %v395_v31 }
  0x74   : > { %398 = vst [vmem:[%s2589_s6 + $0x300] sm:$0xff] %v397_v32 }
  0x75   : > { %400 = vst [vmem:[%s2589_s6 + $0x308] sm:$0xff] %v399_v33 }
  0x76   : > { %402 = vst [vmem:[%s2589_s6 + $0x310] sm:$0xff] %v401_v34 }
  0x77   : > { %404 = vst [vmem:[%s2589_s6 + $0x318] sm:$0xff] %v403_v35 }
  0x78   : > { %406 = vst [vmem:[%s2589_s6 + $0x320] sm:$0xff] %v405_v36 }
  0x79   : > { %408 = vst [vmem:[%s2589_s6 + $0x328] sm:$0xff] %v407_v37 }
  0x7a   : > { %410 = vst [vmem:[%s2589_s6 + $0x330] sm:$0xff] %v409_v38 }
  0x7b   : > { %412 = vst [vmem:[%s2589_s6 + $0x338] sm:$0xff] %v411_v39 }
  0x7c   : > { %414 = vst [vmem:[%s2589_s6 + $0x340] sm:$0xff] %v413_v40 }
  0x7d   : > { %416 = vst [vmem:[%s2589_s6 + $0x348] sm:$0xff] %v415_v41 }
  0x7e   : > { %418 = vst [vmem:[%s2589_s6 + $0x350] sm:$0xff] %v417_v42 }
  0x7f   : > { %420 = vst [vmem:[%s2589_s6 + $0x358] sm:$0xff] %v419_v43 }
  0x80   : > { %422 = vst [vmem:[%s2589_s6 + $0x360] sm:$0xff] %v421_v44 }
  0x81   : > { %424 = vst [vmem:[%s2589_s6 + $0x368] sm:$0xff] %v423_v45 }
  0x82   : > { %426 = vst [vmem:[%s2589_s6 + $0x370] sm:$0xff] %v425_v46 }
  0x83   : > { %428 = vst [vmem:[%s2589_s6 + $0x378] sm:$0xff] %v427_v47 }
  0x84   : > { %430 = vst [vmem:[%s2589_s6 + $0x380] sm:$0xff] %v429_v48 }
  0x85   : > { %432 = vst [vmem:[%s2589_s6 + $0x388] sm:$0xff] %v431_v49 }
  0x86   : > { %434 = vst [vmem:[%s2589_s6 + $0x390] sm:$0xff] %v433_v50 }
  0x87   : > { %436 = vst [vmem:[%s2589_s6 + $0x398] sm:$0xff] %v435_v51 }
  0x88   : > { %438 = vst [vmem:[%s2589_s6 + $0x3a0] sm:$0xff] %v437_v52 }
  0x89   : > { %440 = vst [vmem:[%s2589_s6 + $0x3a8] sm:$0xff] %v439_v53 }
  0x8a   : > { %442 = vst [vmem:[%s2589_s6 + $0x3b0] sm:$0xff] %v441_v54 }
  0x8b   : > { %444 = vst [vmem:[%s2589_s6 + $0x3b8] sm:$0xff] %v443_v55 }
  0x8c   : > { %446 = vst [vmem:[%s2589_s6 + $0x3c0] sm:$0xff] %v445_v56 }
  0x8d   : > { %448 = vst [vmem:[%s2589_s6 + $0x3c8] sm:$0xff] %v447_v57 }
  0x8e   : > { %450 = vst [vmem:[%s2589_s6 + $0x3d0] sm:$0xff] %v449_v58 }
  0x8f   : > { %452 = vst [vmem:[%s2589_s6 + $0x3d8] sm:$0xff] %v451_v59 }
  0x90   : > { %454 = vst [vmem:[%s2589_s6 + $0x3e0] sm:$0xff] %v453_v60 }
  0x91   : > { %456 = vst [vmem:[%s2589_s6 + $0x3e8] sm:$0xff] %v455_v61 }
  0x92   : > { %458 = vst [vmem:[%s2589_s6 + $0x3f0] sm:$0xff] %v457_v62 }
  0x93   : > { %460 = vst [vmem:[%s2589_s6 + $0x3f8] sm:$0xff] %v459_v63 }
  0x94 PF: > { %p1759_p8 = scmp.ge.s32.totalorder %s2509_s19, 1  ;;  %p481_p9 = scmp.lt.s32.totalorder %s2509_s19, 9 }
  0x96   : > { %p482_p10 = pnand %p1759_p8, %p481_p9 }
  0x97   : > { %s488_s7 = sand.u32 (!%p482_p10), 1, %s2493_s15  }
  0x98   : > { %485 = sbr.rel (%p482_p10) target bundleno = 450 (0x1c2), region = 55  ;;  %s1760_s8 = sshll.u32 (!%p482_p10), %s488_s7, 10 }
  0x99   : > { %s2849_s9 = scalar_lea.vmem (!%p482_p10), [#allocation2], %s1760_s8  ;;  %s1761_s22 = sshll.u32 (!%p482_p10), %s488_s7, 5 }
  0x9a   : > { %s3172_s23 = scalar_lea.vmem (!%p482_p10), [#allocation3], %s1761_s22 }
  0x9d   : > { %v1894_v0 = vld [vmem:[%s2849_s9 + $0xe0] sm:$0xf]  ;;  %v2332_v1 = vld [vmem:[%s2849_s9 + $0xec] sm:$0xf0]  ;;  %s2430_s15 = sshll.u32 (%p2571_p6), %s2501_s17, 4 }
  0x9e   : > { %v2022_v2 = vld [vmem:[%s2849_s9 + $0x1e0] sm:$0xf]  ;;  %v1895_v3 = vor.u32 %v2332_v1, %v1894_v0  ;;  %v2364_v4 = vld [vmem:[%s2849_s9 + $0x1ec] sm:$0xf0]  ;;  %s1626_s27 = scalar_lea.vmem (%p2571_p6), %s3211_s4, %s2430_s15 }
  0x9f   : > { %v2150_v5 = vld [vmem:[%s2849_s9 + $0x2e0] sm:$0xf]  ;;  %v2396_v6 = vld [vmem:[%s2849_s9 + $0x2ec] sm:$0xf0]  ;;  %v2023_v7 = vor.u32 %v2364_v4, %v2022_v2 }
  0xa0   : > { %v2151_v8 = vor.u32 %v2396_v6, %v2150_v5  ;;  %v2278_v9 = vld [vmem:[%s2849_s9 + $0x3e0] sm:$0xf]  ;;  %v2428_v10 = vld [vmem:[%s2849_s9 + $0x3ec] sm:$0xf0]  ;;  %1338 = vmatpush.bf16.msra.mxu0 %v1895_v3 }
  0xa1   : > { %v1878_v11 = vld [vmem:[%s2849_s9 + $0xc0] sm:$0xf]  ;;  %v2279_v12 = vor.u32 %v2428_v10, %v2278_v9  ;;  %v2328_v13 = vld [vmem:[%s2849_s9 + $0xcc] sm:$0xf0]  ;;  %1352 = vmatpush.bf16.msra.mxu1 %v2023_v7 }
  0xa2   : > { %v2006_v14 = vld [vmem:[%s2849_s9 + $0x1c0] sm:$0xf]  ;;  %v2360_v15 = vld [vmem:[%s2849_s9 + $0x1cc] sm:$0xf0]  ;;  %1366 = vmatpush.bf16.msra.mxu2 %v2151_v8  ;;  %v1879_v16 = vor.u32 %v2328_v13, %v1878_v11 }
  0xa3   : > { %v2007_v17 = vor.u32 %v2360_v15, %v2006_v14  ;;  %v2134_v18 = vld [vmem:[%s2849_s9 + $0x2c0] sm:$0xf]  ;;  %v2392_v19 = vld [vmem:[%s2849_s9 + $0x2cc] sm:$0xf0]  ;;  %1380 = vmatpush.bf16.msra.mxu3 %v2279_v12 }
  0xa4   : > { %v2262_v20 = vld [vmem:[%s2849_s9 + $0x3c0] sm:$0xf]  ;;  %v2135_v21 = vor.u32 %v2392_v19, %v2134_v18  ;;  %v2424_v22 = vld [vmem:[%s2849_s9 + $0x3cc] sm:$0xf0]  ;;  %1339 = vmatpush.bf16.msra.mxu0 %v1879_v16 }
  0xa5   : > { %v1862_v23 = vld [vmem:[%s2849_s9 + $0xa0] sm:$0xf]  ;;  %v2324_v24 = vld [vmem:[%s2849_s9 + $0xac] sm:$0xf0]  ;;  %v2263_v25 = vor.u32 %v2424_v22, %v2262_v20  ;;  %1353 = vmatpush.bf16.msra.mxu1 %v2007_v17 }
  0xa6   : > { %v1990_v26 = vld [vmem:[%s2849_s9 + $0x1a0] sm:$0xf]  ;;  %v2356_v27 = vld [vmem:[%s2849_s9 + $0x1ac] sm:$0xf0]  ;;  %v1863_v29 = vor.u32 %v2324_v24, %v1862_v23  ;;  %1367 = vmatpush.bf16.msra.mxu2 %v2135_v21 }
  0xa7   : > { %v2118_v28 = vld [vmem:[%s2849_s9 + $0x2a0] sm:$0xf]  ;;  %v2388_v30 = vld [vmem:[%s2849_s9 + $0x2ac] sm:$0xf0]  ;;  %v1991_v33 = vor.u32 %v2356_v27, %v1990_v26  ;;  %1381 = vmatpush.bf16.msra.mxu3 %v2263_v25 }
  0xa8   : > { %v2246_v31 = vld [vmem:[%s2849_s9 + $0x3a0] sm:$0xf]  ;;  %v2420_v32 = vld [vmem:[%s2849_s9 + $0x3ac] sm:$0xf0]  ;;  %v2119_v34 = vor.u32 %v2388_v30, %v2118_v28  ;;  %1340 = vmatpush.bf16.msra.mxu0 %v1863_v29  ;;  %v2330_v28 = vld [vmem:[%s2849_s9 + $0xe4] sm:$0xf] }
  0xa9   : > { %v1846_v35 = vld [vmem:[%s2849_s9 + $0x80] sm:$0xf]  ;;  %v2320_v36 = vld [vmem:[%s2849_s9 + $0x8c] sm:$0xf0]  ;;  %v2247_v38 = vor.u32 %v2420_v32, %v2246_v31  ;;  %1354 = vmatpush.bf16.msra.mxu1 %v1991_v33  ;;  %v1896_v29 = vld [vmem:[%s2849_s9 + $0xf0] sm:$0xf0] }
  0xaa   : > { %v1974_v37 = vld [vmem:[%s2849_s9 + $0x180] sm:$0xf]  ;;  %v2352_v39 = vld [vmem:[%s2849_s9 + $0x18c] sm:$0xf0]  ;;  %v1847_v44 = vor.u32 %v2320_v36, %v1846_v35  ;;  %1368 = vmatpush.bf16.msra.mxu2 %v2119_v34  ;;  %v2362_v30 = vld [vmem:[%s2849_s9 + $0x1e4] sm:$0xf] }
  0xab   : > { %v2102_v40 = vld [vmem:[%s2849_s9 + $0x280] sm:$0xf]  ;;  %v2384_v41 = vld [vmem:[%s2849_s9 + $0x28c] sm:$0xf0]  ;;  %v1975_v45 = vor.u32 %v2352_v39, %v1974_v37  ;;  %1382 = vmatpush.bf16.msra.mxu3 %v2247_v38  ;;  %v2024_v32 = vld [vmem:[%s2849_s9 + $0x1f0] sm:$0xf0] }
  0xac   : > { %v2230_v42 = vld [vmem:[%s2849_s9 + $0x380] sm:$0xf]  ;;  %v2416_v43 = vld [vmem:[%s2849_s9 + $0x38c] sm:$0xf0]  ;;  %v2103_v46 = vor.u32 %v2384_v41, %v2102_v40  ;;  %1341 = vmatpush.bf16.msra.mxu0 %v1847_v44  ;;  %v2394_v33 = vld [vmem:[%s2849_s9 + $0x2e4] sm:$0xf]  ;;  %v1899_v40 = vor.u32 %v2330_v28, %v1896_v29 }
  0xad   : > { %v1830_v47 = vld [vmem:[%s2849_s9 + $0x60] sm:$0xf]  ;;  %v2316_v48 = vld [vmem:[%s2849_s9 + $0x6c] sm:$0xf0]  ;;  %v2231_v50 = vor.u32 %v2416_v43, %v2230_v42  ;;  %1355 = vmatpush.bf16.msra.mxu1 %v1975_v45  ;;  %v2152_v34 = vld [vmem:[%s2849_s9 + $0x2f0] sm:$0xf0]  ;;  %v2027_v43 = vor.u32 %v2362_v30, %v2024_v32 }
  0xae   : > { %v1958_v49 = vld [vmem:[%s2849_s9 + $0x160] sm:$0xf]  ;;  %v2348_v51 = vld [vmem:[%s2849_s9 + $0x16c] sm:$0xf0]  ;;  %v1831_v56 = vor.u32 %v2316_v48, %v1830_v47  ;;  %1369 = vmatpush.bf16.msra.mxu2 %v2103_v46  ;;  %v2426_v37 = vld [vmem:[%s2849_s9 + $0x3e4] sm:$0xf]  ;;  %v2155_v44 = vor.u32 %v2394_v33, %v2152_v34 }
  0xaf   : > { %v2086_v52 = vld [vmem:[%s2849_s9 + $0x260] sm:$0xf]  ;;  %v2380_v53 = vld [vmem:[%s2849_s9 + $0x26c] sm:$0xf0]  ;;  %v1959_v57 = vor.u32 %v2348_v51, %v1958_v49  ;;  %1383 = vmatpush.bf16.msra.mxu3 %v2231_v50  ;;  %v2280_v38 = vld [vmem:[%s2849_s9 + $0x3f0] sm:$0xf0] }
  0xb0   : > { %v2214_v54 = vld [vmem:[%s2849_s9 + $0x360] sm:$0xf]  ;;  %v2412_v55 = vld [vmem:[%s2849_s9 + $0x36c] sm:$0xf0]  ;;  %v2087_v58 = vor.u32 %v2380_v53, %v2086_v52  ;;  %1342 = vmatpush.bf16.msra.mxu0 %v1831_v56  ;;  %v2326_v41 = vld [vmem:[%s2849_s9 + $0xc4] sm:$0xf]  ;;  %v2283_v48 = vor.u32 %v2426_v37, %v2280_v38 }
  0xb1   : > { %v1814_v59 = vld [vmem:[%s2849_s9 + $0x40] sm:$0xf]  ;;  %v2312_v60 = vld [vmem:[%s2849_s9 + $0x4c] sm:$0xf0]  ;;  %v2215_v62 = vor.u32 %v2412_v55, %v2214_v54  ;;  %1356 = vmatpush.bf16.msra.mxu1 %v1959_v57  ;;  %v1880_v42 = vld [vmem:[%s2849_s9 + $0xd0] sm:$0xf0] }
  0xb2   : > { %v1942_v61 = vld [vmem:[%s2849_s9 + $0x140] sm:$0xf]  ;;  %v2344_v63 = vld [vmem:[%s2849_s9 + $0x14c] sm:$0xf0]  ;;  %v1815_v4 = vor.u32 %v2312_v60, %v1814_v59  ;;  %1370 = vmatpush.bf16.msra.mxu2 %v2087_v58  ;;  %v2358_v45 = vld [vmem:[%s2849_s9 + $0x1c4] sm:$0xf]  ;;  %v1883_v55 = vor.u32 %v2326_v41, %v1880_v42 }
  0xb3   : > { %v2070_v0 = vld [vmem:[%s2849_s9 + $0x240] sm:$0xf]  ;;  %v2376_v1 = vld [vmem:[%s2849_s9 + $0x24c] sm:$0xf0]  ;;  %v1943_v5 = vor.u32 %v2344_v63, %v1942_v61  ;;  %1384 = vmatpush.bf16.msra.mxu3 %v2215_v62  ;;  %v2008_v46 = vld [vmem:[%s2849_s9 + $0x1d0] sm:$0xf0] }
  0xb4   : > { %v2198_v2 = vld [vmem:[%s2849_s9 + $0x340] sm:$0xf]  ;;  %v2408_v3 = vld [vmem:[%s2849_s9 + $0x34c] sm:$0xf0]  ;;  %v2071_v6 = vor.u32 %v2376_v1, %v2070_v0  ;;  %1343 = vmatpush.bf16.msra.mxu0 %v1815_v4  ;;  %v2390_v47 = vld [vmem:[%s2849_s9 + $0x2c4] sm:$0xf]  ;;  %v2011_v60 = vor.u32 %v2358_v45, %v2008_v46 }
  0xb5   : > { %v1798_v7 = vld [vmem:[%s2849_s9 + $0x20] sm:$0xf]  ;;  %v2308_v8 = vld [vmem:[%s2849_s9 + $0x2c] sm:$0xf0]  ;;  %v2199_v10 = vor.u32 %v2408_v3, %v2198_v2  ;;  %1357 = vmatpush.bf16.msra.mxu1 %v1943_v5  ;;  %v2136_v49 = vld [vmem:[%s2849_s9 + $0x2d0] sm:$0xf0] }
  0xb6   : > { %v1926_v9 = vld [vmem:[%s2849_s9 + $0x120] sm:$0xf]  ;;  %v2340_v11 = vld [vmem:[%s2849_s9 + $0x12c] sm:$0xf0]  ;;  %v1799_v16 = vor.u32 %v2308_v8, %v1798_v7  ;;  %1371 = vmatpush.bf16.msra.mxu2 %v2071_v6  ;;  %v2422_v50 = vld [vmem:[%s2849_s9 + $0x3c4] sm:$0xf]  ;;  %v2139_v61 = vor.u32 %v2390_v47, %v2136_v49 }
  0xb7   : > { %v2054_v12 = vld [vmem:[%s2849_s9 + $0x220] sm:$0xf]  ;;  %v2372_v13 = vld [vmem:[%s2849_s9 + $0x22c] sm:$0xf0]  ;;  %v1927_v19 = vor.u32 %v2340_v11, %v1926_v9  ;;  %1385 = vmatpush.bf16.msra.mxu3 %v2199_v10  ;;  %v2264_v51 = vld [vmem:[%s2849_s9 + $0x3d0] sm:$0xf0] }
  0xb8   : > { %v2182_v14 = vld [vmem:[%s2849_s9 + $0x320] sm:$0xf]  ;;  %v2404_v15 = vld [vmem:[%s2849_s9 + $0x32c] sm:$0xf0]  ;;  %v2055_v20 = vor.u32 %v2372_v13, %v2054_v12  ;;  %1344 = vmatpush.bf16.msra.mxu0 %v1799_v16  ;;  %v2322_v52 = vld [vmem:[%s2849_s9 + $0xa4] sm:$0xf]  ;;  %v2267_v1 = vor.u32 %v2422_v50, %v2264_v51 }
  0xb9   : > { %v1782_v17 = vld [vmem:[%s2849_s9] sm:$0xf]  ;;  %v2304_v18 = vld [vmem:[%s2849_s9 + $0xc] sm:$0xf0]  ;;  %v2183_v24 = vor.u32 %v2404_v15, %v2182_v14  ;;  %1358 = vmatpush.bf16.msra.mxu1 %v1927_v19  ;;  %v1774_v53 = vld [vmem:[%s3207_s0 + $0x8] sm:$0xf] }
  0xba   : > { %v1910_v21 = vld [vmem:[%s2849_s9 + $0x100] sm:$0xf]  ;;  %v2336_v22 = vld [vmem:[%s2849_s9 + $0x10c] sm:$0xf0]  ;;  %v1783_v31 = vor.u32 %v2304_v18, %v1782_v17  ;;  %1372 = vmatpush.bf16.msra.mxu2 %v2055_v20  ;;  %v2301_v54 = vld [vmem:[%s3207_s0 + $0x14] sm:$0xf0] }
  0xbb   : > { %v2038_v23 = vld [vmem:[%s2849_s9 + $0x200] sm:$0xf]  ;;  %v2368_v25 = vld [vmem:[%s2849_s9 + $0x20c] sm:$0xf0]  ;;  %v1911_v35 = vor.u32 %v2336_v22, %v1910_v21  ;;  %1386 = vmatpush.bf16.msra.mxu3 %v2183_v24  ;;  %v1864_v56 = vld [vmem:[%s2849_s9 + $0xb0] sm:$0xf0]  ;;  %v2941_v59 = vor.u32 %v2301_v54, %v1774_v53 }
  0xbc   : > { %v2166_v26 = vld [vmem:[%s2849_s9 + $0x300] sm:$0xf]  ;;  %v2400_v27 = vld [vmem:[%s2849_s9 + $0x30c] sm:$0xf0]  ;;  %v2039_v36 = vor.u32 %v2368_v25, %v2038_v23  ;;  %1345 = vmatpush.bf16.msra.mxu0 %v1783_v31  ;;  %v2354_v57 = vld [vmem:[%s2849_s9 + $0x1a4] sm:$0xf]  ;;  %v1867_v9 = vor.u32 %v2322_v52, %v1864_v56 }
  0xbd   : > { %v2167_v39 = vor.u32 %v2400_v27, %v2166_v26  ;;  %1359 = vmatpush.bf16.msra.mxu1 %v1911_v35  ;;  %v1992_v58 = vld [vmem:[%s2849_s9 + $0x1b0] sm:$0xf0]  ;;  %v2386_v62 = vld [vmem:[%s2849_s9 + $0x2a4] sm:$0xf]  ;;  %v2299_v3 = vld [vmem:[%s3207_s0 + $0xc] sm:$0xf] }
  0xbe   : > { %1373 = vmatpush.bf16.msra.mxu2 %v2039_v36  ;;  %v2120_v63 = vld [vmem:[%s2849_s9 + $0x2b0] sm:$0xf0]  ;;  %v2418_v0 = vld [vmem:[%s2849_s9 + $0x3a4] sm:$0xf]  ;;  %v1776_v4 = vld [vmem:[%s3207_s0 + $0x18] sm:$0xf0]  ;;  %v1995_v12 = vor.u32 %v2354_v57, %v1992_v58 }
  0xbf   : > { %1387 = vmatpush.bf16.msra.mxu3 %v2167_v39  ;;  %v2248_v2 = vld [vmem:[%s2849_s9 + $0x3b0] sm:$0xf0]  ;;  %v2954_v5 = vor.u32 %v2299_v3, %v1776_v4  ;;  %v1766_v6 = vld [vmem:[%s3207_s0] sm:$0xf]  ;;  %v2300_v7 = vld [vmem:[%s3207_s0 + $0xc] sm:$0xf0]  ;;  %v2123_v13 = vor.u32 %v2386_v62, %v2120_v63 }
  0xc0   : > { %1394 = vmatpush.bf16.msrb.mxu0 %v1899_v40  ;;  %v2298_v8 = vld [vmem:[%s3207_s0 + $0x4] sm:$0xf]  ;;  %v2965_v10 = vor.u32 %v2300_v7, %v1766_v6  ;;  %v1768_v11 = vld [vmem:[%s3207_s0 + $0x10] sm:$0xf0]  ;;  %v2251_v18 = vor.u32 %v2418_v0, %v2248_v2 }
  0xc1   : > { %1408 = vmatpush.bf16.msrb.mxu1 %v2027_v43  ;;  %1374 = vmatmul.bf16.vlgmr.msra.gmra.mxu2 %v2941_v59  ;;  %v2318_v14 = vld [vmem:[%s2849_s9 + $0x84] sm:$0xf]  ;;  %v1848_v15 = vld [vmem:[%s2849_s9 + $0x90] sm:$0xf0]  ;;  %v2973_v17 = vor.u32 %v2298_v8, %v1768_v11  ;;  %v1902_v11 = vld [vmem:[%s2849_s9 + $0xe8] sm:$0xf] }
  0xc2   : > { %1422 = vmatpush.bf16.msrb.mxu2 %v2155_v44  ;;  %v2350_v16 = vld [vmem:[%s2849_s9 + $0x184] sm:$0xf]  ;;  %v1976_v19 = vld [vmem:[%s2849_s9 + $0x190] sm:$0xf0]  ;;  %1346 = vmatmul.bf16.vlgmr.msra.gmra.mxu0 %v2965_v10  ;;  %v1851_v24 = vor.u32 %v2318_v14, %v1848_v15  ;;  %v2365_v15 = vld [vmem:[%s2849_s9 + $0x1f4] sm:$0xf0] }
  0xc3   : > { %1436 = vmatpush.bf16.msrb.mxu3 %v2283_v48  ;;  %v2382_v20 = vld [vmem:[%s2849_s9 + $0x284] sm:$0xf]  ;;  %v2104_v21 = vld [vmem:[%s2849_s9 + $0x290] sm:$0xf0]  ;;  %1360 = vmatmul.bf16.vlgmr.msra.gmra.mxu1 %v2973_v17  ;;  %v1979_v25 = vor.u32 %v2350_v16, %v1976_v19  ;;  %v2158_v16 = vld [vmem:[%s2849_s9 + $0x2e8] sm:$0xf] }
  0xc4   : > { %1395 = vmatpush.bf16.msrb.mxu0 %v1883_v55  ;;  %v2414_v22 = vld [vmem:[%s2849_s9 + $0x384] sm:$0xf]  ;;  %v2232_v23 = vld [vmem:[%s2849_s9 + $0x390] sm:$0xf0]  ;;  %1388 = vmatmul.bf16.vlgmr.msra.gmra.mxu3 %v2954_v5  ;;  %v2107_v26 = vor.u32 %v2382_v20, %v2104_v21  ;;  %v2286_v21 = vld [vmem:[%s2849_s9 + $0x3e8] sm:$0xf] }
  0xc5   : > { %1409 = vmatpush.bf16.msrb.mxu1 %v2011_v60  ;;  %v2314_v27 = vld [vmem:[%s2849_s9 + $0x64] sm:$0xf]  ;;  %v1832_v28 = vld [vmem:[%s2849_s9 + $0x70] sm:$0xf0]  ;;  %v2235_v30 = vor.u32 %v2414_v22, %v2232_v23  ;;  %v2429_v22 = vld [vmem:[%s2849_s9 + $0x3f4] sm:$0xf0] }
  0xc6   : > { %1423 = vmatpush.bf16.msrb.mxu2 %v2139_v61  ;;  %v2346_v29 = vld [vmem:[%s2849_s9 + $0x164] sm:$0xf]  ;;  %v1960_v31 = vld [vmem:[%s2849_s9 + $0x170] sm:$0xf0]  ;;  %v1835_v36 = vor.u32 %v2314_v27, %v1832_v28  ;;  %v1886_v27 = vld [vmem:[%s2849_s9 + $0xc8] sm:$0xf] }
  0xc7   : > { %1437 = vmatpush.bf16.msrb.mxu3 %v2267_v1  ;;  %v2378_v32 = vld [vmem:[%s2849_s9 + $0x264] sm:$0xf]  ;;  %v2088_v33 = vld [vmem:[%s2849_s9 + $0x270] sm:$0xf0]  ;;  %v1963_v37 = vor.u32 %v2346_v29, %v1960_v31  ;;  %v2329_v28 = vld [vmem:[%s2849_s9 + $0xd4] sm:$0xf0] }
  0xc8   : > { %1396 = vmatpush.bf16.msrb.mxu0 %v1867_v9  ;;  %v2410_v34 = vld [vmem:[%s2849_s9 + $0x364] sm:$0xf]  ;;  %v2216_v35 = vld [vmem:[%s2849_s9 + $0x370] sm:$0xf0]  ;;  %v2091_v38 = vor.u32 %v2378_v32, %v2088_v33  ;;  %v2014_v29 = vld [vmem:[%s2849_s9 + $0x1c8] sm:$0xf] }
  0xc9   : > { %1410 = vmatpush.bf16.msrb.mxu1 %v1995_v12  ;;  %v2310_v39 = vld [vmem:[%s2849_s9 + $0x44] sm:$0xf]  ;;  %v1816_v40 = vld [vmem:[%s2849_s9 + $0x50] sm:$0xf0]  ;;  %v2219_v42 = vor.u32 %v2410_v34, %v2216_v35  ;;  %v2333_v12 = vld [vmem:[%s2849_s9 + $0xf4] sm:$0xf0] }
  0xca   : > { %1424 = vmatpush.bf16.msrb.mxu2 %v2123_v13  ;;  %v2342_v41 = vld [vmem:[%s2849_s9 + $0x144] sm:$0xf]  ;;  %v1944_v43 = vld [vmem:[%s2849_s9 + $0x150] sm:$0xf0]  ;;  %v1819_v48 = vor.u32 %v2310_v39, %v1816_v40  ;;  %v2030_v13 = vld [vmem:[%s2849_s9 + $0x1e8] sm:$0xf] }
  0xcb   : > { %1438 = vmatpush.bf16.msrb.mxu3 %v2251_v18  ;;  %v2374_v44 = vld [vmem:[%s2849_s9 + $0x244] sm:$0xf]  ;;  %v2072_v45 = vld [vmem:[%s2849_s9 + $0x250] sm:$0xf0]  ;;  %v1947_v49 = vor.u32 %v2342_v41, %v1944_v43  ;;  %v2397_v18 = vld [vmem:[%s2849_s9 + $0x2f4] sm:$0xf0] }
  0xcc   : > { %1397 = vmatpush.bf16.msrb.mxu0 %v1851_v24  ;;  %v2406_v46 = vld [vmem:[%s2849_s9 + $0x344] sm:$0xf]  ;;  %v2200_v47 = vld [vmem:[%s2849_s9 + $0x350] sm:$0xf0]  ;;  %v2075_v50 = vor.u32 %v2374_v44, %v2072_v45  ;;  %v1903_v24 = vor.u32 %v2333_v12, %v1902_v11  ;;  %v2361_v31 = vld [vmem:[%s2849_s9 + $0x1d4] sm:$0xf0] }
  0xcd   : > { %1411 = vmatpush.bf16.msrb.mxu1 %v1979_v25  ;;  %v2306_v51 = vld [vmem:[%s2849_s9 + $0x24] sm:$0xf]  ;;  %v1800_v52 = vld [vmem:[%s2849_s9 + $0x30] sm:$0xf0]  ;;  %v2203_v54 = vor.u32 %v2406_v46, %v2200_v47  ;;  %v2031_v25 = vor.u32 %v2365_v15, %v2030_v13  ;;  %v2142_v32 = vld [vmem:[%s2849_s9 + $0x2c8] sm:$0xf] }
  0xce   : > { %1425 = vmatpush.bf16.msrb.mxu2 %v2107_v26  ;;  %v2338_v53 = vld [vmem:[%s2849_s9 + $0x124] sm:$0xf]  ;;  %v1928_v55 = vld [vmem:[%s2849_s9 + $0x130] sm:$0xf0]  ;;  %v1803_v61 = vor.u32 %v2306_v51, %v1800_v52  ;;  %v2159_v26 = vor.u32 %v2397_v18, %v2158_v16  ;;  %v2393_v33 = vld [vmem:[%s2849_s9 + $0x2d4] sm:$0xf0] }
  0xcf   : > { %1439 = vmatpush.bf16.msrb.mxu3 %v2235_v30  ;;  %v2370_v56 = vld [vmem:[%s2849_s9 + $0x224] sm:$0xf]  ;;  %v2056_v57 = vld [vmem:[%s2849_s9 + $0x230] sm:$0xf0]  ;;  %v1931_v0 = vor.u32 %v2338_v53, %v1928_v55  ;;  %v2287_v30 = vor.u32 %v2429_v22, %v2286_v21  ;;  %v2270_v34 = vld [vmem:[%s2849_s9 + $0x3c8] sm:$0xf] }
  0xd0   : > { %1398 = vmatpush.bf16.msrb.mxu0 %v1835_v36  ;;  %v2402_v58 = vld [vmem:[%s2849_s9 + $0x324] sm:$0xf]  ;;  %v2184_v60 = vld [vmem:[%s2849_s9 + $0x330] sm:$0xf0]  ;;  %v2059_v1 = vor.u32 %v2370_v56, %v2056_v57  ;;  %v2425_v35 = vld [vmem:[%s2849_s9 + $0x3d4] sm:$0xf0]  ;;  %v1887_v36 = vor.u32 %v2329_v28, %v1886_v27 }
  0xd1   : > { %1412 = vmatpush.bf16.msrb.mxu1 %v1963_v37  ;;  %v2302_v62 = vld [vmem:[%s2849_s9 + $0x4] sm:$0xf]  ;;  %v1784_v63 = vld [vmem:[%s2849_s9 + $0x10] sm:$0xf0]  ;;  %v2187_v6 = vor.u32 %v2402_v58, %v2184_v60  ;;  %v2015_v37 = vor.u32 %v2361_v31, %v2014_v29  ;;  %v1870_v39 = vld [vmem:[%s2849_s9 + $0xa8] sm:$0xf] }
  0xd2   : > { %1426 = vmatpush.bf16.msrb.mxu2 %v2091_v38  ;;  %v2334_v2 = vld [vmem:[%s2849_s9 + $0x104] sm:$0xf]  ;;  %v1912_v3 = vld [vmem:[%s2849_s9 + $0x110] sm:$0xf0]  ;;  %v1787_v14 = vor.u32 %v2302_v62, %v1784_v63  ;;  %v2143_v38 = vor.u32 %v2393_v33, %v2142_v32  ;;  %v2325_v40 = vld [vmem:[%s2849_s9 + $0xb4] sm:$0xf0] }
  0xd3   : > { %1440 = vmatpush.bf16.msrb.mxu3 %v2219_v42  ;;  %v2366_v4 = vld [vmem:[%s2849_s9 + $0x204] sm:$0xf]  ;;  %v2040_v7 = vld [vmem:[%s2849_s9 + $0x210] sm:$0xf0]  ;;  %v1915_v19 = vor.u32 %v2334_v2, %v1912_v3  ;;  %v1998_v41 = vld [vmem:[%s2849_s9 + $0x1a8] sm:$0xf]  ;;  %v2271_v42 = vor.u32 %v2425_v35, %v2270_v34 }
  0xd4   : > { %1399 = vmatpush.bf16.msrb.mxu0 %v1819_v48  ;;  %v2398_v8 = vld [vmem:[%s2849_s9 + $0x304] sm:$0xf]  ;;  %v2168_v9 = vld [vmem:[%s2849_s9 + $0x310] sm:$0xf0]  ;;  %v2043_v20 = vor.u32 %v2366_v4, %v2040_v7  ;;  %v2357_v43 = vld [vmem:[%s2849_s9 + $0x1b4] sm:$0xf0]  ;;  %v1871_v48 = vor.u32 %v2325_v40, %v1870_v39 }
  0xd5   : > { %1413 = vmatpush.bf16.msrb.mxu1 %v1947_v49  ;;  %v2171_v23 = vor.u32 %v2398_v8, %v2168_v9  ;;  %v2126_v44 = vld [vmem:[%s2849_s9 + $0x2a8] sm:$0xf]  ;;  %v2389_v45 = vld [vmem:[%s2849_s9 + $0x2b4] sm:$0xf0]  ;;  %v1999_v49 = vor.u32 %v2357_v43, %v1998_v41 }
  0xd6   : > { %1427 = vmatpush.bf16.msrb.mxu2 %v2075_v50  ;;  %v2254_v46 = vld [vmem:[%s2849_s9 + $0x3a8] sm:$0xf]  ;;  %v2421_v47 = vld [vmem:[%s2849_s9 + $0x3b4] sm:$0xf0]  ;;  %v2127_v50 = vor.u32 %v2389_v45, %v2126_v44 }
  0xd7   : > { %1441 = vmatpush.bf16.msrb.mxu3 %v2203_v54  ;;  %v1854_v51 = vld [vmem:[%s2849_s9 + $0x88] sm:$0xf]  ;;  %v2321_v52 = vld [vmem:[%s2849_s9 + $0x94] sm:$0xf0]  ;;  %v2255_v54 = vor.u32 %v2421_v47, %v2254_v46 }
  0xd8   : > { %1400 = vmatpush.bf16.msrb.mxu0 %v1803_v61  ;;  %v1982_v53 = vld [vmem:[%s2849_s9 + $0x188] sm:$0xf]  ;;  %v2353_v55 = vld [vmem:[%s2849_s9 + $0x194] sm:$0xf0]  ;;  %v1855_v61 = vor.u32 %v2321_v52, %v1854_v51  ;;  %v2032_v52 = vld [vmem:[%s2849_s9 + $0x1f8] sm:$0xf0] }
  0xd9   : > { %1414 = vmatpush.bf16.msrb.mxu1 %v1931_v0  ;;  %v2110_v56 = vld [vmem:[%s2849_s9 + $0x288] sm:$0xf]  ;;  %v2385_v57 = vld [vmem:[%s2849_s9 + $0x294] sm:$0xf0]  ;;  %v1983_v62 = vor.u32 %v2353_v55, %v1982_v53  ;;  %v2395_v53 = vld [vmem:[%s2849_s9 + $0x2ec] sm:$0xf] }
  0xda   : > { %1428 = vmatpush.bf16.msrb.mxu2 %v2059_v1  ;;  %v2238_v58 = vld [vmem:[%s2849_s9 + $0x388] sm:$0xf]  ;;  %v2417_v60 = vld [vmem:[%s2849_s9 + $0x394] sm:$0xf0]  ;;  %v2111_v63 = vor.u32 %v2385_v57, %v2110_v56  ;;  %v2427_v57 = vld [vmem:[%s2849_s9 + $0x3ec] sm:$0xf] }
  0xdb   : > { %1442 = vmatpush.bf16.msrb.mxu3 %v2187_v6  ;;  %v1838_v0 = vld [vmem:[%s2849_s9 + $0x68] sm:$0xf]  ;;  %v2317_v1 = vld [vmem:[%s2849_s9 + $0x74] sm:$0xf0]  ;;  %v2239_v3 = vor.u32 %v2417_v60, %v2238_v58  ;;  %v2288_v58 = vld [vmem:[%s2849_s9 + $0x3f8] sm:$0xf0] }
  0xdc   : > { %1401 = vmatpush.bf16.msrb.mxu0 %v1787_v14  ;;  %v1966_v2 = vld [vmem:[%s2849_s9 + $0x168] sm:$0xf]  ;;  %v2349_v4 = vld [vmem:[%s2849_s9 + $0x174] sm:$0xf0]  ;;  %v1839_v11 = vor.u32 %v2317_v1, %v1838_v0  ;;  %v2327_v0 = vld [vmem:[%s2849_s9 + $0xcc] sm:$0xf] }
  0xdd   : > { %1415 = vmatpush.bf16.msrb.mxu1 %v1915_v19  ;;  %v2094_v6 = vld [vmem:[%s2849_s9 + $0x268] sm:$0xf]  ;;  %v2381_v7 = vld [vmem:[%s2849_s9 + $0x274] sm:$0xf0]  ;;  %v1967_v12 = vor.u32 %v2349_v4, %v1966_v2  ;;  %v1888_v1 = vld [vmem:[%s2849_s9 + $0xd8] sm:$0xf0] }
  0xde   : > { %1429 = vmatpush.bf16.msrb.mxu2 %v2043_v20  ;;  %v2222_v8 = vld [vmem:[%s2849_s9 + $0x368] sm:$0xf]  ;;  %v2413_v9 = vld [vmem:[%s2849_s9 + $0x374] sm:$0xf0]  ;;  %v2095_v13 = vor.u32 %v2381_v7, %v2094_v6  ;;  %v2359_v2 = vld [vmem:[%s2849_s9 + $0x1cc] sm:$0xf] }
  0xdf   : > { %1443 = vmatpush.bf16.msrb.mxu3 %v2171_v23  ;;  %1402 = vmatmul.bf16.vlgmr.msrb.gmra.mxu0 %v2965_v10  ;;  %v1822_v14 = vld [vmem:[%s2849_s9 + $0x48] sm:$0xf]  ;;  %v2313_v15 = vld [vmem:[%s2849_s9 + $0x54] sm:$0xf0]  ;;  %v2223_v18 = vor.u32 %v2413_v9, %v2222_v8  ;;  %v2016_v4 = vld [vmem:[%s2849_s9 + $0x1d8] sm:$0xf0] }
  0xe0   : > { %1450 = vmatpush.bf16.msra.mxu0 %v1903_v24  ;;  %1416 = vmatmul.bf16.vlgmr.msrb.gmra.mxu1 %v2973_v17  ;;  %v1950_v16 = vld [vmem:[%s2849_s9 + $0x148] sm:$0xf]  ;;  %v2345_v19 = vld [vmem:[%s2849_s9 + $0x154] sm:$0xf0]  ;;  %v1823_v24 = vor.u32 %v2313_v15, %v1822_v14  ;;  %v2391_v6 = vld [vmem:[%s2849_s9 + $0x2cc] sm:$0xf] }
  0xe1   : > { %1464 = vmatpush.bf16.msra.mxu1 %v2031_v25  ;;  %1430 = vmatmul.bf16.vlgmr.msrb.gmra.mxu2 %v2941_v59  ;;  %v2078_v20 = vld [vmem:[%s2849_s9 + $0x248] sm:$0xf]  ;;  %v2377_v21 = vld [vmem:[%s2849_s9 + $0x254] sm:$0xf0]  ;;  %v1951_v25 = vor.u32 %v2345_v19, %v1950_v16  ;;  %v2144_v7 = vld [vmem:[%s2849_s9 + $0x2d8] sm:$0xf0] }
  0xe2   : > { %1478 = vmatpush.bf16.msra.mxu2 %v2159_v26  ;;  %1444 = vmatmul.bf16.vlgmr.msrb.gmra.mxu3 %v2954_v5  ;;  %v2206_v22 = vld [vmem:[%s2849_s9 + $0x348] sm:$0xf]  ;;  %v2409_v23 = vld [vmem:[%s2849_s9 + $0x354] sm:$0xf0]  ;;  %v2079_v26 = vor.u32 %v2377_v21, %v2078_v20  ;;  %v2423_v8 = vld [vmem:[%s2849_s9 + $0x3cc] sm:$0xf] }
  0xe3   : > { %1492 = vmatpush.bf16.msra.mxu3 %v2287_v30  ;;  %v1806_v27 = vld [vmem:[%s2849_s9 + $0x28] sm:$0xf]  ;;  %v2309_v28 = vld [vmem:[%s2849_s9 + $0x34] sm:$0xf0]  ;;  %v2207_v30 = vor.u32 %v2409_v23, %v2206_v22  ;;  %v2272_v9 = vld [vmem:[%s2849_s9 + $0x3d8] sm:$0xf0] }
  0xe4   : > { %1451 = vmatpush.bf16.msra.mxu0 %v1887_v36  ;;  %v1934_v29 = vld [vmem:[%s2849_s9 + $0x128] sm:$0xf]  ;;  %v2341_v31 = vld [vmem:[%s2849_s9 + $0x134] sm:$0xf0]  ;;  %v1807_v36 = vor.u32 %v2309_v28, %v1806_v27  ;;  %v2323_v14 = vld [vmem:[%s2849_s9 + $0xac] sm:$0xf] }
  0xe5   : > { %1465 = vmatpush.bf16.msra.mxu1 %v2015_v37  ;;  %v2062_v32 = vld [vmem:[%s2849_s9 + $0x228] sm:$0xf]  ;;  %v2373_v33 = vld [vmem:[%s2849_s9 + $0x234] sm:$0xf0]  ;;  %v1935_v39 = vor.u32 %v2341_v31, %v1934_v29  ;;  %v1872_v15 = vld [vmem:[%s2849_s9 + $0xb8] sm:$0xf0] }
  0xe6   : > { %1479 = vmatpush.bf16.msra.mxu2 %v2143_v38  ;;  %v2190_v34 = vld [vmem:[%s2849_s9 + $0x328] sm:$0xf]  ;;  %v2405_v35 = vld [vmem:[%s2849_s9 + $0x334] sm:$0xf0]  ;;  %v2063_v40 = vor.u32 %v2373_v33, %v2062_v32  ;;  %v2355_v16 = vld [vmem:[%s2849_s9 + $0x1ac] sm:$0xf] }
  0xe7   : > { %1493 = vmatpush.bf16.msra.mxu3 %v2271_v42  ;;  %v1790_v37 = vld [vmem:[%s2849_s9 + $0x8] sm:$0xf]  ;;  %v2305_v38 = vld [vmem:[%s2849_s9 + $0x14] sm:$0xf0]  ;;  %v2191_v44 = vor.u32 %v2405_v35, %v2190_v34  ;;  %v2000_v19 = vld [vmem:[%s2849_s9 + $0x1b8] sm:$0xf0] }
  0xe8   : > { %1452 = vmatpush.bf16.msra.mxu0 %v1871_v48  ;;  %v1918_v41 = vld [vmem:[%s2849_s9 + $0x108] sm:$0xf]  ;;  %v2337_v42 = vld [vmem:[%s2849_s9 + $0x114] sm:$0xf0]  ;;  %v2331_v48 = vld [vmem:[%s2849_s9 + $0xec] sm:$0xf]  ;;  %v1791_v51 = vor.u32 %v2305_v38, %v1790_v37 }
  0xe9   : > { %1466 = vmatpush.bf16.msra.mxu1 %v1999_v49  ;;  %v2046_v43 = vld [vmem:[%s2849_s9 + $0x208] sm:$0xf]  ;;  %v2369_v45 = vld [vmem:[%s2849_s9 + $0x214] sm:$0xf0]  ;;  %v1904_v49 = vld [vmem:[%s2849_s9 + $0xf8] sm:$0xf0]  ;;  %v1919_v55 = vor.u32 %v2337_v42, %v1918_v41 }
  0xea   : > { %1480 = vmatpush.bf16.msra.mxu2 %v2127_v50  ;;  %v2174_v46 = vld [vmem:[%s2849_s9 + $0x308] sm:$0xf]  ;;  %v2401_v47 = vld [vmem:[%s2849_s9 + $0x314] sm:$0xf0]  ;;  %v2363_v50 = vld [vmem:[%s2849_s9 + $0x1ec] sm:$0xf]  ;;  %v2047_v56 = vor.u32 %v2369_v45, %v2046_v43 }
  0xeb   : > { %1494 = vmatpush.bf16.msra.mxu3 %v2255_v54  ;;  %v2160_v54 = vld [vmem:[%s2849_s9 + $0x2f8] sm:$0xf0]  ;;  %v2175_v60 = vor.u32 %v2401_v47, %v2174_v46  ;;  %v2387_v20 = vld [vmem:[%s2849_s9 + $0x2ac] sm:$0xf] }
  0xec   : > { %1453 = vmatpush.bf16.msra.mxu0 %v1855_v61  ;;  %v1907_v61 = vor.u32 %v2331_v48, %v1904_v49  ;;  %v2128_v21 = vld [vmem:[%s2849_s9 + $0x2b8] sm:$0xf0]  ;;  %v2419_v22 = vld [vmem:[%s2849_s9 + $0x3ac] sm:$0xf] }
  0xed   : > { %1467 = vmatpush.bf16.msra.mxu1 %v1983_v62  ;;  %v2035_v62 = vor.u32 %v2363_v50, %v2032_v52  ;;  %v2256_v23 = vld [vmem:[%s2849_s9 + $0x3b8] sm:$0xf0]  ;;  %v2319_v27 = vld [vmem:[%s2849_s9 + $0x8c] sm:$0xf] }
  0xee   : > { %1481 = vmatpush.bf16.msra.mxu2 %v2111_v63  ;;  %v2163_v63 = vor.u32 %v2395_v53, %v2160_v54  ;;  %v1856_v28 = vld [vmem:[%s2849_s9 + $0x98] sm:$0xf0]  ;;  %v2351_v29 = vld [vmem:[%s2849_s9 + $0x18c] sm:$0xf] }
  0xef   : > { %1495 = vmatpush.bf16.msra.mxu3 %v2239_v3  ;;  %v2291_v3 = vor.u32 %v2427_v57, %v2288_v58  ;;  %v1984_v31 = vld [vmem:[%s2849_s9 + $0x198] sm:$0xf0]  ;;  %v2383_v32 = vld [vmem:[%s2849_s9 + $0x28c] sm:$0xf] }
  0xf0   : > { %1454 = vmatpush.bf16.msra.mxu0 %v1839_v11  ;;  %v1891_v11 = vor.u32 %v2327_v0, %v1888_v1  ;;  %v2112_v33 = vld [vmem:[%s2849_s9 + $0x298] sm:$0xf0]  ;;  %v2415_v34 = vld [vmem:[%s2849_s9 + $0x38c] sm:$0xf]  ;;  %v1987_v37 = vor.u32 %v2351_v29, %v1984_v31 }
  0xf1   : > { %1468 = vmatpush.bf16.msra.mxu1 %v1967_v12  ;;  %v2019_v12 = vor.u32 %v2359_v2, %v2016_v4  ;;  %v2240_v35 = vld [vmem:[%s2849_s9 + $0x398] sm:$0xf0]  ;;  %v2115_v38 = vor.u32 %v2383_v32, %v2112_v33  ;;  %v2347_v41 = vld [vmem:[%s2849_s9 + $0x16c] sm:$0xf] }
  0xf2   : > { %1482 = vmatpush.bf16.msra.mxu2 %v2095_v13  ;;  %v2147_v13 = vor.u32 %v2391_v6, %v2144_v7  ;;  %v2243_v42 = vor.u32 %v2415_v34, %v2240_v35  ;;  %v1968_v43 = vld [vmem:[%s2849_s9 + $0x178] sm:$0xf0]  ;;  %v2411_v46 = vld [vmem:[%s2849_s9 + $0x36c] sm:$0xf] }
  0xf3   : > { %1496 = vmatpush.bf16.msra.mxu3 %v2223_v18  ;;  %v2275_v18 = vor.u32 %v2423_v8, %v2272_v9  ;;  %v2096_v45 = vld [vmem:[%s2849_s9 + $0x278] sm:$0xf0]  ;;  %v1971_v49 = vor.u32 %v2347_v41, %v1968_v43  ;;  %v2343_v53 = vld [vmem:[%s2849_s9 + $0x14c] sm:$0xf] }
  0xf4   : > { %1455 = vmatpush.bf16.msra.mxu0 %v1823_v24  ;;  %v1875_v24 = vor.u32 %v2323_v14, %v1872_v15  ;;  %v2224_v47 = vld [vmem:[%s2849_s9 + $0x378] sm:$0xf0]  ;;  %v2407_v58 = vld [vmem:[%s2849_s9 + $0x34c] sm:$0xf] }
  0xf5   : > { %1469 = vmatpush.bf16.msra.mxu1 %v1951_v25  ;;  %v2003_v25 = vor.u32 %v2355_v16, %v2000_v19  ;;  %v1824_v52 = vld [vmem:[%s2849_s9 + $0x58] sm:$0xf0]  ;;  %v2227_v54 = vor.u32 %v2411_v46, %v2224_v47  ;;  %v2307_v0 = vld [vmem:[%s2849_s9 + $0x2c] sm:$0xf] }
  0xf6   : > { %1483 = vmatpush.bf16.msra.mxu2 %v2079_v26  ;;  %v2131_v26 = vor.u32 %v2387_v20, %v2128_v21  ;;  %v2080_v57 = vld [vmem:[%s2849_s9 + $0x258] sm:$0xf0]  ;;  %v2339_v2 = vld [vmem:[%s2849_s9 + $0x12c] sm:$0xf] }
  0xf7   : > { %1497 = vmatpush.bf16.msra.mxu3 %v2207_v30  ;;  %v2259_v30 = vor.u32 %v2419_v22, %v2256_v23  ;;  %v1808_v1 = vld [vmem:[%s2849_s9 + $0x38] sm:$0xf0]  ;;  %v2371_v6 = vld [vmem:[%s2849_s9 + $0x22c] sm:$0xf] }
  0xf8   : > { %1456 = vmatpush.bf16.msra.mxu0 %v1807_v36  ;;  %v1859_v36 = vor.u32 %v2319_v27, %v1856_v28  ;;  %v1936_v4 = vld [vmem:[%s2849_s9 + $0x138] sm:$0xf0]  ;;  %v2403_v8 = vld [vmem:[%s2849_s9 + $0x32c] sm:$0xf] }
  0xf9   : > { %1470 = vmatpush.bf16.msra.mxu1 %v1935_v39  ;;  %v2315_v39 = vld [vmem:[%s2849_s9 + $0x6c] sm:$0xf]  ;;  %v2064_v7 = vld [vmem:[%s2849_s9 + $0x238] sm:$0xf0] }
  0xfa   : > { %1484 = vmatpush.bf16.msra.mxu2 %v2063_v40  ;;  %v1840_v40 = vld [vmem:[%s2849_s9 + $0x78] sm:$0xf0]  ;;  %v2303_v14 = vld [vmem:[%s2849_s9 + $0xc] sm:$0xf] }
  0xfb   : > { %1498 = vmatpush.bf16.msra.mxu3 %v2191_v44  ;;  %v2379_v44 = vld [vmem:[%s2849_s9 + $0x26c] sm:$0xf]  ;;  %v1843_v48 = vor.u32 %v2315_v39, %v1840_v40  ;;  %v2192_v9 = vld [vmem:[%s2849_s9 + $0x338] sm:$0xf0] }
  0xfc   : > { %1457 = vmatpush.bf16.msra.mxu0 %v1791_v51  ;;  %v2099_v50 = vor.u32 %v2379_v44, %v2096_v45  ;;  %v2311_v51 = vld [vmem:[%s2849_s9 + $0x4c] sm:$0xf]  ;;  %v1792_v15 = vld [vmem:[%s2849_s9 + $0x18] sm:$0xf0] }
  0xfd   : > { %1471 = vmatpush.bf16.msra.mxu1 %v1919_v55  ;;  %v1952_v55 = vld [vmem:[%s2849_s9 + $0x158] sm:$0xf0]  ;;  %v2335_v16 = vld [vmem:[%s2849_s9 + $0x10c] sm:$0xf] }
  0xfe   : > { %1485 = vmatpush.bf16.msra.mxu2 %v2047_v56  ;;  %v2375_v56 = vld [vmem:[%s2849_s9 + $0x24c] sm:$0xf]  ;;  %v1920_v19 = vld [vmem:[%s2849_s9 + $0x118] sm:$0xf0] }
  0xff   : > { %1499 = vmatpush.bf16.msra.mxu3 %v2175_v60  ;;  %1458 = vmatmul.bf16.vlgmr.msra.gmra.mxu0 %v2965_v10  ;;  %v2208_v60 = vld [vmem:[%s2849_s9 + $0x358] sm:$0xf0]  ;;  %v2367_v20 = vld [vmem:[%s2849_s9 + $0x20c] sm:$0xf] }
 0x100   : > { %1506 = vmatpush.bf16.msrb.mxu0 %v1907_v61  ;;  %1472 = vmatmul.bf16.vlgmr.msra.gmra.mxu1 %v2973_v17  ;;  %v1827_v61 = vor.u32 %v2311_v51, %v1824_v52  ;;  %v2048_v21 = vld [vmem:[%s2849_s9 + $0x218] sm:$0xf0]  ;;  %v2399_v22 = vld [vmem:[%s2849_s9 + $0x30c] sm:$0xf] }
 0x101   : > { %1520 = vmatpush.bf16.msrb.mxu1 %v2035_v62  ;;  %1486 = vmatmul.bf16.vlgmr.msra.gmra.mxu2 %v2941_v59  ;;  %v1955_v62 = vor.u32 %v2343_v53, %v1952_v55  ;;  %v2176_v23 = vld [vmem:[%s2849_s9 + $0x318] sm:$0xf0]  ;;  %s1762_s9 = sshll.u32 %s2501_s17, 2 }
 0x102   : > { %1534 = vmatpush.bf16.msrb.mxu2 %v2163_v63  ;;  %1500 = vmatmul.bf16.vlgmr.msra.gmra.mxu3 %v2954_v5  ;;  %v2083_v63 = vor.u32 %v2375_v56, %v2080_v57  ;;  %v2179_v27 = vor.u32 %v2399_v22, %v2176_v23  ;;  %p535_p11 = scmp.lt.s32.totalorder %s1762_s9, 31 }
 0x103   : > { %1548 = vmatpush.bf16.msrb.mxu3 %v2291_v3  ;;  %v2211_v3 = vor.u32 %v2407_v58, %v2208_v60 }
 0x104   : > { %1507 = vmatpush.bf16.msrb.mxu0 %v1891_v11  ;;  %v1811_v11 = vor.u32 %v2307_v0, %v1808_v1  ;;  %s3220_s9 = smov (!%p535_p11, %s1762_s9), 31 }
 0x105   : > { %1521 = vmatpush.bf16.msrb.mxu1 %v2019_v12  ;;  %v1939_v12 = vor.u32 %v2339_v2, %v1936_v4  ;;  %s537_s12 = scalar_lea.vmem %s3209_s2, %s3220_s9  ;;  %s542_s21 = scalar_lea.vmem %s3210_s3, %s3220_s9 }
 0x106   : > { %1535 = vmatpush.bf16.msrb.mxu2 %v2147_v13  ;;  %v2067_v13 = vor.u32 %v2371_v6, %v2064_v7  ;;  %v3165_v39 = vld [vmem:[%s542_s21] sm:$0xf] }
 0x107   : > { %1549 = vmatpush.bf16.msrb.mxu3 %v2275_v18  ;;  %v2195_v18 = vor.u32 %v2403_v8, %v2192_v9 }
 0x108   : > { %1508 = vmatpush.bf16.msrb.mxu0 %v1875_v24  ;;  %v1795_v24 = vor.u32 %v2303_v14, %v1792_v15 }
 0x109   : > { %1522 = vmatpush.bf16.msrb.mxu1 %v2003_v25  ;;  %v1923_v25 = vor.u32 %v2335_v16, %v1920_v19 }
 0x10a   : > { %1536 = vmatpush.bf16.msrb.mxu2 %v2131_v26  ;;  %v2051_v26 = vor.u32 %v2367_v20, %v2048_v21 }
 0x10b   : > { %1550 = vmatpush.bf16.msrb.mxu3 %v2259_v30 }
 0x10c   : > { %1509 = vmatpush.bf16.msrb.mxu0 %v1859_v36 }
 0x10d   : > { %1523 = vmatpush.bf16.msrb.mxu1 %v1987_v37 }
 0x10e   : > { %1537 = vmatpush.bf16.msrb.mxu2 %v2115_v38 }
 0x10f   : > { %1551 = vmatpush.bf16.msrb.mxu3 %v2243_v42  ;;  %v1582_v42 = vperm.slane %v3165_v39, 0 }
 0x110   : > { %1510 = vmatpush.bf16.msrb.mxu0 %v1843_v48 }
 0x111   : > { %1524 = vmatpush.bf16.msrb.mxu1 %v1971_v49 }
 0x112   : > { %1538 = vmatpush.bf16.msrb.mxu2 %v2099_v50  ;;  %v1583_v50 = vperm.slane %v3165_v39, 1 }
 0x113   : > { %1552 = vmatpush.bf16.msrb.mxu3 %v2227_v54 }
 0x114   : > { %1511 = vmatpush.bf16.msrb.mxu0 %v1827_v61 }
 0x115   : > { %1525 = vmatpush.bf16.msrb.mxu1 %v1955_v62 }
 0x116   : > { %1539 = vmatpush.bf16.msrb.mxu2 %v2083_v63 }
 0x117   : > { %1553 = vmatpush.bf16.msrb.mxu3 %v2211_v3 }
 0x118   : > { %1512 = vmatpush.bf16.msrb.mxu0 %v1811_v11 }
 0x119   : > { %1526 = vmatpush.bf16.msrb.mxu1 %v1939_v12 }
 0x11a   : > { %1540 = vmatpush.bf16.msrb.mxu2 %v2067_v13 }
 0x11b   : > { %1554 = vmatpush.bf16.msrb.mxu3 %v2195_v18 }
 0x11c   : > { %1513 = vmatpush.bf16.msrb.mxu0 %v1795_v24 }
 0x11d   : > { %1527 = vmatpush.bf16.msrb.mxu1 %v1923_v25 }
 0x11e   : > { %1541 = vmatpush.bf16.msrb.mxu2 %v2051_v26 }
 0x11f   : > { %1555 = vmatpush.bf16.msrb.mxu3 %v2179_v27  ;;  %1514 = vmatmul.bf16.vlgmr.msrb.gmra.mxu0 %v2965_v10 }
 0x120   : > { %1528 = vmatmul.bf16.vlgmr.msrb.gmra.mxu1 %v2973_v17 }
 0x121   : > { %1542 = vmatmul.bf16.vlgmr.msrb.gmra.mxu2 %v2941_v59  ;;  %v3162_v59 = vld [vmem:[%s537_s12] sm:$0xf] }
 0x122   : > { %1556 = vmatmul.bf16.vlgmr.msrb.gmra.mxu3 %v2954_v5  ;;  %v1564_v38 = vperm.slane %v3162_v59, 0  ;;  %v1565_v48 = vperm.slane %v3162_v59, 1  ;;  %v1566_v25 = vperm.slane %v3162_v59, 2 }
 0x13f   : > { %v1347_v28 = vpop.f32.mrf.mxu0 }
 0x140   : > { %v1361_v29 = vpop.f32.mrf.mxu1 }
 0x141   : > { %v1362_v34 = vadd.f32 %v1361_v29, %v1347_v28  ;;  %v1584_v28 = vperm.slane %v3165_v39, 2 }
 0x144   : > { %v1375_v30 = vpop.f32.mrf.mxu2 }
 0x145   : > { %v1376_v17 = vadd.f32 %v1375_v30, %v1362_v34  ;;  %v1567_v34 = vperm.slane %v3162_v59, 3 }
 0x147   : > { %v1389_v31 = vpop.f32.mrf.mxu3  ;;  %v1349_v32 = vpop.f32.mrf.mxu0 }
 0x148   : > { %v1363_v33 = vpop.f32.mrf.mxu1  ;;  %v1390_v37 = vadd.f32 %v1389_v31, %v1376_v17 }
 0x149   : > { %v1364_v40 = vadd.f32 %v1363_v33, %v1349_v32 }
 0x14a   : > { %v1572_v44 = vmul.f32 %v1564_v38, %v1390_v37 }
 0x14c   : > { %v1377_v35 = vpop.f32.mrf.mxu2  ;;  %v1590_v53 = vadd.f32 %v1582_v42, %v1572_v44 }
 0x14d   : > { %v1378_v45 = vadd.f32 %v1377_v35, %v1364_v40 }
 0x14e   : > { %v1598_v60 = vmax.f32 %v1590_v53, 0.0 }
 0x14f   : > { %v1391_v10 = vpop.f32.mrf.mxu3 }
 0x150   : > { %v1392_v54 = vadd.f32 %v1391_v10, %v1378_v45  ;;  %v1585_v10 = vperm.slane %v3165_v39, 3 }
 0x152   : > { %v1576_v61 = vmul.f32 %v1564_v38, %v1392_v54 }
 0x154   : > { %v1594_v3 = vadd.f32 %v1582_v42, %v1576_v61 }
 0x156   : > { %v1602_v7 = vmax.f32 %v1594_v3, 0.0 }
 0x15c   : > { %v1403_v5 = vpop.f32.mrf.mxu0 }
 0x15d   : > { %v1417_v36 = vpop.f32.mrf.mxu1 }
 0x15e   : > { %v1418_v41 = vadd.f32 %v1417_v36, %v1403_v5 }
 0x164   : > { %v1431_v43 = vpop.f32.mrf.mxu2  ;;  %v1405_v51 = vpop.f32.mrf.mxu0 }
 0x165   : > { %v1432_v46 = vadd.f32 %v1431_v43, %v1418_v41  ;;  %v1445_v47 = vpop.f32.mrf.mxu3  ;;  %v1419_v52 = vpop.f32.mrf.mxu1 }
 0x166   : > { %v1420_v56 = vadd.f32 %v1419_v52, %v1405_v51 }
 0x167   : > { %v1446_v49 = vadd.f32 %v1445_v47, %v1432_v46 }
 0x169   : > { %v1573_v55 = vmul.f32 %v1565_v48, %v1446_v49 }
 0x16b   : > { %v1591_v57 = vadd.f32 %v1583_v50, %v1573_v55 }
 0x16c   : > { %v1433_v58 = vpop.f32.mrf.mxu2 }
 0x16d   : > { %v1599_v62 = vmax.f32 %v1591_v57, 0.0  ;;  %v1434_v63 = vadd.f32 %v1433_v58, %v1420_v56  ;;  %v1447_v0 = vpop.f32.mrf.mxu3 }
 0x16f   : > { %v1606_v1 = vpack.c.bf16 %v1599_v62, %v1598_v60  ;;  %v1448_v2 = vadd.f32 %v1447_v0, %v1434_v63 }
 0x171   : > { %1610 = vst [vmem:[%s3172_s23] sm:$0xff] %v1606_v1  ;;  %v1577_v4 = vmul.f32 %v1565_v48, %v1448_v2 }
 0x173   : > { %v1595_v6 = vadd.f32 %v1583_v50, %v1577_v4 }
 0x175   : > { %v1603_v8 = vmax.f32 %v1595_v6, 0.0 }
 0x177   : > { %v1608_v9 = vpack.c.bf16 %v1603_v8, %v1602_v7 }
 0x178   : > { %v1639_v54 = vld [vmem:[%s3172_s23] sm:$0xff] (%p2571_p6) }
 0x179   : > { %1612 = vst [vmem:[%s3172_s23 + $0x10] sm:$0xff] %v1608_v9 }
 0x17a   : > { %1640 = vst [vmem:[%s1626_s27] sm:$0xff] (%p2571_p6), %v1639_v54 }
 0x17c   : > { %v1459_v11 = vpop.f32.mrf.mxu0 }
 0x17d   : > { %v1473_v12 = vpop.f32.mrf.mxu1 }
 0x17e   : > { %v1474_v18 = vadd.f32 %v1473_v12, %v1459_v11 }
 0x180   : > { %v1643_v56 = vld [vmem:[%s3172_s23 + $0x10] sm:$0xff] (%p2571_p6) }
 0x181   : > { %1644 = vst [vmem:[%s1626_s27 + $0x80] sm:$0xff] (%p2571_p6), %v1643_v56 }
 0x184   : > { %v1487_v13 = vpop.f32.mrf.mxu2  ;;  %v1461_v15 = vpop.f32.mrf.mxu0 }
 0x185   : > { %v1501_v14 = vpop.f32.mrf.mxu3  ;;  %v1475_v16 = vpop.f32.mrf.mxu1  ;;  %v1488_v20 = vadd.f32 %v1487_v13, %v1474_v18 }
 0x186   : > { %v1476_v26 = vadd.f32 %v1475_v16, %v1461_v15 }
 0x187   : > { %v1502_v24 = vadd.f32 %v1501_v14, %v1488_v20 }
 0x189   : > { %v1574_v30 = vmul.f32 %v1566_v25, %v1502_v24 }
 0x18b   : > { %v1592_v36 = vadd.f32 %v1584_v28, %v1574_v30 }
 0x18c   : > { %v1489_v19 = vpop.f32.mrf.mxu2 }
 0x18d   : > { %v1503_v21 = vpop.f32.mrf.mxu3  ;;  %v1490_v31 = vadd.f32 %v1489_v19, %v1476_v26  ;;  %v1600_v43 = vmax.f32 %v1592_v36, 0.0 }
 0x18f   : > { %v1504_v37 = vadd.f32 %v1503_v21, %v1490_v31 }
 0x191   : > { %v1578_v44 = vmul.f32 %v1566_v25, %v1504_v37 }
 0x193   : > { %v1596_v49 = vadd.f32 %v1584_v28, %v1578_v44 }
 0x195   : > { %v1604_v51 = vmax.f32 %v1596_v49, 0.0 }
 0x19c   : > { %v1515_v22 = vpop.f32.mrf.mxu0 }
 0x19d   : > { %v1529_v23 = vpop.f32.mrf.mxu1 }
 0x19e   : > { %v1530_v27 = vadd.f32 %v1529_v23, %v1515_v22 }
 0x1a4   : > { %v1543_v29 = vpop.f32.mrf.mxu2  ;;  %v1517_v17 = vpop.f32.mrf.mxu0 }
 0x1a5   : > { %v1544_v32 = vadd.f32 %v1543_v29, %v1530_v27  ;;  %v1557_v33 = vpop.f32.mrf.mxu3  ;;  %v1531_v5 = vpop.f32.mrf.mxu1 }
 0x1a6   : > { %v1532_v41 = vadd.f32 %v1531_v5, %v1517_v17 }
 0x1a7   : > { %v1558_v35 = vadd.f32 %v1557_v33, %v1544_v32 }
 0x1a9   : > { %v1575_v38 = vmul.f32 %v1567_v34, %v1558_v35 }
 0x1ab   : > { %v1593_v40 = vadd.f32 %v1585_v10, %v1575_v38 }
 0x1ac   : > { %v1545_v42 = vpop.f32.mrf.mxu2 }
 0x1ad   : > { %v1601_v45 = vmax.f32 %v1593_v40, 0.0  ;;  %v1546_v46 = vadd.f32 %v1545_v42, %v1532_v41  ;;  %v1559_v47 = vpop.f32.mrf.mxu3 }
 0x1af   : > { %v1607_v48 = vpack.c.bf16 %v1601_v45, %v1600_v43  ;;  %v1560_v59 = vadd.f32 %v1559_v47, %v1546_v46 }
 0x1b1   : > { %1611 = vst [vmem:[%s3172_s23 + $0x8] sm:$0xff] %v1607_v48  ;;  %v1579_v39 = vmul.f32 %v1567_v34, %v1560_v59 }
 0x1b3   : > { %v1597_v50 = vadd.f32 %v1585_v10, %v1579_v39 }
 0x1b5   : > { %v1605_v52 = vmax.f32 %v1597_v50, 0.0  ;;  %1620 = sbr.rel (!%p2571_p6) target bundleno = 450 (0x1c2), region = 63 }
 0x1b7   : > { %v1609_v53 = vpack.c.bf16 %v1605_v52, %v1604_v51 }
 0x1b8   : > { %v1641_v55 = vld [vmem:[%s3172_s23 + $0x8] sm:$0xff] (%p2571_p6) }
 0x1b9   : > { %1613 = vst [vmem:[%s3172_s23 + $0x18] sm:$0xff] %v1609_v53 }
 0x1ba   : > { %1642 = vst [vmem:[%s1626_s27 + $0x8] sm:$0xff] %v1641_v55 }
 0x1c0   : > { %v1645_v57 = vld [vmem:[%s3172_s23 + $0x18] sm:$0xff] }
 0x1c1   : > { %1646 = vst [vmem:[%s1626_s27 + $0x88] sm:$0xff] %v1645_v57 }
 0x1c2 PF: > { %s14_s19 = sadd.s32 1, %s2509_s19   ;;  %s3213_s15 = smov %s2497_s16 }
 0x1c3   : > { %p11_p12 = scmp.ge.s32.totalorder %s14_s19, 10   ;;  %s3214_s16 = smov %s2576_s25 }
 0x1c4   : > { %s3215_s17 = smov %s2505_s18  ;;  %s3216_s18 = smov %s3218_s20 }
 0x1c5   :  { %13 = sbr.rel (!%p11_p12) target bundleno = 3 (0x3), region = 126 }

// kernel: vgg_forward.24
= control target key start
LH: loop header
LB: loop body
LE: loop exit
PB: predicated region body
PF: predicated region fallthrough
CT: control target
= control target key end

     0   :  { %s5032_s0 = inlined_call_operand.vmem [shape: bf16[16,4096], index: 0, kind: input, shape index: {}]   ;;  %s5033_s1 = inlined_call_operand.hbm [shape: bf16[4096,4096], index: 1, kind: input, shape index: {}]   ;;  %s5034_s2 = inlined_call_operand.vmem [shape: f32[1,4096], index: 2, kind: input, shape index: {}]   ;;  %s5035_s3 = inlined_call_operand.vmem [shape: f32[1,4096], index: 3, kind: input, shape index: {}]   ;;  %s5036_s4 = inlined_call_operand.vmem [shape: bf16[16,4096], index: 4, kind: output, shape index: {}]  }
   0x1   :  { %5041 = sst [smem:[#allocation15_spill]] %s5032_s0 }
   0x2   :  { %5042 = sst [smem:[#allocation16_spill]] %s5036_s4 }
   0x3   :  { %9 = vsyncpa [#allocation5], 0 }
   0x4   :  { %11 = vsyncpa [#allocation5 + $0x1], 0  ;;  %s4239_s15 = smov 0   ;;  %s4241_s16 = smov 0  }
   0x5   :  { %s4243_s17 = smov 0   ;;  %s4245_s18 = smov 0  }
   0x6   :  { %s4247_s19 = smov 0   ;;  %s4249_s20 = smov 0  }
   0x7   :  { %s4251_s21 = smov 0   ;;  %s4253_s22 = smov 0  }
   0x8   :  { %s4255_s23 = smov 0   ;;  %s4257_s24 = smov 0  }
   0x9   :  { %s4259_s25 = smov 0   ;;  %s4261_s26 = smov 0  }
   0xa LB: > { %5043 = sst [smem:[#allocation8_spill]] %s4168_s16  ;;  %s2632_s27 = sadd.s32 4294967295, %s4208_s26   ;;  %s4208_s26 = sphi %s4261_s26, %s17_s26   ;;  %s4204_s25 = sphi %s4259_s25, %s5069_s25   ;;  %s4200_s24 = sphi %s4257_s24, %s5068_s24   ;;  %s4196_s23 = sphi %s4255_s23, %s5067_s23   ;;  %s4192_s22 = sphi %s4253_s22, %s5066_s22   ;;  %s4188_s21 = sphi %s4251_s21, %s5060_s21   ;;  %s4184_s20 = sphi %s4249_s20, %s5059_s20   ;;  %s4180_s19 = sphi %s4247_s19, %s5065_s19   ;;  %s4176_s18 = sphi %s4245_s18, %s5064_s18   ;;  %s4172_s17 = sphi %s4243_s17, %s5063_s17   ;;  %s4168_s16 = sphi %s4241_s16, %s5057_s16   ;;  %s4164_s15 = sphi %s4239_s15, %s5056_s15  }
   0xb   : > { %5044 = sst [smem:[#allocation9_spill]] %s4188_s21  ;;  %s29_s28 = sadd.s32 1, %s4200_s24 }
   0xc   : > { %p30_p0 = scmp.ge.s32.totalorder %s29_s28, 4  ;;  %s32_s29 = sadd.s32 1, %s4204_s25 }
   0xd   : > { %s45_s30 = sadd.s32 1, %s4188_s21  ;;  %p52_p1 = scmp.ne.s32.totalorder %s4188_s21, %s4184_s20 }
   0xe   : > { %s5071_s28 = smov (%p30_p0, %s29_s28), 0  ;;  %s5073_s29 = smov (!%p30_p0, %s32_s29), %s4204_s25 }
   0xf   : > { %5045 = sst [smem:[#allocation10_spill]] %s5071_s28  ;;  %s41_s5 = ssub.s32 %s4200_s24, %s5071_s28 }
  0x10   : > { %p53_p2 = scmp.eq.s32.totalorder %s4208_s26, 0  ;;  %p34_p3 = scmp.ge.s32.totalorder %s5073_s29, 8 }
  0x11   : > { %p43_p4 = scmp.eq.s32.totalorder %s41_s5, 0  ;;  %s73_s7 = sadd.s32 1, %s4180_s19 }
  0x12   : > { %p4311_p5 = por %p53_p2, %p52_p1  ;;  %s5075_s29 = smov (%p34_p3, %s5073_s29), 0 }
  0x13   : > { %5047 = sst [smem:[#allocation11_spill]] %s5075_s29  ;;  %s69_s9 = ssub.s32 %s4204_s25, %s5075_s29 }
  0x14   : > { %s4319_s8 = scalar_select %p43_p4, %s4188_s21, %s45_s30  }
  0x15   : > { %p80_p6 = scmp.ne.s32.totalorder %s4180_s19, %s4176_s18  ;;  %s70_s10 = sor.u32 %s69_s9, %s41_s5 }
  0x16   : > { %5048 = sst [smem:[#allocation12_spill]] %s4319_s8  ;;  %p86_p7 = scmp.ne.s32.totalorder %s4176_s18, %s4172_s17 }
  0x17   : > { %p71_p8 = scmp.eq.s32.totalorder %s70_s10, 0  ;;  %p4327_p9 = por %p80_p6, %p53_p2 }
  0x18   : > { %p87_p10 = scmp.eq.s32.totalorder %s2632_s27, 0  ;;  %p151_p11 = scmp.eq.s32.totalorder %s69_s9, 0 }
  0x19   : > { %s4334_s12 = scalar_select %p71_p8, %s4180_s19, %s73_s7  }
  0x1a   : > { %p4336_p12 = por %p87_p10, %p86_p7  ;;  %s153_s14 = sadd.s32 1, %s4168_s16 }
  0x1b   : > { %5050 = sst [smem:[#allocation13_spill]] %s4334_s12  ;;  %p163_p13 = scmp.ne.s32.totalorder %s4168_s16, %s4164_s15 }
  0x1c   : > { %s4342_s30 = scalar_select %p151_p11, %s4168_s16, %s153_s14  }
  0x1d   : > { %p164_p0 = scmp.eq.s32.totalorder %s2632_s27, 31  ;;  %p2635_p2 = scmp.ge.s32.totalorder %s4208_s26, 32 }
  0x1e   : > { %5052 = sst [smem:[#allocation14_spill]] %s4342_s30 }
  0x1f   : > { %p4348_p1 = por %p164_p0, %p163_p13  ;;  %186 = sbr.rel (%p2635_p2) target bundleno = 62 (0x3e), region = 16 }
  0x24   : > { %189 = sbr.rel (!%p4311_p5) target bundleno = 54 (0x36), region = 20  ;;  %s191_s5 = sand.u32 (%p4311_p5), 1, %s4188_s21  }
  0x25   : > { %s3713_s7 = sshll.u32 (%p4311_p5), %s4200_s24, 5  ;;  %s2636_s9 = sshll.u32 (%p4311_p5), %s191_s5, 6 }
  0x26   : > { %s5054_s0 = sld [smem:[#allocation15_spill]] (%p4311_p5)  ;;  %s193_s27 = scalar_lea.vmem (%p4311_p5), [#allocation3], %s2636_s9 }
  0x2c   : > { %s199_s29 = scalar_lea.vmem %s5054_s0, %s3713_s7 }
  0x2d   : > { %v212_v0 = vld [vmem:[%s199_s29] sm:$0xff]  ;;  %v214_v1 = vld [vmem:[%s199_s29 + $0x8] sm:$0xff]  ;;  %v216_v2 = vld [vmem:[%s199_s29 + $0x10] sm:$0xff] }
  0x2e   : > { %213 = vst [vmem:[%s193_s27] sm:$0xff] %v212_v0  ;;  %v218_v3 = vld [vmem:[%s199_s29 + $0x18] sm:$0xff]  ;;  %v220_v4 = vld [vmem:[%s199_s29 + $0x80] sm:$0xff]  ;;  %v222_v5 = vld [vmem:[%s199_s29 + $0x88] sm:$0xff] }
  0x2f   : > { %215 = vst [vmem:[%s193_s27 + $0x8] sm:$0xff] %v214_v1  ;;  %v224_v6 = vld [vmem:[%s199_s29 + $0x90] sm:$0xff]  ;;  %v226_v7 = vld [vmem:[%s199_s29 + $0x98] sm:$0xff] }
  0x30   : > { %217 = vst [vmem:[%s193_s27 + $0x10] sm:$0xff] %v216_v2 }
  0x31   : > { %219 = vst [vmem:[%s193_s27 + $0x18] sm:$0xff] %v218_v3 }
  0x32   : > { %221 = vst [vmem:[%s193_s27 + $0x20] sm:$0xff] %v220_v4 }
  0x33   : > { %223 = vst [vmem:[%s193_s27 + $0x28] sm:$0xff] %v222_v5 }
  0x34   : > { %225 = vst [vmem:[%s193_s27 + $0x30] sm:$0xff] %v224_v6 }
  0x35   : > { %227 = vst [vmem:[%s193_s27 + $0x38] sm:$0xff] %v226_v7 }
  0x36 PF: > { %s234_s6 = sand.u32 1, %s4180_s19   ;;  %s2641_s5 = sshll.u32 %s4204_s25, 2 }
  0x37   : > { %s2639_s7 = sshll.u32 %s234_s6, 11  ;;  %s3714_s9 = sshll.u32 %s4200_s24, 12 }
  0x38   : > { %s244_s10 = sadd.s32 %s3714_s9, %s2641_s5  ;;  %s238_s14 = scalar_lea.vmem [#allocation4], %s2639_s7 }
  0x39   : > { %s249_s0 = sshll.u32 %s238_s14, 4  ;;  %s2643_s28 = sshll.u32 %s244_s10, 2  ;;  %s250_s0 = int_to_ptr.vmem [resolvable:$true] %s249_s0 }
  0x3a   : > { %s246_s29 = scalar_lea.hbm %s5033_s1, %s2643_s28  ;;  %s235_s27 = scalar_lea.sflag [#allocation5], %s234_s6 }
  0x3b   : > { %s247_s12 = sshll.u32 %s246_s29, 4  ;;  %s4210_s30 = smov 2048   ;;  %s248_s12 = int_to_ptr.hbm [resolvable:$true] %s247_s12 }
  0x3c   : > { %s4211_s16 = smov 256   ;;  %s4212_s4 = smov 16  }
  0x3d   : > { %3980 = dma.hbm_to_vmem [thread:$0]  (%p4327_p9), %s248_s12, 32768, %s250_s0, %s235_s27, %s4210_s30, %s4211_s16, %s4212_s4  }
  0x3e PF: > { %p2644_p3 = scmp.ge.s32.totalorder %s4208_s26, 1  ;;  %p273_p4 = scmp.lt.s32.totalorder %s4208_s26, 33 }
  0x40   : > { %p274_p5 = pnand %p2644_p3, %p273_p4 }
  0x41   : > { %s280_s21 = sand.u32 (!%p274_p5), 1, %s4184_s20   ;;  %s286_s28 = sand.u32 (!%p274_p5), 1, %s4176_s18  }
  0x42   : > { %277 = sbr.rel (%p274_p5) target bundleno = 528 (0x210), region = 55  ;;  %s2645_s8 = sshll.u32 (!%p274_p5), %s280_s21, 6 }
  0x43   : > { %s2646_s5 = sshll.u32 (!%p274_p5), %s286_s28, 11  ;;  %s4372_s6 = scalar_lea.vmem (!%p274_p5), [#allocation3], %s2645_s8 }
  0x44   : > { %s287_s7 = scalar_lea.sflag (!%p274_p5), [#allocation5], %s286_s28  ;;  %s4374_s9 = scalar_lea.vmem (!%p274_p5), [#allocation4], %s2646_s5 }
  0x47   : > { %4159 = dma.done.wait (%p4336_p12), %s287_s7, 32768  }
  0x48   : > { %4161 = vsyncadd (%p4336_p12), %s287_s7, 4294934528  ;;  %s324_s0 = sand.u32 1, %s4164_s15   ;;  %s2648_s4 = sshll.u32 %s4196_s23, 2 }
  0x49   : > { %s2647_s16 = sshll.u32 %s324_s0, 5  ;;  %p332_p6 = scmp.lt.s32.totalorder %s2648_s4, 31 }
  0x4a   : > { %s4392_s13 = scalar_lea.vmem [#allocation6], %s2647_s16  ;;  %p2650_p7 = scmp.ne.s32.totalorder %s4192_s22, 0 }
  0x4b   : > { %s5077_s4 = smov (!%p332_p6, %s2648_s4), 31 }
  0x4c   : > { %s334_s12 = scalar_lea.vmem %s5034_s2, %s5077_s4  ;;  %s339_s14 = scalar_lea.vmem %s5035_s3, %s5077_s4 }
  0x4d   : > { %346 = sbr.rel (%p2650_p7) target bundleno = 91 (0x5b), region = 67 }
  0x52   : > { %v4213_v8 = vmov 0.0  }
  0x53   : > { %347 = vst [vmem:[#allocation2 + $0x30] sm:$0xff] %v4213_v8 }
  0x54   : > { %348 = vst [vmem:[#allocation2] sm:$0xff] %v4213_v8 }
  0x55   : > { %349 = vst [vmem:[#allocation2 + $0x18] sm:$0xff] %v4213_v8 }
  0x56   : > { %350 = vst [vmem:[#allocation2 + $0x10] sm:$0xff] %v4213_v8 }
  0x57   : > { %351 = vst [vmem:[#allocation2 + $0x8] sm:$0xff] %v4213_v8 }
  0x58   : > { %352 = vst [vmem:[#allocation2 + $0x20] sm:$0xff] %v4213_v8 }
  0x59   : > { %353 = vst [vmem:[#allocation2 + $0x28] sm:$0xff] %v4213_v8 }
  0x5a   : > { %354 = vst [vmem:[#allocation2 + $0x38] sm:$0xff] %v4213_v8 }
  0x5b PF: > { %v2797_v9 = vld [vmem:[%s4374_s9 + $0xe0] sm:$0xf]  ;;  %v3753_v10 = vld [vmem:[%s4374_s9 + $0xec] sm:$0xf0]  ;;  %p3707_p8 = scmp.ne.s32.totalorder %s4192_s22, 3 }
  0x5c   : > { %v2925_v11 = vld [vmem:[%s4374_s9 + $0x1e0] sm:$0xf]  ;;  %v2798_v12 = vor.u32 %v3753_v10, %v2797_v9  ;;  %v3785_v13 = vld [vmem:[%s4374_s9 + $0x1ec] sm:$0xf0] }
  0x5d   : > { %v3053_v14 = vld [vmem:[%s4374_s9 + $0x2e0] sm:$0xf]  ;;  %v3817_v15 = vld [vmem:[%s4374_s9 + $0x2ec] sm:$0xf0]  ;;  %v2926_v16 = vor.u32 %v3785_v13, %v2925_v11 }
  0x5e   : > { %v3054_v17 = vor.u32 %v3817_v15, %v3053_v14  ;;  %v3181_v18 = vld [vmem:[%s4374_s9 + $0x3e0] sm:$0xf]  ;;  %v3849_v19 = vld [vmem:[%s4374_s9 + $0x3ec] sm:$0xf0]  ;;  %1947 = vmatpush.bf16.msra.mxu0 %v2798_v12 }
  0x5f   : > { %v2781_v20 = vld [vmem:[%s4374_s9 + $0xc0] sm:$0xf]  ;;  %v3182_v21 = vor.u32 %v3849_v19, %v3181_v18  ;;  %v3749_v22 = vld [vmem:[%s4374_s9 + $0xcc] sm:$0xf0]  ;;  %1961 = vmatpush.bf16.msra.mxu1 %v2926_v16 }
  0x60   : > { %v2909_v23 = vld [vmem:[%s4374_s9 + $0x1c0] sm:$0xf]  ;;  %v3781_v24 = vld [vmem:[%s4374_s9 + $0x1cc] sm:$0xf0]  ;;  %1975 = vmatpush.bf16.msra.mxu2 %v3054_v17  ;;  %v2782_v25 = vor.u32 %v3749_v22, %v2781_v20 }
  0x61   : > { %v2910_v26 = vor.u32 %v3781_v24, %v2909_v23  ;;  %v3037_v27 = vld [vmem:[%s4374_s9 + $0x2c0] sm:$0xf]  ;;  %v3813_v28 = vld [vmem:[%s4374_s9 + $0x2cc] sm:$0xf0]  ;;  %1989 = vmatpush.bf16.msra.mxu3 %v3182_v21 }
  0x62   : > { %v3165_v29 = vld [vmem:[%s4374_s9 + $0x3c0] sm:$0xf]  ;;  %v3038_v30 = vor.u32 %v3813_v28, %v3037_v27  ;;  %v3845_v31 = vld [vmem:[%s4374_s9 + $0x3cc] sm:$0xf0]  ;;  %1948 = vmatpush.bf16.msra.mxu0 %v2782_v25 }
  0x63   : > { %v2765_v32 = vld [vmem:[%s4374_s9 + $0xa0] sm:$0xf]  ;;  %v3745_v33 = vld [vmem:[%s4374_s9 + $0xac] sm:$0xf0]  ;;  %v3166_v34 = vor.u32 %v3845_v31, %v3165_v29  ;;  %1962 = vmatpush.bf16.msra.mxu1 %v2910_v26 }
  0x64   : > { %v2893_v35 = vld [vmem:[%s4374_s9 + $0x1a0] sm:$0xf]  ;;  %v3777_v36 = vld [vmem:[%s4374_s9 + $0x1ac] sm:$0xf0]  ;;  %v2766_v38 = vor.u32 %v3745_v33, %v2765_v32  ;;  %1976 = vmatpush.bf16.msra.mxu2 %v3038_v30 }
  0x65   : > { %v3021_v37 = vld [vmem:[%s4374_s9 + $0x2a0] sm:$0xf]  ;;  %v3809_v39 = vld [vmem:[%s4374_s9 + $0x2ac] sm:$0xf0]  ;;  %v2894_v42 = vor.u32 %v3777_v36, %v2893_v35  ;;  %1990 = vmatpush.bf16.msra.mxu3 %v3166_v34 }
  0x66   : > { %v3149_v40 = vld [vmem:[%s4374_s9 + $0x3a0] sm:$0xf]  ;;  %v3841_v41 = vld [vmem:[%s4374_s9 + $0x3ac] sm:$0xf0]  ;;  %v3022_v43 = vor.u32 %v3809_v39, %v3021_v37  ;;  %1949 = vmatpush.bf16.msra.mxu0 %v2766_v38 }
  0x67   : > { %v2749_v44 = vld [vmem:[%s4374_s9 + $0x80] sm:$0xf]  ;;  %v3741_v45 = vld [vmem:[%s4374_s9 + $0x8c] sm:$0xf0]  ;;  %v3150_v47 = vor.u32 %v3841_v41, %v3149_v40  ;;  %1963 = vmatpush.bf16.msra.mxu1 %v2894_v42 }
  0x68   : > { %v2877_v46 = vld [vmem:[%s4374_s9 + $0x180] sm:$0xf]  ;;  %v3773_v48 = vld [vmem:[%s4374_s9 + $0x18c] sm:$0xf0]  ;;  %v2750_v53 = vor.u32 %v3741_v45, %v2749_v44  ;;  %1977 = vmatpush.bf16.msra.mxu2 %v3022_v43 }
  0x69   : > { %v3005_v49 = vld [vmem:[%s4374_s9 + $0x280] sm:$0xf]  ;;  %v3805_v50 = vld [vmem:[%s4374_s9 + $0x28c] sm:$0xf0]  ;;  %v2878_v54 = vor.u32 %v3773_v48, %v2877_v46  ;;  %1991 = vmatpush.bf16.msra.mxu3 %v3150_v47 }
  0x6a   : > { %v3133_v51 = vld [vmem:[%s4374_s9 + $0x380] sm:$0xf]  ;;  %v3837_v52 = vld [vmem:[%s4374_s9 + $0x38c] sm:$0xf0]  ;;  %v3006_v55 = vor.u32 %v3805_v50, %v3005_v49  ;;  %1950 = vmatpush.bf16.msra.mxu0 %v2750_v53 }
  0x6b   : > { %v2733_v56 = vld [vmem:[%s4374_s9 + $0x60] sm:$0xf]  ;;  %v3737_v57 = vld [vmem:[%s4374_s9 + $0x6c] sm:$0xf0]  ;;  %v3134_v59 = vor.u32 %v3837_v52, %v3133_v51  ;;  %1964 = vmatpush.bf16.msra.mxu1 %v2878_v54 }
  0x6c   : > { %v2861_v58 = vld [vmem:[%s4374_s9 + $0x160] sm:$0xf]  ;;  %v3769_v60 = vld [vmem:[%s4374_s9 + $0x16c] sm:$0xf0]  ;;  %v2734_v1 = vor.u32 %v3737_v57, %v2733_v56  ;;  %1978 = vmatpush.bf16.msra.mxu2 %v3006_v55 }
  0x6d   : > { %v2989_v61 = vld [vmem:[%s4374_s9 + $0x260] sm:$0xf]  ;;  %v3801_v62 = vld [vmem:[%s4374_s9 + $0x26c] sm:$0xf0]  ;;  %v2862_v2 = vor.u32 %v3769_v60, %v2861_v58  ;;  %1992 = vmatpush.bf16.msra.mxu3 %v3134_v59 }
  0x6e   : > { %v3117_v63 = vld [vmem:[%s4374_s9 + $0x360] sm:$0xf]  ;;  %v3833_v0 = vld [vmem:[%s4374_s9 + $0x36c] sm:$0xf0]  ;;  %v2990_v3 = vor.u32 %v3801_v62, %v2989_v61  ;;  %1951 = vmatpush.bf16.msra.mxu0 %v2734_v1 }
  0x6f   : > { %v2717_v4 = vld [vmem:[%s4374_s9 + $0x40] sm:$0xf]  ;;  %v3733_v5 = vld [vmem:[%s4374_s9 + $0x4c] sm:$0xf0]  ;;  %v3118_v7 = vor.u32 %v3833_v0, %v3117_v63  ;;  %1965 = vmatpush.bf16.msra.mxu1 %v2862_v2  ;;  %v2661_v63 = vld [vmem:[%s4372_s6 + $0x8] sm:$0xf] }
  0x70   : > { %v2845_v6 = vld [vmem:[%s4374_s9 + $0x140] sm:$0xf]  ;;  %v3765_v8 = vld [vmem:[%s4374_s9 + $0x14c] sm:$0xf0]  ;;  %v2718_v13 = vor.u32 %v3733_v5, %v2717_v4  ;;  %1979 = vmatpush.bf16.msra.mxu2 %v2990_v3  ;;  %v3720_v4 = vld [vmem:[%s4372_s6 + $0x24] sm:$0xf0] }
  0x71   : > { %v2973_v9 = vld [vmem:[%s4374_s9 + $0x240] sm:$0xf]  ;;  %v3797_v10 = vld [vmem:[%s4374_s9 + $0x24c] sm:$0xf0]  ;;  %v2846_v14 = vor.u32 %v3765_v8, %v2845_v6  ;;  %1993 = vmatpush.bf16.msra.mxu3 %v3118_v7 }
  0x72   : > { %v3101_v11 = vld [vmem:[%s4374_s9 + $0x340] sm:$0xf]  ;;  %v3829_v12 = vld [vmem:[%s4374_s9 + $0x34c] sm:$0xf0]  ;;  %v2974_v15 = vor.u32 %v3797_v10, %v2973_v9  ;;  %1952 = vmatpush.bf16.msra.mxu0 %v2718_v13  ;;  %v4486_v10 = vor.u32 %v3720_v4, %v2661_v63 }
  0x73   : > { %v2701_v16 = vld [vmem:[%s4374_s9 + $0x20] sm:$0xf]  ;;  %v3729_v17 = vld [vmem:[%s4374_s9 + $0x2c] sm:$0xf0]  ;;  %v3102_v19 = vor.u32 %v3829_v12, %v3101_v11  ;;  %1966 = vmatpush.bf16.msra.mxu1 %v2846_v14 }
  0x74   : > { %v2829_v18 = vld [vmem:[%s4374_s9 + $0x120] sm:$0xf]  ;;  %v3761_v20 = vld [vmem:[%s4374_s9 + $0x12c] sm:$0xf0]  ;;  %v2702_v25 = vor.u32 %v3729_v17, %v2701_v16  ;;  %1980 = vmatpush.bf16.msra.mxu2 %v2974_v15  ;;  %v3715_v15 = vld [vmem:[%s4372_s6 + $0x4] sm:$0xf] }
  0x75   : > { %v2957_v21 = vld [vmem:[%s4374_s9 + $0x220] sm:$0xf]  ;;  %v3793_v22 = vld [vmem:[%s4374_s9 + $0x22c] sm:$0xf0]  ;;  %v2830_v28 = vor.u32 %v3761_v20, %v2829_v18  ;;  %1994 = vmatpush.bf16.msra.mxu3 %v3102_v19  ;;  %v2655_v16 = vld [vmem:[%s4372_s6 + $0x20] sm:$0xf0] }
  0x76   : > { %v3085_v23 = vld [vmem:[%s4374_s9 + $0x320] sm:$0xf]  ;;  %v3825_v24 = vld [vmem:[%s4374_s9 + $0x32c] sm:$0xf0]  ;;  %v2958_v29 = vor.u32 %v3793_v22, %v2957_v21  ;;  %1953 = vmatpush.bf16.msra.mxu0 %v2702_v25  ;;  %v3716_v17 = vld [vmem:[%s4372_s6 + $0xc] sm:$0xf]  ;;  %v4496_v19 = vor.u32 %v3715_v15, %v2655_v16 }
  0x77   : > { %v2685_v26 = vld [vmem:[%s4374_s9] sm:$0xf]  ;;  %v3725_v27 = vld [vmem:[%s4374_s9 + $0xc] sm:$0xf0]  ;;  %v3086_v33 = vor.u32 %v3825_v24, %v3085_v23  ;;  %1967 = vmatpush.bf16.msra.mxu1 %v2830_v28  ;;  %v2663_v20 = vld [vmem:[%s4372_s6 + $0x28] sm:$0xf0] }
  0x78   : > { %v2813_v30 = vld [vmem:[%s4374_s9 + $0x100] sm:$0xf]  ;;  %v3757_v31 = vld [vmem:[%s4374_s9 + $0x10c] sm:$0xf0]  ;;  %v2686_v40 = vor.u32 %v3725_v27, %v2685_v26  ;;  %1981 = vmatpush.bf16.msra.mxu2 %v2958_v29  ;;  %v4502_v26 = vor.u32 %v3716_v17, %v2663_v20 }
  0x79   : > { %v2941_v32 = vld [vmem:[%s4374_s9 + $0x200] sm:$0xf]  ;;  %v3789_v34 = vld [vmem:[%s4374_s9 + $0x20c] sm:$0xf0]  ;;  %v2814_v44 = vor.u32 %v3757_v31, %v2813_v30  ;;  %1995 = vmatpush.bf16.msra.mxu3 %v3086_v33 }
  0x7a   : > { %v3069_v35 = vld [vmem:[%s4374_s9 + $0x300] sm:$0xf]  ;;  %v3821_v36 = vld [vmem:[%s4374_s9 + $0x30c] sm:$0xf0]  ;;  %v2942_v45 = vor.u32 %v3789_v34, %v2941_v32  ;;  %1954 = vmatpush.bf16.msra.mxu0 %v2686_v40 }
  0x7b   : > { %v3309_v37 = vld [vmem:[%s4374_s9 + $0x4e0] sm:$0xf]  ;;  %v3881_v38 = vld [vmem:[%s4374_s9 + $0x4ec] sm:$0xf0]  ;;  %v3070_v48 = vor.u32 %v3821_v36, %v3069_v35  ;;  %1968 = vmatpush.bf16.msra.mxu1 %v2814_v44 }
  0x7c   : > { %v3437_v39 = vld [vmem:[%s4374_s9 + $0x5e0] sm:$0xf]  ;;  %v3913_v41 = vld [vmem:[%s4374_s9 + $0x5ec] sm:$0xf0]  ;;  %v3310_v49 = vor.u32 %v3881_v38, %v3309_v37  ;;  %1982 = vmatpush.bf16.msra.mxu2 %v2942_v45 }
  0x7d   : > { %v3565_v42 = vld [vmem:[%s4374_s9 + $0x6e0] sm:$0xf]  ;;  %v3945_v43 = vld [vmem:[%s4374_s9 + $0x6ec] sm:$0xf0]  ;;  %v3438_v52 = vor.u32 %v3913_v41, %v3437_v39  ;;  %1996 = vmatpush.bf16.msra.mxu3 %v3070_v48 }
  0x7e   : > { %v3693_v46 = vld [vmem:[%s4374_s9 + $0x7e0] sm:$0xf]  ;;  %v3977_v47 = vld [vmem:[%s4374_s9 + $0x7ec] sm:$0xf0]  ;;  %v3566_v53 = vor.u32 %v3945_v43, %v3565_v42  ;;  %2003 = vmatpush.bf16.msrb.mxu0 %v3310_v49  ;;  %1969 = vmatmul.bf16.vlgmr.msra.gmra.mxu1 %v4496_v19 }
  0x7f   : > { %v3293_v50 = vld [vmem:[%s4374_s9 + $0x4c0] sm:$0xf]  ;;  %v3877_v51 = vld [vmem:[%s4374_s9 + $0x4cc] sm:$0xf0]  ;;  %v3694_v57 = vor.u32 %v3977_v47, %v3693_v46  ;;  %2017 = vmatpush.bf16.msrb.mxu1 %v3438_v52  ;;  %1983 = vmatmul.bf16.vlgmr.msra.gmra.mxu2 %v4486_v10 }
  0x80   : > { %v3421_v54 = vld [vmem:[%s4374_s9 + $0x5c0] sm:$0xf]  ;;  %v3909_v55 = vld [vmem:[%s4374_s9 + $0x5cc] sm:$0xf0]  ;;  %v3294_v0 = vor.u32 %v3877_v51, %v3293_v50  ;;  %2031 = vmatpush.bf16.msrb.mxu2 %v3566_v53  ;;  %1997 = vmatmul.bf16.vlgmr.msra.gmra.mxu3 %v4502_v26 }
  0x81   : > { %v3549_v56 = vld [vmem:[%s4374_s9 + $0x6c0] sm:$0xf]  ;;  %v3941_v58 = vld [vmem:[%s4374_s9 + $0x6cc] sm:$0xf0]  ;;  %v3422_v5 = vor.u32 %v3909_v55, %v3421_v54  ;;  %2045 = vmatpush.bf16.msrb.mxu3 %v3694_v57 }
  0x82   : > { %v3677_v59 = vld [vmem:[%s4374_s9 + $0x7c0] sm:$0xf]  ;;  %v3973_v60 = vld [vmem:[%s4374_s9 + $0x7cc] sm:$0xf0]  ;;  %v3550_v6 = vor.u32 %v3941_v58, %v3549_v56  ;;  %2004 = vmatpush.bf16.msrb.mxu0 %v3294_v0 }
  0x83   : > { %v2653_v61 = vld [vmem:[%s4372_s6] sm:$0xf]  ;;  %v3873_v2 = vld [vmem:[%s4374_s9 + $0x4ac] sm:$0xf0]  ;;  %v3678_v11 = vor.u32 %v3973_v60, %v3677_v59  ;;  %2018 = vmatpush.bf16.msrb.mxu1 %v3422_v5 }
  0x84   : > { %v3719_v62 = vld [vmem:[%s4372_s6 + $0x1c] sm:$0xf0]  ;;  %v3905_v8 = vld [vmem:[%s4374_s9 + $0x5ac] sm:$0xf0]  ;;  %2032 = vmatpush.bf16.msrb.mxu2 %v3550_v6 }
  0x85   : > { %v3277_v1 = vld [vmem:[%s4374_s9 + $0x4a0] sm:$0xf]  ;;  %v4480_v3 = vor.u32 %v3719_v62, %v2653_v61  ;;  %v3937_v12 = vld [vmem:[%s4374_s9 + $0x6ac] sm:$0xf0]  ;;  %2046 = vmatpush.bf16.msrb.mxu3 %v3678_v11 }
  0x86   : > { %v3405_v7 = vld [vmem:[%s4374_s9 + $0x5a0] sm:$0xf]  ;;  %v3969_v14 = vld [vmem:[%s4374_s9 + $0x7ac] sm:$0xf0]  ;;  %v3278_v18 = vor.u32 %v3873_v2, %v3277_v1 }
  0x87   : > { %v3533_v9 = vld [vmem:[%s4374_s9 + $0x6a0] sm:$0xf]  ;;  %1955 = vmatmul.bf16.vlgmr.msra.gmra.mxu0 %v4480_v3  ;;  %v3406_v21 = vor.u32 %v3905_v8, %v3405_v7  ;;  %v3869_v24 = vld [vmem:[%s4374_s9 + $0x48c] sm:$0xf0] }
  0x88   : > { %v3661_v13 = vld [vmem:[%s4374_s9 + $0x7a0] sm:$0xf]  ;;  %v3534_v22 = vor.u32 %v3937_v12, %v3533_v9  ;;  %v3901_v28 = vld [vmem:[%s4374_s9 + $0x58c] sm:$0xf0]  ;;  %2005 = vmatpush.bf16.msrb.mxu0 %v3278_v18  ;;  %v3751_v18 = vld [vmem:[%s4374_s9 + $0xe4] sm:$0xf] }
  0x89   : > { %v3261_v23 = vld [vmem:[%s4374_s9 + $0x480] sm:$0xf]  ;;  %v3662_v27 = vor.u32 %v3969_v14, %v3661_v13  ;;  %v3933_v30 = vld [vmem:[%s4374_s9 + $0x68c] sm:$0xf0]  ;;  %2019 = vmatpush.bf16.msrb.mxu1 %v3406_v21  ;;  %v2799_v21 = vld [vmem:[%s4374_s9 + $0xf0] sm:$0xf0] }
  0x8a   : > { %v3389_v25 = vld [vmem:[%s4374_s9 + $0x580] sm:$0xf]  ;;  %v3965_v32 = vld [vmem:[%s4374_s9 + $0x78c] sm:$0xf0]  ;;  %v3262_v33 = vor.u32 %v3869_v24, %v3261_v23  ;;  %2033 = vmatpush.bf16.msrb.mxu2 %v3534_v22  ;;  %v3783_v22 = vld [vmem:[%s4374_s9 + $0x1e4] sm:$0xf] }
  0x8b   : > { %v3517_v29 = vld [vmem:[%s4374_s9 + $0x680] sm:$0xf]  ;;  %v3390_v34 = vor.u32 %v3901_v28, %v3389_v25  ;;  %v3865_v37 = vld [vmem:[%s4374_s9 + $0x46c] sm:$0xf0]  ;;  %2047 = vmatpush.bf16.msrb.mxu3 %v3662_v27  ;;  %v2927_v23 = vld [vmem:[%s4374_s9 + $0x1f0] sm:$0xf0] }
  0x8c   : > { %v3645_v31 = vld [vmem:[%s4374_s9 + $0x780] sm:$0xf]  ;;  %v3518_v35 = vor.u32 %v3933_v30, %v3517_v29  ;;  %v3897_v40 = vld [vmem:[%s4374_s9 + $0x56c] sm:$0xf0]  ;;  %2006 = vmatpush.bf16.msrb.mxu0 %v3262_v33  ;;  %v3815_v24 = vld [vmem:[%s4374_s9 + $0x2e4] sm:$0xf] }
  0x8d   : > { %v3245_v36 = vld [vmem:[%s4374_s9 + $0x460] sm:$0xf]  ;;  %v3646_v39 = vor.u32 %v3965_v32, %v3645_v31  ;;  %v3929_v42 = vld [vmem:[%s4374_s9 + $0x66c] sm:$0xf0]  ;;  %2020 = vmatpush.bf16.msrb.mxu1 %v3390_v34  ;;  %v3055_v25 = vld [vmem:[%s4374_s9 + $0x2f0] sm:$0xf0] }
  0x8e   : > { %v3373_v38 = vld [vmem:[%s4374_s9 + $0x560] sm:$0xf]  ;;  %v3961_v44 = vld [vmem:[%s4374_s9 + $0x76c] sm:$0xf0]  ;;  %v3246_v45 = vor.u32 %v3865_v37, %v3245_v36  ;;  %2034 = vmatpush.bf16.msrb.mxu2 %v3518_v35  ;;  %v3847_v27 = vld [vmem:[%s4374_s9 + $0x3e4] sm:$0xf] }
  0x8f   : > { %v3501_v41 = vld [vmem:[%s4374_s9 + $0x660] sm:$0xf]  ;;  %v3374_v46 = vor.u32 %v3897_v40, %v3373_v38  ;;  %v3861_v49 = vld [vmem:[%s4374_s9 + $0x44c] sm:$0xf0]  ;;  %2048 = vmatpush.bf16.msrb.mxu3 %v3646_v39  ;;  %v3183_v29 = vld [vmem:[%s4374_s9 + $0x3f0] sm:$0xf0]  ;;  %v2802_v38 = vor.u32 %v3751_v18, %v2799_v21 }
  0x90   : > { %v3629_v43 = vld [vmem:[%s4374_s9 + $0x760] sm:$0xf]  ;;  %v3502_v47 = vor.u32 %v3929_v42, %v3501_v41  ;;  %v3893_v52 = vld [vmem:[%s4374_s9 + $0x54c] sm:$0xf0]  ;;  %2007 = vmatpush.bf16.msrb.mxu0 %v3246_v45  ;;  %v2677_v34 = vld [vmem:[%s4372_s6 + $0x18] sm:$0xf]  ;;  %v2930_v42 = vor.u32 %v3783_v22, %v2927_v23 }
  0x91   : > { %v3229_v48 = vld [vmem:[%s4374_s9 + $0x440] sm:$0xf]  ;;  %v3630_v51 = vor.u32 %v3961_v44, %v3629_v43  ;;  %v3925_v54 = vld [vmem:[%s4374_s9 + $0x64c] sm:$0xf0]  ;;  %2021 = vmatpush.bf16.msrb.mxu1 %v3374_v46  ;;  %v3722_v35 = vld [vmem:[%s4372_s6 + $0x34] sm:$0xf0]  ;;  %v3058_v43 = vor.u32 %v3815_v24, %v3055_v25 }
  0x92   : > { %v3357_v50 = vld [vmem:[%s4374_s9 + $0x540] sm:$0xf]  ;;  %v3957_v56 = vld [vmem:[%s4374_s9 + $0x74c] sm:$0xf0]  ;;  %v3230_v57 = vor.u32 %v3861_v49, %v3229_v48  ;;  %2035 = vmatpush.bf16.msrb.mxu2 %v3502_v47  ;;  %v3717_v36 = vld [vmem:[%s4372_s6 + $0x14] sm:$0xf]  ;;  %v3186_v47 = vor.u32 %v3847_v27, %v3183_v29 }
  0x93   : > { %v3485_v53 = vld [vmem:[%s4374_s9 + $0x640] sm:$0xf]  ;;  %v3358_v59 = vor.u32 %v3893_v52, %v3357_v50  ;;  %v3857_v61 = vld [vmem:[%s4374_s9 + $0x42c] sm:$0xf0]  ;;  %2049 = vmatpush.bf16.msrb.mxu3 %v3630_v51  ;;  %v2671_v39 = vld [vmem:[%s4372_s6 + $0x30] sm:$0xf0]  ;;  %v4567_v52 = vor.u32 %v3722_v35, %v2677_v34 }
  0x94   : > { %v3613_v55 = vld [vmem:[%s4374_s9 + $0x740] sm:$0xf]  ;;  %v3486_v60 = vor.u32 %v3925_v54, %v3485_v53  ;;  %v3889_v63 = vld [vmem:[%s4374_s9 + $0x52c] sm:$0xf0]  ;;  %2008 = vmatpush.bf16.msrb.mxu0 %v3230_v57  ;;  %v3718_v40 = vld [vmem:[%s4372_s6 + $0x1c] sm:$0xf]  ;;  %v4569_v53 = vor.u32 %v3717_v36, %v2671_v39 }
  0x95   : > { %v3213_v58 = vld [vmem:[%s4374_s9 + $0x420] sm:$0xf]  ;;  %v3614_v0 = vor.u32 %v3957_v56, %v3613_v55  ;;  %v3921_v2 = vld [vmem:[%s4374_s9 + $0x62c] sm:$0xf0]  ;;  %2022 = vmatpush.bf16.msrb.mxu1 %v3358_v59  ;;  %v2679_v41 = vld [vmem:[%s4372_s6 + $0x38] sm:$0xf0] }
  0x96   : > { %v3341_v62 = vld [vmem:[%s4374_s9 + $0x520] sm:$0xf]  ;;  %v3953_v5 = vld [vmem:[%s4374_s9 + $0x72c] sm:$0xf0]  ;;  %v3214_v8 = vor.u32 %v3857_v61, %v3213_v58  ;;  %2036 = vmatpush.bf16.msrb.mxu2 %v3486_v60  ;;  %v3747_v44 = vld [vmem:[%s4374_s9 + $0xc4] sm:$0xf]  ;;  %v4573_v56 = vor.u32 %v3718_v40, %v2679_v41 }
  0x97   : > { %v3469_v1 = vld [vmem:[%s4374_s9 + $0x620] sm:$0xf]  ;;  %v3853_v7 = vld [vmem:[%s4374_s9 + $0x40c] sm:$0xf0]  ;;  %v3342_v14 = vor.u32 %v3889_v63, %v3341_v62  ;;  %2050 = vmatpush.bf16.msrb.mxu3 %v3614_v0  ;;  %v2783_v45 = vld [vmem:[%s4374_s9 + $0xd0] sm:$0xf0] }
  0x98   : > { %v3597_v4 = vld [vmem:[%s4374_s9 + $0x720] sm:$0xf]  ;;  %v3885_v11 = vld [vmem:[%s4374_s9 + $0x50c] sm:$0xf0]  ;;  %v3470_v15 = vor.u32 %v3921_v2, %v3469_v1  ;;  %2009 = vmatpush.bf16.msrb.mxu0 %v3214_v8  ;;  %v3779_v46 = vld [vmem:[%s4374_s9 + $0x1c4] sm:$0xf]  ;;  %v2786_v57 = vor.u32 %v3747_v44, %v2783_v45 }
  0x99   : > { %v3197_v6 = vld [vmem:[%s4374_s9 + $0x400] sm:$0xf]  ;;  %v3917_v13 = vld [vmem:[%s4374_s9 + $0x60c] sm:$0xf0]  ;;  %v3598_v20 = vor.u32 %v3953_v5, %v3597_v4  ;;  %2023 = vmatpush.bf16.msrb.mxu1 %v3342_v14  ;;  %v2911_v49 = vld [vmem:[%s4374_s9 + $0x1d0] sm:$0xf0] }
  0x9a   : > { %v3325_v9 = vld [vmem:[%s4374_s9 + $0x500] sm:$0xf]  ;;  %v3949_v17 = vld [vmem:[%s4374_s9 + $0x70c] sm:$0xf0]  ;;  %v3198_v28 = vor.u32 %v3853_v7, %v3197_v6  ;;  %2037 = vmatpush.bf16.msrb.mxu2 %v3470_v15  ;;  %v3811_v50 = vld [vmem:[%s4374_s9 + $0x2c4] sm:$0xf]  ;;  %v2914_v58 = vor.u32 %v3779_v46, %v2911_v49 }
  0x9b   : > { %v3453_v12 = vld [vmem:[%s4374_s9 + $0x600] sm:$0xf]  ;;  %v2669_v30 = vld [vmem:[%s4372_s6 + $0x10] sm:$0xf]  ;;  %v3326_v32 = vor.u32 %v3885_v11, %v3325_v9  ;;  %2051 = vmatpush.bf16.msrb.mxu3 %v3598_v20  ;;  %v3039_v51 = vld [vmem:[%s4374_s9 + $0x2d0] sm:$0xf0] }
  0x9c   : > { %v3581_v16 = vld [vmem:[%s4374_s9 + $0x700] sm:$0xf]  ;;  %v3721_v31 = vld [vmem:[%s4372_s6 + $0x2c] sm:$0xf0]  ;;  %v3454_v33 = vor.u32 %v3917_v13, %v3453_v12  ;;  %2010 = vmatpush.bf16.msrb.mxu0 %v3198_v28  ;;  %v3843_v54 = vld [vmem:[%s4374_s9 + $0x3c4] sm:$0xf]  ;;  %v3042_v59 = vor.u32 %v3811_v50, %v3039_v51 }
  0x9d   : > { %v3582_v37 = vor.u32 %v3949_v17, %v3581_v16  ;;  %v4562_v48 = vor.u32 %v3721_v31, %v2669_v30  ;;  %2024 = vmatpush.bf16.msrb.mxu1 %v3326_v32  ;;  %v3167_v55 = vld [vmem:[%s4374_s9 + $0x3d0] sm:$0xf0]  ;;  %v3743_v60 = vld [vmem:[%s4374_s9 + $0xa4] sm:$0xf] }
  0x9e   : > { %2038 = vmatpush.bf16.msrb.mxu2 %v3454_v33  ;;  %v2767_v61 = vld [vmem:[%s4374_s9 + $0xb0] sm:$0xf0]  ;;  %v3775_v62 = vld [vmem:[%s4374_s9 + $0x1a4] sm:$0xf]  ;;  %v3170_v63 = vor.u32 %v3843_v54, %v3167_v55 }
  0x9f   : > { %2052 = vmatpush.bf16.msrb.mxu3 %v3582_v37  ;;  %2011 = vmatmul.bf16.vlgmr.msrb.gmra.mxu0 %v4562_v48  ;;  %v2895_v0 = vld [vmem:[%s4374_s9 + $0x1b0] sm:$0xf0]  ;;  %v3807_v1 = vld [vmem:[%s4374_s9 + $0x2a4] sm:$0xf]  ;;  %v2770_v6 = vor.u32 %v3743_v60, %v2767_v61 }
  0xa0   : > { %2059 = vmatpush.bf16.msra.mxu0 %v2802_v38  ;;  %v3023_v2 = vld [vmem:[%s4374_s9 + $0x2b0] sm:$0xf0]  ;;  %2025 = vmatmul.bf16.vlgmr.msrb.gmra.mxu1 %v4569_v53  ;;  %v3839_v4 = vld [vmem:[%s4374_s9 + $0x3a4] sm:$0xf]  ;;  %v2898_v7 = vor.u32 %v3775_v62, %v2895_v0 }
  0xa1   : > { %2073 = vmatpush.bf16.msra.mxu1 %v2930_v42  ;;  %2039 = vmatmul.bf16.vlgmr.msrb.gmra.mxu2 %v4567_v52  ;;  %v3151_v5 = vld [vmem:[%s4374_s9 + $0x3b0] sm:$0xf0]  ;;  %v3026_v8 = vor.u32 %v3807_v1, %v3023_v2  ;;  %v3739_v9 = vld [vmem:[%s4374_s9 + $0x84] sm:$0xf] }
  0xa2   : > { %2087 = vmatpush.bf16.msra.mxu2 %v3058_v43  ;;  %2053 = vmatmul.bf16.vlgmr.msrb.gmra.mxu3 %v4573_v56  ;;  %v2751_v11 = vld [vmem:[%s4374_s9 + $0x90] sm:$0xf0]  ;;  %v3771_v12 = vld [vmem:[%s4374_s9 + $0x184] sm:$0xf]  ;;  %v3154_v13 = vor.u32 %v3839_v4, %v3151_v5 }
  0xa3   : > { %2101 = vmatpush.bf16.msra.mxu3 %v3186_v47  ;;  %v2879_v14 = vld [vmem:[%s4374_s9 + $0x190] sm:$0xf0]  ;;  %v3803_v15 = vld [vmem:[%s4374_s9 + $0x284] sm:$0xf]  ;;  %v2754_v20 = vor.u32 %v3739_v9, %v2751_v11 }
  0xa4   : > { %2060 = vmatpush.bf16.msra.mxu0 %v2786_v57  ;;  %v3007_v16 = vld [vmem:[%s4374_s9 + $0x290] sm:$0xf0]  ;;  %v3835_v17 = vld [vmem:[%s4374_s9 + $0x384] sm:$0xf]  ;;  %v2882_v21 = vor.u32 %v3771_v12, %v2879_v14 }
  0xa5   : > { %2074 = vmatpush.bf16.msra.mxu1 %v2914_v58  ;;  %v3135_v18 = vld [vmem:[%s4374_s9 + $0x390] sm:$0xf0]  ;;  %v3010_v22 = vor.u32 %v3803_v15, %v3007_v16  ;;  %v3735_v23 = vld [vmem:[%s4374_s9 + $0x64] sm:$0xf] }
  0xa6   : > { %2088 = vmatpush.bf16.msra.mxu2 %v3042_v59  ;;  %v2735_v24 = vld [vmem:[%s4374_s9 + $0x70] sm:$0xf0]  ;;  %v3767_v25 = vld [vmem:[%s4374_s9 + $0x164] sm:$0xf]  ;;  %v3138_v27 = vor.u32 %v3835_v17, %v3135_v18 }
  0xa7   : > { %2102 = vmatpush.bf16.msra.mxu3 %v3170_v63  ;;  %v2863_v28 = vld [vmem:[%s4374_s9 + $0x170] sm:$0xf0]  ;;  %v3799_v29 = vld [vmem:[%s4374_s9 + $0x264] sm:$0xf]  ;;  %v2738_v33 = vor.u32 %v3735_v23, %v2735_v24 }
  0xa8   : > { %2061 = vmatpush.bf16.msra.mxu0 %v2770_v6  ;;  %v2991_v30 = vld [vmem:[%s4374_s9 + $0x270] sm:$0xf0]  ;;  %v3831_v31 = vld [vmem:[%s4374_s9 + $0x364] sm:$0xf]  ;;  %v2866_v34 = vor.u32 %v3767_v25, %v2863_v28 }
  0xa9   : > { %2075 = vmatpush.bf16.msra.mxu1 %v2898_v7  ;;  %v3119_v32 = vld [vmem:[%s4374_s9 + $0x370] sm:$0xf0]  ;;  %v2994_v35 = vor.u32 %v3799_v29, %v2991_v30  ;;  %v3731_v36 = vld [vmem:[%s4374_s9 + $0x44] sm:$0xf] }
  0xaa   : > { %2089 = vmatpush.bf16.msra.mxu2 %v3026_v8  ;;  %v2719_v37 = vld [vmem:[%s4374_s9 + $0x50] sm:$0xf0]  ;;  %v3763_v38 = vld [vmem:[%s4374_s9 + $0x144] sm:$0xf]  ;;  %v3122_v39 = vor.u32 %v3831_v31, %v3119_v32 }
  0xab   : > { %2103 = vmatpush.bf16.msra.mxu3 %v3154_v13  ;;  %v2847_v40 = vld [vmem:[%s4374_s9 + $0x150] sm:$0xf0]  ;;  %v3795_v41 = vld [vmem:[%s4374_s9 + $0x244] sm:$0xf]  ;;  %v2722_v45 = vor.u32 %v3731_v36, %v2719_v37 }
  0xac   : > { %2062 = vmatpush.bf16.msra.mxu0 %v2754_v20  ;;  %v2975_v42 = vld [vmem:[%s4374_s9 + $0x250] sm:$0xf0]  ;;  %v3827_v43 = vld [vmem:[%s4374_s9 + $0x344] sm:$0xf]  ;;  %v2850_v46 = vor.u32 %v3763_v38, %v2847_v40 }
  0xad   : > { %2076 = vmatpush.bf16.msra.mxu1 %v2882_v21  ;;  %v3103_v44 = vld [vmem:[%s4374_s9 + $0x350] sm:$0xf0]  ;;  %v2978_v47 = vor.u32 %v3795_v41, %v2975_v42  ;;  %v3727_v49 = vld [vmem:[%s4374_s9 + $0x24] sm:$0xf] }
  0xae   : > { %2090 = vmatpush.bf16.msra.mxu2 %v3010_v22  ;;  %v2703_v50 = vld [vmem:[%s4374_s9 + $0x30] sm:$0xf0]  ;;  %v3759_v51 = vld [vmem:[%s4374_s9 + $0x124] sm:$0xf]  ;;  %v3106_v54 = vor.u32 %v3827_v43, %v3103_v44 }
  0xaf   : > { %2104 = vmatpush.bf16.msra.mxu3 %v3138_v27  ;;  %v2831_v55 = vld [vmem:[%s4374_s9 + $0x130] sm:$0xf0]  ;;  %v3791_v57 = vld [vmem:[%s4374_s9 + $0x224] sm:$0xf]  ;;  %v2706_v61 = vor.u32 %v3727_v49, %v2703_v50 }
  0xb0   : > { %2063 = vmatpush.bf16.msra.mxu0 %v2738_v33  ;;  %v2959_v58 = vld [vmem:[%s4374_s9 + $0x230] sm:$0xf0]  ;;  %v3823_v59 = vld [vmem:[%s4374_s9 + $0x324] sm:$0xf]  ;;  %v2834_v0 = vor.u32 %v3759_v51, %v2831_v55 }
  0xb1   : > { %2077 = vmatpush.bf16.msra.mxu1 %v2866_v34  ;;  %v3087_v60 = vld [vmem:[%s4374_s9 + $0x330] sm:$0xf0]  ;;  %v3723_v62 = vld [vmem:[%s4374_s9 + $0x4] sm:$0xf]  ;;  %v2962_v1 = vor.u32 %v3791_v57, %v2959_v58 }
  0xb2   : > { %2091 = vmatpush.bf16.msra.mxu2 %v2994_v35  ;;  %v2687_v63 = vld [vmem:[%s4374_s9 + $0x10] sm:$0xf0]  ;;  %v3755_v2 = vld [vmem:[%s4374_s9 + $0x104] sm:$0xf]  ;;  %v3090_v6 = vor.u32 %v3823_v59, %v3087_v60 }
  0xb3   : > { %2105 = vmatpush.bf16.msra.mxu3 %v3122_v39  ;;  %v2815_v4 = vld [vmem:[%s4374_s9 + $0x110] sm:$0xf0]  ;;  %v3787_v5 = vld [vmem:[%s4374_s9 + $0x204] sm:$0xf]  ;;  %v2690_v14 = vor.u32 %v3723_v62, %v2687_v63 }
  0xb4   : > { %2064 = vmatpush.bf16.msra.mxu0 %v2722_v45  ;;  %v2943_v7 = vld [vmem:[%s4374_s9 + $0x210] sm:$0xf0]  ;;  %v3819_v8 = vld [vmem:[%s4374_s9 + $0x304] sm:$0xf]  ;;  %v2818_v18 = vor.u32 %v3755_v2, %v2815_v4 }
  0xb5   : > { %2078 = vmatpush.bf16.msra.mxu1 %v2850_v46  ;;  %v3071_v9 = vld [vmem:[%s4374_s9 + $0x310] sm:$0xf0]  ;;  %v3879_v11 = vld [vmem:[%s4374_s9 + $0x4e4] sm:$0xf]  ;;  %v2946_v20 = vor.u32 %v3787_v5, %v2943_v7 }
  0xb6   : > { %2092 = vmatpush.bf16.msra.mxu2 %v2978_v47  ;;  %v3311_v12 = vld [vmem:[%s4374_s9 + $0x4f0] sm:$0xf0]  ;;  %v3911_v13 = vld [vmem:[%s4374_s9 + $0x5e4] sm:$0xf]  ;;  %v3074_v23 = vor.u32 %v3819_v8, %v3071_v9 }
  0xb7   : > { %2106 = vmatpush.bf16.msra.mxu3 %v3106_v54  ;;  %v3439_v15 = vld [vmem:[%s4374_s9 + $0x5f0] sm:$0xf0]  ;;  %v3943_v16 = vld [vmem:[%s4374_s9 + $0x6e4] sm:$0xf]  ;;  %v3314_v24 = vor.u32 %v3879_v11, %v3311_v12 }
  0xb8   : > { %2065 = vmatpush.bf16.msra.mxu0 %v2706_v61  ;;  %v3567_v17 = vld [vmem:[%s4374_s9 + $0x6f0] sm:$0xf0]  ;;  %v3975_v21 = vld [vmem:[%s4374_s9 + $0x7e4] sm:$0xf]  ;;  %v3442_v25 = vor.u32 %v3911_v13, %v3439_v15 }
  0xb9   : > { %2079 = vmatpush.bf16.msra.mxu1 %v2834_v0  ;;  %v3695_v22 = vld [vmem:[%s4374_s9 + $0x7f0] sm:$0xf0]  ;;  %v3570_v27 = vor.u32 %v3943_v16, %v3567_v17  ;;  %v3875_v28 = vld [vmem:[%s4374_s9 + $0x4c4] sm:$0xf] }
  0xba   : > { %2093 = vmatpush.bf16.msra.mxu2 %v2962_v1  ;;  %v3295_v29 = vld [vmem:[%s4374_s9 + $0x4d0] sm:$0xf0]  ;;  %v3907_v30 = vld [vmem:[%s4374_s9 + $0x5c4] sm:$0xf]  ;;  %v3698_v31 = vor.u32 %v3975_v21, %v3695_v22 }
  0xbb   : > { %2107 = vmatpush.bf16.msra.mxu3 %v3090_v6  ;;  %v3423_v32 = vld [vmem:[%s4374_s9 + $0x5d0] sm:$0xf0]  ;;  %v3939_v33 = vld [vmem:[%s4374_s9 + $0x6c4] sm:$0xf]  ;;  %v3298_v37 = vor.u32 %v3875_v28, %v3295_v29 }
  0xbc   : > { %2066 = vmatpush.bf16.msra.mxu0 %v2690_v14  ;;  %v3551_v34 = vld [vmem:[%s4374_s9 + $0x6d0] sm:$0xf0]  ;;  %v3971_v35 = vld [vmem:[%s4374_s9 + $0x7c4] sm:$0xf]  ;;  %v3426_v38 = vor.u32 %v3907_v30, %v3423_v32 }
  0xbd   : > { %2080 = vmatpush.bf16.msra.mxu1 %v2818_v18  ;;  %v3679_v36 = vld [vmem:[%s4374_s9 + $0x7d0] sm:$0xf0]  ;;  %v3554_v39 = vor.u32 %v3939_v33, %v3551_v34  ;;  %v3871_v40 = vld [vmem:[%s4374_s9 + $0x4a4] sm:$0xf] }
  0xbe   : > { %2094 = vmatpush.bf16.msra.mxu2 %v2946_v20  ;;  %v3279_v41 = vld [vmem:[%s4374_s9 + $0x4b0] sm:$0xf0]  ;;  %v3903_v42 = vld [vmem:[%s4374_s9 + $0x5a4] sm:$0xf]  ;;  %v3682_v43 = vor.u32 %v3971_v35, %v3679_v36 }
  0xbf   : > { %2108 = vmatpush.bf16.msra.mxu3 %v3074_v23  ;;  %v3407_v44 = vld [vmem:[%s4374_s9 + $0x5b0] sm:$0xf0]  ;;  %v3935_v45 = vld [vmem:[%s4374_s9 + $0x6a4] sm:$0xf]  ;;  %2067 = vmatmul.bf16.vlgmr.msra.gmra.mxu0 %v4480_v3  ;;  %v3282_v50 = vor.u32 %v3871_v40, %v3279_v41 }
  0xc0   : > { %2115 = vmatpush.bf16.msrb.mxu0 %v3314_v24  ;;  %v3535_v46 = vld [vmem:[%s4374_s9 + $0x6b0] sm:$0xf0]  ;;  %v3967_v47 = vld [vmem:[%s4374_s9 + $0x7a4] sm:$0xf]  ;;  %2081 = vmatmul.bf16.vlgmr.msra.gmra.mxu1 %v4496_v19  ;;  %v3410_v51 = vor.u32 %v3903_v42, %v3407_v44 }
  0xc1   : > { %2129 = vmatpush.bf16.msrb.mxu1 %v3442_v25  ;;  %v3663_v49 = vld [vmem:[%s4374_s9 + $0x7b0] sm:$0xf0]  ;;  %2095 = vmatmul.bf16.vlgmr.msra.gmra.mxu2 %v4486_v10  ;;  %v3538_v54 = vor.u32 %v3935_v45, %v3535_v46  ;;  %v3867_v55 = vld [vmem:[%s4374_s9 + $0x484] sm:$0xf] }
  0xc2   : > { %2143 = vmatpush.bf16.msrb.mxu2 %v3570_v27  ;;  %2109 = vmatmul.bf16.vlgmr.msra.gmra.mxu3 %v4502_v26  ;;  %v3263_v57 = vld [vmem:[%s4374_s9 + $0x490] sm:$0xf0]  ;;  %v3899_v58 = vld [vmem:[%s4374_s9 + $0x584] sm:$0xf]  ;;  %v3666_v59 = vor.u32 %v3967_v47, %v3663_v49 }
  0xc3   : > { %2157 = vmatpush.bf16.msrb.mxu3 %v3698_v31  ;;  %v3391_v60 = vld [vmem:[%s4374_s9 + $0x590] sm:$0xf0]  ;;  %v3931_v61 = vld [vmem:[%s4374_s9 + $0x684] sm:$0xf]  ;;  %v3266_v1 = vor.u32 %v3867_v55, %v3263_v57  ;;  %v2805_v57 = vld [vmem:[%s4374_s9 + $0xe8] sm:$0xf] }
  0xc4   : > { %2116 = vmatpush.bf16.msrb.mxu0 %v3298_v37  ;;  %v3519_v62 = vld [vmem:[%s4374_s9 + $0x690] sm:$0xf0]  ;;  %v3963_v63 = vld [vmem:[%s4374_s9 + $0x784] sm:$0xf]  ;;  %v3394_v2 = vor.u32 %v3899_v58, %v3391_v60  ;;  %v3754_v58 = vld [vmem:[%s4374_s9 + $0xf4] sm:$0xf0] }
  0xc5   : > { %2130 = vmatpush.bf16.msrb.mxu1 %v3426_v38  ;;  %v3647_v0 = vld [vmem:[%s4374_s9 + $0x790] sm:$0xf0]  ;;  %v3522_v4 = vor.u32 %v3931_v61, %v3519_v62  ;;  %v3863_v5 = vld [vmem:[%s4374_s9 + $0x464] sm:$0xf]  ;;  %v3786_v61 = vld [vmem:[%s4374_s9 + $0x1f4] sm:$0xf0] }
  0xc6   : > { %2144 = vmatpush.bf16.msrb.mxu2 %v3554_v39  ;;  %v3247_v6 = vld [vmem:[%s4374_s9 + $0x470] sm:$0xf0]  ;;  %v3895_v7 = vld [vmem:[%s4374_s9 + $0x564] sm:$0xf]  ;;  %v3650_v8 = vor.u32 %v3963_v63, %v3647_v0  ;;  %v3061_v62 = vld [vmem:[%s4374_s9 + $0x2e8] sm:$0xf] }
  0xc7   : > { %2158 = vmatpush.bf16.msrb.mxu3 %v3682_v43  ;;  %v3375_v9 = vld [vmem:[%s4374_s9 + $0x570] sm:$0xf0]  ;;  %v3927_v11 = vld [vmem:[%s4374_s9 + $0x664] sm:$0xf]  ;;  %v3250_v15 = vor.u32 %v3863_v5, %v3247_v6  ;;  %v3818_v63 = vld [vmem:[%s4374_s9 + $0x2f4] sm:$0xf0]  ;;  %v2806_v6 = vor.u32 %v3754_v58, %v2805_v57 }
  0xc8   : > { %2117 = vmatpush.bf16.msrb.mxu0 %v3282_v50  ;;  %v3503_v12 = vld [vmem:[%s4374_s9 + $0x670] sm:$0xf0]  ;;  %v3959_v13 = vld [vmem:[%s4374_s9 + $0x764] sm:$0xf]  ;;  %v3378_v16 = vor.u32 %v3895_v7, %v3375_v9  ;;  %v2789_v9 = vld [vmem:[%s4374_s9 + $0xc8] sm:$0xf] }
  0xc9   : > { %2131 = vmatpush.bf16.msrb.mxu1 %v3410_v51  ;;  %v3631_v14 = vld [vmem:[%s4374_s9 + $0x770] sm:$0xf0]  ;;  %v3506_v17 = vor.u32 %v3927_v11, %v3503_v12  ;;  %v3859_v18 = vld [vmem:[%s4374_s9 + $0x444] sm:$0xf]  ;;  %v3750_v11 = vld [vmem:[%s4374_s9 + $0xd4] sm:$0xf0] }
  0xca   : > { %2145 = vmatpush.bf16.msrb.mxu2 %v3538_v54  ;;  %v3231_v20 = vld [vmem:[%s4374_s9 + $0x450] sm:$0xf0]  ;;  %v3891_v21 = vld [vmem:[%s4374_s9 + $0x544] sm:$0xf]  ;;  %v3634_v22 = vor.u32 %v3959_v13, %v3631_v14  ;;  %v2917_v12 = vld [vmem:[%s4374_s9 + $0x1c8] sm:$0xf] }
  0xcb   : > { %2159 = vmatpush.bf16.msrb.mxu3 %v3666_v59  ;;  %v3359_v23 = vld [vmem:[%s4374_s9 + $0x550] sm:$0xf0]  ;;  %v3923_v24 = vld [vmem:[%s4374_s9 + $0x644] sm:$0xf]  ;;  %v3234_v29 = vor.u32 %v3859_v18, %v3231_v20  ;;  %v2933_v59 = vld [vmem:[%s4374_s9 + $0x1e8] sm:$0xf]  ;;  %v2790_v20 = vor.u32 %v3750_v11, %v2789_v9 }
  0xcc   : > { %2118 = vmatpush.bf16.msrb.mxu0 %v3266_v1  ;;  %v3487_v25 = vld [vmem:[%s4374_s9 + $0x650] sm:$0xf0]  ;;  %v3955_v27 = vld [vmem:[%s4374_s9 + $0x744] sm:$0xf]  ;;  %v3362_v30 = vor.u32 %v3891_v21, %v3359_v23  ;;  %v2934_v7 = vor.u32 %v3786_v61, %v2933_v59  ;;  %v3782_v14 = vld [vmem:[%s4374_s9 + $0x1d4] sm:$0xf0] }
  0xcd   : > { %2132 = vmatpush.bf16.msrb.mxu1 %v3394_v2  ;;  %v3615_v28 = vld [vmem:[%s4374_s9 + $0x750] sm:$0xf0]  ;;  %v3490_v31 = vor.u32 %v3923_v24, %v3487_v25  ;;  %v3855_v32 = vld [vmem:[%s4374_s9 + $0x424] sm:$0xf]  ;;  %v3189_v2 = vld [vmem:[%s4374_s9 + $0x3e8] sm:$0xf]  ;;  %v2918_v21 = vor.u32 %v3782_v14, %v2917_v12 }
  0xce   : > { %2146 = vmatpush.bf16.msrb.mxu2 %v3522_v4  ;;  %v3215_v33 = vld [vmem:[%s4374_s9 + $0x430] sm:$0xf0]  ;;  %v3887_v34 = vld [vmem:[%s4374_s9 + $0x524] sm:$0xf]  ;;  %v3618_v35 = vor.u32 %v3955_v27, %v3615_v28  ;;  %v3850_v4 = vld [vmem:[%s4374_s9 + $0x3f4] sm:$0xf0] }
  0xcf   : > { %2160 = vmatpush.bf16.msrb.mxu3 %v3650_v8  ;;  %v3343_v36 = vld [vmem:[%s4374_s9 + $0x530] sm:$0xf0]  ;;  %v3919_v37 = vld [vmem:[%s4374_s9 + $0x624] sm:$0xf]  ;;  %v3218_v41 = vor.u32 %v3855_v32, %v3215_v33  ;;  %v3062_v8 = vor.u32 %v3818_v63, %v3061_v62  ;;  %v3190_v13 = vor.u32 %v3850_v4, %v3189_v2  ;;  %v3846_v18 = vld [vmem:[%s4374_s9 + $0x3d4] sm:$0xf0] }
  0xd0   : > { %2119 = vmatpush.bf16.msrb.mxu0 %v3250_v15  ;;  %v3471_v38 = vld [vmem:[%s4374_s9 + $0x630] sm:$0xf0]  ;;  %v3951_v39 = vld [vmem:[%s4374_s9 + $0x724] sm:$0xf]  ;;  %v3346_v44 = vor.u32 %v3887_v34, %v3343_v36  ;;  %v3045_v15 = vld [vmem:[%s4374_s9 + $0x2c8] sm:$0xf] }
  0xd1   : > { %2133 = vmatpush.bf16.msrb.mxu1 %v3378_v16  ;;  %v3599_v40 = vld [vmem:[%s4374_s9 + $0x730] sm:$0xf0]  ;;  %v3851_v42 = vld [vmem:[%s4374_s9 + $0x404] sm:$0xf]  ;;  %v3474_v45 = vor.u32 %v3919_v37, %v3471_v38  ;;  %v3814_v16 = vld [vmem:[%s4374_s9 + $0x2d4] sm:$0xf0] }
  0xd2   : > { %2147 = vmatpush.bf16.msrb.mxu2 %v3506_v17  ;;  %v3199_v43 = vld [vmem:[%s4374_s9 + $0x410] sm:$0xf0]  ;;  %v3883_v46 = vld [vmem:[%s4374_s9 + $0x504] sm:$0xf]  ;;  %v3602_v50 = vor.u32 %v3951_v39, %v3599_v40  ;;  %v3173_v17 = vld [vmem:[%s4374_s9 + $0x3c8] sm:$0xf] }
  0xd3   : > { %2161 = vmatpush.bf16.msrb.mxu3 %v3634_v22  ;;  %v3327_v47 = vld [vmem:[%s4374_s9 + $0x510] sm:$0xf0]  ;;  %v3915_v49 = vld [vmem:[%s4374_s9 + $0x604] sm:$0xf]  ;;  %v3202_v60 = vor.u32 %v3851_v42, %v3199_v43  ;;  %v3046_v22 = vor.u32 %v3814_v16, %v3045_v15  ;;  %v2773_v23 = vld [vmem:[%s4374_s9 + $0xa8] sm:$0xf]  ;;  %v3174_v27 = vor.u32 %v3846_v18, %v3173_v17 }
  0xd4   : > { %2120 = vmatpush.bf16.msrb.mxu0 %v3234_v29  ;;  %v3455_v51 = vld [vmem:[%s4374_s9 + $0x610] sm:$0xf0]  ;;  %v3947_v54 = vld [vmem:[%s4374_s9 + $0x704] sm:$0xf]  ;;  %v3330_v0 = vor.u32 %v3883_v46, %v3327_v47  ;;  %v3746_v24 = vld [vmem:[%s4374_s9 + $0xb4] sm:$0xf0] }
  0xd5   : > { %2134 = vmatpush.bf16.msrb.mxu1 %v3362_v30  ;;  %v3583_v55 = vld [vmem:[%s4374_s9 + $0x710] sm:$0xf0]  ;;  %v3458_v1 = vor.u32 %v3915_v49, %v3455_v51  ;;  %v2901_v25 = vld [vmem:[%s4374_s9 + $0x1a8] sm:$0xf]  ;;  %v3778_v28 = vld [vmem:[%s4374_s9 + $0x1b4] sm:$0xf0]  ;;  %v2774_v33 = vor.u32 %v3746_v24, %v2773_v23 }
  0xd6   : > { %2148 = vmatpush.bf16.msrb.mxu2 %v3490_v31  ;;  %v3586_v5 = vor.u32 %v3947_v54, %v3583_v55  ;;  %v3029_v29 = vld [vmem:[%s4374_s9 + $0x2a8] sm:$0xf]  ;;  %v3810_v30 = vld [vmem:[%s4374_s9 + $0x2b4] sm:$0xf0]  ;;  %v2902_v34 = vor.u32 %v3778_v28, %v2901_v25 }
  0xd7   : > { %2162 = vmatpush.bf16.msrb.mxu3 %v3618_v35  ;;  %v3157_v31 = vld [vmem:[%s4374_s9 + $0x3a8] sm:$0xf]  ;;  %v3842_v32 = vld [vmem:[%s4374_s9 + $0x3b4] sm:$0xf0]  ;;  %v3030_v35 = vor.u32 %v3810_v30, %v3029_v29 }
  0xd8   : > { %2121 = vmatpush.bf16.msrb.mxu0 %v3218_v41  ;;  %v2757_v36 = vld [vmem:[%s4374_s9 + $0x88] sm:$0xf]  ;;  %v3742_v37 = vld [vmem:[%s4374_s9 + $0x94] sm:$0xf0]  ;;  %v3158_v39 = vor.u32 %v3842_v32, %v3157_v31 }
  0xd9   : > { %2135 = vmatpush.bf16.msrb.mxu1 %v3346_v44  ;;  %v2885_v38 = vld [vmem:[%s4374_s9 + $0x188] sm:$0xf]  ;;  %v3774_v40 = vld [vmem:[%s4374_s9 + $0x194] sm:$0xf0] }
  0xda   : > { %2149 = vmatpush.bf16.msrb.mxu2 %v3474_v45  ;;  %v3013_v41 = vld [vmem:[%s4374_s9 + $0x288] sm:$0xf]  ;;  %v3806_v42 = vld [vmem:[%s4374_s9 + $0x294] sm:$0xf0]  ;;  %v2758_v45 = vor.u32 %v3742_v37, %v2757_v36  ;;  %v2886_v46 = vor.u32 %v3774_v40, %v2885_v38 }
  0xdb   : > { %2163 = vmatpush.bf16.msrb.mxu3 %v3602_v50  ;;  %v3141_v43 = vld [vmem:[%s4374_s9 + $0x388] sm:$0xf]  ;;  %v3838_v44 = vld [vmem:[%s4374_s9 + $0x394] sm:$0xf0]  ;;  %v3014_v47 = vor.u32 %v3806_v42, %v3013_v41 }
  0xdc   : > { %2122 = vmatpush.bf16.msrb.mxu0 %v3202_v60  ;;  %v2741_v49 = vld [vmem:[%s4374_s9 + $0x68] sm:$0xf]  ;;  %v3738_v50 = vld [vmem:[%s4374_s9 + $0x74] sm:$0xf0]  ;;  %v3142_v54 = vor.u32 %v3838_v44, %v3141_v43 }
  0xdd   : > { %2136 = vmatpush.bf16.msrb.mxu1 %v3330_v0  ;;  %v2869_v51 = vld [vmem:[%s4374_s9 + $0x168] sm:$0xf]  ;;  %v3770_v55 = vld [vmem:[%s4374_s9 + $0x174] sm:$0xf0]  ;;  %v2742_v61 = vor.u32 %v3738_v50, %v2741_v49 }
  0xde   : > { %2150 = vmatpush.bf16.msrb.mxu2 %v3458_v1  ;;  %v2997_v57 = vld [vmem:[%s4374_s9 + $0x268] sm:$0xf]  ;;  %v3802_v58 = vld [vmem:[%s4374_s9 + $0x274] sm:$0xf0]  ;;  %v2870_v62 = vor.u32 %v3770_v55, %v2869_v51 }
  0xdf   : > { %2164 = vmatpush.bf16.msrb.mxu3 %v3586_v5  ;;  %2123 = vmatmul.bf16.vlgmr.msrb.gmra.mxu0 %v4562_v48  ;;  %v3125_v59 = vld [vmem:[%s4374_s9 + $0x368] sm:$0xf]  ;;  %v3834_v60 = vld [vmem:[%s4374_s9 + $0x374] sm:$0xf0]  ;;  %v2998_v63 = vor.u32 %v3802_v58, %v2997_v57 }
  0xe0   : > { %2171 = vmatpush.bf16.msra.mxu0 %v2806_v6  ;;  %2137 = vmatmul.bf16.vlgmr.msrb.gmra.mxu1 %v4569_v53  ;;  %v2725_v0 = vld [vmem:[%s4374_s9 + $0x48] sm:$0xf]  ;;  %v3734_v1 = vld [vmem:[%s4374_s9 + $0x54] sm:$0xf0]  ;;  %v3126_v4 = vor.u32 %v3834_v60, %v3125_v59 }
  0xe1   : > { %2185 = vmatpush.bf16.msra.mxu1 %v2934_v7  ;;  %2151 = vmatmul.bf16.vlgmr.msrb.gmra.mxu2 %v4567_v52  ;;  %v2853_v2 = vld [vmem:[%s4374_s9 + $0x148] sm:$0xf]  ;;  %v3766_v5 = vld [vmem:[%s4374_s9 + $0x154] sm:$0xf0]  ;;  %v2726_v11 = vor.u32 %v3734_v1, %v2725_v0 }
  0xe2   : > { %2199 = vmatpush.bf16.msra.mxu2 %v3062_v8  ;;  %2165 = vmatmul.bf16.vlgmr.msrb.gmra.mxu3 %v4573_v56  ;;  %v2981_v6 = vld [vmem:[%s4374_s9 + $0x248] sm:$0xf]  ;;  %v3798_v7 = vld [vmem:[%s4374_s9 + $0x254] sm:$0xf0]  ;;  %v2854_v12 = vor.u32 %v3766_v5, %v2853_v2 }
  0xe3   : > { %2213 = vmatpush.bf16.msra.mxu3 %v3190_v13  ;;  %v3109_v8 = vld [vmem:[%s4374_s9 + $0x348] sm:$0xf]  ;;  %v3830_v9 = vld [vmem:[%s4374_s9 + $0x354] sm:$0xf0]  ;;  %v2982_v13 = vor.u32 %v3798_v7, %v2981_v6 }
  0xe4   : > { %2172 = vmatpush.bf16.msra.mxu0 %v2790_v20  ;;  %v2709_v14 = vld [vmem:[%s4374_s9 + $0x28] sm:$0xf]  ;;  %v3730_v15 = vld [vmem:[%s4374_s9 + $0x34] sm:$0xf0]  ;;  %v3110_v17 = vor.u32 %v3830_v9, %v3109_v8 }
  0xe5   : > { %2186 = vmatpush.bf16.msra.mxu1 %v2918_v21  ;;  %v2837_v16 = vld [vmem:[%s4374_s9 + $0x128] sm:$0xf]  ;;  %v3762_v18 = vld [vmem:[%s4374_s9 + $0x134] sm:$0xf0]  ;;  %v2710_v24 = vor.u32 %v3730_v15, %v2709_v14 }
  0xe6   : > { %2200 = vmatpush.bf16.msra.mxu2 %v3046_v22  ;;  %v2965_v20 = vld [vmem:[%s4374_s9 + $0x228] sm:$0xf]  ;;  %v3794_v21 = vld [vmem:[%s4374_s9 + $0x234] sm:$0xf0]  ;;  %v2838_v28 = vor.u32 %v3762_v18, %v2837_v16 }
  0xe7   : > { %2214 = vmatpush.bf16.msra.mxu3 %v3174_v27  ;;  %v3093_v22 = vld [vmem:[%s4374_s9 + $0x328] sm:$0xf]  ;;  %v3826_v23 = vld [vmem:[%s4374_s9 + $0x334] sm:$0xf0]  ;;  %v2966_v29 = vor.u32 %v3794_v21, %v2965_v20 }
  0xe8   : > { %2173 = vmatpush.bf16.msra.mxu0 %v2774_v33  ;;  %v2693_v25 = vld [vmem:[%s4374_s9 + $0x8] sm:$0xf]  ;;  %v3726_v27 = vld [vmem:[%s4374_s9 + $0x14] sm:$0xf0]  ;;  %v3094_v33 = vor.u32 %v3826_v23, %v3093_v22 }
  0xe9   : > { %2187 = vmatpush.bf16.msra.mxu1 %v2902_v34  ;;  %v2821_v30 = vld [vmem:[%s4374_s9 + $0x108] sm:$0xf]  ;;  %v3758_v31 = vld [vmem:[%s4374_s9 + $0x114] sm:$0xf0]  ;;  %v2694_v40 = vor.u32 %v3726_v27, %v2693_v25 }
  0xea   : > { %2201 = vmatpush.bf16.msra.mxu2 %v3030_v35  ;;  %v2949_v32 = vld [vmem:[%s4374_s9 + $0x208] sm:$0xf]  ;;  %v3790_v34 = vld [vmem:[%s4374_s9 + $0x214] sm:$0xf0]  ;;  %v2822_v44 = vor.u32 %v3758_v31, %v2821_v30 }
  0xeb   : > { %2215 = vmatpush.bf16.msra.mxu3 %v3158_v39  ;;  %v3077_v35 = vld [vmem:[%s4374_s9 + $0x308] sm:$0xf]  ;;  %v3822_v36 = vld [vmem:[%s4374_s9 + $0x314] sm:$0xf0] }
  0xec   : > { %2174 = vmatpush.bf16.msra.mxu0 %v2758_v45  ;;  %v3317_v37 = vld [vmem:[%s4374_s9 + $0x4e8] sm:$0xf]  ;;  %v3882_v38 = vld [vmem:[%s4374_s9 + $0x4f4] sm:$0xf0]  ;;  %v2950_v45 = vor.u32 %v3790_v34, %v2949_v32  ;;  %v3078_v49 = vor.u32 %v3822_v36, %v3077_v35 }
  0xed   : > { %2188 = vmatpush.bf16.msra.mxu1 %v2886_v46  ;;  %v3445_v39 = vld [vmem:[%s4374_s9 + $0x5e8] sm:$0xf]  ;;  %v3914_v41 = vld [vmem:[%s4374_s9 + $0x5f4] sm:$0xf0]  ;;  %v3318_v50 = vor.u32 %v3882_v38, %v3317_v37 }
  0xee   : > { %2202 = vmatpush.bf16.msra.mxu2 %v3014_v47  ;;  %v3573_v42 = vld [vmem:[%s4374_s9 + $0x6e8] sm:$0xf]  ;;  %v3946_v43 = vld [vmem:[%s4374_s9 + $0x6f4] sm:$0xf0]  ;;  %v3446_v51 = vor.u32 %v3914_v41, %v3445_v39 }
  0xef   : > { %2216 = vmatpush.bf16.msra.mxu3 %v3142_v54  ;;  %v3701_v46 = vld [vmem:[%s4374_s9 + $0x7e8] sm:$0xf]  ;;  %v3978_v47 = vld [vmem:[%s4374_s9 + $0x7f4] sm:$0xf0]  ;;  %v3574_v54 = vor.u32 %v3946_v43, %v3573_v42 }
  0xf0   : > { %2175 = vmatpush.bf16.msra.mxu0 %v2742_v61  ;;  %v3301_v55 = vld [vmem:[%s4374_s9 + $0x4c8] sm:$0xf]  ;;  %v3878_v57 = vld [vmem:[%s4374_s9 + $0x4d4] sm:$0xf0]  ;;  %v3702_v59 = vor.u32 %v3978_v47, %v3701_v46 }
  0xf1   : > { %2189 = vmatpush.bf16.msra.mxu1 %v2870_v62  ;;  %v3429_v58 = vld [vmem:[%s4374_s9 + $0x5c8] sm:$0xf]  ;;  %v3910_v60 = vld [vmem:[%s4374_s9 + $0x5d4] sm:$0xf0]  ;;  %v3302_v1 = vor.u32 %v3878_v57, %v3301_v55 }
  0xf2   : > { %2203 = vmatpush.bf16.msra.mxu2 %v2998_v63  ;;  %v3557_v61 = vld [vmem:[%s4374_s9 + $0x6c8] sm:$0xf]  ;;  %v3942_v62 = vld [vmem:[%s4374_s9 + $0x6d4] sm:$0xf0]  ;;  %v3430_v2 = vor.u32 %v3910_v60, %v3429_v58 }
  0xf3   : > { %2217 = vmatpush.bf16.msra.mxu3 %v3126_v4  ;;  %v3685_v63 = vld [vmem:[%s4374_s9 + $0x7c8] sm:$0xf]  ;;  %v3974_v0 = vld [vmem:[%s4374_s9 + $0x7d4] sm:$0xf0]  ;;  %v3558_v4 = vor.u32 %v3942_v62, %v3557_v61 }
  0xf4   : > { %2176 = vmatpush.bf16.msra.mxu0 %v2726_v11  ;;  %v3285_v5 = vld [vmem:[%s4374_s9 + $0x4a8] sm:$0xf]  ;;  %v3874_v6 = vld [vmem:[%s4374_s9 + $0x4b4] sm:$0xf0]  ;;  %v3686_v8 = vor.u32 %v3974_v0, %v3685_v63 }
  0xf5   : > { %2190 = vmatpush.bf16.msra.mxu1 %v2854_v12  ;;  %v3413_v7 = vld [vmem:[%s4374_s9 + $0x5a8] sm:$0xf]  ;;  %v3906_v9 = vld [vmem:[%s4374_s9 + $0x5b4] sm:$0xf0]  ;;  %v3286_v15 = vor.u32 %v3874_v6, %v3285_v5 }
  0xf6   : > { %2204 = vmatpush.bf16.msra.mxu2 %v2982_v13  ;;  %v3541_v11 = vld [vmem:[%s4374_s9 + $0x6a8] sm:$0xf]  ;;  %v3938_v12 = vld [vmem:[%s4374_s9 + $0x6b4] sm:$0xf0]  ;;  %v3414_v16 = vor.u32 %v3906_v9, %v3413_v7 }
  0xf7   : > { %2218 = vmatpush.bf16.msra.mxu3 %v3110_v17  ;;  %v3669_v13 = vld [vmem:[%s4374_s9 + $0x7a8] sm:$0xf]  ;;  %v3970_v14 = vld [vmem:[%s4374_s9 + $0x7b4] sm:$0xf0]  ;;  %v3542_v17 = vor.u32 %v3938_v12, %v3541_v11 }
  0xf8   : > { %2177 = vmatpush.bf16.msra.mxu0 %v2710_v24  ;;  %v3269_v18 = vld [vmem:[%s4374_s9 + $0x488] sm:$0xf]  ;;  %v3870_v20 = vld [vmem:[%s4374_s9 + $0x494] sm:$0xf0]  ;;  %v3670_v22 = vor.u32 %v3970_v14, %v3669_v13 }
  0xf9   : > { %2191 = vmatpush.bf16.msra.mxu1 %v2838_v28  ;;  %v3397_v21 = vld [vmem:[%s4374_s9 + $0x588] sm:$0xf]  ;;  %v3902_v23 = vld [vmem:[%s4374_s9 + $0x594] sm:$0xf0] }
  0xfa   : > { %2205 = vmatpush.bf16.msra.mxu2 %v2966_v29  ;;  %v3525_v24 = vld [vmem:[%s4374_s9 + $0x688] sm:$0xf]  ;;  %v3934_v25 = vld [vmem:[%s4374_s9 + $0x694] sm:$0xf0]  ;;  %v3270_v29 = vor.u32 %v3870_v20, %v3269_v18  ;;  %v3398_v30 = vor.u32 %v3902_v23, %v3397_v21  ;;  %v2807_v23 = vld [vmem:[%s4374_s9 + $0xf8] sm:$0xf0] }
  0xfb   : > { %2219 = vmatpush.bf16.msra.mxu3 %v3094_v33  ;;  %v3653_v27 = vld [vmem:[%s4374_s9 + $0x788] sm:$0xf]  ;;  %v3966_v28 = vld [vmem:[%s4374_s9 + $0x794] sm:$0xf0]  ;;  %v3526_v31 = vor.u32 %v3934_v25, %v3525_v24  ;;  %v1970_v5 = vpop.f32.mrf.mxu1  ;;  %v3784_v24 = vld [vmem:[%s4374_s9 + $0x1ec] sm:$0xf] }
  0xfc   : > { %2178 = vmatpush.bf16.msra.mxu0 %v2694_v40  ;;  %v3253_v32 = vld [vmem:[%s4374_s9 + $0x468] sm:$0xf]  ;;  %v3866_v33 = vld [vmem:[%s4374_s9 + $0x474] sm:$0xf0]  ;;  %v3654_v35 = vor.u32 %v3966_v28, %v3653_v27  ;;  %v2935_v27 = vld [vmem:[%s4374_s9 + $0x1f8] sm:$0xf0] }
  0xfd   : > { %2192 = vmatpush.bf16.msra.mxu1 %v2822_v44  ;;  %v3381_v34 = vld [vmem:[%s4374_s9 + $0x568] sm:$0xf]  ;;  %v3898_v36 = vld [vmem:[%s4374_s9 + $0x574] sm:$0xf0]  ;;  %v3254_v41 = vor.u32 %v3866_v33, %v3253_v32  ;;  %v3816_v28 = vld [vmem:[%s4374_s9 + $0x2ec] sm:$0xf] }
  0xfe   : > { %2206 = vmatpush.bf16.msra.mxu2 %v2950_v45  ;;  %v3509_v37 = vld [vmem:[%s4374_s9 + $0x668] sm:$0xf]  ;;  %v3930_v38 = vld [vmem:[%s4374_s9 + $0x674] sm:$0xf0]  ;;  %v3382_v42 = vor.u32 %v3898_v36, %v3381_v34  ;;  %v3848_v33 = vld [vmem:[%s4374_s9 + $0x3ec] sm:$0xf] }
  0xff   : > { %2220 = vmatpush.bf16.msra.mxu3 %v3078_v49  ;;  %2179 = vmatmul.bf16.vlgmr.msra.gmra.mxu0 %v4480_v3  ;;  %v3637_v39 = vld [vmem:[%s4374_s9 + $0x768] sm:$0xf]  ;;  %v3962_v40 = vld [vmem:[%s4374_s9 + $0x774] sm:$0xf0]  ;;  %v3510_v43 = vor.u32 %v3930_v38, %v3509_v37  ;;  %v3191_v34 = vld [vmem:[%s4374_s9 + $0x3f8] sm:$0xf0] }
 0x100   : > { %2227 = vmatpush.bf16.msrb.mxu0 %v3318_v50  ;;  %2193 = vmatmul.bf16.vlgmr.msra.gmra.mxu1 %v4496_v19  ;;  %v3237_v44 = vld [vmem:[%s4374_s9 + $0x448] sm:$0xf]  ;;  %v3862_v45 = vld [vmem:[%s4374_s9 + $0x454] sm:$0xf0]  ;;  %v3638_v47 = vor.u32 %v3962_v40, %v3637_v39  ;;  %v2938_v39 = vor.u32 %v3784_v24, %v2935_v27  ;;  %v3143_v24 = vld [vmem:[%s4374_s9 + $0x398] sm:$0xf0] }
 0x101   : > { %2241 = vmatpush.bf16.msrb.mxu1 %v3446_v51  ;;  %2207 = vmatmul.bf16.vlgmr.msra.gmra.mxu2 %v4486_v10  ;;  %v3365_v46 = vld [vmem:[%s4374_s9 + $0x548] sm:$0xf]  ;;  %v3894_v49 = vld [vmem:[%s4374_s9 + $0x554] sm:$0xf0]  ;;  %v3238_v57 = vor.u32 %v3862_v45, %v3237_v44  ;;  %v3780_v44 = vld [vmem:[%s4374_s9 + $0x1cc] sm:$0xf]  ;;  %v3194_v45 = vor.u32 %v3848_v33, %v3191_v34 }
 0x102   : > { %2255 = vmatpush.bf16.msrb.mxu2 %v3574_v54  ;;  %2221 = vmatmul.bf16.vlgmr.msra.gmra.mxu3 %v4502_v26  ;;  %v3493_v50 = vld [vmem:[%s4374_s9 + $0x648] sm:$0xf]  ;;  %v3926_v51 = vld [vmem:[%s4374_s9 + $0x654] sm:$0xf0]  ;;  %v3366_v58 = vor.u32 %v3894_v49, %v3365_v46  ;;  %v2919_v46 = vld [vmem:[%s4374_s9 + $0x1d8] sm:$0xf0] }
 0x103   : > { %2269 = vmatpush.bf16.msrb.mxu3 %v3702_v59  ;;  %v3621_v54 = vld [vmem:[%s4374_s9 + $0x748] sm:$0xf]  ;;  %v3958_v55 = vld [vmem:[%s4374_s9 + $0x754] sm:$0xf0]  ;;  %v3494_v59 = vor.u32 %v3926_v51, %v3493_v50  ;;  %v3047_v49 = vld [vmem:[%s4374_s9 + $0x2d8] sm:$0xf0]  ;;  %v1972_v50 = vpop.f32.mrf.mxu1 }
 0x104   : > { %2228 = vmatpush.bf16.msrb.mxu0 %v3302_v1  ;;  %v1956_v60 = vpop.f32.mrf.mxu0  ;;  %v3221_v61 = vld [vmem:[%s4374_s9 + $0x428] sm:$0xf]  ;;  %v3858_v62 = vld [vmem:[%s4374_s9 + $0x434] sm:$0xf0]  ;;  %v3622_v0 = vor.u32 %v3958_v55, %v3621_v54  ;;  %v3844_v51 = vld [vmem:[%s4374_s9 + $0x3cc] sm:$0xf] }
 0x105   : > { %2242 = vmatpush.bf16.msrb.mxu1 %v3430_v2  ;;  %v3349_v63 = vld [vmem:[%s4374_s9 + $0x528] sm:$0xf]  ;;  %v3890_v1 = vld [vmem:[%s4374_s9 + $0x534] sm:$0xf0]  ;;  %v1971_v36 = vadd.f32 %v1970_v5, %v1956_v60  ;;  %v3175_v54 = vld [vmem:[%s4374_s9 + $0x3d8] sm:$0xf0] }
 0x106   : > { %2256 = vmatpush.bf16.msrb.mxu2 %v3558_v4  ;;  %v3477_v2 = vld [vmem:[%s4374_s9 + $0x628] sm:$0xf]  ;;  %v3922_v4 = vld [vmem:[%s4374_s9 + $0x634] sm:$0xf0]  ;;  %v3350_v12 = vor.u32 %v3890_v1, %v3349_v63  ;;  %v3744_v60 = vld [vmem:[%s4374_s9 + $0xac] sm:$0xf]  ;;  %v3178_v63 = vor.u32 %v3844_v51, %v3175_v54 }
 0x107   : > { %2270 = vmatpush.bf16.msrb.mxu3 %v3686_v8  ;;  %v3605_v6 = vld [vmem:[%s4374_s9 + $0x728] sm:$0xf]  ;;  %v3954_v7 = vld [vmem:[%s4374_s9 + $0x734] sm:$0xf0]  ;;  %v3222_v8 = vor.u32 %v3858_v62, %v3221_v61  ;;  %v3478_v13 = vor.u32 %v3922_v4, %v3477_v2  ;;  %v2775_v61 = vld [vmem:[%s4374_s9 + $0xb8] sm:$0xf0] }
 0x108   : > { %2229 = vmatpush.bf16.msrb.mxu0 %v3286_v15  ;;  %v3205_v9 = vld [vmem:[%s4374_s9 + $0x408] sm:$0xf]  ;;  %v3854_v11 = vld [vmem:[%s4374_s9 + $0x414] sm:$0xf0]  ;;  %v3776_v62 = vld [vmem:[%s4374_s9 + $0x1ac] sm:$0xf] }
 0x109   : > { %2243 = vmatpush.bf16.msrb.mxu1 %v3414_v16  ;;  %v3333_v14 = vld [vmem:[%s4374_s9 + $0x508] sm:$0xf]  ;;  %v3886_v15 = vld [vmem:[%s4374_s9 + $0x514] sm:$0xf0]  ;;  %v3206_v25 = vor.u32 %v3854_v11, %v3205_v9  ;;  %v3808_v1 = vld [vmem:[%s4374_s9 + $0x2ac] sm:$0xf] }
 0x10a   : > { %2257 = vmatpush.bf16.msrb.mxu2 %v3542_v17  ;;  %v3461_v16 = vld [vmem:[%s4374_s9 + $0x608] sm:$0xf]  ;;  %v3606_v17 = vor.u32 %v3954_v7, %v3605_v6  ;;  %v3918_v18 = vld [vmem:[%s4374_s9 + $0x614] sm:$0xf0]  ;;  %v3031_v2 = vld [vmem:[%s4374_s9 + $0x2b8] sm:$0xf0]  ;;  %v2778_v7 = vor.u32 %v3744_v60, %v2775_v61 }
 0x10b   : > { %2271 = vmatpush.bf16.msrb.mxu3 %v3670_v22  ;;  %v3589_v20 = vld [vmem:[%s4374_s9 + $0x708] sm:$0xf]  ;;  %v3950_v21 = vld [vmem:[%s4374_s9 + $0x714] sm:$0xf0]  ;;  %v3752_v22 = vld [vmem:[%s4374_s9 + $0xec] sm:$0xf]  ;;  %v3462_v32 = vor.u32 %v3918_v18, %v3461_v16  ;;  %v3034_v11 = vor.u32 %v3808_v1, %v3031_v2 }
 0x10c   : > { %2230 = vmatpush.bf16.msrb.mxu0 %v3270_v29  ;;  %v3063_v29 = vld [vmem:[%s4374_s9 + $0x2f8] sm:$0xf0]  ;;  %v3590_v37 = vor.u32 %v3950_v21, %v3589_v20  ;;  %v2810_v38 = vor.u32 %v3752_v22, %v2807_v23  ;;  %v3840_v4 = vld [vmem:[%s4374_s9 + $0x3ac] sm:$0xf] }
 0x10d   : > { %2244 = vmatpush.bf16.msrb.mxu1 %v3398_v30  ;;  %v1984_v30 = vpop.f32.mrf.mxu2  ;;  %v3066_v40 = vor.u32 %v3816_v28, %v3063_v29  ;;  %v3159_v5 = vld [vmem:[%s4374_s9 + $0x3b8] sm:$0xf0]  ;;  %v3804_v18 = vld [vmem:[%s4374_s9 + $0x28c] sm:$0xf] }
 0x10e   : > { %2258 = vmatpush.bf16.msrb.mxu2 %v3526_v31  ;;  %v3334_v31 = vor.u32 %v3886_v15, %v3333_v14  ;;  %v1985_v55 = vadd.f32 %v1984_v30, %v1971_v36  ;;  %v2759_v14 = vld [vmem:[%s4374_s9 + $0x98] sm:$0xf0]  ;;  %v3772_v15 = vld [vmem:[%s4374_s9 + $0x18c] sm:$0xf]  ;;  %v3162_v16 = vor.u32 %v3840_v4, %v3159_v5 }
 0x10f   : > { %2272 = vmatpush.bf16.msrb.mxu3 %v3654_v35  ;;  %v1998_v35 = vpop.f32.mrf.mxu3  ;;  %v3015_v20 = vld [vmem:[%s4374_s9 + $0x298] sm:$0xf0]  ;;  %v3836_v23 = vld [vmem:[%s4374_s9 + $0x38c] sm:$0xf] }
 0x110   : > { %2231 = vmatpush.bf16.msrb.mxu0 %v3254_v41  ;;  %v1958_v41 = vpop.f32.mrf.mxu0  ;;  %v1999_v6 = vadd.f32 %v1998_v35, %v1985_v55  ;;  %v3018_v30 = vor.u32 %v3804_v18, %v3015_v20  ;;  %v3768_v33 = vld [vmem:[%s4374_s9 + $0x16c] sm:$0xf]  ;;  %v3146_v34 = vor.u32 %v3836_v23, %v3143_v24  ;;  %v2871_v35 = vld [vmem:[%s4374_s9 + $0x178] sm:$0xf0] }
 0x111   : > { %2245 = vmatpush.bf16.msrb.mxu1 %v3382_v42  ;;  %v3748_v42 = vld [vmem:[%s4374_s9 + $0xcc] sm:$0xf]  ;;  %v1973_v21 = vadd.f32 %v1972_v50, %v1958_v41  ;;  %v3127_v41 = vld [vmem:[%s4374_s9 + $0x378] sm:$0xf0] }
 0x112   : > { %2259 = vmatpush.bf16.msrb.mxu2 %v3510_v43  ;;  %v2791_v43 = vld [vmem:[%s4374_s9 + $0xd8] sm:$0xf0]  ;;  %v3800_v36 = vld [vmem:[%s4374_s9 + $0x26c] sm:$0xf] }
 0x113   : > { %2273 = vmatpush.bf16.msrb.mxu3 %v3638_v47  ;;  %v3812_v47 = vld [vmem:[%s4374_s9 + $0x2cc] sm:$0xf]  ;;  %v2983_v55 = vld [vmem:[%s4374_s9 + $0x258] sm:$0xf0] }
 0x114   : > { %2232 = vmatpush.bf16.msrb.mxu0 %v3238_v57  ;;  %v2794_v57 = vor.u32 %v3748_v42, %v2791_v43  ;;  %v3732_v43 = vld [vmem:[%s4374_s9 + $0x4c] sm:$0xf] }
 0x115   : > { %2246 = vmatpush.bf16.msrb.mxu1 %v3366_v58  ;;  %v2922_v58 = vor.u32 %v3780_v44, %v2919_v46  ;;  %v2874_v44 = vor.u32 %v3768_v33, %v2871_v35  ;;  %v2727_v46 = vld [vmem:[%s4374_s9 + $0x58] sm:$0xf0]  ;;  %v3796_v54 = vld [vmem:[%s4374_s9 + $0x24c] sm:$0xf] }
 0x116   : > { %2260 = vmatpush.bf16.msrb.mxu2 %v3494_v59  ;;  %v3050_v59 = vor.u32 %v3812_v47, %v3047_v49  ;;  %v3764_v47 = vld [vmem:[%s4374_s9 + $0x14c] sm:$0xf]  ;;  %v2855_v49 = vld [vmem:[%s4374_s9 + $0x158] sm:$0xf0]  ;;  %v2986_v5 = vor.u32 %v3796_v54, %v2983_v55 }
 0x117   : > { %2274 = vmatpush.bf16.msrb.mxu3 %v3622_v0  ;;  %v2903_v0 = vld [vmem:[%s4374_s9 + $0x1b8] sm:$0xf0]  ;;  %v3828_v61 = vld [vmem:[%s4374_s9 + $0x34c] sm:$0xf]  ;;  %v2858_v1 = vor.u32 %v3764_v47, %v2855_v49 }
 0x118   : > { %2233 = vmatpush.bf16.msrb.mxu0 %v3222_v8  ;;  %v1986_v8 = vpop.f32.mrf.mxu2  ;;  %v2906_v9 = vor.u32 %v3776_v62, %v2903_v0  ;;  %v3111_v62 = vld [vmem:[%s4374_s9 + $0x358] sm:$0xf0]  ;;  %v2730_v0 = vor.u32 %v3732_v43, %v2727_v46  ;;  %v3724_v20 = vld [vmem:[%s4374_s9 + $0xc] sm:$0xf] }
 0x119   : > { %2247 = vmatpush.bf16.msrb.mxu1 %v3350_v12  ;;  %v2000_v12 = vpop.f32.mrf.mxu3  ;;  %v3820_v33 = vld [vmem:[%s4374_s9 + $0x30c] sm:$0xf]  ;;  %v3575_v43 = vld [vmem:[%s4374_s9 + $0x6f8] sm:$0xf0] }
 0x11a   : > { %2261 = vmatpush.bf16.msrb.mxu2 %v3478_v13  ;;  %v3740_v13 = vld [vmem:[%s4374_s9 + $0x8c] sm:$0xf]  ;;  %v3703_v49 = vld [vmem:[%s4374_s9 + $0x7f8] sm:$0xf0] }
 0x11b   : > { %2275 = vmatpush.bf16.msrb.mxu3 %v3606_v17  ;;  %v2887_v17 = vld [vmem:[%s4374_s9 + $0x198] sm:$0xf0]  ;;  %v2762_v27 = vor.u32 %v3740_v13, %v2759_v14  ;;  %v3792_v13 = vld [vmem:[%s4374_s9 + $0x22c] sm:$0xf] }
 0x11c   : > { %2234 = vmatpush.bf16.msrb.mxu0 %v3206_v25  ;;  %v2012_v22 = vpop.f32.mrf.mxu0  ;;  %v2890_v29 = vor.u32 %v3772_v15, %v2887_v17  ;;  %v2967_v14 = vld [vmem:[%s4374_s9 + $0x238] sm:$0xf0]  ;;  %v3976_v47 = vld [vmem:[%s4374_s9 + $0x7ec] sm:$0xf] }
 0x11d   : > { %2248 = vmatpush.bf16.msrb.mxu1 %v3334_v31  ;;  %v2013_v25 = vadd.f32 %v2012_v22, %v1999_v6  ;;  %v2026_v28 = vpop.f32.mrf.mxu1  ;;  %v3736_v31 = vld [vmem:[%s4374_s9 + $0x6c] sm:$0xf]  ;;  %v3095_v17 = vld [vmem:[%s4374_s9 + $0x338] sm:$0xf0] }
 0x11e   : > { %2262 = vmatpush.bf16.msrb.mxu2 %v3462_v32  ;;  %v2743_v32 = vld [vmem:[%s4374_s9 + $0x78] sm:$0xf0]  ;;  %v3728_v6 = vld [vmem:[%s4374_s9 + $0x2c] sm:$0xf] }
 0x11f   : > { %2276 = vmatpush.bf16.msrb.mxu3 %v3590_v37  ;;  %2235 = vmatmul.bf16.vlgmr.msrb.gmra.mxu0 %v4562_v48  ;;  %v2999_v37 = vld [vmem:[%s4374_s9 + $0x278] sm:$0xf0]  ;;  %v2746_v42 = vor.u32 %v3736_v31, %v2743_v32  ;;  %v3756_v22 = vld [vmem:[%s4374_s9 + $0x10c] sm:$0xf] }
 0x120   : > { %2283 = vmatpush.bf16.msra.mxu0 %v2810_v38  ;;  %2249 = vmatmul.bf16.vlgmr.msrb.gmra.mxu1 %v4569_v53  ;;  %v1987_v38 = vadd.f32 %v1986_v8, %v1973_v21  ;;  %v3760_v8 = vld [vmem:[%s4374_s9 + $0x12c] sm:$0xf]  ;;  %v2695_v21 = vld [vmem:[%s4374_s9 + $0x18] sm:$0xf0] }
 0x121   : > { %2297 = vmatpush.bf16.msra.mxu1 %v2938_v39  ;;  %2263 = vmatmul.bf16.vlgmr.msrb.gmra.mxu2 %v4567_v52  ;;  %v2027_v39 = vadd.f32 %v2026_v28, %v2013_v25  ;;  %v2970_v25 = vor.u32 %v3792_v13, %v2967_v14  ;;  %v3788_v28 = vld [vmem:[%s4374_s9 + $0x20c] sm:$0xf]  ;;  %v2951_v32 = vld [vmem:[%s4374_s9 + $0x218] sm:$0xf0] }
 0x122   : > { %2311 = vmatpush.bf16.msra.mxu2 %v3066_v40  ;;  %2277 = vmatmul.bf16.vlgmr.msrb.gmra.mxu3 %v4573_v56  ;;  %v3832_v40 = vld [vmem:[%s4374_s9 + $0x36c] sm:$0xf]  ;;  %v2954_v46 = vor.u32 %v3788_v28, %v2951_v32  ;;  %v3543_v14 = vld [vmem:[%s4374_s9 + $0x6b8] sm:$0xf0] }
 0x123   : > { %2325 = vmatpush.bf16.msra.mxu3 %v3194_v45  ;;  %v3002_v45 = vor.u32 %v3800_v36, %v2999_v37  ;;  %v3130_v50 = vor.u32 %v3832_v40, %v3127_v41  ;;  %v359_v31 = vld [vmem:[#allocation2 + $0x8] sm:$0xff]  ;;  %v2698_v40 = vor.u32 %v3724_v20, %v2695_v21  ;;  %v3447_v41 = vld [vmem:[%s4374_s9 + $0x5f8] sm:$0xf0] }
 0x124   : > { %2284 = vmatpush.bf16.msra.mxu0 %v2794_v57  ;;  %v2040_v51 = vpop.f32.mrf.mxu2  ;;  %v2001_v57 = vadd.f32 %v2000_v12, %v1987_v38  ;;  %v2839_v12 = vld [vmem:[%s4374_s9 + $0x138] sm:$0xf0]  ;;  %v3880_v37 = vld [vmem:[%s4374_s9 + $0x4ec] sm:$0xf] }
 0x125   : > { %2298 = vmatpush.bf16.msra.mxu1 %v2922_v58  ;;  %v2041_v58 = vadd.f32 %v2040_v51, %v2027_v39  ;;  %v2054_v60 = vpop.f32.mrf.mxu3  ;;  %v2842_v24 = vor.u32 %v3760_v8, %v2839_v12  ;;  %v3319_v38 = vld [vmem:[%s4374_s9 + $0x4f8] sm:$0xf0]  ;;  %v3912_v39 = vld [vmem:[%s4374_s9 + $0x5ec] sm:$0xf] }
 0x126   : > { %2312 = vmatpush.bf16.msra.mxu2 %v3050_v59  ;;  %v2014_v59 = vpop.f32.mrf.mxu0  ;;  %v3322_v51 = vor.u32 %v3880_v37, %v3319_v38  ;;  %v3450_v55 = vor.u32 %v3912_v39, %v3447_v41  ;;  %v3287_v8 = vld [vmem:[%s4374_s9 + $0x4b8] sm:$0xf0]  ;;  %v3936_v13 = vld [vmem:[%s4374_s9 + $0x6ac] sm:$0xf] }
 0x127   : > { %2326 = vmatpush.bf16.msra.mxu3 %v3178_v63  ;;  %v355_v63 = vld [vmem:[#allocation2 + $0x30] sm:$0xff]  ;;  %v2015_v2 = vadd.f32 %v2014_v59, %v2001_v57  ;;  %v2055_v4 = vadd.f32 %v2054_v60, %v2041_v58  ;;  %v3876_v58 = vld [vmem:[%s4374_s9 + $0x4cc] sm:$0xf]  ;;  %v3303_v59 = vld [vmem:[%s4374_s9 + $0x4d8] sm:$0xf0] }
 0x128   : > { %2285 = vmatpush.bf16.msra.mxu0 %v2778_v7  ;;  %v2711_v7 = vld [vmem:[%s4374_s9 + $0x38] sm:$0xf0]  ;;  %v3908_v60 = vld [vmem:[%s4374_s9 + $0x5cc] sm:$0xf] }
 0x129   : > { %2299 = vmatpush.bf16.msra.mxu1 %v2906_v9  ;;  %v3114_v9 = vor.u32 %v3828_v61, %v3111_v62  ;;  %v2395_v15 = vadd.f32 %v2055_v4, %v355_v63  ;;  %v2714_v18 = vor.u32 %v3728_v6, %v2711_v7  ;;  %v3706_v61 = vor.u32 %v3976_v47, %v3703_v49  ;;  %v3431_v62 = vld [vmem:[%s4374_s9 + $0x5d8] sm:$0xf0]  ;;  %v3940_v63 = vld [vmem:[%s4374_s9 + $0x6cc] sm:$0xf] }
 0x12a   : > { %2313 = vmatpush.bf16.msra.mxu2 %v3034_v11  ;;  %v2028_v11 = vpop.f32.mrf.mxu1  ;;  %v3306_v4 = vor.u32 %v3876_v58, %v3303_v59  ;;  %v3872_v7 = vld [vmem:[%s4374_s9 + $0x4ac] sm:$0xf]  ;;  %v3415_v12 = vld [vmem:[%s4374_s9 + $0x5b8] sm:$0xf0] }
 0x12b   : > { %2327 = vmatpush.bf16.msra.mxu3 %v3162_v16  ;;  %v3824_v16 = vld [vmem:[%s4374_s9 + $0x32c] sm:$0xf]  ;;  %2403 = vst [vmem:[#allocation2 + $0x30] sm:$0xff] %v2395_v15  ;;  %v2029_v23 = vadd.f32 %v2028_v11, %v2015_v2  ;;  %v3687_v2 = vld [vmem:[%s4374_s9 + $0x7d8] sm:$0xf0] }
 0x12c   : > { %2286 = vmatpush.bf16.msra.mxu0 %v2762_v27  ;;  %v2823_v27 = vld [vmem:[%s4374_s9 + $0x118] sm:$0xf0]  ;;  %v3968_v15 = vld [vmem:[%s4374_s9 + $0x7ac] sm:$0xf] }
 0x12d   : > { %2300 = vmatpush.bf16.msra.mxu1 %v2890_v29  ;;  %v3098_v29 = vor.u32 %v3824_v16, %v3095_v17  ;;  %v2056_v36 = vpop.f32.mrf.mxu3  ;;  %v3671_v16 = vld [vmem:[%s4374_s9 + $0x7b8] sm:$0xf0]  ;;  %v3290_v17 = vor.u32 %v3872_v7, %v3287_v8  ;;  %v3868_v20 = vld [vmem:[%s4374_s9 + $0x48c] sm:$0xf] }
 0x12e   : > { %2314 = vmatpush.bf16.msra.mxu2 %v3018_v30  ;;  %v2042_v30 = vpop.f32.mrf.mxu2  ;;  %v3900_v21 = vld [vmem:[%s4374_s9 + $0x58c] sm:$0xf]  ;;  %v3639_v38 = vld [vmem:[%s4374_s9 + $0x778] sm:$0xf0] }
 0x12f   : > { %2328 = vmatpush.bf16.msra.mxu3 %v3146_v34  ;;  %v3079_v34 = vld [vmem:[%s4374_s9 + $0x318] sm:$0xf0]  ;;  %v2043_v35 = vadd.f32 %v2042_v30, %v2029_v23  ;;  %v3864_v30 = vld [vmem:[%s4374_s9 + $0x46c] sm:$0xf] }
 0x130   : > { %2287 = vmatpush.bf16.msra.mxu0 %v2746_v42  ;;  %v3944_v42 = vld [vmem:[%s4374_s9 + $0x6ec] sm:$0xf]  ;;  %v3399_v23 = vld [vmem:[%s4374_s9 + $0x598] sm:$0xf0] }
 0x131   : > { %2301 = vmatpush.bf16.msra.mxu1 %v2874_v44  ;;  %v2057_v44 = vadd.f32 %v2056_v36, %v2043_v35  ;;  %v3578_v57 = vor.u32 %v3944_v42, %v3575_v43  ;;  %v3402_v28 = vor.u32 %v3900_v21, %v3399_v23  ;;  %v3896_v32 = vld [vmem:[%s4374_s9 + $0x56c] sm:$0xf]  ;;  %v3511_v36 = vld [vmem:[%s4374_s9 + $0x678] sm:$0xf0] }
 0x132   : > { %2315 = vmatpush.bf16.msra.mxu2 %v3002_v45  ;;  %v2826_v45 = vor.u32 %v3756_v22, %v2823_v27  ;;  %v3674_v22 = vor.u32 %v3968_v15, %v3671_v16  ;;  %v3928_v35 = vld [vmem:[%s4374_s9 + $0x66c] sm:$0xf]  ;;  %v3239_v43 = vld [vmem:[%s4374_s9 + $0x458] sm:$0xf0] }
 0x133   : > { %2329 = vmatpush.bf16.msra.mxu3 %v3130_v50  ;;  %v3082_v50 = vor.u32 %v3820_v33, %v3079_v34  ;;  %v2399_v54 = vadd.f32 %v2057_v44, %v359_v31  ;;  %v3255_v31 = vld [vmem:[%s4374_s9 + $0x478] sm:$0xf0]  ;;  %v3960_v37 = vld [vmem:[%s4374_s9 + $0x76c] sm:$0xf]  ;;  %v3514_v41 = vor.u32 %v3928_v35, %v3511_v36 }
 0x134   : > { %2288 = vmatpush.bf16.msra.mxu0 %v2730_v0  ;;  %v3559_v0 = vld [vmem:[%s4374_s9 + $0x6d8] sm:$0xf0]  ;;  %v3258_v39 = vor.u32 %v3864_v30, %v3255_v31  ;;  %v3860_v42 = vld [vmem:[%s4374_s9 + $0x44c] sm:$0xf] }
 0x135   : > { %2302 = vmatpush.bf16.msra.mxu1 %v2858_v1  ;;  %2407 = vst [vmem:[#allocation2 + $0x8] sm:$0xff] %v2399_v54  ;;  %v3972_v1 = vld [vmem:[%s4374_s9 + $0x7cc] sm:$0xf]  ;;  %v3562_v6 = vor.u32 %v3940_v63, %v3559_v0  ;;  %v3383_v34 = vld [vmem:[%s4374_s9 + $0x578] sm:$0xf0]  ;;  %v3242_v54 = vor.u32 %v3860_v42, %v3239_v43 }
 0x136   : > { %2316 = vmatpush.bf16.msra.mxu2 %v2986_v5  ;;  %v3434_v5 = vor.u32 %v3908_v60, %v3431_v62  ;;  %v3690_v11 = vor.u32 %v3972_v1, %v3687_v2  ;;  %v3892_v44 = vld [vmem:[%s4374_s9 + $0x54c] sm:$0xf]  ;;  %v3495_v49 = vld [vmem:[%s4374_s9 + $0x658] sm:$0xf0] }
 0x137   : > { %2330 = vmatpush.bf16.msra.mxu3 %v3114_v9  ;;  %v3904_v9 = vld [vmem:[%s4374_s9 + $0x5ac] sm:$0xf]  ;;  %v3223_v60 = vld [vmem:[%s4374_s9 + $0x438] sm:$0xf0] }
 0x138   : > { %2289 = vmatpush.bf16.msra.mxu0 %v2714_v18  ;;  %v3546_v18 = vor.u32 %v3936_v13, %v3543_v14  ;;  %v3924_v47 = vld [vmem:[%s4374_s9 + $0x64c] sm:$0xf]  ;;  %v3351_v63 = vld [vmem:[%s4374_s9 + $0x538] sm:$0xf0] }
 0x139   : > { %2303 = vmatpush.bf16.msra.mxu1 %v2842_v24  ;;  %v3527_v24 = vld [vmem:[%s4374_s9 + $0x698] sm:$0xf0]  ;;  %v3856_v59 = vld [vmem:[%s4374_s9 + $0x42c] sm:$0xf] }
 0x13a   : > { %2317 = vmatpush.bf16.msra.mxu2 %v2970_v25  ;;  %v3964_v25 = vld [vmem:[%s4374_s9 + $0x78c] sm:$0xf]  ;;  %v3479_v1 = vld [vmem:[%s4374_s9 + $0x638] sm:$0xf0] }
 0x13b   : > { %2331 = vmatpush.bf16.msra.mxu3 %v3098_v29  ;;  %v3920_v0 = vld [vmem:[%s4374_s9 + $0x62c] sm:$0xf]  ;;  %v3335_v14 = vld [vmem:[%s4374_s9 + $0x518] sm:$0xf0] }
 0x13c   : > { %2290 = vmatpush.bf16.msra.mxu0 %v2698_v40  ;;  %v3386_v40 = vor.u32 %v3896_v32, %v3383_v34  ;;  %v2068_v58 = vpop.f32.mrf.mxu0  ;;  %v3482_v8 = vor.u32 %v3920_v0, %v3479_v1  ;;  %v3916_v15 = vld [vmem:[%s4374_s9 + $0x60c] sm:$0xf]  ;;  %v3463_v16 = vld [vmem:[%s4374_s9 + $0x618] sm:$0xf0] }
 0x13d   : > { %2304 = vmatpush.bf16.msra.mxu1 %v2826_v45  ;;  %v3642_v45 = vor.u32 %v3960_v37, %v3639_v38  ;;  %v2082_v2 = vpop.f32.mrf.mxu1  ;;  %v3466_v21 = vor.u32 %v3916_v15, %v3463_v16 }
 0x13e   : > { %2318 = vmatpush.bf16.msra.mxu2 %v2954_v46  ;;  %v3367_v46 = vld [vmem:[%s4374_s9 + $0x558] sm:$0xf0]  ;;  %v2083_v23 = vadd.f32 %v2082_v2, %v2068_v58 }
 0x13f   : > { %2332 = vmatpush.bf16.msra.mxu3 %v3082_v50  ;;  %2291 = vmatmul.bf16.vlgmr.msra.gmra.mxu0 %v4480_v3  ;;  %v3932_v3 = vld [vmem:[%s4374_s9 + $0x68c] sm:$0xf] }
 0x140   : > { %2339 = vmatpush.bf16.msrb.mxu0 %v3322_v51  ;;  %2305 = vmatmul.bf16.vlgmr.msra.gmra.mxu1 %v4496_v19  ;;  %v3655_v19 = vld [vmem:[%s4374_s9 + $0x798] sm:$0xf0]  ;;  %v3530_v29 = vor.u32 %v3932_v3, %v3527_v24  ;;  %v3956_v50 = vld [vmem:[%s4374_s9 + $0x74c] sm:$0xf] }
 0x141   : > { %2353 = vmatpush.bf16.msrb.mxu1 %v3450_v55  ;;  %2319 = vmatmul.bf16.vlgmr.msra.gmra.mxu2 %v4486_v10  ;;  %v3418_v10 = vor.u32 %v3904_v9, %v3415_v12  ;;  %v3658_v33 = vor.u32 %v3964_v25, %v3655_v19  ;;  %v3623_v51 = vld [vmem:[%s4374_s9 + $0x758] sm:$0xf0]  ;;  %v3370_v55 = vor.u32 %v3892_v44, %v3367_v46  ;;  %v3852_v9 = vld [vmem:[%s4374_s9 + $0x40c] sm:$0xf]  ;;  %v360_v46 = vld [vmem:[#allocation2 + $0x20] sm:$0xff] }
 0x142   : > { %2367 = vmatpush.bf16.msrb.mxu2 %v3578_v57  ;;  %2333 = vmatmul.bf16.vlgmr.msra.gmra.mxu3 %v4502_v26  ;;  %v3271_v26 = vld [vmem:[%s4374_s9 + $0x498] sm:$0xf0]  ;;  %v3498_v57 = vor.u32 %v3924_v47, %v3495_v49  ;;  %v3626_v62 = vor.u32 %v3956_v50, %v3623_v51  ;;  %v3884_v12 = vld [vmem:[%s4374_s9 + $0x50c] sm:$0xf] }
 0x143   : > { %2381 = vmatpush.bf16.msrb.mxu3 %v3706_v61  ;;  %v3274_v27 = vor.u32 %v3868_v20, %v3271_v26  ;;  %v3888_v61 = vld [vmem:[%s4374_s9 + $0x52c] sm:$0xf]  ;;  %v3338_v26 = vor.u32 %v3884_v12, %v3335_v14 }
 0x144   : > { %2340 = vmatpush.bf16.msrb.mxu0 %v3306_v4  ;;  %v3952_v4 = vld [vmem:[%s4374_s9 + $0x72c] sm:$0xf]  ;;  %v3354_v7 = vor.u32 %v3888_v61, %v3351_v63  ;;  %v2096_v20 = vpop.f32.mrf.mxu2  ;;  %v2070_v24 = vpop.f32.mrf.mxu0 }
 0x145   : > { %2354 = vmatpush.bf16.msrb.mxu1 %v3434_v5  ;;  %v3607_v5 = vld [vmem:[%s4374_s9 + $0x738] sm:$0xf0]  ;;  %v2084_v25 = vpop.f32.mrf.mxu1  ;;  %v2097_v19 = vadd.f32 %v2096_v20, %v2083_v23 }
 0x146   : > { %2368 = vmatpush.bf16.msrb.mxu2 %v3562_v6  ;;  %v3226_v6 = vor.u32 %v3856_v59, %v3223_v60  ;;  %v3610_v13 = vor.u32 %v3952_v4, %v3607_v5  ;;  %v2085_v30 = vadd.f32 %v2084_v25, %v2070_v24 }
 0x147   : > { %2382 = vmatpush.bf16.msrb.mxu3 %v3690_v11  ;;  %v3207_v11 = vld [vmem:[%s4374_s9 + $0x418] sm:$0xf0] }
 0x148   : > { %2341 = vmatpush.bf16.msrb.mxu0 %v3290_v17  ;;  %v3948_v17 = vld [vmem:[%s4374_s9 + $0x70c] sm:$0xf] }
 0x149   : > { %2355 = vmatpush.bf16.msrb.mxu1 %v3418_v10  ;;  %v3591_v10 = vld [vmem:[%s4374_s9 + $0x718] sm:$0xf0] }
 0x14a   : > { %2369 = vmatpush.bf16.msrb.mxu2 %v3546_v18  ;;  %v3210_v18 = vor.u32 %v3852_v9, %v3207_v11  ;;  %v3594_v3 = vor.u32 %v3948_v17, %v3591_v10 }
 0x14b   : > { %2383 = vmatpush.bf16.msrb.mxu3 %v3674_v22  ;;  %v2110_v22 = vpop.f32.mrf.mxu3 }
 0x14c   : > { %2342 = vmatpush.bf16.msrb.mxu0 %v3274_v27  ;;  %v2111_v27 = vadd.f32 %v2110_v22, %v2097_v19 }
 0x14d   : > { %2356 = vmatpush.bf16.msrb.mxu1 %v3402_v28  ;;  %v2098_v28 = vpop.f32.mrf.mxu2 }
 0x14e   : > { %2370 = vmatpush.bf16.msrb.mxu2 %v3530_v29  ;;  %v2099_v34 = vadd.f32 %v2098_v28, %v2085_v30 }
 0x14f   : > { %2384 = vmatpush.bf16.msrb.mxu3 %v3658_v33 }
 0x150   : > { %2343 = vmatpush.bf16.msrb.mxu0 %v3258_v39 }
 0x151   : > { %2357 = vmatpush.bf16.msrb.mxu1 %v3386_v40  ;;  %v356_v40 = vld [vmem:[#allocation2] sm:$0xff] }
 0x152   : > { %2371 = vmatpush.bf16.msrb.mxu2 %v3514_v41 }
 0x153   : > { %2385 = vmatpush.bf16.msrb.mxu3 %v3642_v45  ;;  %v2112_v29 = vpop.f32.mrf.mxu3 }
 0x154   : > { %2344 = vmatpush.bf16.msrb.mxu0 %v3242_v54  ;;  %v2113_v37 = vadd.f32 %v2112_v29, %v2099_v34 }
 0x155   : > { %2358 = vmatpush.bf16.msrb.mxu1 %v3370_v55 }
 0x156   : > { %2372 = vmatpush.bf16.msrb.mxu2 %v3498_v57 }
 0x157   : > { %2386 = vmatpush.bf16.msrb.mxu3 %v3626_v62 }
 0x158   : > { %2345 = vmatpush.bf16.msrb.mxu0 %v3226_v6 }
 0x159   : > { %2359 = vmatpush.bf16.msrb.mxu1 %v3354_v7 }
 0x15a   : > { %2373 = vmatpush.bf16.msrb.mxu2 %v3482_v8 }
 0x15b   : > { %2387 = vmatpush.bf16.msrb.mxu3 %v3610_v13  ;;  %v357_v13 = vld [vmem:[#allocation2 + $0x18] sm:$0xff] }
 0x15c   : > { %2346 = vmatpush.bf16.msrb.mxu0 %v3210_v18  ;;  %v2124_v31 = vpop.f32.mrf.mxu0 }
 0x15d   : > { %2360 = vmatpush.bf16.msrb.mxu1 %v3338_v26  ;;  %v2125_v32 = vadd.f32 %v2124_v31, %v2111_v27  ;;  %v2138_v33 = vpop.f32.mrf.mxu1 }
 0x15e   : > { %2374 = vmatpush.bf16.msrb.mxu2 %v3466_v21  ;;  %v361_v21 = vld [vmem:[#allocation2 + $0x28] sm:$0xff] }
 0x15f   : > { %2388 = vmatpush.bf16.msrb.mxu3 %v3594_v3  ;;  %2347 = vmatmul.bf16.vlgmr.msrb.gmra.mxu0 %v4562_v48  ;;  %v2139_v35 = vadd.f32 %v2138_v33, %v2125_v32 }
 0x160   : > { %2361 = vmatmul.bf16.vlgmr.msrb.gmra.mxu1 %v4569_v53 }
 0x161   : > { %2375 = vmatmul.bf16.vlgmr.msrb.gmra.mxu2 %v4567_v52 }
 0x162   : > { %2389 = vmatmul.bf16.vlgmr.msrb.gmra.mxu3 %v4573_v56 }
 0x164   : > { %v2152_v36 = vpop.f32.mrf.mxu2  ;;  %v2126_v39 = vpop.f32.mrf.mxu0 }
 0x165   : > { %v2153_v38 = vadd.f32 %v2152_v36, %v2139_v35  ;;  %v2166_v48 = vpop.f32.mrf.mxu3  ;;  %v2127_v53 = vadd.f32 %v2126_v39, %v2113_v37  ;;  %v2140_v52 = vpop.f32.mrf.mxu1 }
 0x167   : > { %v2167_v41 = vadd.f32 %v2166_v48, %v2153_v38  ;;  %v2141_v56 = vadd.f32 %v2140_v52, %v2127_v53 }
 0x169   : > { %v2396_v42 = vadd.f32 %v2167_v41, %v356_v40 }
 0x16b   : > { %2404 = vst [vmem:[#allocation2] sm:$0xff] %v2396_v42  ;;  %v358_v42 = vld [vmem:[#allocation2 + $0x10] sm:$0xff] }
 0x16c   : > { %v2154_v43 = vpop.f32.mrf.mxu2 }
 0x16d   : > { %v2155_v44 = vadd.f32 %v2154_v43, %v2141_v56  ;;  %v2168_v45 = vpop.f32.mrf.mxu3 }
 0x16f   : > { %v2169_v47 = vadd.f32 %v2168_v45, %v2155_v44 }
 0x171   : > { %v2400_v49 = vadd.f32 %v2169_v47, %v360_v46 }
 0x173   : > { %2408 = vst [vmem:[#allocation2 + $0x20] sm:$0xff] %v2400_v49 }
 0x17c   : > { %v2180_v50 = vpop.f32.mrf.mxu0 }
 0x17d   : > { %v2194_v51 = vpop.f32.mrf.mxu1 }
 0x17e   : > { %v2195_v57 = vadd.f32 %v2194_v51, %v2180_v50  ;;  %v362_v50 = vld [vmem:[#allocation2 + $0x38] sm:$0xff] }
 0x184   : > { %v2208_v54 = vpop.f32.mrf.mxu2  ;;  %v2182_v58 = vpop.f32.mrf.mxu0 }
 0x185   : > { %v2222_v55 = vpop.f32.mrf.mxu3  ;;  %v2196_v59 = vpop.f32.mrf.mxu1  ;;  %v2209_v60 = vadd.f32 %v2208_v54, %v2195_v57 }
 0x186   : > { %v2197_v0 = vadd.f32 %v2196_v59, %v2182_v58 }
 0x187   : > { %v2223_v61 = vadd.f32 %v2222_v55, %v2209_v60 }
 0x18c   : > { %v2210_v62 = vpop.f32.mrf.mxu2 }
 0x18d   : > { %v2224_v63 = vpop.f32.mrf.mxu3  ;;  %v2211_v5 = vadd.f32 %v2210_v62, %v2197_v0 }
 0x18f   : > { %v2225_v8 = vadd.f32 %v2224_v63, %v2211_v5 }
 0x19c   : > { %v2236_v1 = vpop.f32.mrf.mxu0 }
 0x19d   : > { %v2237_v2 = vadd.f32 %v2236_v1, %v2223_v61  ;;  %v2250_v4 = vpop.f32.mrf.mxu1 }
 0x19f   : > { %v2251_v6 = vadd.f32 %v2250_v4, %v2237_v2 }
 0x1a4   : > { %v2264_v7 = vpop.f32.mrf.mxu2  ;;  %v2238_v11 = vpop.f32.mrf.mxu0 }
 0x1a5   : > { %v2265_v9 = vadd.f32 %v2264_v7, %v2251_v6  ;;  %v2278_v12 = vpop.f32.mrf.mxu3  ;;  %v2239_v14 = vadd.f32 %v2238_v11, %v2225_v8  ;;  %v2252_v16 = vpop.f32.mrf.mxu1 }
 0x1a7   : > { %v2279_v15 = vadd.f32 %v2278_v12, %v2265_v9  ;;  %v2253_v10 = vadd.f32 %v2252_v16, %v2239_v14 }
 0x1a9   : > { %v2397_v17 = vadd.f32 %v2279_v15, %v357_v13 }
 0x1ab   : > { %2405 = vst [vmem:[#allocation2 + $0x18] sm:$0xff] %v2397_v17 }
 0x1ac   : > { %v2266_v18 = vpop.f32.mrf.mxu2 }
 0x1ad   : > { %v2267_v20 = vadd.f32 %v2266_v18, %v2253_v10  ;;  %v2280_v26 = vpop.f32.mrf.mxu3 }
 0x1af   : > { %v2281_v22 = vadd.f32 %v2280_v26, %v2267_v20 }
 0x1b1   : > { %v2401_v23 = vadd.f32 %v2281_v22, %v361_v21 }
 0x1b3   : > { %2409 = vst [vmem:[#allocation2 + $0x28] sm:$0xff] %v2401_v23 }
 0x1bc   : > { %v2292_v3 = vpop.f32.mrf.mxu0 }
 0x1bd   : > { %v2306_v24 = vpop.f32.mrf.mxu1 }
 0x1be   : > { %v2307_v27 = vadd.f32 %v2306_v24, %v2292_v3 }
 0x1c4   : > { %v2320_v25 = vpop.f32.mrf.mxu2  ;;  %v2294_v28 = vpop.f32.mrf.mxu0 }
 0x1c5   : > { %v2334_v19 = vpop.f32.mrf.mxu3  ;;  %v2308_v29 = vpop.f32.mrf.mxu1  ;;  %v2321_v30 = vadd.f32 %v2320_v25, %v2307_v27 }
 0x1c6   : > { %v2309_v33 = vadd.f32 %v2308_v29, %v2294_v28 }
 0x1c7   : > { %v2335_v32 = vadd.f32 %v2334_v19, %v2321_v30 }
 0x1cc   : > { %v2322_v31 = vpop.f32.mrf.mxu2 }
 0x1cd   : > { %v2336_v34 = vpop.f32.mrf.mxu3  ;;  %v2323_v38 = vadd.f32 %v2322_v31, %v2309_v33 }
 0x1cf   : > { %v2337_v40 = vadd.f32 %v2336_v34, %v2323_v38 }
 0x1dc   : > { %v2348_v35 = vpop.f32.mrf.mxu0 }
 0x1dd   : > { %v2349_v36 = vadd.f32 %v2348_v35, %v2335_v32  ;;  %v2362_v37 = vpop.f32.mrf.mxu1 }
 0x1df   : > { %v2363_v39 = vadd.f32 %v2362_v37, %v2349_v36 }
 0x1e4   : > { %v2376_v48 = vpop.f32.mrf.mxu2  ;;  %v2350_v52 = vpop.f32.mrf.mxu0 }
 0x1e5   : > { %v2377_v53 = vadd.f32 %v2376_v48, %v2363_v39  ;;  %v2390_v41 = vpop.f32.mrf.mxu3  ;;  %v2351_v43 = vadd.f32 %v2350_v52, %v2337_v40  ;;  %v2364_v45 = vpop.f32.mrf.mxu1 }
 0x1e7   : > { %v2391_v56 = vadd.f32 %v2390_v41, %v2377_v53  ;;  %v2365_v46 = vadd.f32 %v2364_v45, %v2351_v43 }
 0x1e9   : > { %v2398_v44 = vadd.f32 %v2391_v56, %v358_v42 }
 0x1eb   : > { %2406 = vst [vmem:[#allocation2 + $0x10] sm:$0xff] %v2398_v44 }
 0x1ec   : > { %v2378_v47 = vpop.f32.mrf.mxu2 }
 0x1ed   : > { %v2379_v49 = vadd.f32 %v2378_v47, %v2365_v46  ;;  %v2392_v51 = vpop.f32.mrf.mxu3 }
 0x1ef   : > { %v2393_v54 = vadd.f32 %v2392_v51, %v2379_v49  ;;  %2414 = sbr.rel (%p3707_p8) target bundleno = 516 (0x204), region = 71 }
 0x1f1   : > { %v2402_v55 = vadd.f32 %v2393_v54, %v362_v50 }
 0x1f3   : > { %2410 = vst [vmem:[#allocation2 + $0x38] sm:$0xff] %v2402_v55 }
 0x1f4   : > { %v2415_v57 = vld [vmem:[#allocation2 + $0x30] sm:$0xff]  ;;  %v2416_v58 = vld [vmem:[#allocation2] sm:$0xff]  ;;  %v2417_v63 = vld [vmem:[#allocation2 + $0x18] sm:$0xff] }
 0x1f5   : > { %v2423_v59 = vld [vmem:[%s334_s12] sm:$0xf]  ;;  %v2418_v0 = vld [vmem:[#allocation2 + $0x10] sm:$0xff]  ;;  %v2419_v6 = vld [vmem:[#allocation2 + $0x8] sm:$0xff] }
 0x1f6   : > { %v2425_v60 = vperm.slane %v2423_v59, 0  ;;  %v2426_v61 = vperm.slane %v2423_v59, 1  ;;  %v2441_v62 = vld [vmem:[%s339_s14] sm:$0xf]  ;;  %v2427_v4 = vperm.slane %v2423_v59, 2  ;;  %v2428_v5 = vperm.slane %v2423_v59, 3 }
 0x1f7   : > { %v2443_v1 = vperm.slane %v2441_v62, 0  ;;  %v2444_v2 = vperm.slane %v2441_v62, 1  ;;  %v2420_v7 = vld [vmem:[#allocation2 + $0x20] sm:$0xff]  ;;  %v2445_v11 = vperm.slane %v2441_v62, 2  ;;  %v2446_v12 = vperm.slane %v2441_v62, 3  ;;  %v2421_v13 = vld [vmem:[#allocation2 + $0x28] sm:$0xff] }
 0x1f8   : > { %v2433_v8 = vmul.f32 %v2425_v60, %v2415_v57  ;;  %v2434_v9 = vmul.f32 %v2426_v61, %v2416_v58  ;;  %v2435_v15 = vmul.f32 %v2427_v4, %v2417_v63  ;;  %v2436_v16 = vmul.f32 %v2428_v5, %v2418_v0 }
 0x1f9   : > { %v2437_v17 = vmul.f32 %v2425_v60, %v2419_v6  ;;  %v2438_v10 = vmul.f32 %v2426_v61, %v2420_v7  ;;  %v2439_v26 = vmul.f32 %v2427_v4, %v2421_v13 }
 0x1fa   : > { %v2422_v14 = vld [vmem:[#allocation2 + $0x38] sm:$0xff]  ;;  %v2451_v18 = vadd.f32 %v2443_v1, %v2433_v8  ;;  %v2452_v20 = vadd.f32 %v2444_v2, %v2434_v9  ;;  %v2453_v22 = vadd.f32 %v2445_v11, %v2435_v15  ;;  %v2454_v23 = vadd.f32 %v2446_v12, %v2436_v16 }
 0x1fb   : > { %v2440_v21 = vmul.f32 %v2428_v5, %v2422_v14  ;;  %v2455_v3 = vadd.f32 %v2443_v1, %v2437_v17  ;;  %v2456_v24 = vadd.f32 %v2444_v2, %v2438_v10  ;;  %v2457_v27 = vadd.f32 %v2445_v11, %v2439_v26 }
 0x1fc   : > { %v2459_v25 = vmax.f32 %v2451_v18, 0.0  ;;  %v2460_v19 = vmax.f32 %v2452_v20, 0.0  ;;  %v2461_v29 = vmax.f32 %v2453_v22, 0.0  ;;  %v2462_v30 = vmax.f32 %v2454_v23, 0.0 }
 0x1fd   : > { %v2458_v28 = vadd.f32 %v2446_v12, %v2440_v21  ;;  %v2463_v31 = vmax.f32 %v2455_v3, 0.0  ;;  %v2464_v32 = vmax.f32 %v2456_v24, 0.0  ;;  %v2465_v34 = vmax.f32 %v2457_v27, 0.0 }
 0x1fe   : > { %v2467_v33 = vpack.c.bf16 %v2460_v19, %v2459_v25  ;;  %v2468_v36 = vpack.c.bf16 %v2462_v30, %v2461_v29 }
 0x1ff   : > { %v2466_v35 = vmax.f32 %v2458_v28, 0.0  ;;  %v2469_v37 = vpack.c.bf16 %v2464_v32, %v2463_v31 }
 0x200   : > { %2471 = vst [vmem:[%s4392_s13] sm:$0xff] %v2467_v33 }
 0x201   : > { %v2470_v38 = vpack.c.bf16 %v2466_v35, %v2465_v34  ;;  %2472 = vst [vmem:[%s4392_s13 + $0x8] sm:$0xff] %v2468_v36 }
 0x202   : > { %2473 = vst [vmem:[%s4392_s13 + $0x10] sm:$0xff] %v2469_v37 }
 0x203   : > { %2474 = vst [vmem:[%s4392_s13 + $0x18] sm:$0xff] %v2470_v38 }
 0x204 PF: > { %2481 = sbr.rel (!%p4348_p1) target bundleno = 528 (0x210), region = 75  ;;  %s3979_s22 = sshll.u32 (%p4348_p1), %s4196_s23, 4 }
 0x205   : > { %s5055_s5 = sld [smem:[#allocation16_spill]] (%p4348_p1) }
 0x207   : > { %v2500_v39 = vld [vmem:[%s4392_s13] sm:$0xff] (%p4348_p1) }
 0x208   : > { %v2502_v48 = vld [vmem:[%s4392_s13 + $0x8] sm:$0xff] (%p4348_p1) }
 0x209   : > { %v2504_v40 = vld [vmem:[%s4392_s13 + $0x10] sm:$0xff] }
 0x20a   : > { %v2506_v53 = vld [vmem:[%s4392_s13 + $0x18] sm:$0xff] }
 0x20b   : > { %s2487_s6 = scalar_lea.vmem %s5055_s5, %s3979_s22 }
 0x20c   : > { %2501 = vst [vmem:[%s2487_s6] sm:$0xff] %v2500_v39 }
 0x20d   : > { %2503 = vst [vmem:[%s2487_s6 + $0x8] sm:$0xff] %v2502_v48 }
 0x20e   : > { %2505 = vst [vmem:[%s2487_s6 + $0x80] sm:$0xff] %v2504_v40 }
 0x20f   : > { %2507 = vst [vmem:[%s2487_s6 + $0x88] sm:$0xff] %v2506_v53 }
 0x210 PF: > { %s17_s26 = sadd.s32 1, %s4208_s26   ;;  %s5056_s15 = sld [smem:[#allocation8_spill]] }
 0x211   : > { %p14_p9 = scmp.ge.s32.totalorder %s17_s26, 34   ;;  %s5057_s16 = sld [smem:[#allocation14_spill]] }
 0x212   : > { %s5058_s23 = sld [smem:[#allocation13_spill]]  ;;  %s5063_s17 = smov %s4176_s18 }
 0x213   : > { %s5059_s20 = sld [smem:[#allocation9_spill]]  ;;  %s5064_s18 = smov %s4180_s19 }
 0x214   : > { %s5060_s21 = sld [smem:[#allocation12_spill]]  ;;  %s5066_s22 = smov %s4200_s24 }
 0x215   : > { %s5061_s7 = sld [smem:[#allocation10_spill]] }
 0x216   : > { %s5062_s9 = sld [smem:[#allocation11_spill]] }
 0x218   : > { %s5065_s19 = smov %s5058_s23  ;;  %s5067_s23 = smov %s4204_s25 }
 0x219   :  { %16 = sbr.rel (!%p14_p9) target bundleno = 10 (0xa), region = 144 }
 0x21b   : > { %s5068_s24 = smov %s5061_s7 }
 0x21c   : > { %s5069_s25 = smov %s5062_s9 }
 0x21e   :  { %2523 = vsyncpa [#allocation5], 1 }
 0x21f   :  { %2525 = vsyncpa [#allocation5 + $0x1], 1 }

// kernel: vgg_forward.25
= control target key start
LH: loop header
LB: loop body
LE: loop exit
PB: predicated region body
PF: predicated region fallthrough
CT: control target
= control target key end

     0   :  { %s1643_s15 = smov 0   ;;  %s1645_s16 = smov 0   ;;  %s1806_s0 = inlined_call_operand.vmem [shape: bf16[16,4096], index: 0, kind: input, shape index: {}]   ;;  %s1807_s1 = inlined_call_operand.vmem [shape: bf16[4096,128], index: 1, kind: input, shape index: {}]   ;;  %s1808_s2 = inlined_call_operand.vmem [shape: f32[1,128], index: 2, kind: input, shape index: {}]   ;;  %s1809_s3 = inlined_call_operand.vmem [shape: f32[1,128], index: 3, kind: input, shape index: {}]   ;;  %s1810_s4 = inlined_call_operand.vmem [shape: f32[16,128], index: 4, kind: output, shape index: {}]  }
   0x1   :  { %s1647_s17 = smov 0   ;;  %s1649_s18 = smov 0  }
   0x2   :  { %s1651_s19 = smov 0  }
   0x3 LB: > { %s26_s20 = sadd.s32 1, %s1611_s18  ;;  %p49_p1 = scmp.ne.s32.totalorder %s1603_s16, %s1599_s15  ;;  %s1615_s19 = sphi %s1651_s19, %s14_s19   ;;  %s1611_s18 = sphi %s1649_s18, %s1814_s18   ;;  %s1607_s17 = sphi %s1647_s17, %s1813_s17   ;;  %s1603_s16 = sphi %s1645_s16, %s1812_s16   ;;  %s1599_s15 = sphi %s1643_s15, %s1811_s15  }
   0x4   : > { %p27_p0 = scmp.ge.s32.totalorder %s26_s20, 4  ;;  %p50_p2 = scmp.eq.s32.totalorder %s1615_s19, 0 }
   0x5   : > { %s42_s22 = sadd.s32 1, %s1603_s16  ;;  %p1159_p5 = scmp.ge.s32.totalorder %s1615_s19, 4 }
   0x6   : > { %s1816_s20 = smov (%p27_p0, %s26_s20), 0  ;;  %p51_p3 = por %p50_p2, %p49_p1 }
   0x7   : > { %s38_s21 = ssub.s32 %s1611_s18, %s1816_s20  ;;  %195 = sbr.rel (%p1159_p5) target bundleno = 24 (0x18), region = 24 }
   0x8   : > { %p40_p4 = scmp.eq.s32.totalorder %s38_s21, 0 }
   0xa   : > { %s1678_s23 = scalar_select %p40_p4, %s1603_s16, %s42_s22  }
   0xc   : > { %198 = sbr.rel (!%p51_p3) target bundleno = 24 (0x18), region = 28  ;;  %s200_s24 = sand.u32 (%p51_p3), 1, %s1603_s16  }
   0xd   : > { %s1461_s25 = sshll.u32 (%p51_p3), %s1611_s18, 5  ;;  %s1160_s26 = sshll.u32 (%p51_p3), %s200_s24, 6 }
   0xe   : > { %s208_s29 = scalar_lea.vmem (%p51_p3), %s1806_s0, %s1461_s25  ;;  %s202_s30 = scalar_lea.vmem (%p51_p3), [#allocation3], %s1160_s26 }
   0xf   : > { %v221_v0 = vld [vmem:[%s208_s29] sm:$0xff] (%p51_p3)  ;;  %v223_v1 = vld [vmem:[%s208_s29 + $0x8] sm:$0xff] (%p51_p3)  ;;  %v225_v2 = vld [vmem:[%s208_s29 + $0x10] sm:$0xff] (%p51_p3) }
  0x10   : > { %222 = vst [vmem:[%s202_s30] sm:$0xff] (%p51_p3), %v221_v0  ;;  %v227_v3 = vld [vmem:[%s208_s29 + $0x18] sm:$0xff] (%p51_p3)  ;;  %v229_v4 = vld [vmem:[%s208_s29 + $0x80] sm:$0xff] (%p51_p3)  ;;  %v231_v5 = vld [vmem:[%s208_s29 + $0x88] sm:$0xff] (%p51_p3) }
  0x11   : > { %224 = vst [vmem:[%s202_s30 + $0x8] sm:$0xff] %v223_v1  ;;  %v233_v6 = vld [vmem:[%s208_s29 + $0x90] sm:$0xff]  ;;  %v235_v7 = vld [vmem:[%s208_s29 + $0x98] sm:$0xff] }
  0x12   : > { %226 = vst [vmem:[%s202_s30 + $0x10] sm:$0xff] %v225_v2 }
  0x13   : > { %228 = vst [vmem:[%s202_s30 + $0x18] sm:$0xff] %v227_v3 }
  0x14   : > { %230 = vst [vmem:[%s202_s30 + $0x20] sm:$0xff] %v229_v4 }
  0x15   : > { %232 = vst [vmem:[%s202_s30 + $0x28] sm:$0xff] %v231_v5 }
  0x16   : > { %234 = vst [vmem:[%s202_s30 + $0x30] sm:$0xff] %v233_v6 }
  0x17   : > { %236 = vst [vmem:[%s202_s30 + $0x38] sm:$0xff] %v235_v7 }
  0x18 PF: > { %p1163_p6 = scmp.ge.s32.totalorder %s1615_s19, 1  ;;  %p253_p7 = scmp.lt.s32.totalorder %s1615_s19, 5 }
  0x1a   : > { %p254_p8 = pnand %p1163_p6, %p253_p7 }
  0x1b   : > { %s260_s5 = sand.u32 (!%p254_p8), 1, %s1599_s15   ;;  %s1165_s6 = sshll.u32 (!%p254_p8), %s1607_s17, 7 }
  0x1c   : > { %257 = sbr.rel (%p254_p8) target bundleno = 266 (0x10a), region = 55  ;;  %s1164_s7 = sshll.u32 (!%p254_p8), %s260_s5, 6 }
  0x1d   : > { %p305_p9 = scmp.lt.s32.totalorder (!%p254_p8), %s1165_s6, 511  ;;  %s1695_s12 = scalar_lea.vmem (!%p254_p8), [#allocation3], %s1164_s7 }
  0x1e   : > { %p1167_p10 = scmp.ne.s32.totalorder (!%p254_p8), %s1607_s17, 0 }
  0x21   : > { %s1818_s6 = smov (!%p305_p9, %s1165_s6), 511  ;;  %331 = sbr.rel (%p1167_p10) target bundleno = 41 (0x29), region = 63 }
  0x22   : > { %s1166_s8 = sshll.u32 %s1818_s6, 2 }
  0x23   : > { %s1693_s11 = scalar_lea.vmem %s1807_s1, %s1166_s8 }
  0x26   : > { %v1617_v8 = vmov 0.0  }
  0x27   : > { %332 = vst [vmem:[#allocation2] sm:$0xff] %v1617_v8 }
  0x28   : > { %333 = vst [vmem:[#allocation2 + $0x8] sm:$0xff] %v1617_v8 }
  0x29 PF: > { %v1477_v9 = vld [vmem:[%s1693_s11 + $0x38] sm:$0xff]  ;;  %v1476_v13 = vld [vmem:[%s1693_s11 + $0x30] sm:$0xff]  ;;  %v1475_v17 = vld [vmem:[%s1693_s11 + $0x28] sm:$0xff]  ;;  %p1456_p11 = scmp.ne.s32.totalorder %s1607_s17, 3 }
  0x2a   : > { %v1485_v10 = vld [vmem:[%s1693_s11 + $0x78] sm:$0xff]  ;;  %896 = vmatpush.bf16.msra.mxu0 %v1477_v9  ;;  %v1484_v14 = vld [vmem:[%s1693_s11 + $0x70] sm:$0xff]  ;;  %v1483_v18 = vld [vmem:[%s1693_s11 + $0x68] sm:$0xff] }
  0x2b   : > { %v1493_v11 = vld [vmem:[%s1693_s11 + $0xb8] sm:$0xff]  ;;  %910 = vmatpush.bf16.msra.mxu1 %v1485_v10  ;;  %v1492_v15 = vld [vmem:[%s1693_s11 + $0xb0] sm:$0xff]  ;;  %v1491_v19 = vld [vmem:[%s1693_s11 + $0xa8] sm:$0xff] }
  0x2c   : > { %v1501_v12 = vld [vmem:[%s1693_s11 + $0xf8] sm:$0xff]  ;;  %924 = vmatpush.bf16.msra.mxu2 %v1493_v11  ;;  %v1500_v16 = vld [vmem:[%s1693_s11 + $0xf0] sm:$0xff]  ;;  %v1499_v20 = vld [vmem:[%s1693_s11 + $0xe8] sm:$0xff] }
  0x2d   : > { %938 = vmatpush.bf16.msra.mxu3 %v1501_v12  ;;  %v1474_v21 = vld [vmem:[%s1693_s11 + $0x20] sm:$0xff]  ;;  %v1473_v25 = vld [vmem:[%s1693_s11 + $0x18] sm:$0xff]  ;;  %v1472_v29 = vld [vmem:[%s1693_s11 + $0x10] sm:$0xff] }
  0x2e   : > { %897 = vmatpush.bf16.msra.mxu0 %v1476_v13  ;;  %v1482_v22 = vld [vmem:[%s1693_s11 + $0x60] sm:$0xff]  ;;  %v1481_v26 = vld [vmem:[%s1693_s11 + $0x58] sm:$0xff]  ;;  %v1480_v30 = vld [vmem:[%s1693_s11 + $0x50] sm:$0xff] }
  0x2f   : > { %911 = vmatpush.bf16.msra.mxu1 %v1484_v14  ;;  %v1490_v23 = vld [vmem:[%s1693_s11 + $0xa0] sm:$0xff]  ;;  %v1489_v27 = vld [vmem:[%s1693_s11 + $0x98] sm:$0xff]  ;;  %v1488_v31 = vld [vmem:[%s1693_s11 + $0x90] sm:$0xff] }
  0x30   : > { %925 = vmatpush.bf16.msra.mxu2 %v1492_v15  ;;  %v1498_v24 = vld [vmem:[%s1693_s11 + $0xe0] sm:$0xff]  ;;  %v1497_v28 = vld [vmem:[%s1693_s11 + $0xd8] sm:$0xff]  ;;  %v1496_v32 = vld [vmem:[%s1693_s11 + $0xd0] sm:$0xff] }
  0x31   : > { %939 = vmatpush.bf16.msra.mxu3 %v1500_v16  ;;  %v1471_v33 = vld [vmem:[%s1693_s11 + $0x8] sm:$0xff]  ;;  %v1470_v37 = vld [vmem:[%s1693_s11] sm:$0xff]  ;;  %v1509_v41 = vld [vmem:[%s1693_s11 + $0x138] sm:$0xff] }
  0x32   : > { %898 = vmatpush.bf16.msra.mxu0 %v1475_v17  ;;  %v1479_v34 = vld [vmem:[%s1693_s11 + $0x48] sm:$0xff]  ;;  %v1478_v38 = vld [vmem:[%s1693_s11 + $0x40] sm:$0xff]  ;;  %v1517_v42 = vld [vmem:[%s1693_s11 + $0x178] sm:$0xff] }
  0x33   : > { %912 = vmatpush.bf16.msra.mxu1 %v1483_v18  ;;  %v1487_v35 = vld [vmem:[%s1693_s11 + $0x88] sm:$0xff]  ;;  %v1486_v39 = vld [vmem:[%s1693_s11 + $0x80] sm:$0xff]  ;;  %v1178_v43 = vld [vmem:[%s1695_s12 + $0x8] sm:$0xf] }
  0x34   : > { %926 = vmatpush.bf16.msra.mxu2 %v1491_v19  ;;  %v1495_v36 = vld [vmem:[%s1693_s11 + $0xc8] sm:$0xff]  ;;  %v1494_v40 = vld [vmem:[%s1693_s11 + $0xc0] sm:$0xff]  ;;  %v1467_v44 = vld [vmem:[%s1695_s12 + $0x24] sm:$0xf0] }
  0x35   : > { %940 = vmatpush.bf16.msra.mxu3 %v1499_v20  ;;  %v1463_v45 = vld [vmem:[%s1695_s12 + $0xc] sm:$0xf]  ;;  %v1170_v47 = vld [vmem:[%s1695_s12] sm:$0xf]  ;;  %v1462_v49 = vld [vmem:[%s1695_s12 + $0x4] sm:$0xf]  ;;  %v1179_v53 = vor.u32 %v1467_v44, %v1178_v43 }
  0x36   : > { %899 = vmatpush.bf16.msra.mxu0 %v1474_v21  ;;  %v1180_v46 = vld [vmem:[%s1695_s12 + $0x28] sm:$0xf0]  ;;  %v1466_v48 = vld [vmem:[%s1695_s12 + $0x1c] sm:$0xf0]  ;;  %v1172_v50 = vld [vmem:[%s1695_s12 + $0x20] sm:$0xf0] }
  0x37   : > { %913 = vmatpush.bf16.msra.mxu1 %v1482_v22  ;;  %v1525_v51 = vld [vmem:[%s1693_s11 + $0x1b8] sm:$0xff]  ;;  %v1183_v54 = vor.u32 %v1463_v45, %v1180_v46  ;;  %v1171_v55 = vor.u32 %v1466_v48, %v1170_v47  ;;  %v1175_v56 = vor.u32 %v1462_v49, %v1172_v50  ;;  %v1508_v57 = vld [vmem:[%s1693_s11 + $0x130] sm:$0xff]  ;;  %v1507_v61 = vld [vmem:[%s1693_s11 + $0x128] sm:$0xff] }
  0x38   : > { %927 = vmatpush.bf16.msra.mxu2 %v1490_v23  ;;  %v1533_v52 = vld [vmem:[%s1693_s11 + $0x1f8] sm:$0xff]  ;;  %v1516_v58 = vld [vmem:[%s1693_s11 + $0x170] sm:$0xff]  ;;  %v1515_v62 = vld [vmem:[%s1693_s11 + $0x168] sm:$0xff] }
  0x39   : > { %941 = vmatpush.bf16.msra.mxu3 %v1498_v24  ;;  %v1524_v59 = vld [vmem:[%s1693_s11 + $0x1b0] sm:$0xff]  ;;  %v1523_v63 = vld [vmem:[%s1693_s11 + $0x1a8] sm:$0xff]  ;;  %v1506_v1 = vld [vmem:[%s1693_s11 + $0x120] sm:$0xff] }
  0x3a   : > { %900 = vmatpush.bf16.msra.mxu0 %v1473_v25  ;;  %v1532_v60 = vld [vmem:[%s1693_s11 + $0x1f0] sm:$0xff]  ;;  %v1531_v0 = vld [vmem:[%s1693_s11 + $0x1e8] sm:$0xff]  ;;  %v1514_v2 = vld [vmem:[%s1693_s11 + $0x160] sm:$0xff] }
  0x3b   : > { %914 = vmatpush.bf16.msra.mxu1 %v1481_v26  ;;  %v1522_v3 = vld [vmem:[%s1693_s11 + $0x1a0] sm:$0xff]  ;;  %v1505_v5 = vld [vmem:[%s1693_s11 + $0x118] sm:$0xff]  ;;  %v1504_v9 = vld [vmem:[%s1693_s11 + $0x110] sm:$0xff] }
  0x3c   : > { %928 = vmatpush.bf16.msra.mxu2 %v1489_v27  ;;  %v1530_v4 = vld [vmem:[%s1693_s11 + $0x1e0] sm:$0xff]  ;;  %v1513_v6 = vld [vmem:[%s1693_s11 + $0x158] sm:$0xff]  ;;  %v1512_v10 = vld [vmem:[%s1693_s11 + $0x150] sm:$0xff] }
  0x3d   : > { %942 = vmatpush.bf16.msra.mxu3 %v1497_v28  ;;  %v1521_v7 = vld [vmem:[%s1693_s11 + $0x198] sm:$0xff]  ;;  %v1520_v11 = vld [vmem:[%s1693_s11 + $0x190] sm:$0xff]  ;;  %v1503_v13 = vld [vmem:[%s1693_s11 + $0x108] sm:$0xff] }
  0x3e   : > { %901 = vmatpush.bf16.msra.mxu0 %v1472_v29  ;;  %v1529_v8 = vld [vmem:[%s1693_s11 + $0x1d8] sm:$0xff]  ;;  %v1528_v12 = vld [vmem:[%s1693_s11 + $0x1d0] sm:$0xff]  ;;  %v1511_v14 = vld [vmem:[%s1693_s11 + $0x148] sm:$0xff] }
  0x3f   : > { %915 = vmatpush.bf16.msra.mxu1 %v1480_v30  ;;  %v1519_v15 = vld [vmem:[%s1693_s11 + $0x188] sm:$0xff]  ;;  %v1502_v17 = vld [vmem:[%s1693_s11 + $0x100] sm:$0xff] }
  0x40   : > { %929 = vmatpush.bf16.msra.mxu2 %v1488_v31  ;;  %v1527_v16 = vld [vmem:[%s1693_s11 + $0x1c8] sm:$0xff]  ;;  %v1510_v18 = vld [vmem:[%s1693_s11 + $0x140] sm:$0xff] }
  0x41   : > { %943 = vmatpush.bf16.msra.mxu3 %v1496_v32  ;;  %v1518_v19 = vld [vmem:[%s1693_s11 + $0x180] sm:$0xff]  ;;  %v1194_v25 = vld [vmem:[%s1695_s12 + $0x18] sm:$0xf]  ;;  %v1465_v27 = vld [vmem:[%s1695_s12 + $0x1c] sm:$0xf] }
  0x42   : > { %902 = vmatpush.bf16.msra.mxu0 %v1471_v33  ;;  %v1526_v20 = vld [vmem:[%s1693_s11 + $0x1c0] sm:$0xff]  ;;  %v1469_v26 = vld [vmem:[%s1695_s12 + $0x34] sm:$0xf0]  ;;  %v1196_v28 = vld [vmem:[%s1695_s12 + $0x38] sm:$0xf0] }
  0x43   : > { %916 = vmatpush.bf16.msra.mxu1 %v1479_v34  ;;  %v1186_v21 = vld [vmem:[%s1695_s12 + $0x10] sm:$0xf]  ;;  %v1464_v23 = vld [vmem:[%s1695_s12 + $0x14] sm:$0xf]  ;;  %v1195_v31 = vor.u32 %v1469_v26, %v1194_v25  ;;  %v1199_v32 = vor.u32 %v1465_v27, %v1196_v28 }
  0x44   : > { %930 = vmatpush.bf16.msra.mxu2 %v1487_v35  ;;  %v1468_v22 = vld [vmem:[%s1695_s12 + $0x2c] sm:$0xf0]  ;;  %v1188_v24 = vld [vmem:[%s1695_s12 + $0x30] sm:$0xf0] }
  0x45   : > { %944 = vmatpush.bf16.msra.mxu3 %v1495_v36  ;;  %v1187_v29 = vor.u32 %v1468_v22, %v1186_v21  ;;  %v1191_v30 = vor.u32 %v1464_v23, %v1188_v24 }
  0x46   : > { %903 = vmatpush.bf16.msra.mxu0 %v1470_v37 }
  0x47   : > { %917 = vmatpush.bf16.msra.mxu1 %v1478_v38 }
  0x48   : > { %931 = vmatpush.bf16.msra.mxu2 %v1486_v39 }
  0x49   : > { %945 = vmatpush.bf16.msra.mxu3 %v1494_v40  ;;  %904 = vmatmul.bf16.vlgmr.msra.gmra.mxu0 %v1171_v55  ;;  %v334_v55 = vld [vmem:[#allocation2] sm:$0xff] }
  0x4a   : > { %952 = vmatpush.bf16.msrb.mxu0 %v1509_v41  ;;  %918 = vmatmul.bf16.vlgmr.msra.gmra.mxu1 %v1175_v56 }
  0x4b   : > { %966 = vmatpush.bf16.msrb.mxu1 %v1517_v42  ;;  %932 = vmatmul.bf16.vlgmr.msra.gmra.mxu2 %v1179_v53 }
  0x4c   : > { %980 = vmatpush.bf16.msrb.mxu2 %v1525_v51  ;;  %946 = vmatmul.bf16.vlgmr.msra.gmra.mxu3 %v1183_v54 }
  0x4d   : > { %994 = vmatpush.bf16.msrb.mxu3 %v1533_v52 }
  0x4e   : > { %953 = vmatpush.bf16.msrb.mxu0 %v1508_v57 }
  0x4f   : > { %967 = vmatpush.bf16.msrb.mxu1 %v1516_v58 }
  0x50   : > { %981 = vmatpush.bf16.msrb.mxu2 %v1524_v59 }
  0x51   : > { %995 = vmatpush.bf16.msrb.mxu3 %v1532_v60 }
  0x52   : > { %954 = vmatpush.bf16.msrb.mxu0 %v1507_v61 }
  0x53   : > { %968 = vmatpush.bf16.msrb.mxu1 %v1515_v62 }
  0x54   : > { %982 = vmatpush.bf16.msrb.mxu2 %v1523_v63  ;;  %v335_v63 = vld [vmem:[#allocation2 + $0x8] sm:$0xff] }
  0x55   : > { %996 = vmatpush.bf16.msrb.mxu3 %v1531_v0 }
  0x56   : > { %955 = vmatpush.bf16.msrb.mxu0 %v1506_v1 }
  0x57   : > { %969 = vmatpush.bf16.msrb.mxu1 %v1514_v2 }
  0x58   : > { %983 = vmatpush.bf16.msrb.mxu2 %v1522_v3 }
  0x59   : > { %997 = vmatpush.bf16.msrb.mxu3 %v1530_v4 }
  0x5a   : > { %956 = vmatpush.bf16.msrb.mxu0 %v1505_v5 }
  0x5b   : > { %970 = vmatpush.bf16.msrb.mxu1 %v1513_v6 }
  0x5c   : > { %984 = vmatpush.bf16.msrb.mxu2 %v1521_v7 }
  0x5d   : > { %998 = vmatpush.bf16.msrb.mxu3 %v1529_v8 }
  0x5e   : > { %957 = vmatpush.bf16.msrb.mxu0 %v1504_v9 }
  0x5f   : > { %971 = vmatpush.bf16.msrb.mxu1 %v1512_v10 }
  0x60   : > { %985 = vmatpush.bf16.msrb.mxu2 %v1520_v11 }
  0x61   : > { %999 = vmatpush.bf16.msrb.mxu3 %v1528_v12 }
  0x62   : > { %958 = vmatpush.bf16.msrb.mxu0 %v1503_v13 }
  0x63   : > { %972 = vmatpush.bf16.msrb.mxu1 %v1511_v14 }
  0x64   : > { %986 = vmatpush.bf16.msrb.mxu2 %v1519_v15 }
  0x65   : > { %1000 = vmatpush.bf16.msrb.mxu3 %v1527_v16 }
  0x66   : > { %959 = vmatpush.bf16.msrb.mxu0 %v1502_v17 }
  0x67   : > { %973 = vmatpush.bf16.msrb.mxu1 %v1510_v18 }
  0x68   : > { %987 = vmatpush.bf16.msrb.mxu2 %v1518_v19 }
  0x69   : > { %1001 = vmatpush.bf16.msrb.mxu3 %v1526_v20  ;;  %960 = vmatmul.bf16.vlgmr.msrb.gmra.mxu0 %v1187_v29 }
  0x6a   : > { %974 = vmatmul.bf16.vlgmr.msrb.gmra.mxu1 %v1191_v30 }
  0x6b   : > { %988 = vmatmul.bf16.vlgmr.msrb.gmra.mxu2 %v1195_v31 }
  0x6c   : > { %1002 = vmatmul.bf16.vlgmr.msrb.gmra.mxu3 %v1199_v32 }
  0xc6   : > { %v905_v33 = vpop.f32.mrf.mxu0 }
  0xc7   : > { %v919_v34 = vpop.f32.mrf.mxu1 }
  0xc8   : > { %v920_v37 = vadd.f32 %v919_v34, %v905_v33 }
  0xce   : > { %v933_v35 = vpop.f32.mrf.mxu2  ;;  %v907_v38 = vpop.f32.mrf.mxu0 }
  0xcf   : > { %v947_v36 = vpop.f32.mrf.mxu3  ;;  %v921_v39 = vpop.f32.mrf.mxu1  ;;  %v934_v40 = vadd.f32 %v933_v35, %v920_v37 }
  0xd0   : > { %v922_v44 = vadd.f32 %v921_v39, %v907_v38 }
  0xd1   : > { %v948_v43 = vadd.f32 %v947_v36, %v934_v40 }
  0xd6   : > { %v935_v41 = vpop.f32.mrf.mxu2 }
  0xd7   : > { %v949_v42 = vpop.f32.mrf.mxu3  ;;  %v936_v48 = vadd.f32 %v935_v41, %v922_v44 }
  0xd9   : > { %v950_v52 = vadd.f32 %v949_v42, %v936_v48 }
  0xe6   : > { %v961_v45 = vpop.f32.mrf.mxu0 }
  0xe7   : > { %v962_v46 = vadd.f32 %v961_v45, %v948_v43  ;;  %v975_v47 = vpop.f32.mrf.mxu1 }
  0xe9   : > { %v976_v49 = vadd.f32 %v975_v47, %v962_v46 }
  0xee   : > { %v989_v50 = vpop.f32.mrf.mxu2  ;;  %v963_v54 = vpop.f32.mrf.mxu0 }
  0xef   : > { %v1003_v51 = vpop.f32.mrf.mxu3  ;;  %v990_v53 = vadd.f32 %v989_v50, %v976_v49  ;;  %v964_v57 = vadd.f32 %v963_v54, %v950_v52  ;;  %v977_v59 = vpop.f32.mrf.mxu1 }
  0xf1   : > { %v1004_v56 = vadd.f32 %v1003_v51, %v990_v53  ;;  %v978_v60 = vadd.f32 %v977_v59, %v964_v57 }
  0xf3   : > { %v1008_v58 = vadd.f32 %v1004_v56, %v334_v55 }
  0xf5   : > { %1010 = vst [vmem:[#allocation2] sm:$0xff] %v1008_v58 }
  0xf6   : > { %v991_v61 = vpop.f32.mrf.mxu2 }
  0xf7   : > { %v992_v62 = vadd.f32 %v991_v61, %v978_v60  ;;  %v1005_v0 = vpop.f32.mrf.mxu3 }
  0xf9   : > { %v1006_v1 = vadd.f32 %v1005_v0, %v992_v62  ;;  %1015 = sbr.rel (%p1456_p11) target bundleno = 266 (0x10a), region = 67 }
  0xfb   : > { %v1009_v2 = vadd.f32 %v1006_v1, %v335_v63 }
  0xfd   : > { %1011 = vst [vmem:[#allocation2 + $0x8] sm:$0xff] %v1009_v2 }
  0xfe   : > { %v1016_v3 = vld [vmem:[#allocation2] sm:$0xff] }
  0xff   : > { %v1575_v4 = vld [vmem:[%s1808_s2] ss:$0 sm:$0xff] }
 0x100   : > { %v1576_v5 = vld [vmem:[%s1809_s3] ss:$0 sm:$0xff]  ;;  %v1022_v7 = vmul.f32 %v1575_v4, %v1016_v3 }
 0x102   : > { %v1028_v9 = vadd.f32 %v1576_v5, %v1022_v7 }
 0x104   : > { %v1017_v6 = vld [vmem:[#allocation2 + $0x8] sm:$0xff]  ;;  %1030 = vst [vmem:[%s1810_s4] sm:$0xff] %v1028_v9 }
 0x105   : > { %v1023_v8 = vmul.f32 %v1575_v4, %v1017_v6 }
 0x107   : > { %v1029_v10 = vadd.f32 %v1576_v5, %v1023_v8 }
 0x109   : > { %1031 = vst [vmem:[%s1810_s4 + $0x8] sm:$0xff] %v1029_v10 }
 0x10a PF: > { %s14_s19 = sadd.s32 1, %s1615_s19   ;;  %s1811_s15 = smov %s1603_s16 }
 0x10b   : > { %p11_p12 = scmp.ge.s32.totalorder %s14_s19, 6   ;;  %s1812_s16 = smov %s1678_s23 }
 0x10c   : > { %s1813_s17 = smov %s1611_s18  ;;  %s1814_s18 = smov %s1816_s20 }
 0x10d   :  { %13 = sbr.rel (!%p11_p12) target bundleno = 3 (0x3), region = 111 }

// kernel: vgg_forward.21
= control target key start
LH: loop header
LB: loop body
LE: loop exit
PB: predicated region body
PF: predicated region fallthrough
CT: control target
= control target key end

     0   :  { %s5797_s1 = inlined_call_operand.vmem [shape: bf16[1152,512], index: 1, kind: input, shape index: {}]   ;;  %s5798_s0 = inlined_call_operand.vmem [shape: bf16[16,1152], index: 0, kind: input, shape index: {}]   ;;  %s5799_s2 = inlined_call_operand.vmem [shape: f32[1,512], index: 2, kind: input, shape index: {}]   ;;  %s5800_s3 = inlined_call_operand.vmem [shape: f32[1,512], index: 3, kind: input, shape index: {}]   ;;  %s5801_s4 = inlined_call_operand.vmem [shape: bf16[16,512], index: 4, kind: output, shape index: {}]  }
   0x1   :  { %v2511_v0 = vld [vmem:[%s5797_s1 + $0xe0] sm:$0xf]  ;;  %v3588_v1 = vld [vmem:[%s5797_s1 + $0xec] sm:$0xf0] }
   0x2   :  { %v2639_v2 = vld [vmem:[%s5797_s1 + $0x1e0] sm:$0xf]  ;;  %v2512_v3 = vor.u32 %v3588_v1, %v2511_v0  ;;  %v3620_v4 = vld [vmem:[%s5797_s1 + $0x1ec] sm:$0xf0] }
   0x3   :  { %v2767_v5 = vld [vmem:[%s5797_s1 + $0x2e0] sm:$0xf]  ;;  %v3652_v6 = vld [vmem:[%s5797_s1 + $0x2ec] sm:$0xf0]  ;;  %v2640_v7 = vor.u32 %v3620_v4, %v2639_v2 }
   0x4   :  { %v2768_v8 = vor.u32 %v3652_v6, %v2767_v5  ;;  %v2895_v9 = vld [vmem:[%s5797_s1 + $0x3e0] sm:$0xf]  ;;  %v3684_v10 = vld [vmem:[%s5797_s1 + $0x3ec] sm:$0xf0]  ;;  %1801 = vmatpush.bf16.msra.mxu0 %v2512_v3 }
   0x5   :  { %v2495_v11 = vld [vmem:[%s5797_s1 + $0xc0] sm:$0xf]  ;;  %v2896_v12 = vor.u32 %v3684_v10, %v2895_v9  ;;  %v3584_v13 = vld [vmem:[%s5797_s1 + $0xcc] sm:$0xf0]  ;;  %1815 = vmatpush.bf16.msra.mxu1 %v2640_v7 }
   0x6   :  { %v2623_v14 = vld [vmem:[%s5797_s1 + $0x1c0] sm:$0xf]  ;;  %v3616_v15 = vld [vmem:[%s5797_s1 + $0x1cc] sm:$0xf0]  ;;  %1829 = vmatpush.bf16.msra.mxu2 %v2768_v8  ;;  %v2496_v16 = vor.u32 %v3584_v13, %v2495_v11 }
   0x7   :  { %v2624_v17 = vor.u32 %v3616_v15, %v2623_v14  ;;  %v2751_v18 = vld [vmem:[%s5797_s1 + $0x2c0] sm:$0xf]  ;;  %v3648_v19 = vld [vmem:[%s5797_s1 + $0x2cc] sm:$0xf0]  ;;  %1843 = vmatpush.bf16.msra.mxu3 %v2896_v12 }
   0x8   :  { %v2879_v20 = vld [vmem:[%s5797_s1 + $0x3c0] sm:$0xf]  ;;  %v2752_v21 = vor.u32 %v3648_v19, %v2751_v18  ;;  %v3680_v22 = vld [vmem:[%s5797_s1 + $0x3cc] sm:$0xf0]  ;;  %1802 = vmatpush.bf16.msra.mxu0 %v2496_v16 }
   0x9   :  { %v2479_v23 = vld [vmem:[%s5797_s1 + $0xa0] sm:$0xf]  ;;  %v3580_v24 = vld [vmem:[%s5797_s1 + $0xac] sm:$0xf0]  ;;  %v2880_v25 = vor.u32 %v3680_v22, %v2879_v20  ;;  %1816 = vmatpush.bf16.msra.mxu1 %v2624_v17 }
   0xa   :  { %v2607_v26 = vld [vmem:[%s5797_s1 + $0x1a0] sm:$0xf]  ;;  %v3612_v27 = vld [vmem:[%s5797_s1 + $0x1ac] sm:$0xf0]  ;;  %v2480_v29 = vor.u32 %v3580_v24, %v2479_v23  ;;  %1830 = vmatpush.bf16.msra.mxu2 %v2752_v21 }
   0xb   :  { %v2735_v28 = vld [vmem:[%s5797_s1 + $0x2a0] sm:$0xf]  ;;  %v3644_v30 = vld [vmem:[%s5797_s1 + $0x2ac] sm:$0xf0]  ;;  %v2608_v33 = vor.u32 %v3612_v27, %v2607_v26  ;;  %1844 = vmatpush.bf16.msra.mxu3 %v2880_v25 }
   0xc   :  { %v2863_v31 = vld [vmem:[%s5797_s1 + $0x3a0] sm:$0xf]  ;;  %v3676_v32 = vld [vmem:[%s5797_s1 + $0x3ac] sm:$0xf0]  ;;  %v2736_v34 = vor.u32 %v3644_v30, %v2735_v28  ;;  %1803 = vmatpush.bf16.msra.mxu0 %v2480_v29 }
   0xd   :  { %v2463_v35 = vld [vmem:[%s5797_s1 + $0x80] sm:$0xf]  ;;  %v3576_v36 = vld [vmem:[%s5797_s1 + $0x8c] sm:$0xf0]  ;;  %v2864_v38 = vor.u32 %v3676_v32, %v2863_v31  ;;  %1817 = vmatpush.bf16.msra.mxu1 %v2608_v33 }
   0xe   :  { %v2591_v37 = vld [vmem:[%s5797_s1 + $0x180] sm:$0xf]  ;;  %v3608_v39 = vld [vmem:[%s5797_s1 + $0x18c] sm:$0xf0]  ;;  %v2464_v44 = vor.u32 %v3576_v36, %v2463_v35  ;;  %1831 = vmatpush.bf16.msra.mxu2 %v2736_v34 }
   0xf   :  { %v2719_v40 = vld [vmem:[%s5797_s1 + $0x280] sm:$0xf]  ;;  %v3640_v41 = vld [vmem:[%s5797_s1 + $0x28c] sm:$0xf0]  ;;  %v2592_v45 = vor.u32 %v3608_v39, %v2591_v37  ;;  %1845 = vmatpush.bf16.msra.mxu3 %v2864_v38 }
  0x10   :  { %v2847_v42 = vld [vmem:[%s5797_s1 + $0x380] sm:$0xf]  ;;  %v3672_v43 = vld [vmem:[%s5797_s1 + $0x38c] sm:$0xf0]  ;;  %v2720_v46 = vor.u32 %v3640_v41, %v2719_v40  ;;  %1804 = vmatpush.bf16.msra.mxu0 %v2464_v44 }
  0x11   :  { %v2447_v47 = vld [vmem:[%s5797_s1 + $0x60] sm:$0xf]  ;;  %v3572_v48 = vld [vmem:[%s5797_s1 + $0x6c] sm:$0xf0]  ;;  %v2848_v50 = vor.u32 %v3672_v43, %v2847_v42  ;;  %1818 = vmatpush.bf16.msra.mxu1 %v2592_v45 }
  0x12   :  { %v2575_v49 = vld [vmem:[%s5797_s1 + $0x160] sm:$0xf]  ;;  %v3604_v51 = vld [vmem:[%s5797_s1 + $0x16c] sm:$0xf0]  ;;  %v2448_v56 = vor.u32 %v3572_v48, %v2447_v47  ;;  %1832 = vmatpush.bf16.msra.mxu2 %v2720_v46 }
  0x13   :  { %v2703_v52 = vld [vmem:[%s5797_s1 + $0x260] sm:$0xf]  ;;  %v3636_v53 = vld [vmem:[%s5797_s1 + $0x26c] sm:$0xf0]  ;;  %v2576_v57 = vor.u32 %v3604_v51, %v2575_v49  ;;  %1846 = vmatpush.bf16.msra.mxu3 %v2848_v50 }
  0x14   :  { %v2831_v54 = vld [vmem:[%s5797_s1 + $0x360] sm:$0xf]  ;;  %v3668_v55 = vld [vmem:[%s5797_s1 + $0x36c] sm:$0xf0]  ;;  %v2704_v58 = vor.u32 %v3636_v53, %v2703_v52  ;;  %1805 = vmatpush.bf16.msra.mxu0 %v2448_v56  ;;  %v3553_v53 = vld [vmem:[%s5798_s0 + $0x20] sm:$0xf0] }
  0x15   :  { %v2431_v59 = vld [vmem:[%s5797_s1 + $0x40] sm:$0xf]  ;;  %v3568_v60 = vld [vmem:[%s5797_s1 + $0x4c] sm:$0xf0]  ;;  %v2832_v62 = vor.u32 %v3668_v55, %v2831_v54  ;;  %1819 = vmatpush.bf16.msra.mxu1 %v2576_v57  ;;  %v2371_v54 = vld [vmem:[%s5798_s0 + $0x8] sm:$0xf] }
  0x16   :  { %v2559_v61 = vld [vmem:[%s5797_s1 + $0x140] sm:$0xf]  ;;  %v3600_v63 = vld [vmem:[%s5797_s1 + $0x14c] sm:$0xf0]  ;;  %v2432_v4 = vor.u32 %v3568_v60, %v2431_v59  ;;  %1833 = vmatpush.bf16.msra.mxu2 %v2704_v58  ;;  %v3554_v59 = vld [vmem:[%s5798_s0 + $0x28] sm:$0xf0] }
  0x17   :  { %v2687_v0 = vld [vmem:[%s5797_s1 + $0x240] sm:$0xf]  ;;  %v3632_v1 = vld [vmem:[%s5797_s1 + $0x24c] sm:$0xf0]  ;;  %v2560_v5 = vor.u32 %v3600_v63, %v2559_v61  ;;  %1847 = vmatpush.bf16.msra.mxu3 %v2832_v62 }
  0x18   :  { %v2815_v2 = vld [vmem:[%s5797_s1 + $0x340] sm:$0xf]  ;;  %v3664_v3 = vld [vmem:[%s5797_s1 + $0x34c] sm:$0xf0]  ;;  %v2688_v6 = vor.u32 %v3632_v1, %v2687_v0  ;;  %1806 = vmatpush.bf16.msra.mxu0 %v2432_v4  ;;  %v4140_v1 = vor.u32 %v3554_v59, %v2371_v54 }
  0x19   :  { %v2415_v7 = vld [vmem:[%s5797_s1 + $0x20] sm:$0xf]  ;;  %v3564_v8 = vld [vmem:[%s5797_s1 + $0x2c] sm:$0xf0]  ;;  %v2816_v10 = vor.u32 %v3664_v3, %v2815_v2  ;;  %1820 = vmatpush.bf16.msra.mxu1 %v2560_v5 }
  0x1a   :  { %v2543_v9 = vld [vmem:[%s5797_s1 + $0x120] sm:$0xf]  ;;  %v3596_v11 = vld [vmem:[%s5797_s1 + $0x12c] sm:$0xf0]  ;;  %v2416_v16 = vor.u32 %v3564_v8, %v2415_v7  ;;  %1834 = vmatpush.bf16.msra.mxu2 %v2688_v6  ;;  %v3549_v6 = vld [vmem:[%s5798_s0 + $0x4] sm:$0xf] }
  0x1b   :  { %v2671_v12 = vld [vmem:[%s5797_s1 + $0x220] sm:$0xf]  ;;  %v3628_v13 = vld [vmem:[%s5797_s1 + $0x22c] sm:$0xf0]  ;;  %v2544_v19 = vor.u32 %v3596_v11, %v2543_v9  ;;  %1848 = vmatpush.bf16.msra.mxu3 %v2816_v10  ;;  %v2365_v7 = vld [vmem:[%s5798_s0 + $0x24] sm:$0xf0] }
  0x1c   :  { %v2799_v14 = vld [vmem:[%s5797_s1 + $0x320] sm:$0xf]  ;;  %v3660_v15 = vld [vmem:[%s5797_s1 + $0x32c] sm:$0xf0]  ;;  %v2672_v20 = vor.u32 %v3628_v13, %v2671_v12  ;;  %1807 = vmatpush.bf16.msra.mxu0 %v2416_v16  ;;  %v3550_v8 = vld [vmem:[%s5798_s0 + $0xc] sm:$0xf]  ;;  %v4162_v10 = vor.u32 %v3549_v6, %v2365_v7 }
  0x1d   :  { %v2399_v17 = vld [vmem:[%s5797_s1] sm:$0xf]  ;;  %v3560_v18 = vld [vmem:[%s5797_s1 + $0xc] sm:$0xf0]  ;;  %v2800_v24 = vor.u32 %v3660_v15, %v2799_v14  ;;  %1821 = vmatpush.bf16.msra.mxu1 %v2544_v19 }
  0x1e   :  { %v2527_v21 = vld [vmem:[%s5797_s1 + $0x100] sm:$0xf]  ;;  %v3592_v22 = vld [vmem:[%s5797_s1 + $0x10c] sm:$0xf0]  ;;  %v2400_v31 = vor.u32 %v3560_v18, %v2399_v17  ;;  %1835 = vmatpush.bf16.msra.mxu2 %v2672_v20 }
  0x1f   :  { %v2655_v23 = vld [vmem:[%s5797_s1 + $0x200] sm:$0xf]  ;;  %v3624_v25 = vld [vmem:[%s5797_s1 + $0x20c] sm:$0xf0]  ;;  %v2528_v35 = vor.u32 %v3592_v22, %v2527_v21  ;;  %1849 = vmatpush.bf16.msra.mxu3 %v2800_v24 }
  0x20   :  { %v2783_v26 = vld [vmem:[%s5797_s1 + $0x300] sm:$0xf]  ;;  %v3656_v27 = vld [vmem:[%s5797_s1 + $0x30c] sm:$0xf0]  ;;  %v2656_v36 = vor.u32 %v3624_v25, %v2655_v23  ;;  %1808 = vmatpush.bf16.msra.mxu0 %v2400_v31 }
  0x21   :  { %v3023_v28 = vld [vmem:[%s5797_s1 + $0x4e0] sm:$0xf]  ;;  %v3716_v29 = vld [vmem:[%s5797_s1 + $0x4ec] sm:$0xf0]  ;;  %v2784_v39 = vor.u32 %v3656_v27, %v2783_v26  ;;  %1822 = vmatpush.bf16.msra.mxu1 %v2528_v35 }
  0x22   :  { %v3151_v30 = vld [vmem:[%s5797_s1 + $0x5e0] sm:$0xf]  ;;  %v3748_v32 = vld [vmem:[%s5797_s1 + $0x5ec] sm:$0xf0]  ;;  %v3024_v40 = vor.u32 %v3716_v29, %v3023_v28  ;;  %1836 = vmatpush.bf16.msra.mxu2 %v2656_v36 }
  0x23   :  { %v3279_v33 = vld [vmem:[%s5797_s1 + $0x6e0] sm:$0xf]  ;;  %v3780_v34 = vld [vmem:[%s5797_s1 + $0x6ec] sm:$0xf0]  ;;  %v3152_v43 = vor.u32 %v3748_v32, %v3151_v30  ;;  %1850 = vmatpush.bf16.msra.mxu3 %v2784_v39 }
  0x24   :  { %v3407_v37 = vld [vmem:[%s5797_s1 + $0x7e0] sm:$0xf]  ;;  %v3812_v38 = vld [vmem:[%s5797_s1 + $0x7ec] sm:$0xf0]  ;;  %v3280_v44 = vor.u32 %v3780_v34, %v3279_v33  ;;  %1857 = vmatpush.bf16.msrb.mxu0 %v3024_v40  ;;  %1823 = vmatmul.bf16.vlgmr.msra.gmra.mxu1 %v4162_v10 }
  0x25   :  { %v3007_v41 = vld [vmem:[%s5797_s1 + $0x4c0] sm:$0xf]  ;;  %v3712_v42 = vld [vmem:[%s5797_s1 + $0x4cc] sm:$0xf0]  ;;  %v3408_v48 = vor.u32 %v3812_v38, %v3407_v37  ;;  %1871 = vmatpush.bf16.msrb.mxu1 %v3152_v43  ;;  %1837 = vmatmul.bf16.vlgmr.msra.gmra.mxu2 %v4140_v1 }
  0x26   :  { %v3135_v45 = vld [vmem:[%s5797_s1 + $0x5c0] sm:$0xf]  ;;  %v3744_v46 = vld [vmem:[%s5797_s1 + $0x5cc] sm:$0xf0]  ;;  %v3008_v55 = vor.u32 %v3712_v42, %v3007_v41  ;;  %1885 = vmatpush.bf16.msrb.mxu2 %v3280_v44 }
  0x27   :  { %v3263_v47 = vld [vmem:[%s5797_s1 + $0x6c0] sm:$0xf]  ;;  %v3776_v49 = vld [vmem:[%s5797_s1 + $0x6cc] sm:$0xf0]  ;;  %v3136_v60 = vor.u32 %v3744_v46, %v3135_v45  ;;  %1899 = vmatpush.bf16.msrb.mxu3 %v3408_v48 }
  0x28   :  { %v3391_v50 = vld [vmem:[%s5797_s1 + $0x7c0] sm:$0xf]  ;;  %v3808_v51 = vld [vmem:[%s5797_s1 + $0x7cc] sm:$0xf0]  ;;  %v3264_v61 = vor.u32 %v3776_v49, %v3263_v47  ;;  %1858 = vmatpush.bf16.msrb.mxu0 %v3008_v55 }
  0x29   :  { %v2363_v52 = vld [vmem:[%s5798_s0] sm:$0xf]  ;;  %v3708_v57 = vld [vmem:[%s5797_s1 + $0x4ac] sm:$0xf0]  ;;  %v3392_v2 = vor.u32 %v3808_v51, %v3391_v50  ;;  %1872 = vmatpush.bf16.msrb.mxu1 %v3136_v60 }
  0x2a   :  { %v2991_v56 = vld [vmem:[%s5797_s1 + $0x4a0] sm:$0xf]  ;;  %v4126_v58 = vor.u32 %v3553_v53, %v2363_v52  ;;  %v3740_v63 = vld [vmem:[%s5797_s1 + $0x5ac] sm:$0xf0]  ;;  %1886 = vmatpush.bf16.msrb.mxu2 %v3264_v61 }
  0x2b   :  { %v3119_v62 = vld [vmem:[%s5797_s1 + $0x5a0] sm:$0xf]  ;;  %v3772_v3 = vld [vmem:[%s5797_s1 + $0x6ac] sm:$0xf0]  ;;  %v2992_v9 = vor.u32 %v3708_v57, %v2991_v56  ;;  %1900 = vmatpush.bf16.msrb.mxu3 %v3392_v2 }
  0x2c   :  { %v3247_v0 = vld [vmem:[%s5797_s1 + $0x6a0] sm:$0xf]  ;;  %v3804_v5 = vld [vmem:[%s5797_s1 + $0x7ac] sm:$0xf0]  ;;  %1809 = vmatmul.bf16.vlgmr.msra.gmra.mxu0 %v4126_v58  ;;  %v3120_v12 = vor.u32 %v3740_v63, %v3119_v62 }
  0x2d   :  { %v3375_v4 = vld [vmem:[%s5797_s1 + $0x7a0] sm:$0xf]  ;;  %v2373_v11 = vld [vmem:[%s5798_s0 + $0x2c] sm:$0xf0]  ;;  %v3248_v13 = vor.u32 %v3772_v3, %v3247_v0  ;;  %1859 = vmatpush.bf16.msrb.mxu0 %v2992_v9 }
  0x2e   :  { %v2975_v14 = vld [vmem:[%s5797_s1 + $0x480] sm:$0xf]  ;;  %v3704_v15 = vld [vmem:[%s5797_s1 + $0x48c] sm:$0xf0]  ;;  %v4176_v17 = vor.u32 %v3550_v8, %v2373_v11  ;;  %v3376_v18 = vor.u32 %v3804_v5, %v3375_v4  ;;  %1873 = vmatpush.bf16.msrb.mxu1 %v3120_v12 }
  0x2f   :  { %v3103_v16 = vld [vmem:[%s5797_s1 + $0x580] sm:$0xf]  ;;  %v3736_v19 = vld [vmem:[%s5797_s1 + $0x58c] sm:$0xf0]  ;;  %v2976_v24 = vor.u32 %v3704_v15, %v2975_v14  ;;  %1887 = vmatpush.bf16.msrb.mxu2 %v3248_v13  ;;  %v3586_v13 = vld [vmem:[%s5797_s1 + $0xe4] sm:$0xf] }
  0x30   :  { %v3231_v20 = vld [vmem:[%s5797_s1 + $0x680] sm:$0xf]  ;;  %v3768_v21 = vld [vmem:[%s5797_s1 + $0x68c] sm:$0xf0]  ;;  %1851 = vmatmul.bf16.vlgmr.msra.gmra.mxu3 %v4176_v17  ;;  %v3104_v25 = vor.u32 %v3736_v19, %v3103_v16  ;;  %v2513_v14 = vld [vmem:[%s5797_s1 + $0xf0] sm:$0xf0] }
  0x31   :  { %v3359_v22 = vld [vmem:[%s5797_s1 + $0x780] sm:$0xf]  ;;  %v3800_v23 = vld [vmem:[%s5797_s1 + $0x78c] sm:$0xf0]  ;;  %v3232_v26 = vor.u32 %v3768_v21, %v3231_v20  ;;  %1901 = vmatpush.bf16.msrb.mxu3 %v3376_v18  ;;  %1860 = vmatpush.bf16.msrb.mxu0 %v2976_v24  ;;  %v3618_v15 = vld [vmem:[%s5797_s1 + $0x1e4] sm:$0xf] }
  0x32   :  { %v2959_v27 = vld [vmem:[%s5797_s1 + $0x460] sm:$0xf]  ;;  %v3700_v28 = vld [vmem:[%s5797_s1 + $0x46c] sm:$0xf0]  ;;  %v3360_v30 = vor.u32 %v3800_v23, %v3359_v22  ;;  %1874 = vmatpush.bf16.msrb.mxu1 %v3104_v25  ;;  %v2641_v16 = vld [vmem:[%s5797_s1 + $0x1f0] sm:$0xf0] }
  0x33   :  { %v3087_v29 = vld [vmem:[%s5797_s1 + $0x560] sm:$0xf]  ;;  %v3732_v31 = vld [vmem:[%s5797_s1 + $0x56c] sm:$0xf0]  ;;  %v2960_v36 = vor.u32 %v3700_v28, %v2959_v27  ;;  %1888 = vmatpush.bf16.msrb.mxu2 %v3232_v26  ;;  %v3650_v18 = vld [vmem:[%s5797_s1 + $0x2e4] sm:$0xf] }
  0x34   :  { %v3215_v32 = vld [vmem:[%s5797_s1 + $0x660] sm:$0xf]  ;;  %v3764_v33 = vld [vmem:[%s5797_s1 + $0x66c] sm:$0xf0]  ;;  %v3088_v37 = vor.u32 %v3732_v31, %v3087_v29  ;;  %v2769_v20 = vld [vmem:[%s5797_s1 + $0x2f0] sm:$0xf0] }
  0x35   :  { %v3343_v34 = vld [vmem:[%s5797_s1 + $0x760] sm:$0xf]  ;;  %v3796_v35 = vld [vmem:[%s5797_s1 + $0x76c] sm:$0xf0]  ;;  %v3216_v38 = vor.u32 %v3764_v33, %v3215_v32  ;;  %1902 = vmatpush.bf16.msrb.mxu3 %v3360_v30  ;;  %1861 = vmatpush.bf16.msrb.mxu0 %v2960_v36  ;;  %v3555_v22 = vld [vmem:[%s5798_s0 + $0x30] sm:$0xf0]  ;;  %v2516_v33 = vor.u32 %v3586_v13, %v2513_v14 }
  0x36   :  { %v2943_v39 = vld [vmem:[%s5797_s1 + $0x440] sm:$0xf]  ;;  %v3696_v40 = vld [vmem:[%s5797_s1 + $0x44c] sm:$0xf0]  ;;  %v3344_v42 = vor.u32 %v3796_v35, %v3343_v34  ;;  %1875 = vmatpush.bf16.msrb.mxu1 %v3088_v37  ;;  %v2387_v25 = vld [vmem:[%s5798_s0 + $0x18] sm:$0xf]  ;;  %v2644_v34 = vor.u32 %v3618_v15, %v2641_v16 }
  0x37   :  { %v3071_v41 = vld [vmem:[%s5797_s1 + $0x540] sm:$0xf]  ;;  %v3728_v43 = vld [vmem:[%s5797_s1 + $0x54c] sm:$0xf0]  ;;  %v2944_v48 = vor.u32 %v3696_v40, %v2943_v39  ;;  %1889 = vmatpush.bf16.msrb.mxu2 %v3216_v38  ;;  %v3556_v26 = vld [vmem:[%s5798_s0 + $0x38] sm:$0xf0]  ;;  %v2772_v38 = vor.u32 %v3650_v18, %v2769_v20 }
  0x38   :  { %v3199_v44 = vld [vmem:[%s5797_s1 + $0x640] sm:$0xf]  ;;  %v3760_v45 = vld [vmem:[%s5797_s1 + $0x64c] sm:$0xf0]  ;;  %v3072_v50 = vor.u32 %v3728_v43, %v3071_v41  ;;  %v3551_v27 = vld [vmem:[%s5798_s0 + $0x14] sm:$0xf]  ;;  %v4359_v43 = vor.u32 %v3556_v26, %v2387_v25 }
  0x39   :  { %v3327_v46 = vld [vmem:[%s5797_s1 + $0x740] sm:$0xf]  ;;  %v3792_v47 = vld [vmem:[%s5797_s1 + $0x74c] sm:$0xf0]  ;;  %v3200_v51 = vor.u32 %v3760_v45, %v3199_v44  ;;  %1903 = vmatpush.bf16.msrb.mxu3 %v3344_v42  ;;  %1862 = vmatpush.bf16.msrb.mxu0 %v2944_v48  ;;  %v2381_v30 = vld [vmem:[%s5798_s0 + $0x34] sm:$0xf0] }
  0x3a   :  { %v2927_v49 = vld [vmem:[%s5797_s1 + $0x420] sm:$0xf]  ;;  %v3692_v52 = vld [vmem:[%s5797_s1 + $0x42c] sm:$0xf0]  ;;  %v3328_v55 = vor.u32 %v3792_v47, %v3327_v46  ;;  %1876 = vmatpush.bf16.msrb.mxu1 %v3072_v50  ;;  %v3552_v31 = vld [vmem:[%s5798_s0 + $0x1c] sm:$0xf]  ;;  %v4361_v44 = vor.u32 %v3551_v27, %v2381_v30 }
  0x3b   :  { %v3055_v53 = vld [vmem:[%s5797_s1 + $0x520] sm:$0xf]  ;;  %v3724_v54 = vld [vmem:[%s5797_s1 + $0x52c] sm:$0xf0]  ;;  %v2928_v63 = vor.u32 %v3692_v52, %v2927_v49  ;;  %1890 = vmatpush.bf16.msrb.mxu2 %v3200_v51  ;;  %v3582_v37 = vld [vmem:[%s5797_s1 + $0xc4] sm:$0xf] }
  0x3c   :  { %v3183_v56 = vld [vmem:[%s5797_s1 + $0x620] sm:$0xf]  ;;  %v3756_v57 = vld [vmem:[%s5797_s1 + $0x62c] sm:$0xf0]  ;;  %v3056_v5 = vor.u32 %v3724_v54, %v3055_v53  ;;  %v2497_v40 = vld [vmem:[%s5797_s1 + $0xd0] sm:$0xf0] }
  0x3d   :  { %v3311_v59 = vld [vmem:[%s5797_s1 + $0x720] sm:$0xf]  ;;  %v3788_v60 = vld [vmem:[%s5797_s1 + $0x72c] sm:$0xf0]  ;;  %v3184_v6 = vor.u32 %v3756_v57, %v3183_v56  ;;  %1904 = vmatpush.bf16.msrb.mxu3 %v3328_v55  ;;  %1863 = vmatpush.bf16.msrb.mxu0 %v2928_v63  ;;  %v3614_v41 = vld [vmem:[%s5797_s1 + $0x1c4] sm:$0xf]  ;;  %v2500_v49 = vor.u32 %v3582_v37, %v2497_v40 }
  0x3e   :  { %v2911_v61 = vld [vmem:[%s5797_s1 + $0x400] sm:$0xf]  ;;  %v3688_v62 = vld [vmem:[%s5797_s1 + $0x40c] sm:$0xf0]  ;;  %v3312_v11 = vor.u32 %v3788_v60, %v3311_v59  ;;  %1877 = vmatpush.bf16.msrb.mxu1 %v3056_v5  ;;  %v2625_v42 = vld [vmem:[%s5797_s1 + $0x1d0] sm:$0xf0] }
  0x3f   :  { %v3039_v0 = vld [vmem:[%s5797_s1 + $0x500] sm:$0xf]  ;;  %v3720_v2 = vld [vmem:[%s5797_s1 + $0x50c] sm:$0xf0]  ;;  %v2912_v19 = vor.u32 %v3688_v62, %v2911_v61  ;;  %1891 = vmatpush.bf16.msrb.mxu2 %v3184_v6  ;;  %v3646_v45 = vld [vmem:[%s5797_s1 + $0x2c4] sm:$0xf]  ;;  %v2628_v50 = vor.u32 %v3614_v41, %v2625_v42 }
  0x40   :  { %v3167_v3 = vld [vmem:[%s5797_s1 + $0x600] sm:$0xf]  ;;  %v3752_v4 = vld [vmem:[%s5797_s1 + $0x60c] sm:$0xf0]  ;;  %v3040_v23 = vor.u32 %v3720_v2, %v3039_v0  ;;  %v2753_v46 = vld [vmem:[%s5797_s1 + $0x2d0] sm:$0xf0] }
  0x41   :  { %v3295_v7 = vld [vmem:[%s5797_s1 + $0x700] sm:$0xf]  ;;  %v3784_v8 = vld [vmem:[%s5797_s1 + $0x70c] sm:$0xf0]  ;;  %v3168_v24 = vor.u32 %v3752_v4, %v3167_v3  ;;  %1905 = vmatpush.bf16.msrb.mxu3 %v3312_v11  ;;  %1864 = vmatpush.bf16.msrb.mxu0 %v2912_v19  ;;  %v3578_v53 = vld [vmem:[%s5797_s1 + $0xa4] sm:$0xf]  ;;  %v2756_v54 = vor.u32 %v3646_v45, %v2753_v46 }
  0x42   :  { %v3535_v9 = vld [vmem:[%s5797_s1 + $0x8e0] sm:$0xf]  ;;  %v3844_v12 = vld [vmem:[%s5797_s1 + $0x8ec] sm:$0xf0]  ;;  %v3296_v28 = vor.u32 %v3784_v8, %v3295_v7  ;;  %1878 = vmatpush.bf16.msrb.mxu1 %v3040_v23  ;;  %v2481_v55 = vld [vmem:[%s5797_s1 + $0xb0] sm:$0xf0] }
  0x43   :  { %v2379_v21 = vld [vmem:[%s5798_s0 + $0x10] sm:$0xf]  ;;  %v3536_v29 = vor.u32 %v3844_v12, %v3535_v9  ;;  %v2389_v32 = vld [vmem:[%s5798_s0 + $0x3c] sm:$0xf0]  ;;  %1892 = vmatpush.bf16.msrb.mxu2 %v3168_v24  ;;  %v3610_v56 = vld [vmem:[%s5797_s1 + $0x1a4] sm:$0xf]  ;;  %v2484_v62 = vor.u32 %v3578_v53, %v2481_v55 }
  0x44   :  { %v3519_v35 = vld [vmem:[%s5797_s1 + $0x8c0] sm:$0xf]  ;;  %v3840_v36 = vld [vmem:[%s5797_s1 + $0x8cc] sm:$0xf0]  ;;  %v4348_v39 = vor.u32 %v3555_v22, %v2379_v21  ;;  %v4369_v47 = vor.u32 %v3552_v31, %v2389_v32  ;;  %v2609_v57 = vld [vmem:[%s5797_s1 + $0x1b0] sm:$0xf0] }
  0x45   :  { %1906 = vmatpush.bf16.msrb.mxu3 %v3296_v28  ;;  %1913 = vmatpush.bf16.msra.mxu0 %v3536_v29  ;;  %v3520_v48 = vor.u32 %v3840_v36, %v3519_v35  ;;  %v3503_v51 = vld [vmem:[%s5797_s1 + $0x8a0] sm:$0xf]  ;;  %v3836_v52 = vld [vmem:[%s5797_s1 + $0x8ac] sm:$0xf0]  ;;  %v3642_v59 = vld [vmem:[%s5797_s1 + $0x2a4] sm:$0xf]  ;;  %v2612_v63 = vor.u32 %v3610_v56, %v2609_v57 }
  0x46   :  { %1927 = vmatpush.bf16.msra.mxu1 %v2516_v33  ;;  %1865 = vmatmul.bf16.vlgmr.msrb.gmra.mxu0 %v4348_v39  ;;  %v2737_v60 = vld [vmem:[%s5797_s1 + $0x2b0] sm:$0xf0]  ;;  %v3504_v61 = vor.u32 %v3836_v52, %v3503_v51  ;;  %v3487_v0 = vld [vmem:[%s5797_s1 + $0x880] sm:$0xf]  ;;  %v3832_v2 = vld [vmem:[%s5797_s1 + $0x88c] sm:$0xf0] }
  0x47   :  { %1941 = vmatpush.bf16.msra.mxu2 %v2644_v34  ;;  %1879 = vmatmul.bf16.vlgmr.msrb.gmra.mxu1 %v4361_v44  ;;  %v3574_v3 = vld [vmem:[%s5797_s1 + $0x84] sm:$0xf]  ;;  %v2740_v4 = vor.u32 %v3642_v59, %v2737_v60  ;;  %v2465_v5 = vld [vmem:[%s5797_s1 + $0x90] sm:$0xf0]  ;;  %v3488_v11 = vor.u32 %v3832_v2, %v3487_v0  ;;  %v3471_v14 = vld [vmem:[%s5797_s1 + $0x860] sm:$0xf] }
  0x48   :  { %1893 = vmatmul.bf16.vlgmr.msrb.gmra.mxu2 %v4359_v43  ;;  %1907 = vmatmul.bf16.vlgmr.msrb.gmra.mxu3 %v4369_v47  ;;  %v3606_v6 = vld [vmem:[%s5797_s1 + $0x184] sm:$0xf]  ;;  %v2593_v7 = vld [vmem:[%s5797_s1 + $0x190] sm:$0xf0]  ;;  %v2468_v12 = vor.u32 %v3574_v3, %v2465_v5  ;;  %v3828_v15 = vld [vmem:[%s5797_s1 + $0x86c] sm:$0xf0] }
  0x49   :  { %1955 = vmatpush.bf16.msra.mxu3 %v2772_v38  ;;  %1914 = vmatpush.bf16.msra.mxu0 %v3520_v48  ;;  %v3638_v8 = vld [vmem:[%s5797_s1 + $0x284] sm:$0xf]  ;;  %v2721_v9 = vld [vmem:[%s5797_s1 + $0x290] sm:$0xf0]  ;;  %v2596_v13 = vor.u32 %v3606_v6, %v2593_v7  ;;  %v3472_v24 = vor.u32 %v3828_v15, %v3471_v14  ;;  %v3455_v27 = vld [vmem:[%s5797_s1 + $0x840] sm:$0xf] }
  0x4a   :  { %1928 = vmatpush.bf16.msra.mxu1 %v2500_v49  ;;  %v3570_v16 = vld [vmem:[%s5797_s1 + $0x64] sm:$0xf]  ;;  %v2724_v18 = vor.u32 %v3638_v8, %v2721_v9  ;;  %v2449_v19 = vld [vmem:[%s5797_s1 + $0x70] sm:$0xf0]  ;;  %v3824_v28 = vld [vmem:[%s5797_s1 + $0x84c] sm:$0xf0] }
  0x4b   :  { %1942 = vmatpush.bf16.msra.mxu2 %v2628_v50  ;;  %v3602_v20 = vld [vmem:[%s5797_s1 + $0x164] sm:$0xf]  ;;  %v2577_v21 = vld [vmem:[%s5797_s1 + $0x170] sm:$0xf0]  ;;  %v2452_v25 = vor.u32 %v3570_v16, %v2449_v19  ;;  %v3456_v36 = vor.u32 %v3824_v28, %v3455_v27  ;;  %v3439_v40 = vld [vmem:[%s5797_s1 + $0x820] sm:$0xf] }
  0x4c   :  { %v3634_v22 = vld [vmem:[%s5797_s1 + $0x264] sm:$0xf]  ;;  %v2705_v23 = vld [vmem:[%s5797_s1 + $0x270] sm:$0xf0]  ;;  %v2580_v26 = vor.u32 %v3602_v20, %v2577_v21  ;;  %v3820_v41 = vld [vmem:[%s5797_s1 + $0x82c] sm:$0xf0] }
  0x4d   :  { %1956 = vmatpush.bf16.msra.mxu3 %v2756_v54  ;;  %1915 = vmatpush.bf16.msra.mxu0 %v3504_v61  ;;  %v3566_v29 = vld [vmem:[%s5797_s1 + $0x44] sm:$0xf]  ;;  %v2708_v30 = vor.u32 %v3634_v22, %v2705_v23  ;;  %v2433_v31 = vld [vmem:[%s5797_s1 + $0x50] sm:$0xf0]  ;;  %v3440_v52 = vor.u32 %v3820_v41, %v3439_v40  ;;  %v3423_v53 = vld [vmem:[%s5797_s1 + $0x800] sm:$0xf] }
  0x4e   :  { %1929 = vmatpush.bf16.msra.mxu1 %v2484_v62  ;;  %v3598_v32 = vld [vmem:[%s5797_s1 + $0x144] sm:$0xf]  ;;  %v2561_v33 = vld [vmem:[%s5797_s1 + $0x150] sm:$0xf0]  ;;  %v2436_v37 = vor.u32 %v3566_v29, %v2433_v31  ;;  %v3816_v54 = vld [vmem:[%s5797_s1 + $0x80c] sm:$0xf0] }
  0x4f   :  { %1943 = vmatpush.bf16.msra.mxu2 %v2612_v63  ;;  %v3630_v34 = vld [vmem:[%s5797_s1 + $0x244] sm:$0xf]  ;;  %v2689_v35 = vld [vmem:[%s5797_s1 + $0x250] sm:$0xf0]  ;;  %v2564_v38 = vor.u32 %v3598_v32, %v2561_v33  ;;  %v3424_v6 = vor.u32 %v3816_v54, %v3423_v53  ;;  %v2395_v14 = vld [vmem:[%s5798_s0 + $0x20] sm:$0xf] }
  0x50   :  { %v3562_v42 = vld [vmem:[%s5797_s1 + $0x24] sm:$0xf]  ;;  %v2692_v45 = vor.u32 %v3630_v34, %v2689_v35  ;;  %v2417_v46 = vld [vmem:[%s5797_s1 + $0x30] sm:$0xf0] }
  0x51   :  { %1957 = vmatpush.bf16.msra.mxu3 %v2740_v4  ;;  %1916 = vmatpush.bf16.msra.mxu0 %v3488_v11  ;;  %v3594_v48 = vld [vmem:[%s5797_s1 + $0x124] sm:$0xf]  ;;  %v2545_v49 = vld [vmem:[%s5797_s1 + $0x130] sm:$0xf0]  ;;  %v2420_v56 = vor.u32 %v3562_v42, %v2417_v46 }
  0x52   :  { %1930 = vmatpush.bf16.msra.mxu1 %v2468_v12  ;;  %v3626_v50 = vld [vmem:[%s5797_s1 + $0x224] sm:$0xf]  ;;  %v2673_v51 = vld [vmem:[%s5797_s1 + $0x230] sm:$0xf0]  ;;  %v2548_v57 = vor.u32 %v3594_v48, %v2545_v49 }
  0x53   :  { %1944 = vmatpush.bf16.msra.mxu2 %v2596_v13  ;;  %v3558_v55 = vld [vmem:[%s5797_s1 + $0x4] sm:$0xf]  ;;  %v2401_v59 = vld [vmem:[%s5797_s1 + $0x10] sm:$0xf0]  ;;  %v2676_v62 = vor.u32 %v3626_v50, %v2673_v51 }
  0x54   :  { %v3590_v60 = vld [vmem:[%s5797_s1 + $0x104] sm:$0xf]  ;;  %v2529_v61 = vld [vmem:[%s5797_s1 + $0x110] sm:$0xf0]  ;;  %v2404_v11 = vor.u32 %v3558_v55, %v2401_v59 }
  0x55   :  { %1958 = vmatpush.bf16.msra.mxu3 %v2724_v18  ;;  %1917 = vmatpush.bf16.msra.mxu0 %v3472_v24  ;;  %v3622_v63 = vld [vmem:[%s5797_s1 + $0x204] sm:$0xf]  ;;  %v2657_v0 = vld [vmem:[%s5797_s1 + $0x210] sm:$0xf0]  ;;  %v2532_v12 = vor.u32 %v3590_v60, %v2529_v61 }
  0x56   :  { %1931 = vmatpush.bf16.msra.mxu1 %v2452_v25  ;;  %v3682_v2 = vld [vmem:[%s5797_s1 + $0x3e4] sm:$0xf]  ;;  %v2897_v3 = vld [vmem:[%s5797_s1 + $0x3f0] sm:$0xf0]  ;;  %v2660_v16 = vor.u32 %v3622_v63, %v2657_v0 }
  0x57   :  { %1945 = vmatpush.bf16.msra.mxu2 %v2580_v26  ;;  %v3714_v4 = vld [vmem:[%s5797_s1 + $0x4e4] sm:$0xf]  ;;  %v3025_v5 = vld [vmem:[%s5797_s1 + $0x4f0] sm:$0xf0]  ;;  %v2900_v18 = vor.u32 %v3682_v2, %v2897_v3 }
  0x58   :  { %v3746_v7 = vld [vmem:[%s5797_s1 + $0x5e4] sm:$0xf]  ;;  %v3153_v8 = vld [vmem:[%s5797_s1 + $0x5f0] sm:$0xf0]  ;;  %v3028_v19 = vor.u32 %v3714_v4, %v3025_v5 }
  0x59   :  { %1959 = vmatpush.bf16.msra.mxu3 %v2708_v30  ;;  %1918 = vmatpush.bf16.msra.mxu0 %v3456_v36  ;;  %v3778_v9 = vld [vmem:[%s5797_s1 + $0x6e4] sm:$0xf]  ;;  %v3281_v13 = vld [vmem:[%s5797_s1 + $0x6f0] sm:$0xf0]  ;;  %v3156_v20 = vor.u32 %v3746_v7, %v3153_v8 }
  0x5a   :  { %1932 = vmatpush.bf16.msra.mxu1 %v2436_v37  ;;  %v3557_v15 = vld [vmem:[%s5798_s0 + $0x40] sm:$0xf0]  ;;  %v2881_v22 = vld [vmem:[%s5797_s1 + $0x3d0] sm:$0xf0]  ;;  %v3284_v24 = vor.u32 %v3778_v9, %v3281_v13 }
  0x5b   :  { %1946 = vmatpush.bf16.msra.mxu2 %v2564_v38  ;;  %v3678_v21 = vld [vmem:[%s5797_s1 + $0x3c4] sm:$0xf]  ;;  %v4558_v25 = vor.u32 %v3557_v15, %v2395_v14  ;;  %v3009_v26 = vld [vmem:[%s5797_s1 + $0x4d0] sm:$0xf0] }
  0x5c   :  { %v3710_v23 = vld [vmem:[%s5797_s1 + $0x4c4] sm:$0xf]  ;;  %v3137_v28 = vld [vmem:[%s5797_s1 + $0x5d0] sm:$0xf0]  ;;  %v2884_v31 = vor.u32 %v3678_v21, %v2881_v22 }
  0x5d   :  { %1960 = vmatpush.bf16.msra.mxu3 %v2692_v45  ;;  %1919 = vmatpush.bf16.msra.mxu0 %v3440_v52  ;;  %v3742_v27 = vld [vmem:[%s5797_s1 + $0x5c4] sm:$0xf]  ;;  %v3265_v30 = vld [vmem:[%s5797_s1 + $0x6d0] sm:$0xf0]  ;;  %v3012_v32 = vor.u32 %v3710_v23, %v3009_v26 }
  0x5e   :  { %1933 = vmatpush.bf16.msra.mxu1 %v2420_v56  ;;  %v3774_v29 = vld [vmem:[%s5797_s1 + $0x6c4] sm:$0xf]  ;;  %v3140_v33 = vor.u32 %v3742_v27, %v3137_v28  ;;  %v2865_v35 = vld [vmem:[%s5797_s1 + $0x3b0] sm:$0xf0] }
  0x5f   :  { %1947 = vmatpush.bf16.msra.mxu2 %v2548_v57  ;;  %v3674_v34 = vld [vmem:[%s5797_s1 + $0x3a4] sm:$0xf]  ;;  %v3268_v37 = vor.u32 %v3774_v29, %v3265_v30  ;;  %v2993_v38 = vld [vmem:[%s5797_s1 + $0x4b0] sm:$0xf0] }
  0x60   :  { %v3706_v36 = vld [vmem:[%s5797_s1 + $0x4a4] sm:$0xf]  ;;  %v3121_v41 = vld [vmem:[%s5797_s1 + $0x5b0] sm:$0xf0]  ;;  %v2868_v46 = vor.u32 %v3674_v34, %v2865_v35 }
  0x61   :  { %1961 = vmatpush.bf16.msra.mxu3 %v2676_v62  ;;  %1920 = vmatpush.bf16.msra.mxu0 %v3424_v6  ;;  %v3738_v40 = vld [vmem:[%s5797_s1 + $0x5a4] sm:$0xf]  ;;  %v3249_v45 = vld [vmem:[%s5797_s1 + $0x6b0] sm:$0xf0]  ;;  %v2996_v48 = vor.u32 %v3706_v36, %v2993_v38 }
  0x62   :  { %1934 = vmatpush.bf16.msra.mxu1 %v2404_v11  ;;  %v3770_v42 = vld [vmem:[%s5797_s1 + $0x6a4] sm:$0xf]  ;;  %v3124_v49 = vor.u32 %v3738_v40, %v3121_v41  ;;  %v2849_v51 = vld [vmem:[%s5797_s1 + $0x390] sm:$0xf0] }
  0x63   :  { %1948 = vmatpush.bf16.msra.mxu2 %v2532_v12  ;;  %v3670_v50 = vld [vmem:[%s5797_s1 + $0x384] sm:$0xf]  ;;  %v3252_v53 = vor.u32 %v3770_v42, %v3249_v45  ;;  %v2977_v54 = vld [vmem:[%s5797_s1 + $0x490] sm:$0xf0] }
  0x64   :  { %1921 = vmatmul.bf16.vlgmr.msra.gmra.mxu0 %v4558_v25  ;;  %v3702_v52 = vld [vmem:[%s5797_s1 + $0x484] sm:$0xf]  ;;  %v3105_v56 = vld [vmem:[%s5797_s1 + $0x590] sm:$0xf0]  ;;  %v2852_v60 = vor.u32 %v3670_v50, %v2849_v51 }
  0x65   :  { %1962 = vmatpush.bf16.msra.mxu3 %v2660_v16  ;;  %1969 = vmatpush.bf16.msrb.mxu0 %v2900_v18  ;;  %v3734_v55 = vld [vmem:[%s5797_s1 + $0x584] sm:$0xf]  ;;  %v3233_v59 = vld [vmem:[%s5797_s1 + $0x690] sm:$0xf0]  ;;  %v2980_v61 = vor.u32 %v3702_v52, %v2977_v54 }
  0x66   :  { %1983 = vmatpush.bf16.msrb.mxu1 %v3028_v19  ;;  %1949 = vmatmul.bf16.vlgmr.msra.gmra.mxu2 %v4162_v10  ;;  %v3766_v57 = vld [vmem:[%s5797_s1 + $0x684] sm:$0xf]  ;;  %v3108_v62 = vor.u32 %v3734_v55, %v3105_v56  ;;  %v2833_v0 = vld [vmem:[%s5797_s1 + $0x370] sm:$0xf0] }
  0x67   :  { %1997 = vmatpush.bf16.msrb.mxu2 %v3156_v20  ;;  %1935 = vmatmul.bf16.vlgmr.msra.gmra.mxu1 %v4126_v58  ;;  %v3666_v63 = vld [vmem:[%s5797_s1 + $0x364] sm:$0xf]  ;;  %v3236_v3 = vor.u32 %v3766_v57, %v3233_v59  ;;  %v2961_v4 = vld [vmem:[%s5797_s1 + $0x470] sm:$0xf0]  ;;  %v2519_v57 = vld [vmem:[%s5797_s1 + $0xe8] sm:$0xf] }
  0x68   :  { %1963 = vmatmul.bf16.vlgmr.msra.gmra.mxu3 %v4140_v1  ;;  %v3698_v2 = vld [vmem:[%s5797_s1 + $0x464] sm:$0xf]  ;;  %v3089_v6 = vld [vmem:[%s5797_s1 + $0x570] sm:$0xf0]  ;;  %v2836_v9 = vor.u32 %v3666_v63, %v2833_v0  ;;  %v3589_v59 = vld [vmem:[%s5797_s1 + $0xf4] sm:$0xf0] }
  0x69   :  { %2011 = vmatpush.bf16.msrb.mxu3 %v3284_v24  ;;  %1970 = vmatpush.bf16.msrb.mxu0 %v2884_v31  ;;  %v3730_v5 = vld [vmem:[%s5797_s1 + $0x564] sm:$0xf]  ;;  %v3217_v8 = vld [vmem:[%s5797_s1 + $0x670] sm:$0xf0]  ;;  %v2964_v11 = vor.u32 %v3698_v2, %v2961_v4  ;;  %v3621_v63 = vld [vmem:[%s5797_s1 + $0x1f4] sm:$0xf0]  ;;  %v2520_v4 = vor.u32 %v3589_v59, %v2519_v57 }
  0x6a   :  { %1984 = vmatpush.bf16.msrb.mxu1 %v3012_v32  ;;  %v3762_v7 = vld [vmem:[%s5797_s1 + $0x664] sm:$0xf]  ;;  %v3092_v12 = vor.u32 %v3730_v5, %v3089_v6  ;;  %v2817_v14 = vld [vmem:[%s5797_s1 + $0x350] sm:$0xf0] }
  0x6b   :  { %1998 = vmatpush.bf16.msrb.mxu2 %v3140_v33  ;;  %v3662_v13 = vld [vmem:[%s5797_s1 + $0x344] sm:$0xf]  ;;  %v3220_v16 = vor.u32 %v3762_v7, %v3217_v8  ;;  %v2945_v18 = vld [vmem:[%s5797_s1 + $0x450] sm:$0xf0] }
  0x6c   :  { %v3694_v15 = vld [vmem:[%s5797_s1 + $0x444] sm:$0xf]  ;;  %v3073_v20 = vld [vmem:[%s5797_s1 + $0x550] sm:$0xf0]  ;;  %v2820_v23 = vor.u32 %v3662_v13, %v2817_v14  ;;  %v2631_v13 = vld [vmem:[%s5797_s1 + $0x1c8] sm:$0xf] }
  0x6d   :  { %2012 = vmatpush.bf16.msrb.mxu3 %v3268_v37  ;;  %1971 = vmatpush.bf16.msrb.mxu0 %v2868_v46  ;;  %v3726_v19 = vld [vmem:[%s5797_s1 + $0x544] sm:$0xf]  ;;  %v3201_v22 = vld [vmem:[%s5797_s1 + $0x650] sm:$0xf0]  ;;  %v2948_v24 = vor.u32 %v3694_v15, %v2945_v18  ;;  %v3617_v14 = vld [vmem:[%s5797_s1 + $0x1d4] sm:$0xf0] }
  0x6e   :  { %1985 = vmatpush.bf16.msrb.mxu1 %v2996_v48  ;;  %v3758_v21 = vld [vmem:[%s5797_s1 + $0x644] sm:$0xf]  ;;  %v3076_v26 = vor.u32 %v3726_v19, %v3073_v20  ;;  %v2801_v28 = vld [vmem:[%s5797_s1 + $0x330] sm:$0xf0] }
  0x6f   :  { %1999 = vmatpush.bf16.msrb.mxu2 %v3124_v49  ;;  %v3658_v27 = vld [vmem:[%s5797_s1 + $0x324] sm:$0xf]  ;;  %v3204_v30 = vor.u32 %v3758_v21, %v3201_v22  ;;  %v2929_v31 = vld [vmem:[%s5797_s1 + $0x430] sm:$0xf0]  ;;  %v2632_v22 = vor.u32 %v3617_v14, %v2631_v13 }
  0x70   :  { %v3690_v29 = vld [vmem:[%s5797_s1 + $0x424] sm:$0xf]  ;;  %v3057_v33 = vld [vmem:[%s5797_s1 + $0x530] sm:$0xf0]  ;;  %v2804_v36 = vor.u32 %v3658_v27, %v2801_v28  ;;  %v2615_v27 = vld [vmem:[%s5797_s1 + $0x1a8] sm:$0xf] }
  0x71   :  { %2013 = vmatpush.bf16.msrb.mxu3 %v3252_v53  ;;  %1972 = vmatpush.bf16.msrb.mxu0 %v2852_v60  ;;  %v3722_v32 = vld [vmem:[%s5797_s1 + $0x524] sm:$0xf]  ;;  %v3185_v35 = vld [vmem:[%s5797_s1 + $0x630] sm:$0xf0]  ;;  %v2932_v40 = vor.u32 %v3690_v29, %v2929_v31  ;;  %v3613_v28 = vld [vmem:[%s5797_s1 + $0x1b4] sm:$0xf0] }
  0x72   :  { %1986 = vmatpush.bf16.msrb.mxu1 %v2980_v61  ;;  %v3754_v34 = vld [vmem:[%s5797_s1 + $0x624] sm:$0xf]  ;;  %v2785_v38 = vld [vmem:[%s5797_s1 + $0x310] sm:$0xf0]  ;;  %v3060_v41 = vor.u32 %v3722_v32, %v3057_v33 }
  0x73   :  { %2000 = vmatpush.bf16.msrb.mxu2 %v3108_v62  ;;  %v3654_v37 = vld [vmem:[%s5797_s1 + $0x304] sm:$0xf]  ;;  %v2913_v45 = vld [vmem:[%s5797_s1 + $0x410] sm:$0xf0]  ;;  %v3188_v48 = vor.u32 %v3754_v34, %v3185_v35  ;;  %v2647_v62 = vld [vmem:[%s5797_s1 + $0x1e8] sm:$0xf]  ;;  %v2616_v35 = vor.u32 %v3613_v28, %v2615_v27 }
  0x74   :  { %v3686_v42 = vld [vmem:[%s5797_s1 + $0x404] sm:$0xf]  ;;  %v3041_v49 = vld [vmem:[%s5797_s1 + $0x510] sm:$0xf0]  ;;  %v2788_v55 = vor.u32 %v3654_v37, %v2785_v38  ;;  %v2648_v8 = vor.u32 %v3621_v63, %v2647_v62  ;;  %v2471_v37 = vld [vmem:[%s5797_s1 + $0x88] sm:$0xf] }
  0x75   :  { %2014 = vmatpush.bf16.msrb.mxu3 %v3236_v3  ;;  %1973 = vmatpush.bf16.msrb.mxu0 %v2836_v9  ;;  %v3718_v46 = vld [vmem:[%s5797_s1 + $0x504] sm:$0xf]  ;;  %v3169_v51 = vld [vmem:[%s5797_s1 + $0x610] sm:$0xf0]  ;;  %v2916_v60 = vor.u32 %v3686_v42, %v2913_v45  ;;  %v3577_v38 = vld [vmem:[%s5797_s1 + $0x94] sm:$0xf0] }
  0x76   :  { %1987 = vmatpush.bf16.msrb.mxu1 %v2964_v11  ;;  %v3750_v50 = vld [vmem:[%s5797_s1 + $0x604] sm:$0xf]  ;;  %v3409_v53 = vld [vmem:[%s5797_s1 + $0x7f0] sm:$0xf0]  ;;  %v3044_v61 = vor.u32 %v3718_v46, %v3041_v49  ;;  %v2503_v11 = vld [vmem:[%s5797_s1 + $0xc8] sm:$0xf]  ;;  %v2472_v46 = vor.u32 %v3577_v38, %v2471_v37 }
  0x77   :  { %2001 = vmatpush.bf16.msrb.mxu2 %v3092_v12  ;;  %v3810_v52 = vld [vmem:[%s5797_s1 + $0x7e4] sm:$0xf]  ;;  %v3537_v56 = vld [vmem:[%s5797_s1 + $0x8f0] sm:$0xf0]  ;;  %v3172_v0 = vor.u32 %v3750_v50, %v3169_v51  ;;  %v3585_v12 = vld [vmem:[%s5797_s1 + $0xd4] sm:$0xf0] }
  0x78   :  { %v3842_v54 = vld [vmem:[%s5797_s1 + $0x8e4] sm:$0xf]  ;;  %v3412_v2 = vor.u32 %v3810_v52, %v3409_v53  ;;  %v3393_v6 = vld [vmem:[%s5797_s1 + $0x7d0] sm:$0xf0]  ;;  %v2504_v18 = vor.u32 %v3585_v12, %v2503_v11  ;;  %v2455_v53 = vld [vmem:[%s5797_s1 + $0x68] sm:$0xf] }
  0x79   :  { %2015 = vmatpush.bf16.msrb.mxu3 %v3220_v16  ;;  %1974 = vmatpush.bf16.msrb.mxu0 %v2820_v23  ;;  %v3540_v3 = vor.u32 %v3842_v54, %v3537_v56  ;;  %v3806_v5 = vld [vmem:[%s5797_s1 + $0x7c4] sm:$0xf]  ;;  %v3521_v9 = vld [vmem:[%s5797_s1 + $0x8d0] sm:$0xf0]  ;;  %v3573_v54 = vld [vmem:[%s5797_s1 + $0x74] sm:$0xf0] }
  0x7a   :  { %1988 = vmatpush.bf16.msrb.mxu1 %v2948_v24  ;;  %v3838_v7 = vld [vmem:[%s5797_s1 + $0x8c4] sm:$0xf]  ;;  %v3396_v15 = vor.u32 %v3806_v5, %v3393_v6  ;;  %v3377_v20 = vld [vmem:[%s5797_s1 + $0x7b0] sm:$0xf0]  ;;  %v2487_v24 = vld [vmem:[%s5797_s1 + $0xa8] sm:$0xf] }
  0x7b   :  { %2002 = vmatpush.bf16.msrb.mxu2 %v3076_v26  ;;  %v3524_v16 = vor.u32 %v3838_v7, %v3521_v9  ;;  %v3802_v19 = vld [vmem:[%s5797_s1 + $0x7a4] sm:$0xf]  ;;  %v3505_v23 = vld [vmem:[%s5797_s1 + $0x8b0] sm:$0xf0]  ;;  %v3581_v26 = vld [vmem:[%s5797_s1 + $0xb4] sm:$0xf0] }
  0x7c   :  { %v3834_v21 = vld [vmem:[%s5797_s1 + $0x8a4] sm:$0xf]  ;;  %v3380_v29 = vor.u32 %v3802_v19, %v3377_v20  ;;  %v2488_v31 = vor.u32 %v3581_v26, %v2487_v24  ;;  %v3361_v33 = vld [vmem:[%s5797_s1 + $0x790] sm:$0xf0]  ;;  %v3605_v56 = vld [vmem:[%s5797_s1 + $0x174] sm:$0xf0] }
  0x7d   :  { %2016 = vmatpush.bf16.msrb.mxu3 %v3204_v30  ;;  %1975 = vmatpush.bf16.msrb.mxu0 %v2804_v36  ;;  %v3508_v30 = vor.u32 %v3834_v21, %v3505_v23  ;;  %v3798_v32 = vld [vmem:[%s5797_s1 + $0x784] sm:$0xf]  ;;  %v3489_v36 = vld [vmem:[%s5797_s1 + $0x890] sm:$0xf0]  ;;  %v2567_v5 = vld [vmem:[%s5797_s1 + $0x148] sm:$0xf] }
  0x7e   :  { %1989 = vmatpush.bf16.msrb.mxu1 %v2932_v40  ;;  %v3830_v34 = vld [vmem:[%s5797_s1 + $0x884] sm:$0xf]  ;;  %v2599_v40 = vld [vmem:[%s5797_s1 + $0x188] sm:$0xf]  ;;  %v3364_v42 = vor.u32 %v3798_v32, %v3361_v33  ;;  %v3345_v49 = vld [vmem:[%s5797_s1 + $0x770] sm:$0xf0] }
  0x7f   :  { %2003 = vmatpush.bf16.msrb.mxu2 %v3060_v41  ;;  %v3609_v41 = vld [vmem:[%s5797_s1 + $0x194] sm:$0xf0]  ;;  %v3492_v45 = vor.u32 %v3830_v34, %v3489_v36  ;;  %v3826_v50 = vld [vmem:[%s5797_s1 + $0x864] sm:$0xf]  ;;  %v3473_v52 = vld [vmem:[%s5797_s1 + $0x870] sm:$0xf0] }
  0x80   :  { %v2600_v51 = vor.u32 %v3609_v41, %v2599_v40  ;;  %v3476_v59 = vor.u32 %v3826_v50, %v3473_v52  ;;  %v3329_v62 = vld [vmem:[%s5797_s1 + $0x750] sm:$0xf0]  ;;  %v3822_v63 = vld [vmem:[%s5797_s1 + $0x844] sm:$0xf]  ;;  %v3601_v6 = vld [vmem:[%s5797_s1 + $0x154] sm:$0xf0] }
  0x81   :  { %2017 = vmatpush.bf16.msrb.mxu3 %v3188_v48  ;;  %1976 = vmatpush.bf16.msrb.mxu0 %v2788_v55  ;;  %v3794_v48 = vld [vmem:[%s5797_s1 + $0x764] sm:$0xf]  ;;  %v2583_v55 = vld [vmem:[%s5797_s1 + $0x168] sm:$0xf]  ;;  %v3313_v12 = vld [vmem:[%s5797_s1 + $0x730] sm:$0xf0]  ;;  %v2568_v14 = vor.u32 %v3601_v6, %v2567_v5 }
  0x82   :  { %1990 = vmatpush.bf16.msrb.mxu1 %v2916_v60  ;;  %v3348_v57 = vor.u32 %v3794_v48, %v3345_v49  ;;  %v2456_v60 = vor.u32 %v3573_v54, %v2455_v53  ;;  %v3786_v11 = vld [vmem:[%s5797_s1 + $0x724] sm:$0xf]  ;;  %v2551_v19 = vld [vmem:[%s5797_s1 + $0x128] sm:$0xf]  ;;  %v3597_v20 = vld [vmem:[%s5797_s1 + $0x134] sm:$0xf0] }
  0x83   :  { %2004 = vmatpush.bf16.msrb.mxu2 %v3044_v61  ;;  %v3790_v61 = vld [vmem:[%s5797_s1 + $0x744] sm:$0xf]  ;;  %v3316_v21 = vor.u32 %v3786_v11, %v3313_v12  ;;  %v3297_v23 = vld [vmem:[%s5797_s1 + $0x710] sm:$0xf0]  ;;  %v2535_v32 = vld [vmem:[%s5797_s1 + $0x108] sm:$0xf] }
  0x84   :  { %1977 = vmatmul.bf16.vlgmr.msrb.gmra.mxu0 %v4176_v17  ;;  %v3332_v7 = vor.u32 %v3790_v61, %v3329_v62  ;;  %v3818_v13 = vld [vmem:[%s5797_s1 + $0x824] sm:$0xf]  ;;  %v3425_v28 = vld [vmem:[%s5797_s1 + $0x810] sm:$0xf0]  ;;  %v3593_v33 = vld [vmem:[%s5797_s1 + $0x114] sm:$0xf0] }
  0x85   :  { %2018 = vmatpush.bf16.msrb.mxu3 %v3172_v0  ;;  %2025 = vmatpush.bf16.msra.mxu0 %v3412_v2  ;;  %v2584_v0 = vor.u32 %v3605_v56, %v2583_v55  ;;  %v3457_v2 = vld [vmem:[%s5797_s1 + $0x850] sm:$0xf0]  ;;  %v3814_v27 = vld [vmem:[%s5797_s1 + $0x804] sm:$0xf]  ;;  %v2775_v34 = vld [vmem:[%s5797_s1 + $0x2e8] sm:$0xf]  ;;  %v2536_v49 = vor.u32 %v3593_v33, %v2535_v32 }
  0x86   :  { %2039 = vmatpush.bf16.msra.mxu1 %v3540_v3  ;;  %2005 = vmatmul.bf16.vlgmr.msrb.gmra.mxu2 %v4361_v44  ;;  %v2439_v3 = vld [vmem:[%s5797_s1 + $0x48] sm:$0xf]  ;;  %v3685_v38 = vld [vmem:[%s5797_s1 + $0x3f4] sm:$0xf0] }
  0x87   :  { %2053 = vmatpush.bf16.msra.mxu2 %v2520_v4  ;;  %1991 = vmatmul.bf16.vlgmr.msrb.gmra.mxu1 %v4348_v39  ;;  %v3569_v4 = vld [vmem:[%s5797_s1 + $0x54] sm:$0xf0]  ;;  %v2903_v36 = vld [vmem:[%s5797_s1 + $0x3e8] sm:$0xf] }
  0x88   :  { %2019 = vmatmul.bf16.vlgmr.msrb.gmra.mxu3 %v4359_v43  ;;  %v2440_v9 = vor.u32 %v3569_v4, %v2439_v3  ;;  %v3031_v40 = vld [vmem:[%s5797_s1 + $0x4e8] sm:$0xf]  ;;  %v3717_v41 = vld [vmem:[%s5797_s1 + $0x4f4] sm:$0xf0] }
  0x89   :  { %2067 = vmatpush.bf16.msra.mxu3 %v2648_v8  ;;  %2026 = vmatpush.bf16.msra.mxu0 %v3396_v15  ;;  %v3460_v8 = vor.u32 %v3822_v63, %v3457_v2  ;;  %v3441_v15 = vld [vmem:[%s5797_s1 + $0x830] sm:$0xf0]  ;;  %v3749_v48 = vld [vmem:[%s5797_s1 + $0x5f4] sm:$0xf0]  ;;  %v3032_v52 = vor.u32 %v3717_v41, %v3031_v40  ;;  %v2759_v53 = vld [vmem:[%s5797_s1 + $0x2c8] sm:$0xf] }
  0x8a   :  { %2040 = vmatpush.bf16.msra.mxu1 %v3524_v16  ;;  %v2423_v16 = vld [vmem:[%s5797_s1 + $0x28] sm:$0xf]  ;;  %v3444_v24 = vor.u32 %v3818_v13, %v3441_v15  ;;  %v3649_v54 = vld [vmem:[%s5797_s1 + $0x2d4] sm:$0xf0] }
  0x8b   :  { %2054 = vmatpush.bf16.msra.mxu2 %v2504_v18  ;;  %v3565_v18 = vld [vmem:[%s5797_s1 + $0x34] sm:$0xf0]  ;;  %v2887_v55 = vld [vmem:[%s5797_s1 + $0x3c8] sm:$0xf]  ;;  %v2760_v63 = vor.u32 %v3649_v54, %v2759_v53 }
  0x8c   :  { %v2424_v26 = vor.u32 %v3565_v18, %v2423_v16  ;;  %v3143_v61 = vld [vmem:[%s5797_s1 + $0x5c8] sm:$0xf]  ;;  %v3745_v62 = vld [vmem:[%s5797_s1 + $0x5d4] sm:$0xf0] }
  0x8d   :  { %2068 = vmatpush.bf16.msra.mxu3 %v2632_v22  ;;  %2027 = vmatpush.bf16.msra.mxu0 %v3380_v29  ;;  %v3782_v22 = vld [vmem:[%s5797_s1 + $0x704] sm:$0xf]  ;;  %v2407_v29 = vld [vmem:[%s5797_s1 + $0x8] sm:$0xf]  ;;  %v3645_v4 = vld [vmem:[%s5797_s1 + $0x2b4] sm:$0xf0]  ;;  %v3144_v6 = vor.u32 %v3745_v62, %v3143_v61 }
  0x8e   :  { %2041 = vmatpush.bf16.msra.mxu1 %v3508_v30  ;;  %v2552_v30 = vor.u32 %v3597_v20, %v2551_v19  ;;  %v3300_v37 = vor.u32 %v3782_v22, %v3297_v23  ;;  %v2743_v3 = vld [vmem:[%s5797_s1 + $0x2a8] sm:$0xf]  ;;  %v3741_v12 = vld [vmem:[%s5797_s1 + $0x5b4] sm:$0xf0] }
  0x8f   :  { %2055 = vmatpush.bf16.msra.mxu2 %v2488_v31  ;;  %v3561_v31 = vld [vmem:[%s5797_s1 + $0x14] sm:$0xf0]  ;;  %v2871_v5 = vld [vmem:[%s5797_s1 + $0x3a8] sm:$0xf]  ;;  %v2744_v13 = vor.u32 %v3645_v4, %v2743_v3 }
  0x90   :  { %v3127_v11 = vld [vmem:[%s5797_s1 + $0x5a8] sm:$0xf]  ;;  %v3641_v18 = vld [vmem:[%s5797_s1 + $0x294] sm:$0xf0] }
  0x91   :  { %2069 = vmatpush.bf16.msra.mxu3 %v2616_v35  ;;  %2028 = vmatpush.bf16.msra.mxu0 %v3364_v42  ;;  %v3653_v35 = vld [vmem:[%s5797_s1 + $0x2f4] sm:$0xf0]  ;;  %v3428_v42 = vor.u32 %v3814_v27, %v3425_v28  ;;  %v2727_v16 = vld [vmem:[%s5797_s1 + $0x288] sm:$0xf]  ;;  %v3128_v20 = vor.u32 %v3741_v12, %v3127_v11 }
  0x92   :  { %2042 = vmatpush.bf16.msra.mxu1 %v3492_v45  ;;  %v2408_v45 = vor.u32 %v3561_v31, %v2407_v29  ;;  %v2776_v50 = vor.u32 %v3653_v35, %v2775_v34  ;;  %v2855_v19 = vld [vmem:[%s5797_s1 + $0x388] sm:$0xf]  ;;  %v3705_v23 = vld [vmem:[%s5797_s1 + $0x494] sm:$0xf0]  ;;  %v2728_v27 = vor.u32 %v3641_v18, %v2727_v16 }
  0x93   :  { %2056 = vmatpush.bf16.msra.mxu2 %v2472_v46  ;;  %v3159_v46 = vld [vmem:[%s5797_s1 + $0x5e8] sm:$0xf]  ;;  %v3637_v31 = vld [vmem:[%s5797_s1 + $0x274] sm:$0xf0] }
  0x94   :  { %v3160_v56 = vor.u32 %v3749_v48, %v3159_v46  ;;  %v2983_v22 = vld [vmem:[%s5797_s1 + $0x488] sm:$0xf]  ;;  %v3669_v34 = vld [vmem:[%s5797_s1 + $0x374] sm:$0xf0] }
  0x95   :  { %2070 = vmatpush.bf16.msra.mxu3 %v2600_v51  ;;  %2029 = vmatpush.bf16.msra.mxu0 %v3348_v57  ;;  %v2904_v51 = vor.u32 %v3685_v38, %v2903_v36  ;;  %v3681_v57 = vld [vmem:[%s5797_s1 + $0x3d4] sm:$0xf0]  ;;  %v2984_v29 = vor.u32 %v3705_v23, %v2983_v22  ;;  %v2839_v32 = vld [vmem:[%s5797_s1 + $0x368] sm:$0xf] }
  0x96   :  { %2043 = vmatpush.bf16.msra.mxu1 %v3476_v59  ;;  %v3015_v59 = vld [vmem:[%s5797_s1 + $0x4c8] sm:$0xf]  ;;  %v3701_v36 = vld [vmem:[%s5797_s1 + $0x474] sm:$0xf0]  ;;  %v2840_v41 = vor.u32 %v3669_v34, %v2839_v32 }
  0x97   :  { %2057 = vmatpush.bf16.msra.mxu2 %v2456_v60  ;;  %v3713_v60 = vld [vmem:[%s5797_s1 + $0x4d4] sm:$0xf0]  ;;  %v2967_v35 = vld [vmem:[%s5797_s1 + $0x468] sm:$0xf] }
  0x98   :  { %v3016_v2 = vor.u32 %v3713_v60, %v3015_v59  ;;  %v3733_v38 = vld [vmem:[%s5797_s1 + $0x574] sm:$0xf0]  ;;  %v2823_v48 = vld [vmem:[%s5797_s1 + $0x348] sm:$0xf] }
  0x99   :  { %2071 = vmatpush.bf16.msra.mxu3 %v2584_v0  ;;  %2030 = vmatpush.bf16.msra.mxu0 %v3332_v7  ;;  %v2888_v0 = vor.u32 %v3681_v57, %v2887_v55  ;;  %v3677_v7 = vld [vmem:[%s5797_s1 + $0x3b4] sm:$0xf0]  ;;  %v3079_v53 = vld [vmem:[%s5797_s1 + $0x548] sm:$0xf] }
  0x9a   :  { %2044 = vmatpush.bf16.msra.mxu1 %v3460_v8  ;;  %v2999_v8 = vld [vmem:[%s5797_s1 + $0x4a8] sm:$0xf]  ;;  %v3633_v46 = vld [vmem:[%s5797_s1 + $0x254] sm:$0xf0] }
  0x9b   :  { %2058 = vmatpush.bf16.msra.mxu2 %v2440_v9  ;;  %v3709_v9 = vld [vmem:[%s5797_s1 + $0x4b4] sm:$0xf0]  ;;  %v2679_v59 = vld [vmem:[%s5797_s1 + $0x228] sm:$0xf] }
  0x9c   :  { %v3000_v15 = vor.u32 %v3709_v9, %v2999_v8  ;;  %v3729_v54 = vld [vmem:[%s5797_s1 + $0x554] sm:$0xf0]  ;;  %v2807_v61 = vld [vmem:[%s5797_s1 + $0x328] sm:$0xf] }
  0x9d   :  { %2072 = vmatpush.bf16.msra.mxu3 %v2568_v14  ;;  %2031 = vmatpush.bf16.msra.mxu0 %v3316_v21  ;;  %v2872_v14 = vor.u32 %v3677_v7, %v2871_v5  ;;  %v3673_v21 = vld [vmem:[%s5797_s1 + $0x394] sm:$0xf0]  ;;  %v3080_v62 = vor.u32 %v3729_v54, %v3079_v53  ;;  %v3063_v3 = vld [vmem:[%s5797_s1 + $0x528] sm:$0xf] }
  0x9e   :  { %2045 = vmatpush.bf16.msra.mxu1 %v3444_v24  ;;  %v3111_v24 = vld [vmem:[%s5797_s1 + $0x588] sm:$0xf]  ;;  %v2856_v28 = vor.u32 %v3673_v21, %v2855_v19  ;;  %v3629_v60 = vld [vmem:[%s5797_s1 + $0x234] sm:$0xf0] }
  0x9f   :  { %2059 = vmatpush.bf16.msra.mxu2 %v2424_v26  ;;  %v3737_v26 = vld [vmem:[%s5797_s1 + $0x594] sm:$0xf0]  ;;  %v2680_v5 = vor.u32 %v3629_v60, %v2679_v59  ;;  %v2791_v11 = vld [vmem:[%s5797_s1 + $0x308] sm:$0xf]  ;;  %v3579_v59 = vld [vmem:[%s5797_s1 + $0xac] sm:$0xf] }
  0xa0   :  { %v3112_v33 = vor.u32 %v3737_v26, %v3111_v24  ;;  %v3725_v4 = vld [vmem:[%s5797_s1 + $0x534] sm:$0xf0]  ;;  %v3047_v16 = vld [vmem:[%s5797_s1 + $0x508] sm:$0xf]  ;;  %v2489_v60 = vld [vmem:[%s5797_s1 + $0xb8] sm:$0xf0] }
  0xa1   :  { %2073 = vmatpush.bf16.msra.mxu3 %v2552_v30  ;;  %2032 = vmatpush.bf16.msra.mxu0 %v3300_v37  ;;  %v2711_v30 = vld [vmem:[%s5797_s1 + $0x268] sm:$0xf]  ;;  %v3625_v7 = vld [vmem:[%s5797_s1 + $0x214] sm:$0xf0] }
  0xa2   :  { %2046 = vmatpush.bf16.msra.mxu1 %v3428_v42  ;;  %v3095_v37 = vld [vmem:[%s5797_s1 + $0x568] sm:$0xf]  ;;  %v2712_v40 = vor.u32 %v3637_v31, %v2711_v30  ;;  %v2968_v42 = vor.u32 %v3701_v36, %v2967_v35  ;;  %v3657_v12 = vld [vmem:[%s5797_s1 + $0x314] sm:$0xf0]  ;;  %v2521_v30 = vld [vmem:[%s5797_s1 + $0xf8] sm:$0xf0] }
  0xa3   :  { %2060 = vmatpush.bf16.msra.mxu2 %v2408_v45  ;;  %v2695_v45 = vld [vmem:[%s5797_s1 + $0x248] sm:$0xf]  ;;  %v3721_v18 = vld [vmem:[%s5797_s1 + $0x514] sm:$0xf0] }
  0xa4   :  { %2033 = vmatmul.bf16.vlgmr.msra.gmra.mxu0 %v4369_v47  ;;  %v2696_v55 = vor.u32 %v3633_v46, %v2695_v45  ;;  %v3287_v19 = vld [vmem:[%s5797_s1 + $0x6e8] sm:$0xf]  ;;  %v3813_v23 = vld [vmem:[%s5797_s1 + $0x7f4] sm:$0xf0]  ;;  %v3048_v31 = vor.u32 %v3721_v18, %v3047_v16  ;;  %v3583_v45 = vld [vmem:[%s5797_s1 + $0xcc] sm:$0xf] }
  0xa5   :  { %2074 = vmatpush.bf16.msra.mxu3 %v2536_v49  ;;  %2081 = vmatpush.bf16.msrb.mxu0 %v2776_v50  ;;  %v3096_v49 = vor.u32 %v3733_v38, %v3095_v37  ;;  %v3665_v50 = vld [vmem:[%s5797_s1 + $0x354] sm:$0xf0]  ;;  %v3415_v21 = vld [vmem:[%s5797_s1 + $0x7e8] sm:$0xf]  ;;  %v2505_v46 = vld [vmem:[%s5797_s1 + $0xd8] sm:$0xf0] }
  0xa6   :  { %2095 = vmatpush.bf16.msrb.mxu1 %v2904_v51  ;;  %2061 = vmatmul.bf16.vlgmr.msra.gmra.mxu2 %v4126_v58  ;;  %v2951_v51 = vld [vmem:[%s5797_s1 + $0x448] sm:$0xf]  ;;  %v3845_v26 = vld [vmem:[%s5797_s1 + $0x8f4] sm:$0xf0]  ;;  %v2508_v54 = vor.u32 %v3583_v45, %v2505_v46 }
  0xa7   :  { %2109 = vmatpush.bf16.msrb.mxu2 %v3032_v52  ;;  %2047 = vmatmul.bf16.vlgmr.msra.gmra.mxu1 %v4558_v25  ;;  %v3697_v52 = vld [vmem:[%s5797_s1 + $0x454] sm:$0xf0]  ;;  %v3543_v24 = vld [vmem:[%s5797_s1 + $0x8e8] sm:$0xf] }
  0xa8   :  { %2075 = vmatmul.bf16.vlgmr.msra.gmra.mxu3 %v4162_v10  ;;  %v2952_v57 = vor.u32 %v3697_v52, %v2951_v51  ;;  %v3544_v34 = vor.u32 %v3845_v26, %v3543_v24  ;;  %v3271_v35 = vld [vmem:[%s5797_s1 + $0x6c8] sm:$0xf]  ;;  %v3777_v36 = vld [vmem:[%s5797_s1 + $0x6d4] sm:$0xf0] }
  0xa9   :  { %2123 = vmatpush.bf16.msrb.mxu3 %v3160_v56  ;;  %2082 = vmatpush.bf16.msrb.mxu0 %v2760_v63  ;;  %v2824_v56 = vor.u32 %v3665_v50, %v2823_v48  ;;  %v3661_v63 = vld [vmem:[%s5797_s1 + $0x334] sm:$0xf0]  ;;  %v3399_v37 = vld [vmem:[%s5797_s1 + $0x7c8] sm:$0xf]  ;;  %v3272_v48 = vor.u32 %v3777_v36, %v3271_v35  ;;  %v3567_v35 = vld [vmem:[%s5797_s1 + $0x4c] sm:$0xf] }
  0xaa   :  { %2096 = vmatpush.bf16.msrb.mxu1 %v2888_v0  ;;  %v2935_v0 = vld [vmem:[%s5797_s1 + $0x428] sm:$0xf]  ;;  %v2808_v8 = vor.u32 %v3661_v63, %v2807_v61  ;;  %v3773_v52 = vld [vmem:[%s5797_s1 + $0x6b4] sm:$0xf0]  ;;  %v2441_v36 = vld [vmem:[%s5797_s1 + $0x58] sm:$0xf0] }
  0xab   :  { %2110 = vmatpush.bf16.msrb.mxu2 %v3016_v2  ;;  %v3693_v2 = vld [vmem:[%s5797_s1 + $0x434] sm:$0xf0]  ;;  %v3255_v51 = vld [vmem:[%s5797_s1 + $0x6a8] sm:$0xf]  ;;  %v2444_v46 = vor.u32 %v3567_v35, %v2441_v36  ;;  %v3611_v36 = vld [vmem:[%s5797_s1 + $0x1ac] sm:$0xf] }
  0xac   :  { %v2936_v9 = vor.u32 %v3693_v2, %v2935_v0  ;;  %v3383_v53 = vld [vmem:[%s5797_s1 + $0x7a8] sm:$0xf]  ;;  %v3256_v61 = vor.u32 %v3773_v52, %v3255_v51  ;;  %v3769_v2 = vld [vmem:[%s5797_s1 + $0x694] sm:$0xf0]  ;;  %v3563_v51 = vld [vmem:[%s5797_s1 + $0x2c] sm:$0xf] }
  0xad   :  { %2124 = vmatpush.bf16.msrb.mxu3 %v3144_v6  ;;  %2083 = vmatpush.bf16.msrb.mxu0 %v2744_v13  ;;  %v2663_v6 = vld [vmem:[%s5797_s1 + $0x208] sm:$0xf]  ;;  %v2425_v52 = vld [vmem:[%s5797_s1 + $0x38] sm:$0xf0] }
  0xae   :  { %2097 = vmatpush.bf16.msrb.mxu1 %v2872_v14  ;;  %v2919_v13 = vld [vmem:[%s5797_s1 + $0x408] sm:$0xf]  ;;  %v3064_v14 = vor.u32 %v3725_v4, %v3063_v3  ;;  %v2664_v22 = vor.u32 %v3625_v7, %v2663_v6  ;;  %v2492_v4 = vor.u32 %v3579_v59, %v2489_v60  ;;  %v3833_v7 = vld [vmem:[%s5797_s1 + $0x894] sm:$0xf0] }
  0xaf   :  { %2111 = vmatpush.bf16.msrb.mxu2 %v3000_v15  ;;  %v3689_v15 = vld [vmem:[%s5797_s1 + $0x414] sm:$0xf0]  ;;  %v3239_v0 = vld [vmem:[%s5797_s1 + $0x688] sm:$0xf] }
  0xb0   :  { %v3367_v3 = vld [vmem:[%s5797_s1 + $0x788] sm:$0xf]  ;;  %v3785_v60 = vld [vmem:[%s5797_s1 + $0x714] sm:$0xf0] }
  0xb1   :  { %2125 = vmatpush.bf16.msrb.mxu3 %v3128_v20  ;;  %2084 = vmatpush.bf16.msrb.mxu0 %v2728_v27  ;;  %v3781_v20 = vld [vmem:[%s5797_s1 + $0x6f4] sm:$0xf0]  ;;  %v2792_v27 = vor.u32 %v3657_v12, %v2791_v11  ;;  %v3495_v6 = vld [vmem:[%s5797_s1 + $0x888] sm:$0xf]  ;;  %v3240_v11 = vor.u32 %v3769_v2, %v3239_v0  ;;  %v3559_v2 = vld [vmem:[%s5797_s1 + $0xc] sm:$0xf] }
  0xb2   :  { %2098 = vmatpush.bf16.msrb.mxu1 %v2856_v28  ;;  %v2920_v28 = vor.u32 %v3689_v15, %v2919_v13  ;;  %v3288_v32 = vor.u32 %v3781_v20, %v3287_v19  ;;  %v3496_v13 = vor.u32 %v3833_v7, %v3495_v6  ;;  %v3765_v15 = vld [vmem:[%s5797_s1 + $0x674] sm:$0xf0]  ;;  %v3351_v16 = vld [vmem:[%s5797_s1 + $0x768] sm:$0xf]  ;;  %v2649_v6 = vld [vmem:[%s5797_s1 + $0x1f8] sm:$0xf0] }
  0xb3   :  { %2112 = vmatpush.bf16.msrb.mxu2 %v2984_v29  ;;  %v3587_v29 = vld [vmem:[%s5797_s1 + $0xec] sm:$0xf]  ;;  %v3797_v19 = vld [vmem:[%s5797_s1 + $0x774] sm:$0xf0]  ;;  %v3479_v20 = vld [vmem:[%s5797_s1 + $0x868] sm:$0xf] }
  0xb4   :  { %v2524_v38 = vor.u32 %v3587_v29, %v2521_v30  ;;  %v3352_v26 = vor.u32 %v3797_v19, %v3351_v16  ;;  %v3761_v29 = vld [vmem:[%s5797_s1 + $0x654] sm:$0xf0]  ;;  %v3335_v30 = vld [vmem:[%s5797_s1 + $0x748] sm:$0xf]  ;;  %v3651_v7 = vld [vmem:[%s5797_s1 + $0x2ec] sm:$0xf] }
  0xb5   :  { %2126 = vmatpush.bf16.msrb.mxu3 %v3112_v33  ;;  %2085 = vmatpush.bf16.msrb.mxu0 %v2712_v40  ;;  %v3416_v33 = vor.u32 %v3813_v23, %v3415_v21  ;;  %v3809_v40 = vld [vmem:[%s5797_s1 + $0x7d4] sm:$0xf0]  ;;  %v2457_v23 = vld [vmem:[%s5797_s1 + $0x78] sm:$0xf0]  ;;  %v3319_v45 = vld [vmem:[%s5797_s1 + $0x728] sm:$0xf] }
  0xb6   :  { %2099 = vmatpush.bf16.msrb.mxu1 %v2840_v41  ;;  %v3527_v41 = vld [vmem:[%s5797_s1 + $0x8c8] sm:$0xf]  ;;  %v3829_v21 = vld [vmem:[%s5797_s1 + $0x874] sm:$0xf0]  ;;  %v3033_v16 = vld [vmem:[%s5797_s1 + $0x4f8] sm:$0xf0] }
  0xb7   :  { %2113 = vmatpush.bf16.msrb.mxu2 %v2968_v42  ;;  %v3841_v42 = vld [vmem:[%s5797_s1 + $0x8d4] sm:$0xf0]  ;;  %v3303_v59 = vld [vmem:[%s5797_s1 + $0x708] sm:$0xf] }
  0xb8   :  { %v3528_v50 = vor.u32 %v3841_v42, %v3527_v41  ;;  %v3191_v41 = vld [vmem:[%s5797_s1 + $0x628] sm:$0xf]  ;;  %v3757_v42 = vld [vmem:[%s5797_s1 + $0x634] sm:$0xf0] }
  0xb9   :  { %2127 = vmatpush.bf16.msrb.mxu3 %v3096_v49  ;;  %2086 = vmatpush.bf16.msrb.mxu0 %v2696_v55  ;;  %v3400_v49 = vor.u32 %v3809_v40, %v3399_v37  ;;  %v3805_v55 = vld [vmem:[%s5797_s1 + $0x7b4] sm:$0xf0] }
  0xba   :  { %2100 = vmatpush.bf16.msrb.mxu1 %v2824_v56  ;;  %v3511_v56 = vld [vmem:[%s5797_s1 + $0x8a8] sm:$0xf]  ;;  %v3817_v0 = vld [vmem:[%s5797_s1 + $0x814] sm:$0xf0] }
  0xbb   :  { %2114 = vmatpush.bf16.msrb.mxu2 %v2952_v57  ;;  %v3837_v57 = vld [vmem:[%s5797_s1 + $0x8b4] sm:$0xf0] }
  0xbc   :  { %v3512_v63 = vor.u32 %v3837_v57, %v3511_v56 }
  0xbd   :  { %2128 = vmatpush.bf16.msrb.mxu3 %v3080_v62  ;;  %2087 = vmatpush.bf16.msrb.mxu0 %v2680_v5  ;;  %v3384_v62 = vor.u32 %v3805_v55, %v3383_v53  ;;  %v3801_v5 = vld [vmem:[%s5797_s1 + $0x794] sm:$0xf0]  ;;  %v3192_v53 = vor.u32 %v3757_v42, %v3191_v41  ;;  %v2745_v42 = vld [vmem:[%s5797_s1 + $0x2b8] sm:$0xf0] }
  0xbe   :  { %2101 = vmatpush.bf16.msrb.mxu1 %v2808_v8  ;;  %v3575_v8 = vld [vmem:[%s5797_s1 + $0x8c] sm:$0xf]  ;;  %v3368_v12 = vor.u32 %v3801_v5, %v3367_v3  ;;  %v3753_v55 = vld [vmem:[%s5797_s1 + $0x614] sm:$0xf0]  ;;  %v2409_v3 = vld [vmem:[%s5797_s1 + $0x18] sm:$0xf0] }
  0xbf   :  { %2115 = vmatpush.bf16.msrb.mxu2 %v2936_v9  ;;  %v2473_v9 = vld [vmem:[%s5797_s1 + $0x98] sm:$0xf0]  ;;  %v3619_v5 = vld [vmem:[%s5797_s1 + $0x1ec] sm:$0xf] }
  0xc0   :  { %v2476_v18 = vor.u32 %v3575_v8, %v2473_v9  ;;  %v2777_v9 = vld [vmem:[%s5797_s1 + $0x2f8] sm:$0xf0]  ;;  %v2652_v19 = vor.u32 %v3619_v5, %v2649_v6 }
  0xc1   :  { %2129 = vmatpush.bf16.msrb.mxu3 %v3064_v14  ;;  %2088 = vmatpush.bf16.msrb.mxu0 %v2664_v22  ;;  %v3223_v14 = vld [vmem:[%s5797_s1 + $0x668] sm:$0xf]  ;;  %v3571_v22 = vld [vmem:[%s5797_s1 + $0x6c] sm:$0xf] }
  0xc2   :  { %2102 = vmatpush.bf16.msrb.mxu1 %v2792_v27  ;;  %v3224_v24 = vor.u32 %v3765_v15, %v3223_v14  ;;  %v3480_v27 = vor.u32 %v3829_v21, %v3479_v20  ;;  %v3715_v15 = vld [vmem:[%s5797_s1 + $0x4ec] sm:$0xf]  ;;  %v2780_v20 = vor.u32 %v3651_v7, %v2777_v9 }
  0xc3   :  { %2116 = vmatpush.bf16.msrb.mxu2 %v2920_v28  ;;  %v3207_v28 = vld [vmem:[%s5797_s1 + $0x648] sm:$0xf]  ;;  %v3603_v7 = vld [vmem:[%s5797_s1 + $0x16c] sm:$0xf] }
  0xc4   :  { %2089 = vmatmul.bf16.vlgmr.msrb.gmra.mxu0 %v4140_v1  ;;  %v3208_v37 = vor.u32 %v3761_v29, %v3207_v28  ;;  %v3679_v28 = vld [vmem:[%s5797_s1 + $0x3cc] sm:$0xf]  ;;  %v2889_v29 = vld [vmem:[%s5797_s1 + $0x3d8] sm:$0xf0] }
  0xc5   :  { %2130 = vmatpush.bf16.msrb.mxu3 %v3048_v31  ;;  %2137 = vmatpush.bf16.msra.mxu0 %v3288_v32  ;;  %v2460_v31 = vor.u32 %v3571_v22, %v2457_v23  ;;  %v3793_v32 = vld [vmem:[%s5797_s1 + $0x754] sm:$0xf0]  ;;  %v3615_v22 = vld [vmem:[%s5797_s1 + $0x1cc] sm:$0xf]  ;;  %v2633_v23 = vld [vmem:[%s5797_s1 + $0x1d8] sm:$0xf0]  ;;  %v2892_v35 = vor.u32 %v3679_v28, %v2889_v29 }
  0xc6   :  { %2151 = vmatpush.bf16.msra.mxu1 %v3416_v33  ;;  %2117 = vmatmul.bf16.vlgmr.msrb.gmra.mxu2 %v4348_v39  ;;  %v3463_v33 = vld [vmem:[%s5797_s1 + $0x848] sm:$0xf]  ;;  %v3635_v9 = vld [vmem:[%s5797_s1 + $0x26c] sm:$0xf]  ;;  %v2697_v29 = vld [vmem:[%s5797_s1 + $0x258] sm:$0xf0] }
  0xc7   :  { %2165 = vmatpush.bf16.msra.mxu2 %v3544_v34  ;;  %2103 = vmatmul.bf16.vlgmr.msrb.gmra.mxu1 %v4176_v17  ;;  %v3825_v34 = vld [vmem:[%s5797_s1 + $0x854] sm:$0xf0] }
  0xc8   :  { %2131 = vmatmul.bf16.vlgmr.msrb.gmra.mxu3 %v4361_v44  ;;  %v3464_v40 = vor.u32 %v3825_v34, %v3463_v33  ;;  %v2636_v33 = vor.u32 %v3615_v22, %v2633_v23 }
  0xc9   :  { %2179 = vmatpush.bf16.msra.mxu3 %v2524_v38  ;;  %2138 = vmatpush.bf16.msra.mxu0 %v3272_v48  ;;  %v3336_v38 = vor.u32 %v3793_v32, %v3335_v30  ;;  %v3789_v48 = vld [vmem:[%s5797_s1 + $0x734] sm:$0xf0]  ;;  %v5357_v30 = vpop.f32.mrf.mxu2  ;;  %v3017_v32 = vld [vmem:[%s5797_s1 + $0x4d8] sm:$0xf0] }
  0xca   :  { %2152 = vmatpush.bf16.msra.mxu1 %v3400_v49  ;;  %v3447_v49 = vld [vmem:[%s5797_s1 + $0x828] sm:$0xf]  ;;  %v3320_v56 = vor.u32 %v3789_v48, %v3319_v45  ;;  %v3675_v45 = vld [vmem:[%s5797_s1 + $0x3ac] sm:$0xf] }
  0xcb   :  { %2166 = vmatpush.bf16.msra.mxu2 %v3528_v50  ;;  %v3821_v50 = vld [vmem:[%s5797_s1 + $0x834] sm:$0xf0] }
  0xcc   :  { %v3448_v57 = vor.u32 %v3821_v50, %v3447_v49  ;;  %v5388_v49 = vpop.f32.mrf.mxu3  ;;  %v3707_v50 = vld [vmem:[%s5797_s1 + $0x4ac] sm:$0xf] }
  0xcd   :  { %2180 = vmatpush.bf16.msra.mxu3 %v2508_v54  ;;  %2139 = vmatpush.bf16.msra.mxu0 %v3256_v61  ;;  %v3175_v54 = vld [vmem:[%s5797_s1 + $0x608] sm:$0xf] }
  0xce   :  { %2153 = vmatpush.bf16.msra.mxu1 %v3384_v62  ;;  %v3431_v61 = vld [vmem:[%s5797_s1 + $0x808] sm:$0xf]  ;;  %v5302_v62 = vpop.f32.mrf.mxu1  ;;  %v3176_v8 = vor.u32 %v3753_v55, %v3175_v54  ;;  %v3607_v55 = vld [vmem:[%s5797_s1 + $0x18c] sm:$0xf] }
  0xcf   :  { %2167 = vmatpush.bf16.msra.mxu2 %v3512_v63  ;;  %v2428_v63 = vor.u32 %v3563_v51, %v2425_v52  ;;  %v3432_v14 = vor.u32 %v3817_v0, %v3431_v61  ;;  %v3001_v51 = vld [vmem:[%s5797_s1 + $0x4b8] sm:$0xf0] }
  0xd0   :  { %v2857_v61 = vld [vmem:[%s5797_s1 + $0x398] sm:$0xf0] }
  0xd1   :  { %2181 = vmatpush.bf16.msra.mxu3 %v2492_v4  ;;  %2140 = vmatpush.bf16.msra.mxu0 %v3240_v11  ;;  %v5313_v4 = vpop.f32.mrf.mxu0  ;;  %v3683_v11 = vld [vmem:[%s5797_s1 + $0x3ec] sm:$0xf]  ;;  %v2985_v0 = vld [vmem:[%s5797_s1 + $0x498] sm:$0xf0] }
  0xd2   :  { %2154 = vmatpush.bf16.msra.mxu1 %v3368_v12  ;;  %v2905_v12 = vld [vmem:[%s5797_s1 + $0x3f8] sm:$0xf0] }
  0xd3   :  { %2168 = vmatpush.bf16.msra.mxu2 %v3496_v13  ;;  %v3304_v13 = vor.u32 %v3785_v60, %v3303_v59  ;;  %v2908_v21 = vor.u32 %v3683_v11, %v2905_v12  ;;  %v3004_v59 = vor.u32 %v3707_v50, %v3001_v51  ;;  %v3671_v60 = vld [vmem:[%s5797_s1 + $0x38c] sm:$0xf]  ;;  %v2713_v12 = vld [vmem:[%s5797_s1 + $0x278] sm:$0xf0] }
  0xd4   :  { %v2860_v6 = vor.u32 %v3671_v60, %v2857_v61  ;;  %v2716_v22 = vor.u32 %v3635_v9, %v2713_v12  ;;  %v3659_v50 = vld [vmem:[%s5797_s1 + $0x32c] sm:$0xf]  ;;  %v2809_v51 = vld [vmem:[%s5797_s1 + $0x338] sm:$0xf0] }
  0xd5   :  { %2182 = vmatpush.bf16.msra.mxu3 %v2476_v18  ;;  %2141 = vmatpush.bf16.msra.mxu0 %v3224_v24  ;;  %v2412_v18 = vor.u32 %v3559_v2, %v2409_v3  ;;  %v3647_v24 = vld [vmem:[%s5797_s1 + $0x2cc] sm:$0xf]  ;;  %v5423_v3 = vpop.f32.mrf.mxu2  ;;  %v2665_v61 = vld [vmem:[%s5797_s1 + $0x218] sm:$0xf0] }
  0xd6   :  { %2155 = vmatpush.bf16.msra.mxu1 %v3352_v26  ;;  %v3036_v26 = vor.u32 %v3715_v15, %v3033_v16  ;;  %v3699_v15 = vld [vmem:[%s5797_s1 + $0x46c] sm:$0xf]  ;;  %v2969_v16 = vld [vmem:[%s5797_s1 + $0x478] sm:$0xf0] }
  0xd7   :  { %2169 = vmatpush.bf16.msra.mxu2 %v3480_v27  ;;  %v2761_v27 = vld [vmem:[%s5797_s1 + $0x2d8] sm:$0xf0]  ;;  %v2972_v28 = vor.u32 %v3699_v15, %v2969_v16  ;;  %v3623_v60 = vld [vmem:[%s5797_s1 + $0x20c] sm:$0xf] }
  0xd8   :  { %v2764_v34 = vor.u32 %v3647_v24, %v2761_v27  ;;  %v3599_v24 = vld [vmem:[%s5797_s1 + $0x14c] sm:$0xf]  ;;  %v3161_v12 = vld [vmem:[%s5797_s1 + $0x5f8] sm:$0xf0] }
  0xd9   :  { %2183 = vmatpush.bf16.msra.mxu3 %v2460_v31  ;;  %2142 = vmatpush.bf16.msra.mxu0 %v3208_v37  ;;  %v3711_v31 = vld [vmem:[%s5797_s1 + $0x4cc] sm:$0xf]  ;;  %v2617_v37 = vld [vmem:[%s5797_s1 + $0x1b8] sm:$0xf0]  ;;  %v5386_v48 = vpop.f32.mrf.mxu0 }
  0xda   :  { %2156 = vmatpush.bf16.msra.mxu1 %v3336_v38  ;;  %v3643_v38 = vld [vmem:[%s5797_s1 + $0x2ac] sm:$0xf]  ;;  %v3020_v41 = vor.u32 %v3711_v31, %v3017_v32  ;;  %v2620_v52 = vor.u32 %v3611_v36, %v2617_v37  ;;  %v2825_v32 = vld [vmem:[%s5797_s1 + $0x358] sm:$0xf0] }
  0xdb   :  { %2170 = vmatpush.bf16.msra.mxu2 %v3464_v40  ;;  %v5374_v40 = vpop.f32.mrf.mxu1  ;;  %v3631_v27 = vld [vmem:[%s5797_s1 + $0x24c] sm:$0xf]  ;;  %v3289_v15 = vld [vmem:[%s5797_s1 + $0x6f8] sm:$0xf0] }
  0xdc   :  { %v3663_v31 = vld [vmem:[%s5797_s1 + $0x34c] sm:$0xf]  ;;  %v2700_v36 = vor.u32 %v3631_v27, %v2697_v29 }
  0xdd   :  { %2184 = vmatpush.bf16.msra.mxu3 %v2444_v46  ;;  %2143 = vmatpush.bf16.msra.mxu0 %v3192_v53  ;;  %v2873_v46 = vld [vmem:[%s5797_s1 + $0x3b8] sm:$0xf0]  ;;  %v2748_v53 = vor.u32 %v3643_v38, %v2745_v42  ;;  %v2828_v37 = vor.u32 %v3663_v31, %v2825_v32  ;;  %v3595_v38 = vld [vmem:[%s5797_s1 + $0x12c] sm:$0xf] }
  0xde   :  { %2157 = vmatpush.bf16.msra.mxu1 %v3320_v56  ;;  %v2876_v54 = vor.u32 %v3675_v45, %v2873_v46  ;;  %v2601_v56 = vld [vmem:[%s5797_s1 + $0x198] sm:$0xf0]  ;;  %v3627_v42 = vld [vmem:[%s5797_s1 + $0x22c] sm:$0xf] }
  0xdf   :  { %2171 = vmatpush.bf16.msra.mxu2 %v3448_v57  ;;  %v3639_v57 = vld [vmem:[%s5797_s1 + $0x28c] sm:$0xf]  ;;  %v2604_v2 = vor.u32 %v3607_v55, %v2601_v56  ;;  %v2681_v46 = vld [vmem:[%s5797_s1 + $0x238] sm:$0xf0] }
  0xe0   :  { %v3591_v56 = vld [vmem:[%s5797_s1 + $0x10c] sm:$0xf] }
  0xe1   :  { %2185 = vmatpush.bf16.msra.mxu3 %v2428_v63  ;;  %2144 = vmatpush.bf16.msra.mxu0 %v3176_v8  ;;  %v3703_v63 = vld [vmem:[%s5797_s1 + $0x48c] sm:$0xf]  ;;  %v2585_v8 = vld [vmem:[%s5797_s1 + $0x178] sm:$0xf0] }
  0xe2   :  { %2158 = vmatpush.bf16.msra.mxu1 %v3304_v13  ;;  %v2988_v11 = vor.u32 %v3703_v63, %v2985_v0  ;;  %v3667_v13 = vld [vmem:[%s5797_s1 + $0x36c] sm:$0xf] }
  0xe3   :  { %2172 = vmatpush.bf16.msra.mxu2 %v3432_v14  ;;  %v2841_v14 = vld [vmem:[%s5797_s1 + $0x378] sm:$0xf0]  ;;  %v3655_v63 = vld [vmem:[%s5797_s1 + $0x30c] sm:$0xf] }
  0xe4   :  { %2145 = vmatmul.bf16.vlgmr.msra.gmra.mxu0 %v4359_v43  ;;  %v2844_v23 = vor.u32 %v3667_v13, %v2841_v14  ;;  %v3779_v13 = vld [vmem:[%s5797_s1 + $0x6ec] sm:$0xf] }
  0xe5   :  { %2186 = vmatpush.bf16.msra.mxu3 %v2412_v18  ;;  %2193 = vmatpush.bf16.msrb.mxu0 %v2652_v19  ;;  %v5449_v18 = vpop.f32.mrf.mxu1  ;;  %v2588_v19 = vor.u32 %v3603_v7, %v2585_v8  ;;  %v2921_v7 = vld [vmem:[%s5797_s1 + $0x418] sm:$0xf0]  ;;  %v3811_v16 = vld [vmem:[%s5797_s1 + $0x7ec] sm:$0xf]  ;;  %v3292_v29 = vor.u32 %v3779_v13, %v3289_v15 }
  0xe6   :  { %2207 = vmatpush.bf16.msrb.mxu1 %v2780_v20  ;;  %2173 = vmatmul.bf16.vlgmr.msra.gmra.mxu2 %v4558_v25  ;;  %v5451_v20 = vpop.f32.mrf.mxu3  ;;  %v3743_v32 = vld [vmem:[%s5797_s1 + $0x5cc] sm:$0xf] }
  0xe7   :  { %2221 = vmatpush.bf16.msrb.mxu2 %v2908_v21  ;;  %2159 = vmatmul.bf16.vlgmr.msra.gmra.mxu1 %v4369_v47  ;;  %v5453_v21 = vpop.f32.mrf.mxu0  ;;  %v3799_v13 = vld [vmem:[%s5797_s1 + $0x78c] sm:$0xf] }
  0xe8   :  { %2187 = vmatmul.bf16.vlgmr.msra.gmra.mxu3 %v4126_v58  ;;  %v2729_v58 = vld [vmem:[%s5797_s1 + $0x298] sm:$0xf0] }
  0xe9   :  { %2235 = vmatpush.bf16.msrb.mxu3 %v3036_v26  ;;  %2194 = vmatpush.bf16.msrb.mxu0 %v2636_v33  ;;  %v2732_v5 = vor.u32 %v3639_v57, %v2729_v58  ;;  %v2569_v26 = vld [vmem:[%s5797_s1 + $0x158] sm:$0xf0]  ;;  %v3695_v33 = vld [vmem:[%s5797_s1 + $0x44c] sm:$0xf]  ;;  %v2812_v58 = vor.u32 %v3659_v50, %v2809_v51 }
  0xea   :  { %2208 = vmatpush.bf16.msrb.mxu1 %v2764_v34  ;;  %v2953_v34 = vld [vmem:[%s5797_s1 + $0x458] sm:$0xf0] }
  0xeb   :  { %2222 = vmatpush.bf16.msrb.mxu2 %v2892_v35  ;;  %v2572_v35 = vor.u32 %v3599_v24, %v2569_v26  ;;  %v2956_v45 = vor.u32 %v3695_v33, %v2953_v34  ;;  %v2537_v57 = vld [vmem:[%s5797_s1 + $0x118] sm:$0xf0]  ;;  %v3843_v24 = vld [vmem:[%s5797_s1 + $0x8ec] sm:$0xf] }
  0xec   :  { %v2540_v14 = vor.u32 %v3591_v56, %v2537_v57  ;;  %v3545_v26 = vld [vmem:[%s5797_s1 + $0x8f8] sm:$0xf0]  ;;  %v3775_v34 = vld [vmem:[%s5797_s1 + $0x6cc] sm:$0xf] }
  0xed   :  { %2236 = vmatpush.bf16.msrb.mxu3 %v3020_v41  ;;  %2195 = vmatpush.bf16.msrb.mxu0 %v2620_v52  ;;  %v2553_v41 = vld [vmem:[%s5797_s1 + $0x138] sm:$0xf0]  ;;  %v5497_v52 = vpop.f32.mrf.mxu2  ;;  %v5520_v0 = vpop.f32.mrf.mxu1  ;;  %v3771_v57 = vld [vmem:[%s5797_s1 + $0x6ac] sm:$0xf] }
  0xee   :  { %2209 = vmatpush.bf16.msrb.mxu1 %v2748_v53  ;;  %v3691_v53 = vld [vmem:[%s5797_s1 + $0x42c] sm:$0xf]  ;;  %v2556_v55 = vor.u32 %v3595_v38, %v2553_v41  ;;  %v5533_v9 = vpop.f32.mrf.mxu3  ;;  %v3145_v33 = vld [vmem:[%s5797_s1 + $0x5d8] sm:$0xf0] }
  0xef   :  { %2223 = vmatpush.bf16.msrb.mxu2 %v2876_v54  ;;  %v2937_v54 = vld [vmem:[%s5797_s1 + $0x438] sm:$0xf0]  ;;  %v5531_v8 = vpop.f32.mrf.mxu0  ;;  %v3148_v50 = vor.u32 %v3743_v32, %v3145_v33  ;;  %v3795_v32 = vld [vmem:[%s5797_s1 + $0x76c] sm:$0xf] }
  0xf0   :  { %v3401_v38 = vld [vmem:[%s5797_s1 + $0x7d8] sm:$0xf0] }
  0xf1   :  { %2237 = vmatpush.bf16.msrb.mxu3 %v3004_v59  ;;  %2196 = vmatpush.bf16.msrb.mxu0 %v2604_v2  ;;  %v2684_v59 = vor.u32 %v3627_v42, %v2681_v46  ;;  %v2940_v2 = vor.u32 %v3691_v53, %v2937_v54  ;;  %v3839_v42 = vld [vmem:[%s5797_s1 + $0x8cc] sm:$0xf]  ;;  %v3129_v56 = vld [vmem:[%s5797_s1 + $0x5b8] sm:$0xf0] }
  0xf2   :  { %2210 = vmatpush.bf16.msrb.mxu1 %v2732_v5  ;;  %v2793_v5 = vld [vmem:[%s5797_s1 + $0x318] sm:$0xf0] }
  0xf3   :  { %2224 = vmatpush.bf16.msrb.mxu2 %v2860_v6  ;;  %v3687_v6 = vld [vmem:[%s5797_s1 + $0x40c] sm:$0xf]  ;;  %v3353_v33 = vld [vmem:[%s5797_s1 + $0x778] sm:$0xf0] }
  0xf4   :  { %v2924_v27 = vor.u32 %v3687_v6, %v2921_v7 }
  0xf5   :  { %2238 = vmatpush.bf16.msrb.mxu3 %v2988_v11  ;;  %2197 = vmatpush.bf16.msrb.mxu0 %v2588_v19  ;;  %v3747_v11 = vld [vmem:[%s5797_s1 + $0x5ec] sm:$0xf]  ;;  %v3417_v19 = vld [vmem:[%s5797_s1 + $0x7f8] sm:$0xf0]  ;;  %v5577_v41 = vpop.f32.mrf.mxu2  ;;  %v5585_v46 = vpop.f32.mrf.mxu1 }
  0xf6   :  { %2211 = vmatpush.bf16.msrb.mxu1 %v2716_v22  ;;  %v2668_v22 = vor.u32 %v3623_v60, %v2665_v61  ;;  %v3420_v31 = vor.u32 %v3811_v16, %v3417_v19  ;;  %v3803_v60 = vld [vmem:[%s5797_s1 + $0x7ac] sm:$0xf]  ;;  %v3385_v61 = vld [vmem:[%s5797_s1 + $0x7b8] sm:$0xf0] }
  0xf7   :  { %2225 = vmatpush.bf16.msrb.mxu2 %v2844_v23  ;;  %v2796_v23 = vor.u32 %v3655_v63, %v2793_v5  ;;  %v5587_v51 = vpop.f32.mrf.mxu0  ;;  %v5608_v63 = vpop.f32.mrf.mxu3  ;;  %v3388_v7 = vor.u32 %v3803_v60, %v3385_v61  ;;  %v3831_v16 = vld [vmem:[%s5797_s1 + $0x88c] sm:$0xf]  ;;  %v3497_v19 = vld [vmem:[%s5797_s1 + $0x898] sm:$0xf0] }
  0xf8   :  { %v3465_v60 = vld [vmem:[%s5797_s1 + $0x858] sm:$0xf0] }
  0xf9   :  { %2239 = vmatpush.bf16.msrb.mxu3 %v2972_v28  ;;  %2198 = vmatpush.bf16.msrb.mxu0 %v2572_v35  ;;  %v3164_v28 = vor.u32 %v3747_v11, %v3161_v12  ;;  %v3548_v35 = vor.u32 %v3843_v24, %v3545_v26  ;;  %v3767_v11 = vld [vmem:[%s5797_s1 + $0x68c] sm:$0xf]  ;;  %v3241_v12 = vld [vmem:[%s5797_s1 + $0x698] sm:$0xf0] }
  0xfa   :  { %2212 = vmatpush.bf16.msrb.mxu1 %v2700_v36  ;;  %v3273_v36 = vld [vmem:[%s5797_s1 + $0x6d8] sm:$0xf0]  ;;  %v3244_v24 = vor.u32 %v3767_v11, %v3241_v12 }
  0xfb   :  { %2226 = vmatpush.bf16.msrb.mxu2 %v2828_v37  ;;  %v3807_v37 = vld [vmem:[%s5797_s1 + $0x7cc] sm:$0xf]  ;;  %v3276_v53 = vor.u32 %v3775_v34, %v3273_v36  ;;  %v3193_v11 = vld [vmem:[%s5797_s1 + $0x638] sm:$0xf0] }
  0xfc   :  { %v3404_v54 = vor.u32 %v3807_v37, %v3401_v38  ;;  %v3827_v36 = vld [vmem:[%s5797_s1 + $0x86c] sm:$0xf]  ;;  %v3481_v37 = vld [vmem:[%s5797_s1 + $0x878] sm:$0xf0] }
  0xfd   :  { %2240 = vmatpush.bf16.msrb.mxu3 %v2956_v45  ;;  %2199 = vmatpush.bf16.msrb.mxu0 %v2556_v55  ;;  %v3529_v45 = vld [vmem:[%s5797_s1 + $0x8d8] sm:$0xf0]  ;;  %v3739_v55 = vld [vmem:[%s5797_s1 + $0x5ac] sm:$0xf]  ;;  %v1950_v15 = vpop.f32.mrf.mxu2 }
  0xfe   :  { %2213 = vmatpush.bf16.msrb.mxu1 %v2684_v59  ;;  %v3532_v59 = vor.u32 %v3839_v42, %v3529_v45  ;;  %v3132_v5 = vor.u32 %v3739_v55, %v3129_v56  ;;  %v3759_v55 = vld [vmem:[%s5797_s1 + $0x64c] sm:$0xf]  ;;  %v3209_v56 = vld [vmem:[%s5797_s1 + $0x658] sm:$0xf0] }
  0xff   :  { %2227 = vmatpush.bf16.msrb.mxu2 %v2812_v58  ;;  %v3257_v58 = vld [vmem:[%s5797_s1 + $0x6b8] sm:$0xf0]  ;;  %v5665_v34 = vpop.f32.mrf.mxu0 }
 0x100   :  { %v3260_v6 = vor.u32 %v3771_v57, %v3257_v58  ;;  %v3791_v57 = vld [vmem:[%s5797_s1 + $0x74c] sm:$0xf]  ;;  %v3321_v12 = vld [vmem:[%s5797_s1 + $0x738] sm:$0xf0] }
 0x101   :  { %2241 = vmatpush.bf16.msrb.mxu3 %v2940_v2  ;;  %2200 = vmatpush.bf16.msrb.mxu0 %v2540_v14  ;;  %v3513_v2 = vld [vmem:[%s5797_s1 + $0x8b8] sm:$0xf0]  ;;  %v3823_v58 = vld [vmem:[%s5797_s1 + $0x84c] sm:$0xf] }
 0x102   :  { %2214 = vmatpush.bf16.msrb.mxu1 %v2668_v22  ;;  %v3369_v14 = vld [vmem:[%s5797_s1 + $0x798] sm:$0xf0]  ;;  %v1825_v22 = vadd.f32 %v5302_v62, %v5313_v4  ;;  %v3500_v62 = vor.u32 %v3831_v16, %v3497_v19  ;;  %v1827_v16 = vadd.f32 %v5374_v40, %v5386_v48  ;;  %v3751_v40 = vld [vmem:[%s5797_s1 + $0x60c] sm:$0xf] }
 0x103   :  { %2228 = vmatpush.bf16.msrb.mxu2 %v2796_v23  ;;  %v3372_v26 = vor.u32 %v3799_v13, %v3369_v14  ;;  %v3225_v4 = vld [vmem:[%s5797_s1 + $0x678] sm:$0xf0]  ;;  %v3819_v14 = vld [vmem:[%s5797_s1 + $0x82c] sm:$0xf] }
 0x104   :  { %2201 = vmatmul.bf16.vlgmr.msrb.gmra.mxu0 %v4162_v10  ;;  %v3835_v10 = vld [vmem:[%s5797_s1 + $0x8ac] sm:$0xf]  ;;  %v1839_v38 = vadd.f32 %v5357_v30, %v1825_v22  ;;  %v3484_v30 = vor.u32 %v3827_v36, %v3481_v37  ;;  %v1841_v36 = vadd.f32 %v5423_v3, %v1827_v16 }
 0x105   :  { %2242 = vmatpush.bf16.msrb.mxu3 %v2924_v27  ;;  %2249 = vmatpush.bf16.msra.mxu0 %v3164_v28  ;;  %v3731_v27 = vld [vmem:[%s5797_s1 + $0x56c] sm:$0xf]  ;;  %v3097_v28 = vld [vmem:[%s5797_s1 + $0x578] sm:$0xf0] }
 0x106   :  { %2263 = vmatpush.bf16.msra.mxu1 %v3292_v29  ;;  %2229 = vmatmul.bf16.vlgmr.msrb.gmra.mxu2 %v4176_v17  ;;  %v3113_v17 = vld [vmem:[%s5797_s1 + $0x598] sm:$0xf0]  ;;  %v3763_v29 = vld [vmem:[%s5797_s1 + $0x66c] sm:$0xf]  ;;  %v3100_v42 = vor.u32 %v3731_v27, %v3097_v28  ;;  %v1853_v61 = vadd.f32 %v5388_v49, %v1839_v38 }
 0x107   :  { %2277 = vmatpush.bf16.msra.mxu2 %v3420_v31  ;;  %2215 = vmatmul.bf16.vlgmr.msrb.gmra.mxu1 %v4140_v1  ;;  %v3735_v1 = vld [vmem:[%s5797_s1 + $0x58c] sm:$0xf]  ;;  %v5654_v31 = vpop.f32.mrf.mxu1  ;;  %v3228_v45 = vor.u32 %v3763_v29, %v3225_v4  ;;  %v1978_v13 = vpop.f32.mrf.mxu0 }
 0x108   :  { %2243 = vmatmul.bf16.vlgmr.msrb.gmra.mxu3 %v4348_v39  ;;  %v3516_v39 = vor.u32 %v3835_v10, %v3513_v2  ;;  %v3116_v23 = vor.u32 %v3735_v1, %v3113_v17  ;;  %v1951_v10 = vadd.f32 %v1950_v15, %v5585_v46  ;;  %v3723_v1 = vld [vmem:[%s5797_s1 + $0x52c] sm:$0xf]  ;;  %v3065_v17 = vld [vmem:[%s5797_s1 + $0x538] sm:$0xf0]  ;;  %v3468_v46 = vor.u32 %v3823_v58, %v3465_v60  ;;  %v5760_v58 = vld [vmem:[%s5799_s2] sm:$0xf] }
 0x109   :  { %2291 = vmatpush.bf16.msra.mxu3 %v3548_v35  ;;  %2250 = vmatpush.bf16.msra.mxu0 %v3148_v50  ;;  %v1964_v35 = vpop.f32.mrf.mxu3  ;;  %v3356_v50 = vor.u32 %v3795_v32, %v3353_v33  ;;  %v3755_v49 = vld [vmem:[%s5797_s1 + $0x62c] sm:$0xf]  ;;  %v3449_v15 = vld [vmem:[%s5797_s1 + $0x838] sm:$0xf0]  ;;  %v1867_v19 = vadd.f32 %v5453_v21, %v1853_v61 }
 0x10a   :  { %2264 = vmatpush.bf16.msra.mxu1 %v3276_v53  ;;  %v3727_v53 = vld [vmem:[%s5797_s1 + $0x54c] sm:$0xf]  ;;  %v1965_v22 = vadd.f32 %v1964_v35, %v1951_v10  ;;  %v3196_v27 = vor.u32 %v3755_v49, %v3193_v11  ;;  %v3452_v48 = vor.u32 %v3819_v14, %v3449_v15  ;;  %v3177_v21 = vld [vmem:[%s5797_s1 + $0x618] sm:$0xf0]  ;;  %v2307_v10 = vperm.slane %v5760_v58, 0 }
 0x10b   :  { %2278 = vmatpush.bf16.msra.mxu2 %v3404_v54  ;;  %v3081_v54 = vld [vmem:[%s5797_s1 + $0x558] sm:$0xf0]  ;;  %v3719_v29 = vld [vmem:[%s5797_s1 + $0x50c] sm:$0xf]  ;;  %v1881_v37 = vadd.f32 %v5449_v18, %v1867_v19 }
 0x10c   :  { %v3084_v2 = vor.u32 %v3727_v53, %v3081_v54  ;;  %v3783_v4 = vld [vmem:[%s5797_s1 + $0x70c] sm:$0xf]  ;;  %v3305_v32 = vld [vmem:[%s5797_s1 + $0x718] sm:$0xf0]  ;;  %v1979_v38 = vadd.f32 %v1978_v13, %v1965_v22 }
 0x10d   :  { %2292 = vmatpush.bf16.msra.mxu3 %v3532_v59  ;;  %2251 = vmatpush.bf16.msra.mxu0 %v3132_v5  ;;  %v3337_v59 = vld [vmem:[%s5797_s1 + $0x758] sm:$0xf0]  ;;  %v1952_v5 = vpop.f32.mrf.mxu2  ;;  %v3815_v33 = vld [vmem:[%s5797_s1 + $0x80c] sm:$0xf] }
 0x10e   :  { %2265 = vmatpush.bf16.msra.mxu1 %v3260_v6  ;;  %v3212_v6 = vor.u32 %v3759_v55, %v3209_v56  ;;  %v3433_v35 = vld [vmem:[%s5797_s1 + $0x818] sm:$0xf0]  ;;  %v1855_v55 = vadd.f32 %v5451_v20, %v1841_v36  ;;  %v1953_v56 = vadd.f32 %v1952_v5, %v5654_v31 }
 0x10f   :  { %2279 = vmatpush.bf16.msra.mxu2 %v3388_v7  ;;  %v3340_v7 = vor.u32 %v3791_v57, %v3337_v59  ;;  %v3436_v53 = vor.u32 %v3815_v33, %v3433_v35  ;;  %v1980_v3 = vpop.f32.mrf.mxu0 }
 0x110   :  { %v1869_v18 = vadd.f32 %v5531_v8, %v1855_v55 }
 0x111   :  { %2293 = vmatpush.bf16.msra.mxu3 %v3516_v39  ;;  %2252 = vmatpush.bf16.msra.mxu0 %v3116_v23  ;;  %v3787_v39 = vld [vmem:[%s5797_s1 + $0x72c] sm:$0xf]  ;;  %v1992_v23 = vpop.f32.mrf.mxu1 }
 0x112   :  { %2266 = vmatpush.bf16.msra.mxu1 %v3244_v24  ;;  %v3068_v24 = vor.u32 %v3723_v1, %v3065_v17  ;;  %v3324_v28 = vor.u32 %v3787_v39, %v3321_v12  ;;  %v1993_v57 = vadd.f32 %v1992_v23, %v1979_v38  ;;  %v1883_v8 = vadd.f32 %v5520_v0, %v1869_v18 }
 0x113   :  { %2280 = vmatpush.bf16.msra.mxu2 %v3372_v26  ;;  %v1966_v26 = vpop.f32.mrf.mxu3 }
 0x115   :  { %2294 = vmatpush.bf16.msra.mxu3 %v3500_v62  ;;  %2253 = vmatpush.bf16.msra.mxu0 %v3100_v42  ;;  %v3049_v62 = vld [vmem:[%s5797_s1 + $0x518] sm:$0xf0]  ;;  %v2006_v54 = vpop.f32.mrf.mxu2 }
 0x116   :  { %2267 = vmatpush.bf16.msra.mxu1 %v3228_v45  ;;  %v3052_v42 = vor.u32 %v3719_v29, %v3049_v62  ;;  %v3180_v45 = vor.u32 %v3751_v40, %v3177_v21  ;;  %v2007_v31 = vadd.f32 %v2006_v54, %v1993_v57 }
 0x117   :  { %2281 = vmatpush.bf16.msra.mxu2 %v3356_v50  ;;  %v3308_v50 = vor.u32 %v3783_v4, %v3305_v32 }
 0x119   :  { %2295 = vmatpush.bf16.msra.mxu3 %v3484_v30  ;;  %2254 = vmatpush.bf16.msra.mxu0 %v3084_v2  ;;  %v1895_v30 = vadd.f32 %v5497_v52, %v1881_v37  ;;  %v1994_v59 = vpop.f32.mrf.mxu1  ;;  %v1967_v52 = vadd.f32 %v1966_v26, %v1953_v56  ;;  %v1897_v2 = vadd.f32 %v5577_v41, %v1883_v8 }
 0x11a   :  { %2268 = vmatpush.bf16.msra.mxu1 %v3212_v6 }
 0x11b   :  { %2282 = vmatpush.bf16.msra.mxu2 %v3340_v7  ;;  %v2020_v60 = vpop.f32.mrf.mxu3  ;;  %v1909_v20 = vadd.f32 %v5533_v9, %v1895_v30  ;;  %v1981_v9 = vadd.f32 %v1980_v3, %v1967_v52  ;;  %v1911_v17 = vadd.f32 %v5608_v63, %v1897_v2 }
 0x11c   :  { %v2021_v5 = vadd.f32 %v2020_v60, %v2007_v31 }
 0x11d   :  { %2296 = vmatpush.bf16.msra.mxu3 %v3468_v46  ;;  %2255 = vmatpush.bf16.msra.mxu0 %v3068_v24  ;;  %v1923_v61 = vadd.f32 %v5587_v51, %v1909_v20  ;;  %v1995_v7 = vadd.f32 %v1994_v59, %v1981_v9  ;;  %v2308_v51 = vperm.slane %v5760_v58, 1  ;;  %v1925_v41 = vadd.f32 %v5665_v34, %v1911_v17 }
 0x11e   :  { %2269 = vmatpush.bf16.msra.mxu1 %v3196_v27 }
 0x11f   :  { %2283 = vmatpush.bf16.msra.mxu2 %v3324_v28  ;;  %v2319_v22 = vmul.f32 %v2307_v10, %v1925_v41 }
 0x121   :  { %2297 = vmatpush.bf16.msra.mxu3 %v3452_v48  ;;  %2256 = vmatpush.bf16.msra.mxu0 %v3052_v42  ;;  %v2034_v6 = vpop.f32.mrf.mxu0 }
 0x122   :  { %2270 = vmatpush.bf16.msra.mxu1 %v3180_v45  ;;  %v2035_v0 = vadd.f32 %v2034_v6, %v2021_v5 }
 0x123   :  { %2284 = vmatpush.bf16.msra.mxu2 %v3308_v50  ;;  %v2022_v39 = vpop.f32.mrf.mxu3 }
 0x124   :  { %2257 = vmatmul.bf16.vlgmr.msra.gmra.mxu0 %v4361_v44  ;;  %v5773_v44 = vld [vmem:[%s5800_s3] sm:$0xf]  ;;  %v2048_v1 = vpop.f32.mrf.mxu1 }
 0x125   :  { %2298 = vmatpush.bf16.msra.mxu3 %v3436_v53  ;;  %2271 = vmatmul.bf16.vlgmr.msra.gmra.mxu1 %v4359_v43  ;;  %v2325_v43 = vperm.slane %v5773_v44, 0  ;;  %v2049_v46 = vadd.f32 %v2048_v1, %v2035_v0  ;;  %v2326_v11 = vperm.slane %v5773_v44, 1 }
 0x126   :  { %2285 = vmatmul.bf16.vlgmr.msra.gmra.mxu2 %v4369_v47  ;;  %v2008_v47 = vpop.f32.mrf.mxu2 }
 0x127   :  { %v2009_v49 = vadd.f32 %v2008_v47, %v1995_v7  ;;  %v2316_v13 = vmul.f32 %v2308_v51, %v2049_v46  ;;  %v2337_v63 = vadd.f32 %v2325_v43, %v2319_v22  ;;  %v2309_v22 = vperm.slane %v5760_v58, 2 }
 0x128   :  { %2299 = vmatmul.bf16.vlgmr.msra.gmra.mxu3 %v4558_v25  ;;  %v2315_v25 = vmul.f32 %v2307_v10, %v1923_v61 }
 0x129   :  { %v2023_v14 = vadd.f32 %v2022_v39, %v2009_v49  ;;  %v2334_v15 = vadd.f32 %v2326_v11, %v2316_v13  ;;  %v2036_v16 = vpop.f32.mrf.mxu0  ;;  %v2345_v40 = vmax.f32 %v2337_v63, 0.0 }
 0x12a   :  { %v2333_v12 = vadd.f32 %v2325_v43, %v2315_v25 }
 0x12b   :  { %v2342_v23 = vmax.f32 %v2334_v15, 0.0  ;;  %v2037_v24 = vadd.f32 %v2036_v16, %v2023_v14  ;;  %v2076_v21 = vpop.f32.mrf.mxu3 }
 0x12c   :  { %v2341_v19 = vmax.f32 %v2333_v12, 0.0  ;;  %v2050_v26 = vpop.f32.mrf.mxu1 }
 0x12d   :  { %v2051_v28 = vadd.f32 %v2050_v26, %v2037_v24 }
 0x12e   :  { %v2349_v27 = vpack.c.bf16 %v2342_v23, %v2341_v19  ;;  %v2062_v4 = vpop.f32.mrf.mxu2 }
 0x12f   :  { %v2320_v29 = vmul.f32 %v2308_v51, %v2051_v28  ;;  %v2077_v18 = vadd.f32 %v2076_v21, %v2062_v4 }
 0x130   :  { %2353 = vst [vmem:[%s5801_s4] sm:$0xff] %v2349_v27  ;;  %v2327_v27 = vperm.slane %v5773_v44, 2 }
 0x131   :  { %v2338_v62 = vadd.f32 %v2326_v11, %v2320_v29 }
 0x133   :  { %v2346_v34 = vmax.f32 %v2338_v62, 0.0  ;;  %v2078_v32 = vpop.f32.mrf.mxu3 }
 0x135   :  { %v2351_v48 = vpack.c.bf16 %v2346_v34, %v2345_v40  ;;  %v2310_v34 = vperm.slane %v5760_v58, 3 }
 0x136   :  { %v2064_v33 = vpop.f32.mrf.mxu2 }
 0x137   :  { %2355 = vst [vmem:[%s5801_s4 + $0x10] sm:$0xff] %v2351_v48  ;;  %v2079_v2 = vadd.f32 %v2078_v32, %v2064_v33  ;;  %v2328_v32 = vperm.slane %v5773_v44, 3 }
 0x141   :  { %v2090_v35 = vpop.f32.mrf.mxu0 }
 0x142   :  { %v2091_v52 = vadd.f32 %v2090_v35, %v2077_v18 }
 0x144   :  { %v2104_v36 = vpop.f32.mrf.mxu1 }
 0x145   :  { %v2105_v8 = vadd.f32 %v2104_v36, %v2091_v52 }
 0x149   :  { %v2118_v38 = vpop.f32.mrf.mxu2  ;;  %v2092_v42 = vpop.f32.mrf.mxu0 }
 0x14a   :  { %v2119_v5 = vadd.f32 %v2118_v38, %v2105_v8  ;;  %v2093_v6 = vadd.f32 %v2092_v42, %v2079_v2 }
 0x14b   :  { %v2132_v37 = vpop.f32.mrf.mxu3 }
 0x14c   :  { %v2106_v45 = vpop.f32.mrf.mxu1  ;;  %v2133_v7 = vadd.f32 %v2132_v37, %v2119_v5 }
 0x14d   :  { %v2107_v1 = vadd.f32 %v2106_v45, %v2093_v6 }
 0x151   :  { %v2120_v53 = vpop.f32.mrf.mxu2 }
 0x152   :  { %v2121_v46 = vadd.f32 %v2120_v53, %v2107_v1 }
 0x153   :  { %v2134_v50 = vpop.f32.mrf.mxu3 }
 0x154   :  { %v2135_v16 = vadd.f32 %v2134_v50, %v2121_v46 }
 0x161   :  { %v2146_v54 = vpop.f32.mrf.mxu0 }
 0x162   :  { %v2147_v51 = vadd.f32 %v2146_v54, %v2133_v7 }
 0x164   :  { %v2160_v55 = vpop.f32.mrf.mxu1 }
 0x165   :  { %v2161_v41 = vadd.f32 %v2160_v55, %v2147_v51 }
 0x169   :  { %v2174_v56 = vpop.f32.mrf.mxu2  ;;  %v2148_v57 = vpop.f32.mrf.mxu0 }
 0x16a   :  { %v2175_v19 = vadd.f32 %v2174_v56, %v2161_v41  ;;  %v2149_v24 = vadd.f32 %v2148_v57, %v2135_v16 }
 0x16b   :  { %v2188_v30 = vpop.f32.mrf.mxu3 }
 0x16c   :  { %v2162_v3 = vpop.f32.mrf.mxu1  ;;  %v2317_v63 = vmul.f32 %v2309_v22, %v2175_v19 }
 0x16d   :  { %v2163_v21 = vadd.f32 %v2162_v3, %v2149_v24 }
 0x16e   :  { %v2335_v35 = vadd.f32 %v2327_v27, %v2317_v63 }
 0x170   :  { %v2343_v53 = vmax.f32 %v2335_v35, 0.0 }
 0x171   :  { %v2176_v60 = vpop.f32.mrf.mxu2 }
 0x172   :  { %v2177_v36 = vadd.f32 %v2176_v60, %v2163_v21 }
 0x173   :  { %v2190_v59 = vpop.f32.mrf.mxu3 }
 0x174   :  { %v2321_v54 = vmul.f32 %v2309_v22, %v2177_v36 }
 0x176   :  { %v2339_v18 = vadd.f32 %v2327_v27, %v2321_v54 }
 0x181   :  { %v2202_v20 = vpop.f32.mrf.mxu0 }
 0x182   :  { %v2203_v61 = vadd.f32 %v2202_v20, %v2188_v30 }
 0x184   :  { %v2216_v31 = vpop.f32.mrf.mxu1 }
 0x185   :  { %v2217_v43 = vadd.f32 %v2216_v31, %v2203_v61 }
 0x189   :  { %v2230_v10 = vpop.f32.mrf.mxu2  ;;  %v2204_v47 = vpop.f32.mrf.mxu0 }
 0x18a   :  { %v2231_v0 = vadd.f32 %v2230_v10, %v2217_v43  ;;  %v2205_v17 = vadd.f32 %v2204_v47, %v2190_v59  ;;  %v2347_v59 = vmax.f32 %v2339_v18, 0.0 }
 0x18b   :  { %v2244_v9 = vpop.f32.mrf.mxu3 }
 0x18c   :  { %v2218_v25 = vpop.f32.mrf.mxu1  ;;  %v2245_v11 = vadd.f32 %v2244_v9, %v2231_v0 }
 0x18d   :  { %v2219_v13 = vadd.f32 %v2218_v25, %v2205_v17 }
 0x191   :  { %v2232_v49 = vpop.f32.mrf.mxu2 }
 0x192   :  { %v2233_v23 = vadd.f32 %v2232_v49, %v2219_v13 }
 0x193   :  { %v2246_v39 = vpop.f32.mrf.mxu3 }
 0x194   :  { %v2247_v29 = vadd.f32 %v2246_v39, %v2233_v23 }
 0x1a1   :  { %v2258_v12 = vpop.f32.mrf.mxu0 }
 0x1a2   :  { %v2259_v14 = vadd.f32 %v2258_v12, %v2245_v11  ;;  %v2272_v15 = vpop.f32.mrf.mxu1 }
 0x1a4   :  { %v2273_v26 = vadd.f32 %v2272_v15, %v2259_v14 }
 0x1a9   :  { %v2286_v28 = vpop.f32.mrf.mxu2  ;;  %v2260_v48 = vpop.f32.mrf.mxu0 }
 0x1aa   :  { %v2287_v62 = vadd.f32 %v2286_v28, %v2273_v26  ;;  %v2261_v33 = vadd.f32 %v2260_v48, %v2247_v29  ;;  %v2274_v38 = vpop.f32.mrf.mxu1 }
 0x1ab   :  { %v2300_v40 = vpop.f32.mrf.mxu3 }
 0x1ac   :  { %v2301_v4 = vadd.f32 %v2300_v40, %v2287_v62  ;;  %v2275_v45 = vadd.f32 %v2274_v38, %v2261_v33 }
 0x1ae   :  { %v2318_v37 = vmul.f32 %v2310_v34, %v2301_v4 }
 0x1b0   :  { %v2336_v42 = vadd.f32 %v2328_v32, %v2318_v37 }
 0x1b1   :  { %v2288_v50 = vpop.f32.mrf.mxu2 }
 0x1b2   :  { %v2344_v55 = vmax.f32 %v2336_v42, 0.0  ;;  %v2289_v30 = vadd.f32 %v2288_v50, %v2275_v45 }
 0x1b3   :  { %v2302_v56 = vpop.f32.mrf.mxu3 }
 0x1b4   :  { %v2350_v57 = vpack.c.bf16 %v2344_v55, %v2343_v53  ;;  %v2303_v58 = vadd.f32 %v2302_v56, %v2289_v30 }
 0x1b6   :  { %2354 = vst [vmem:[%s5801_s4 + $0x8] sm:$0xff] %v2350_v57  ;;  %v2322_v44 = vmul.f32 %v2310_v34, %v2303_v58 }
 0x1b8   :  { %v2340_v3 = vadd.f32 %v2328_v32, %v2322_v44 }
 0x1ba   :  { %v2348_v60 = vmax.f32 %v2340_v3, 0.0 }
 0x1bc   :  { %v2352_v20 = vpack.c.bf16 %v2348_v60, %v2347_v59 }
 0x1be   :  { %2356 = vst [vmem:[%s5801_s4 + $0x18] sm:$0xff] %v2352_v20 }

</bundles_post_ra>
